<compile_context>
chip_gen: v7x
topology: tpu7x:2x2x1
jax: 0.10.0
libtpu: 0.0.40
codegen_flags: <defaults>
</compile_context>

<pallas_src>
import jax
import jax.numpy as jnp
from jax.experimental import pallas as pl
from jax.experimental.pallas import tpu as pltpu

LRELU_SLOPE = 0.1        # upsample blocks + residual blocks (espnet config)
OUT_LRELU_SLOPE = 0.01   # output_conv uses torch.nn.LeakyReLU() default slope


def _leaky(x, slope):
    return jnp.where(x >= 0, x, slope * x)


def _zero_map(ndim):
    def index_map(i):
        return (0,) * ndim
    return index_map


def _full_spec(arr):
    return pl.BlockSpec(arr.shape, _zero_map(arr.ndim))


def _cost(flops, bytes_accessed, transcendentals=0):
    return pl.CostEstimate(flops=int(flops),
                           transcendentals=int(transcendentals),
                           bytes_accessed=int(bytes_accessed))


def _vmem_limit(in_arrays, out_bytes, scratch_bytes):
    io = sum(int(a.size) * a.dtype.itemsize for a in in_arrays) + int(out_bytes)
    est = 2 * io + int(scratch_bytes) + (2 << 20)
    return int(min(100 << 20, max(16 << 20, est)))


# ----------------------------------------------------------------------------
# Kernel 1: input Conv1d (tap-folded single matmul; bias already carries the
#           folded global conditioning).
# ----------------------------------------------------------------------------
def _input_conv_kernel(K, pad, T):
    def kernel(x_ref, w_ref, b_ref, o_ref, xpad_ref):
        xpad_ref[...] = jnp.zeros_like(xpad_ref)            # zero padding in VMEM
        xpad_ref[pl.ds(pad, T), :] = x_ref[...]
        opnd = jnp.concatenate(
            [xpad_ref[pl.ds(k, T), :] for k in range(K)],
            axis=1).astype(jnp.bfloat16)                     # (T, K*C_in)
        o_ref[...] = jnp.dot(opnd, w_ref[...],
                             preferred_element_type=jnp.float32) + b_ref[...]
    return kernel


def input_conv(x, w_fold, b_eff):
    """x: (T, C_in) f32, w_fold: (K*C_in, C_out) bf16, b_eff: (1, C_out) f32."""
    T, C_in = x.shape
    KC, C_out = w_fold.shape
    K = KC // C_in
    pad = (K - 1) // 2
    scratch_bytes = 4 * (T + 2 * pad) * C_in
    return pl.pallas_call(
        _input_conv_kernel(K, pad, T),
        grid=(1,),
        in_specs=[_full_spec(x), _full_spec(w_fold), _full_spec(b_eff)],
        out_specs=pl.BlockSpec((T, C_out), _zero_map(2)),
        out_shape=jax.ShapeDtypeStruct((T, C_out), jnp.float32),
        scratch_shapes=[pltpu.VMEM((T + 2 * pad, C_in), jnp.float32)],
        compiler_params=pltpu.CompilerParams(
            dimension_semantics=("arbitrary",),
            vmem_limit_bytes=_vmem_limit([x, w_fold, b_eff],
                                         4 * T * C_out, scratch_bytes)),
        cost_estimate=_cost(2 * T * K * C_in * C_out,
                            4 * T * (C_in + C_out) + 2 * K * C_in * C_out),
    )(x, w_fold, b_eff)


# ----------------------------------------------------------------------------
# Kernel 2: fused upsample stage on phase-major, lane-packed activations.
#   LeakyReLU -> polyphase ConvTranspose1d -> residual blocks -> average
#   [-> LeakyReLU -> output Conv1d -> tanh when this is the last stage]
# ----------------------------------------------------------------------------
def _make_stage_kernel(*, T, s, P_prev, P_new, C_in, C_out,
                       tc_entries, tc_r, pin_lo, blocks, padt_lo, out_cfg):
    nb = len(blocks)
    inv_nb = 1.0 / nb

    def conv_all_phases(src_ref, row0, entries, c_in, w_fn, bias):
        """Tap-folded conv over all phases.

        src_ref holds the (zero-padded) conv input with valid data in rows
        [row0, row0+T).  `entries[p]` is the static list of (dt, sp) source
        (time-offset, phase) pairs for output phase p.  Returns the packed
        (T, P*C_out_conv) f32 result.
        """
        dts = sorted({dt for taps in entries for dt, _ in taps})
        # load + cast each needed time-shift slab exactly once
        slabs = {dt: src_ref[pl.ds(row0 + dt, T), :].astype(jnp.bfloat16)
                 for dt in dts}
        outs = []
        for p, taps in enumerate(entries):
            parts = [slabs[dt][:, sp * c_in:(sp + 1) * c_in] for dt, sp in taps]
            opnd = parts[0] if len(parts) == 1 else jnp.concatenate(parts, axis=1)
            outs.append(jnp.dot(opnd, w_fn(p),
                                preferred_element_type=jnp.float32) + bias)
        return outs[0] if len(outs) == 1 else jnp.concatenate(outs, axis=1)

    def kernel(*refs):
        x_ref, wt_ref, bt_ref = refs[0], refs[1], refs[2]
        blk_refs = refs[3:3 + 4 * nb]
        pos = 3 + 4 * nb
        if out_cfg is not None:
            wo_ref, bo_ref = refs[pos], refs[pos + 1]
            pos += 2
        o_ref = refs[pos]
        scr = refs[pos + 1:]
        if out_cfg is not None:
            xin_ref, ph_ref, ct_ref, xcur_ref, ysum_ref = scr
        else:
            xin_ref, ph_ref, ct_ref, xcur_ref = scr
            ysum_ref = o_ref            # accumulate block sum in the output block

        # zero-initialised scratch => exact zero padding at sequence edges
        xin_ref[...] = jnp.zeros_like(xin_ref)
        ph_ref[...] = jnp.zeros_like(ph_ref)

        # ---- fused LeakyReLU + polyphase ConvTranspose1d (composed phases) ----
        xin_ref[pl.ds(pin_lo, T), :] = _leaky(x_ref[...], LRELU_SLOPE)
        wt_mats = [wt_ref[r] for r in range(s)]
        bt_val = bt_ref[...]
        ct_ref[...] = conv_all_phases(xin_ref, pin_lo, tc_entries, C_in,
                                      lambda p: wt_mats[tc_r[p]], bt_val)

        # ---- residual blocks at the upsampled rate, in phase coordinates ------
        for bi, (Kr, dils, ent1, ent2) in enumerate(blocks):
            w1_ref, b1_ref, w2_ref, b2_ref = blk_refs[4 * bi:4 * bi + 4]
            xcur_ref[...] = ct_ref[...]
            for di in range(len(dils)):
                w1m, b1v = w1_ref[di], b1_ref[di]
                w2m, b2v = w2_ref[di], b2_ref[di]
                ph_ref[pl.ds(padt_lo, T), :] = _leaky(xcur_ref[...], LRELU_SLOPE)
                t1 = conv_all_phases(ph_ref, padt_lo, ent1[di], C_out,
                                     lambda p: w1m, b1v)
                ph_ref[pl.ds(padt_lo, T), :] = _leaky(t1, LRELU_SLOPE)
                t2 = conv_all_phases(ph_ref, padt_lo, ent2[di], C_out,
                                     lambda p: w2m, b2v)
                xcur_ref[...] += t2
            if bi == 0:
                ysum_ref[...] = xcur_ref[...]
            else:
                ysum_ref[...] += xcur_ref[...]

        if out_cfg is None:
            if nb > 1:
                o_ref[...] *= inv_nb
        else:
            # ---- fused output conv: LeakyReLU -> 7-tap conv -> tanh -----------
            y = ysum_ref[...] * inv_nb if nb > 1 else ysum_ref[...]
            ph_ref[pl.ds(padt_lo, T), :] = _leaky(y, OUT_LRELU_SLOPE)
            wo_mat, bo_val = wo_ref[...], bo_ref[...]
            wav = conv_all_phases(ph_ref, padt_lo, out_cfg["entries"], C_out,
                                  lambda p: wo_mat, bo_val)
            o_ref[...] = jnp.tanh(wav)

    return kernel


def upsample_stage(x, P_prev, up_w, up_b, stage_blocks, *, scale, up_kernel,
                   out_conv=None):
    """One fused HiFiGAN upsample stage on phase-major, lane-packed activations.

    x: (T, P_prev*C_in) f32 (phase on lanes, channel minor).
    Returns (y, P_new) with y: (T, P_new*C_out) f32; if out_conv=(ow, ob) is
    given, y is instead (T, P_new*out_channels) holding tanh(output_conv(.)).
    """
    T, width = x.shape
    C_in = width // P_prev
    s, Ku = scale, up_kernel
    C_out = up_w.shape[2]
    p_up = s // 2 + s % 2
    assert s % 2 == 0 and Ku == s + 2 * p_up, \
        "only even scales with kernel == 2*scale supported"
    P_new = P_prev * s

    # ---- transposed conv: per-phase folded weights + static source schedule ---
    wt_parts, offs_per_r = [], []
    for r in range(s):
        k0, q0 = (r + p_up) % s, (r + p_up) // s
        ks = [k0 + i * s for i in range(-(-(Ku - k0) // s))]
        wt_parts.append(jnp.concatenate([up_w[k] for k in ks], axis=0))
        offs_per_r.append([q0 - i for i in range(len(ks))])
    n_taps = len(offs_per_r[0])
    assert all(len(o) == n_taps for o in offs_per_r)
    wt_fold = jnp.stack(wt_parts)                      # (s, n_taps*C_in, C_out)

    tc_entries, tc_r = [], []
    for p2 in range(P_new):
        p1, r = p2 // s, p2 % s
        tc_entries.append([((p1 + off) // P_prev, (p1 + off) % P_prev)
                           for off in offs_per_r[r]])
        tc_r.append(r)
    pin_dts = [dt for taps in tc_entries for dt, _ in taps]
    pin_lo, pin_hi = max(0, -min(pin_dts)), max(0, max(pin_dts))

    # ---- residual-block (and fused output-conv) static source schedules -------
    def conv_entries(K, d, P):
        pad_u = (K - 1) // 2 * d
        return [[((p + k * d - pad_u) // P, (p + k * d - pad_u) % P)
                 for k in range(K)] for p in range(P)]

    blocks_cfg, all_dts = [], []
    for blk in stage_blocks:
        Kr, dils = blk["kernel"], tuple(blk["dils"])
        ent1 = [conv_entries(Kr, d, P_new) for d in dils]
        ent2 = [conv_entries(Kr, 1, P_new) for _ in dils]
        blocks_cfg.append((Kr, dils, ent1, ent2))
        for ent in ent1 + ent2:
            all_dts += [dt for taps in ent for dt, _ in taps]

    out_cfg, out_ch, Ko = None, C_out, 0
    if out_conv is not None:
        ow, ob = out_conv                              # (Ko, C_out, out_ch), (1, out_ch)
        Ko, out_ch = ow.shape[0], ow.shape[2]
        assert ow.shape[1] == C_out
        ent_out = conv_entries(Ko, 1, P_new)
        all_dts += [dt for taps in ent_out for dt, _ in taps]
        out_cfg = {"entries": ent_out}
    padt_lo, padt_hi = max(0, -min(all_dts)), max(0, max(all_dts))

    # ---- kernel arguments (weights pre-folded for single-matmul taps) ---------
    args = [x, wt_fold, up_b]
    for blk in stage_blocks:
        Kr, D = blk["kernel"], len(blk["dils"])
        args += [blk["w1"].reshape(D, Kr * C_out, C_out), blk["b1"],
                 blk["w2"].reshape(D, Kr * C_out, C_out), blk["b2"]]
    if out_conv is not None:
        args += [ow.reshape(Ko * C_out, out_ch), ob]

    o_width = P_new * (out_ch if out_conv is not None else C_out)
    n_big = 3 if out_conv is not None else 2
    scratch_shapes = [
        pltpu.VMEM((T + pin_lo + pin_hi, P_prev * C_in), jnp.float32),   # xin
        pltpu.VMEM((T + padt_lo + padt_hi, P_new * C_out), jnp.float32),  # ph
        pltpu.VMEM((T, P_new * C_out), jnp.float32),                      # ct
        pltpu.VMEM((T, P_new * C_out), jnp.float32),                      # xcur
    ]
    if out_conv is not None:
        scratch_shapes.append(pltpu.VMEM((T, P_new * C_out), jnp.float32))  # ysum
    scratch_bytes = (4 * (T + pin_lo + pin_hi) * P_prev * C_in
                     + 4 * (T + padt_lo + padt_hi) * P_new * C_out
                     + 4 * T * P_new * C_out * n_big)

    macs = n_taps * C_in * C_out * T * P_new
    for Kr, dils, _, _ in blocks_cfg:
        macs += 2 * len(dils) * Kr * C_out * C_out * T * P_new
    trans = 0
    if out_conv is not None:
        macs += Ko * C_out * out_ch * T * P_new
        trans = T * P_new * out_ch
    io_bytes = (sum(int(a.size) * a.dtype.itemsize for a in args)
                + 4 * T * o_width)

    kernel = _make_stage_kernel(T=T, s=s, P_prev=P_prev, P_new=P_new,
                                C_in=C_in, C_out=C_out,
                                tc_entries=tc_entries, tc_r=tc_r,
                                pin_lo=pin_lo, blocks=blocks_cfg,
                                padt_lo=padt_lo, out_cfg=out_cfg)
    out = pl.pallas_call(
        kernel,
        grid=(1,),
        in_specs=[_full_spec(a) for a in args],
        out_specs=pl.BlockSpec((T, o_width), _zero_map(2)),
        out_shape=jax.ShapeDtypeStruct((T, o_width), jnp.float32),
        scratch_shapes=scratch_shapes,
        compiler_params=pltpu.CompilerParams(
            dimension_semantics=("arbitrary",),
            vmem_limit_bytes=_vmem_limit(args, 4 * T * o_width, scratch_bytes)),
        cost_estimate=_cost(2 * macs, io_bytes, trans),
    )(*args)
    return out, P_new


# ----------------------------------------------------------------------------
# Deterministic synthetic HiFiGAN parameters (small config, weight-norm removed)
# ----------------------------------------------------------------------------
def _init_conv(key, K, C_in, C_out):
    kw, kb = jax.random.split(key)
    scale = 1.0 / jnp.sqrt(jnp.asarray(C_in * K, jnp.float32))
    w = (scale * jax.random.normal(kw, (K, C_in, C_out), jnp.float32)
         ).astype(jnp.bfloat16)
    b = 0.01 * jax.random.normal(kb, (1, C_out), jnp.float32)
    return w, b


def init_hifigan_params(key, *, in_channels=8, channels=32, out_channels=1,
                        global_channels=16, kernel_size=7,
                        upsample_scales=(4, 4), upsample_kernel_sizes=(8, 8),
                        resblock_kernel_sizes=(3,),
                        resblock_dilations=((1, 3),)):
    # NOTE: weights are stored as (K, C_in, C_out).  Real torch Conv1d weights
    # (C_out, C_in, K) map via transpose(2, 1, 0); ConvTranspose1d weights
    # (C_in, C_out, K) map via transpose(2, 0, 1) -- no in/out channel swap.
    params = {}
    key, k = jax.random.split(key)
    params["input_conv"] = _init_conv(k, kernel_size, in_channels, channels)
    key, k = jax.random.split(key)
    params["global_conv"] = _init_conv(k, 1, global_channels, channels)

    ups, blocks = [], []
    ch = channels
    for _s, uk in zip(upsample_scales, upsample_kernel_sizes):
        key, k = jax.random.split(key)
        ups.append(_init_conv(k, uk, ch, ch // 2))
        ch //= 2
        for rk, dils in zip(resblock_kernel_sizes, resblock_dilations):
            c1, c2 = [], []
            for _ in dils:
                key, k1 = jax.random.split(key)
                c1.append(_init_conv(k1, rk, ch, ch))
                key, k2 = jax.random.split(key)
                c2.append(_init_conv(k2, rk, ch, ch))
            blocks.append({
                "kernel": rk, "dils": tuple(dils),
                "w1": jnp.stack([w for w, _ in c1]),
                "b1": jnp.stack([b for _, b in c1]),
                "w2": jnp.stack([w for w, _ in c2]),
                "b2": jnp.stack([b for _, b in c2]),
            })
    key, k = jax.random.split(key)
    params["output_conv"] = _init_conv(k, kernel_size, ch, out_channels)
    params["upsamples"] = ups
    params["blocks"] = blocks
    params["config"] = dict(upsample_scales=tuple(upsample_scales),
                            upsample_kernel_sizes=tuple(upsample_kernel_sizes),
                            num_blocks=len(resblock_kernel_sizes),
                            kernel_size=kernel_size)
    return params


# ----------------------------------------------------------------------------
# HiFiGAN generator forward (espnet2.gan_tts.hifigan.HiFiGANGenerator semantics)
# ----------------------------------------------------------------------------
def hifigan_generator(params, c, g_vec=None):
    cfg = params["config"]
    w_in, b_in = params["input_conv"]
    K, C_in, C_mid = w_in.shape
    b_eff = b_in
    if g_vec is not None:
        gw, gb = params["global_conv"]
        # 1x1 global conv on a length-1 sequence == per-channel constant:
        # fold it into the input conv's bias (no kernel launch / HBM pass).
        b_eff = b_in + gb + jnp.dot(g_vec.astype(jnp.bfloat16).reshape(1, -1),
                                    gw[0], preferred_element_type=jnp.float32)
    x = input_conv(c, w_in.reshape(K * C_in, C_mid), b_eff)    # (T, channels)

    nb = cfg["num_blocks"]
    scales = cfg["upsample_scales"]
    n_stages = len(scales)
    P = 1
    for i, (s, uk) in enumerate(zip(scales, cfg["upsample_kernel_sizes"])):
        out_conv = params["output_conv"] if i == n_stages - 1 else None
        x, P = upsample_stage(x, P, *params["upsamples"][i],
                              params["blocks"][i * nb:(i + 1) * nb],
                              scale=s, up_kernel=uk, out_conv=out_conv)
    out_ch = params["output_conv"][0].shape[2]
    # phase-major -> time-major is a free row-major reshape of the final audio
    return x.reshape(-1, out_ch)                      # (T * upsample_factor, C)


def onnx_hifigan_vocoder_forward(params, c, g=None):
    """Matches OnnxHiFiGANVocoder.forward.

    c: (T, in_channels) or (1, T, in_channels); g: (global_channels, 1) or None.
    Returns (T * upsample_factor, out_channels).
    """
    g_vec = None if g is None else g[:, 0]
    if c.ndim == 3:
        # TODO(synk): the PyTorch wrapper's squeeze(0) only supports B == 1.
        c = c[0]
    return hifigan_generator(params, c, g_vec)


# ----------------------------------------------------------------------------
# Plain-JAX reference (same bf16 matmul casts) for a numerical sanity check.
# ----------------------------------------------------------------------------
def _ref_conv1d(x, w, b, *, dilation=1, padding=0, pre_leaky=None,
                post_tanh=False):
    if pre_leaky is not None:
        x = _leaky(x, pre_leaky)
    xp = jnp.pad(x.astype(jnp.bfloat16), ((padding, padding), (0, 0)))
    K, _, C_out = w.shape
    T_out = xp.shape[0] - dilation * (K - 1)
    acc = jnp.zeros((T_out, C_out), jnp.float32)
    for k in range(K):
        acc = acc + jnp.dot(xp[k * dilation:k * dilation + T_out], w[k],
                            preferred_element_type=jnp.float32)
    acc = acc + b
    return jnp.tanh(acc) if post_tanh else acc


def _ref_conv_transpose1d(x, w, b, *, stride, padding, pre_leaky=None):
    if pre_leaky is not None:
        x = _leaky(x, pre_leaky)
    T, C = x.shape
    K = w.shape[0]
    x_up = jnp.zeros(((T - 1) * stride + 1, C), x.dtype).at[::stride].set(x)
    return _ref_conv1d(x_up, w[::-1], b, padding=K - 1 - padding)


def reference_forward(params, c, g_vec=None):
    cfg = params["config"]
    ks = cfg["kernel_size"]
    w, b = params["input_conv"]
    x = _ref_conv1d(c, w, b, padding=(ks - 1) // 2)
    if g_vec is not None:
        gw, gb = params["global_conv"]
        x = x + _ref_conv1d(g_vec.reshape(1, -1), gw, gb)
    nb = cfg["num_blocks"]
    for i, s in enumerate(cfg["upsample_scales"]):
        uw, ub = params["upsamples"][i]
        x = _ref_conv_transpose1d(x, uw, ub, stride=s,
                                  padding=s // 2 + s % 2, pre_leaky=LRELU_SLOPE)
        cs = 0.0
        for blk in params["blocks"][i * nb:(i + 1) * nb]:
            xb, Kr = x, blk["kernel"]
            for di, d in enumerate(blk["dils"]):
                xt = _ref_conv1d(xb, blk["w1"][di], blk["b1"][di], dilation=d,
                                 padding=(Kr - 1) // 2 * d, pre_leaky=LRELU_SLOPE)
                xt = _ref_conv1d(xt, blk["w2"][di], blk["b2"][di],
                                 padding=(Kr - 1) // 2, pre_leaky=LRELU_SLOPE)
                xb = xb + xt
            cs = cs + xb
        x = cs / nb
    ow, ob = params["output_conv"]
    return _ref_conv1d(x, ow, ob, padding=(ks - 1) // 2,
                       pre_leaky=OUT_LRELU_SLOPE, post_tanh=True)


if __name__ == "__main__":
    key = jax.random.PRNGKey(0)
    pk, ck, gk = jax.random.split(key, 3)

    T, in_channels, global_channels = 16, 8, 16
    upsample_factor = 4 * 4

    params = init_hifigan_params(pk, in_channels=in_channels,
                                 global_channels=global_channels)
    c = jax.random.normal(ck, (T, in_channels), jnp.float32)
    g = jax.random.normal(gk, (global_channels, 1), jnp.float32)

    fwd = jax.jit(lambda c_, g_: onnx_hifigan_vocoder_forward(params, c_, g_))
    wav = jax.block_until_ready(fwd(c, g))

    assert wav.shape == (T * upsample_factor, 1), wav.shape
    assert bool(jnp.all(jnp.isfinite(wav)))

    # numerical check of the fused / composed-polyphase kernels against a
    # plain-JAX reference with the same bf16-matmul / f32-accumulate precision.
    ref = jax.block_until_ready(reference_forward(params, c, g[:, 0]))
    err = float(jnp.max(jnp.abs(wav - ref)))
    assert err < 1e-2, f"max |pallas - reference| = {err}"
    print("KERNEL_OK")
</pallas_src>

<mosaic_0001>
module attributes {stable_mosaic.version = 11 : i64} {
  func.func @kernel(%arg0: i32, %arg1: memref<16x8xf32, #tpu.memory_space<vmem>>, %arg2: memref<56x32xbf16, #tpu.memory_space<vmem>>, %arg3: memref<1x32xf32, #tpu.memory_space<vmem>>, %arg4: memref<16x32xf32, #tpu.memory_space<vmem>>, %arg5: memref<22x8xf32, #tpu.memory_space<vmem>>) attributes {dimension_semantics = [#tpu.dimension_semantics<arbitrary>], iteration_bounds = array<i64: 1>, scalar_prefetch = 0 : i64, scratch_operands = 1 : i64, tpu.core_type = #tpu.core_type<tc>, window_params = [{pipeline_mode = #tpu.pipeline_mode<synchronous>, transform_indices = @transform_0, window_bounds = array<i64: 16, 8>}, {pipeline_mode = #tpu.pipeline_mode<synchronous>, transform_indices = @transform_1, window_bounds = array<i64: 56, 32>}, {pipeline_mode = #tpu.pipeline_mode<synchronous>, transform_indices = @transform_2, window_bounds = array<i64: 1, 32>}, {pipeline_mode = #tpu.pipeline_mode<synchronous>, transform_indices = @transform_3, window_bounds = array<i64: 16, 32>}]} {
    %cst = arith.constant 0.000000e+00 : f32
    %0 = vector.broadcast %cst : f32 to vector<22x8xf32>
    %c0 = arith.constant 0 : index
    %c0_0 = arith.constant 0 : index
    %1 = vector.load %arg5[%c0, %c0_0] : memref<22x8xf32, #tpu.memory_space<vmem>>, vector<22x8xf32>
    tpu.vector_store %arg5[%c0, %c0_0], %0 {strides = array<i32>} : memref<22x8xf32, #tpu.memory_space<vmem>>, vector<22x8xf32>,
    %c0_1 = arith.constant 0 : index
    %c0_2 = arith.constant 0 : index
    %2 = vector.load %arg1[%c0_1, %c0_2] : memref<16x8xf32, #tpu.memory_space<vmem>>, vector<16x8xf32>
    %c3 = arith.constant 3 : index
    %c0_3 = arith.constant 0 : index
    %3 = vector.load %arg5[%c3, %c0_3] : memref<22x8xf32, #tpu.memory_space<vmem>>, vector<16x8xf32>
    tpu.vector_store %arg5[%c3, %c0_3], %2 {strides = array<i32>} : memref<22x8xf32, #tpu.memory_space<vmem>>, vector<16x8xf32>,
    %c0_4 = arith.constant 0 : index
    %c0_5 = arith.constant 0 : index
    %4 = vector.load %arg5[%c0_4, %c0_5] : memref<22x8xf32, #tpu.memory_space<vmem>>, vector<16x8xf32>
    %c1 = arith.constant 1 : index
    %c0_6 = arith.constant 0 : index
    %5 = vector.load %arg5[%c1, %c0_6] : memref<22x8xf32, #tpu.memory_space<vmem>>, vector<16x8xf32>
    %c2 = arith.constant 2 : index
    %c0_7 = arith.constant 0 : index
    %6 = vector.load %arg5[%c2, %c0_7] : memref<22x8xf32, #tpu.memory_space<vmem>>, vector<16x8xf32>
    %c3_8 = arith.constant 3 : index
    %c0_9 = arith.constant 0 : index
    %7 = vector.load %arg5[%c3_8, %c0_9] : memref<22x8xf32, #tpu.memory_space<vmem>>, vector<16x8xf32>
    %c4 = arith.constant 4 : index
    %c0_10 = arith.constant 0 : index
    %8 = vector.load %arg5[%c4, %c0_10] : memref<22x8xf32, #tpu.memory_space<vmem>>, vector<16x8xf32>
    %c5 = arith.constant 5 : index
    %c0_11 = arith.constant 0 : index
    %9 = vector.load %arg5[%c5, %c0_11] : memref<22x8xf32, #tpu.memory_space<vmem>>, vector<16x8xf32>
    %c6 = arith.constant 6 : index
    %c0_12 = arith.constant 0 : index
    %10 = vector.load %arg5[%c6, %c0_12] : memref<22x8xf32, #tpu.memory_space<vmem>>, vector<16x8xf32>
    %11 = tpu.concatenate %4, %5, %6, %7, %8, %9, %10 in 1 : vector<16x8xf32>, vector<16x8xf32>, vector<16x8xf32>, vector<16x8xf32>, vector<16x8xf32>, vector<16x8xf32>, vector<16x8xf32> -> vector<16x56xf32>
    %12 = arith.truncf %11 : vector<16x56xf32> to vector<16x56xbf16>
    %c0_13 = arith.constant 0 : index
    %c0_14 = arith.constant 0 : index
    %13 = vector.load %arg2[%c0_13, %c0_14] : memref<56x32xbf16, #tpu.memory_space<vmem>>, vector<56x32xbf16>
    %cst_15 = arith.constant dense<0.000000e+00> : vector<16x32xf32>
    %14 = tpu.matmul %12, %13, %cst_15 {dimension_numbers = #tpu.dot_dimension_numbers<[1], [0], [0], [1], [0, 0, 1, 1], [], []>} : vector<16x56xbf16>, vector<56x32xbf16>, vector<16x32xf32> -> vector<16x32xf32>
    %c0_16 = arith.constant 0 : index
    %c0_17 = arith.constant 0 : index
    %15 = vector.load %arg3[%c0_16, %c0_17] : memref<1x32xf32, #tpu.memory_space<vmem>>, vector<1x32xf32>
    %16 = vector.broadcast %15 : vector<1x32xf32> to vector<16x32xf32>
    %17 = arith.addf %14, %16 : vector<16x32xf32>
    %c0_18 = arith.constant 0 : index
    %c0_19 = arith.constant 0 : index
    %18 = vector.load %arg4[%c0_18, %c0_19] : memref<16x32xf32, #tpu.memory_space<vmem>>, vector<16x32xf32>
    tpu.vector_store %arg4[%c0_18, %c0_19], %17 {strides = array<i32>} : memref<16x32xf32, #tpu.memory_space<vmem>>, vector<16x32xf32>,
    return
  }
  func.func @transform_0(%arg0: i32) -> (i32, i32) {
    %c0_i32 = arith.constant 0 : i32
    %c0_i32_0 = arith.constant 0 : i32
    %c0_i32_1 = arith.constant 0 : i32
    return %c0_i32, %c0_i32_0 : i32, i32
  }
  func.func @transform_1(%arg0: i32) -> (i32, i32) {
    %c0_i32 = arith.constant 0 : i32
    %c0_i32_0 = arith.constant 0 : i32
    %c0_i32_1 = arith.constant 0 : i32
    return %c0_i32, %c0_i32_0 : i32, i32
  }
  func.func @transform_2(%arg0: i32) -> (i32, i32) {
    %c0_i32 = arith.constant 0 : i32
    %c0_i32_0 = arith.constant 0 : i32
    %c0_i32_1 = arith.constant 0 : i32
    return %c0_i32, %c0_i32_0 : i32, i32
  }
  func.func @transform_3(%arg0: i32) -> (i32, i32) {
    %c0_i32 = arith.constant 0 : i32
    %c0_i32_0 = arith.constant 0 : i32
    %c0_i32_1 = arith.constant 0 : i32
    return %c0_i32, %c0_i32_0 : i32, i32
  }
}

module attributes {stable_mosaic.version = 11 : i64} {
  func.func @kernel(%arg0: i32, %arg1: memref<16x32xf32, #tpu.memory_space<vmem>>, %arg2: memref<4x64x16xbf16, #tpu.memory_space<vmem>>, %arg3: memref<1x16xf32, #tpu.memory_space<vmem>>, %arg4: memref<2x48x16xbf16, #tpu.memory_space<vmem>>, %arg5: memref<2x1x16xf32, #tpu.memory_space<vmem>>, %arg6: memref<2x48x16xbf16, #tpu.memory_space<vmem>>, %arg7: memref<2x1x16xf32, #tpu.memory_space<vmem>>, %arg8: memref<16x64xf32, #tpu.memory_space<vmem>>, %arg9: memref<18x32xf32, #tpu.memory_space<vmem>>, %arg10: memref<18x64xf32, #tpu.memory_space<vmem>>, %arg11: memref<16x64xf32, #tpu.memory_space<vmem>>, %arg12: memref<16x64xf32, #tpu.memory_space<vmem>>) attributes {dimension_semantics = [#tpu.dimension_semantics<arbitrary>], iteration_bounds = array<i64: 1>, scalar_prefetch = 0 : i64, scratch_operands = 4 : i64, tpu.core_type = #tpu.core_type<tc>, window_params = [{pipeline_mode = #tpu.pipeline_mode<synchronous>, transform_indices = @transform_0, window_bounds = array<i64: 16, 32>}, {pipeline_mode = #tpu.pipeline_mode<synchronous>, transform_indices = @transform_1, window_bounds = array<i64: 4, 64, 16>}, {pipeline_mode = #tpu.pipeline_mode<synchronous>, transform_indices = @transform_2, window_bounds = array<i64: 1, 16>}, {pipeline_mode = #tpu.pipeline_mode<synchronous>, transform_indices = @transform_3, window_bounds = array<i64: 2, 48, 16>}, {pipeline_mode = #tpu.pipeline_mode<synchronous>, transform_indices = @transform_4, window_bounds = array<i64: 2, 1, 16>}, {pipeline_mode = #tpu.pipeline_mode<synchronous>, transform_indices = @transform_5, window_bounds = array<i64: 2, 48, 16>}, {pipeline_mode = #tpu.pipeline_mode<synchronous>, transform_indices = @transform_6, window_bounds = array<i64: 2, 1, 16>}, {pipeline_mode = #tpu.pipeline_mode<synchronous>, transform_indices = @transform_7, window_bounds = array<i64: 16, 64>}]} {
    %cst = arith.constant 0.000000e+00 : f32
    %0 = vector.broadcast %cst : f32 to vector<18x32xf32>
    %c0 = arith.constant 0 : index
    %c0_0 = arith.constant 0 : index
    %1 = vector.load %arg9[%c0, %c0_0] : memref<18x32xf32, #tpu.memory_space<vmem>>, vector<18x32xf32>
    tpu.vector_store %arg9[%c0, %c0_0], %0 {strides = array<i32>} : memref<18x32xf32, #tpu.memory_space<vmem>>, vector<18x32xf32>,
    %cst_1 = arith.constant 0.000000e+00 : f32
    %2 = vector.broadcast %cst_1 : f32 to vector<18x64xf32>
    %c0_2 = arith.constant 0 : index
    %c0_3 = arith.constant 0 : index
    %3 = vector.load %arg10[%c0_2, %c0_3] : memref<18x64xf32, #tpu.memory_space<vmem>>, vector<18x64xf32>
    tpu.vector_store %arg10[%c0_2, %c0_3], %2 {strides = array<i32>} : memref<18x64xf32, #tpu.memory_space<vmem>>, vector<18x64xf32>,
    %c0_4 = arith.constant 0 : index
    %c0_5 = arith.constant 0 : index
    %4 = vector.load %arg1[%c0_4, %c0_5] : memref<16x32xf32, #tpu.memory_space<vmem>>, vector<16x32xf32>
    %cst_6 = arith.constant 0.000000e+00 : f32
    %5 = vector.broadcast %cst_6 : f32 to vector<16x32xf32>
    %6 = arith.cmpf oge, %4, %5 : vector<16x32xf32>
    %cst_7 = arith.constant 1.000000e-01 : f32
    %7 = vector.broadcast %cst_7 : f32 to vector<16x32xf32>
    %8 = arith.mulf %7, %4 : vector<16x32xf32>
    %9 = arith.select %6, %4, %8 : vector<16x32xi1>, vector<16x32xf32>
    %c1 = arith.constant 1 : index
    %c0_8 = arith.constant 0 : index
    %10 = vector.load %arg9[%c1, %c0_8] : memref<18x32xf32, #tpu.memory_space<vmem>>, vector<16x32xf32>
    tpu.vector_store %arg9[%c1, %c0_8], %9 {strides = array<i32>} : memref<18x32xf32, #tpu.memory_space<vmem>>, vector<16x32xf32>,
    %c0_9 = arith.constant 0 : index
    %c0_10 = arith.constant 0 : index
    %c0_11 = arith.constant 0 : index
    %11 = vector.load %arg2[%c0_9, %c0_10, %c0_11] : memref<4x64x16xbf16, #tpu.memory_space<vmem>>, vector<1x64x16xbf16>
    %12 = vector.shape_cast %11 : vector<1x64x16xbf16> to vector<64x16xbf16>
    %c1_12 = arith.constant 1 : index
    %c0_13 = arith.constant 0 : index
    %c0_14 = arith.constant 0 : index
    %13 = vector.load %arg2[%c1_12, %c0_13, %c0_14] : memref<4x64x16xbf16, #tpu.memory_space<vmem>>, vector<1x64x16xbf16>
    %14 = vector.shape_cast %13 : vector<1x64x16xbf16> to vector<64x16xbf16>
    %c2 = arith.constant 2 : index
    %c0_15 = arith.constant 0 : index
    %c0_16 = arith.constant 0 : index
    %15 = vector.load %arg2[%c2, %c0_15, %c0_16] : memref<4x64x16xbf16, #tpu.memory_space<vmem>>, vector<1x64x16xbf16>
    %16 = vector.shape_cast %15 : vector<1x64x16xbf16> to vector<64x16xbf16>
    %c3 = arith.constant 3 : index
    %c0_17 = arith.constant 0 : index
    %c0_18 = arith.constant 0 : index
    %17 = vector.load %arg2[%c3, %c0_17, %c0_18] : memref<4x64x16xbf16, #tpu.memory_space<vmem>>, vector<1x64x16xbf16>
    %18 = vector.shape_cast %17 : vector<1x64x16xbf16> to vector<64x16xbf16>
    %c0_19 = arith.constant 0 : index
    %c0_20 = arith.constant 0 : index
    %19 = vector.load %arg3[%c0_19, %c0_20] : memref<1x16xf32, #tpu.memory_space<vmem>>, vector<1x16xf32>
    %c0_21 = arith.constant 0 : index
    %c0_22 = arith.constant 0 : index
    %20 = vector.load %arg9[%c0_21, %c0_22] : memref<18x32xf32, #tpu.memory_space<vmem>>, vector<16x32xf32>
    %21 = arith.truncf %20 : vector<16x32xf32> to vector<16x32xbf16>
    %c1_23 = arith.constant 1 : index
    %c0_24 = arith.constant 0 : index
    %22 = vector.load %arg9[%c1_23, %c0_24] : memref<18x32xf32, #tpu.memory_space<vmem>>, vector<16x32xf32>
    %23 = arith.truncf %22 : vector<16x32xf32> to vector<16x32xbf16>
    %c2_25 = arith.constant 2 : index
    %c0_26 = arith.constant 0 : index
    %24 = vector.load %arg9[%c2_25, %c0_26] : memref<18x32xf32, #tpu.memory_space<vmem>>, vector<16x32xf32>
    %25 = arith.truncf %24 : vector<16x32xf32> to vector<16x32xbf16>
    %26 = tpu.concatenate %23, %21 in 1 : vector<16x32xbf16>, vector<16x32xbf16> -> vector<16x64xbf16>
    %cst_27 = arith.constant dense<0.000000e+00> : vector<16x16xf32>
    %27 = tpu.matmul %26, %12, %cst_27 {dimension_numbers = #tpu.dot_dimension_numbers<[1], [0], [0], [1], [0, 0, 1, 1], [], []>} : vector<16x64xbf16>, vector<64x16xbf16>, vector<16x16xf32> -> vector<16x16xf32>
    %28 = vector.broadcast %19 : vector<1x16xf32> to vector<16x16xf32>
    %29 = arith.addf %27, %28 : vector<16x16xf32>
    %30 = tpu.concatenate %23, %21 in 1 : vector<16x32xbf16>, vector<16x32xbf16> -> vector<16x64xbf16>
    %cst_28 = arith.constant dense<0.000000e+00> : vector<16x16xf32>
    %31 = tpu.matmul %30, %14, %cst_28 {dimension_numbers = #tpu.dot_dimension_numbers<[1], [0], [0], [1], [0, 0, 1, 1], [], []>} : vector<16x64xbf16>, vector<64x16xbf16>, vector<16x16xf32> -> vector<16x16xf32>
    %32 = vector.broadcast %19 : vector<1x16xf32> to vector<16x16xf32>
    %33 = arith.addf %31, %32 : vector<16x16xf32>
    %34 = tpu.concatenate %25, %23 in 1 : vector<16x32xbf16>, vector<16x32xbf16> -> vector<16x64xbf16>
    %cst_29 = arith.constant dense<0.000000e+00> : vector<16x16xf32>
    %35 = tpu.matmul %34, %16, %cst_29 {dimension_numbers = #tpu.dot_dimension_numbers<[1], [0], [0], [1], [0, 0, 1, 1], [], []>} : vector<16x64xbf16>, vector<64x16xbf16>, vector<16x16xf32> -> vector<16x16xf32>
    %36 = vector.broadcast %19 : vector<1x16xf32> to vector<16x16xf32>
    %37 = arith.addf %35, %36 : vector<16x16xf32>
    %38 = tpu.concatenate %25, %23 in 1 : vector<16x32xbf16>, vector<16x32xbf16> -> vector<16x64xbf16>
    %cst_30 = arith.constant dense<0.000000e+00> : vector<16x16xf32>
    %39 = tpu.matmul %38, %18, %cst_30 {dimension_numbers = #tpu.dot_dimension_numbers<[1], [0], [0], [1], [0, 0, 1, 1], [], []>} : vector<16x64xbf16>, vector<64x16xbf16>, vector<16x16xf32> -> vector<16x16xf32>
    %40 = vector.broadcast %19 : vector<1x16xf32> to vector<16x16xf32>
    %41 = arith.addf %39, %40 : vector<16x16xf32>
    %42 = tpu.concatenate %29, %33, %37, %41 in 1 : vector<16x16xf32>, vector<16x16xf32>, vector<16x16xf32>, vector<16x16xf32> -> vector<16x64xf32>
    %c0_31 = arith.constant 0 : index
    %c0_32 = arith.constant 0 : index
    %43 = vector.load %arg11[%c0_31, %c0_32] : memref<16x64xf32, #tpu.memory_space<vmem>>, vector<16x64xf32>
    tpu.vector_store %arg11[%c0_31, %c0_32], %42 {strides = array<i32>} : memref<16x64xf32, #tpu.memory_space<vmem>>, vector<16x64xf32>,
    %c0_33 = arith.constant 0 : index
    %c0_34 = arith.constant 0 : index
    %44 = vector.load %arg11[%c0_33, %c0_34] : memref<16x64xf32, #tpu.memory_space<vmem>>, vector<16x64xf32>
    %c0_35 = arith.constant 0 : index
    %c0_36 = arith.constant 0 : index
    %45 = vector.load %arg12[%c0_35, %c0_36] : memref<16x64xf32, #tpu.memory_space<vmem>>, vector<16x64xf32>
    tpu.vector_store %arg12[%c0_35, %c0_36], %44 {strides = array<i32>} : memref<16x64xf32, #tpu.memory_space<vmem>>, vector<16x64xf32>,
    %c0_37 = arith.constant 0 : index
    %c0_38 = arith.constant 0 : index
    %c0_39 = arith.constant 0 : index
    %46 = vector.load %arg4[%c0_37, %c0_38, %c0_39] : memref<2x48x16xbf16, #tpu.memory_space<vmem>>, vector<1x48x16xbf16>
    %47 = vector.shape_cast %46 : vector<1x48x16xbf16> to vector<48x16xbf16>
    %c0_40 = arith.constant 0 : index
    %c0_41 = arith.constant 0 : index
    %c0_42 = arith.constant 0 : index
    %48 = vector.load %arg5[%c0_40, %c0_41, %c0_42] : memref<2x1x16xf32, #tpu.memory_space<vmem>>, vector<1x1x16xf32>
    %49 = vector.shape_cast %48 : vector<1x1x16xf32> to vector<1x16xf32>
    %c0_43 = arith.constant 0 : index
    %c0_44 = arith.constant 0 : index
    %c0_45 = arith.constant 0 : index
    %50 = vector.load %arg6[%c0_43, %c0_44, %c0_45] : memref<2x48x16xbf16, #tpu.memory_space<vmem>>, vector<1x48x16xbf16>
    %51 = vector.shape_cast %50 : vector<1x48x16xbf16> to vector<48x16xbf16>
    %c0_46 = arith.constant 0 : index
    %c0_47 = arith.constant 0 : index
    %c0_48 = arith.constant 0 : index
    %52 = vector.load %arg7[%c0_46, %c0_47, %c0_48] : memref<2x1x16xf32, #tpu.memory_space<vmem>>, vector<1x1x16xf32>
    %53 = vector.shape_cast %52 : vector<1x1x16xf32> to vector<1x16xf32>
    %c0_49 = arith.constant 0 : index
    %c0_50 = arith.constant 0 : index
    %54 = vector.load %arg12[%c0_49, %c0_50] : memref<16x64xf32, #tpu.memory_space<vmem>>, vector<16x64xf32>
    %cst_51 = arith.constant 0.000000e+00 : f32
    %55 = vector.broadcast %cst_51 : f32 to vector<16x64xf32>
    %56 = arith.cmpf oge, %54, %55 : vector<16x64xf32>
    %cst_52 = arith.constant 1.000000e-01 : f32
    %57 = vector.broadcast %cst_52 : f32 to vector<16x64xf32>
    %58 = arith.mulf %57, %54 : vector<16x64xf32>
    %59 = arith.select %56, %54, %58 : vector<16x64xi1>, vector<16x64xf32>
    %c1_53 = arith.constant 1 : index
    %c0_54 = arith.constant 0 : index
    %60 = vector.load %arg10[%c1_53, %c0_54] : memref<18x64xf32, #tpu.memory_space<vmem>>, vector<16x64xf32>
    tpu.vector_store %arg10[%c1_53, %c0_54], %59 {strides = array<i32>} : memref<18x64xf32, #tpu.memory_space<vmem>>, vector<16x64xf32>,
    %c0_55 = arith.constant 0 : index
    %c0_56 = arith.constant 0 : index
    %61 = vector.load %arg10[%c0_55, %c0_56] : memref<18x64xf32, #tpu.memory_space<vmem>>, vector<16x64xf32>
    %62 = arith.truncf %61 : vector<16x64xf32> to vector<16x64xbf16>
    %c1_57 = arith.constant 1 : index
    %c0_58 = arith.constant 0 : index
    %63 = vector.load %arg10[%c1_57, %c0_58] : memref<18x64xf32, #tpu.memory_space<vmem>>, vector<16x64xf32>
    %64 = arith.truncf %63 : vector<16x64xf32> to vector<16x64xbf16>
    %c2_59 = arith.constant 2 : index
    %c0_60 = arith.constant 0 : index
    %65 = vector.load %arg10[%c2_59, %c0_60] : memref<18x64xf32, #tpu.memory_space<vmem>>, vector<16x64xf32>
    %66 = arith.truncf %65 : vector<16x64xf32> to vector<16x64xbf16>
    %67 = vector.extract_strided_slice %62 {offsets = [0, 48], sizes = [16, 16], strides = [1, 1]} : vector<16x64xbf16> to vector<16x16xbf16>
    %68 = vector.extract_strided_slice %64 {offsets = [0, 0], sizes = [16, 16], strides = [1, 1]} : vector<16x64xbf16> to vector<16x16xbf16>
    %69 = vector.extract_strided_slice %64 {offsets = [0, 16], sizes = [16, 16], strides = [1, 1]} : vector<16x64xbf16> to vector<16x16xbf16>
    %70 = tpu.concatenate %67, %68, %69 in 1 : vector<16x16xbf16>, vector<16x16xbf16>, vector<16x16xbf16> -> vector<16x48xbf16>
    %cst_61 = arith.constant dense<0.000000e+00> : vector<16x16xf32>
    %71 = tpu.matmul %70, %47, %cst_61 {dimension_numbers = #tpu.dot_dimension_numbers<[1], [0], [0], [1], [0, 0, 1, 1], [], []>} : vector<16x48xbf16>, vector<48x16xbf16>, vector<16x16xf32> -> vector<16x16xf32>
    %72 = vector.broadcast %49 : vector<1x16xf32> to vector<16x16xf32>
    %73 = arith.addf %71, %72 : vector<16x16xf32>
    %74 = vector.extract_strided_slice %64 {offsets = [0, 0], sizes = [16, 16], strides = [1, 1]} : vector<16x64xbf16> to vector<16x16xbf16>
    %75 = vector.extract_strided_slice %64 {offsets = [0, 16], sizes = [16, 16], strides = [1, 1]} : vector<16x64xbf16> to vector<16x16xbf16>
    %76 = vector.extract_strided_slice %64 {offsets = [0, 32], sizes = [16, 16], strides = [1, 1]} : vector<16x64xbf16> to vector<16x16xbf16>
    %77 = tpu.concatenate %74, %75, %76 in 1 : vector<16x16xbf16>, vector<16x16xbf16>, vector<16x16xbf16> -> vector<16x48xbf16>
    %cst_62 = arith.constant dense<0.000000e+00> : vector<16x16xf32>
    %78 = tpu.matmul %77, %47, %cst_62 {dimension_numbers = #tpu.dot_dimension_numbers<[1], [0], [0], [1], [0, 0, 1, 1], [], []>} : vector<16x48xbf16>, vector<48x16xbf16>, vector<16x16xf32> -> vector<16x16xf32>
    %79 = vector.broadcast %49 : vector<1x16xf32> to vector<16x16xf32>
    %80 = arith.addf %78, %79 : vector<16x16xf32>
    %81 = vector.extract_strided_slice %64 {offsets = [0, 16], sizes = [16, 16], strides = [1, 1]} : vector<16x64xbf16> to vector<16x16xbf16>
    %82 = vector.extract_strided_slice %64 {offsets = [0, 32], sizes = [16, 16], strides = [1, 1]} : vector<16x64xbf16> to vector<16x16xbf16>
    %83 = vector.extract_strided_slice %64 {offsets = [0, 48], sizes = [16, 16], strides = [1, 1]} : vector<16x64xbf16> to vector<16x16xbf16>
    %84 = tpu.concatenate %81, %82, %83 in 1 : vector<16x16xbf16>, vector<16x16xbf16>, vector<16x16xbf16> -> vector<16x48xbf16>
    %cst_63 = arith.constant dense<0.000000e+00> : vector<16x16xf32>
    %85 = tpu.matmul %84, %47, %cst_63 {dimension_numbers = #tpu.dot_dimension_numbers<[1], [0], [0], [1], [0, 0, 1, 1], [], []>} : vector<16x48xbf16>, vector<48x16xbf16>, vector<16x16xf32> -> vector<16x16xf32>
    %86 = vector.broadcast %49 : vector<1x16xf32> to vector<16x16xf32>
    %87 = arith.addf %85, %86 : vector<16x16xf32>
    %88 = vector.extract_strided_slice %64 {offsets = [0, 32], sizes = [16, 16], strides = [1, 1]} : vector<16x64xbf16> to vector<16x16xbf16>
    %89 = vector.extract_strided_slice %64 {offsets = [0, 48], sizes = [16, 16], strides = [1, 1]} : vector<16x64xbf16> to vector<16x16xbf16>
    %90 = vector.extract_strided_slice %66 {offsets = [0, 0], sizes = [16, 16], strides = [1, 1]} : vector<16x64xbf16> to vector<16x16xbf16>
    %91 = tpu.concatenate %88, %89, %90 in 1 : vector<16x16xbf16>, vector<16x16xbf16>, vector<16x16xbf16> -> vector<16x48xbf16>
    %cst_64 = arith.constant dense<0.000000e+00> : vector<16x16xf32>
    %92 = tpu.matmul %91, %47, %cst_64 {dimension_numbers = #tpu.dot_dimension_numbers<[1], [0], [0], [1], [0, 0, 1, 1], [], []>} : vector<16x48xbf16>, vector<48x16xbf16>, vector<16x16xf32> -> vector<16x16xf32>
    %93 = vector.broadcast %49 : vector<1x16xf32> to vector<16x16xf32>
    %94 = arith.addf %92, %93 : vector<16x16xf32>
    %95 = tpu.concatenate %73, %80, %87, %94 in 1 : vector<16x16xf32>, vector<16x16xf32>, vector<16x16xf32>, vector<16x16xf32> -> vector<16x64xf32>
    %cst_65 = arith.constant 0.000000e+00 : f32
    %96 = vector.broadcast %cst_65 : f32 to vector<16x64xf32>
    %97 = arith.cmpf oge, %95, %96 : vector<16x64xf32>
    %cst_66 = arith.constant 1.000000e-01 : f32
    %98 = vector.broadcast %cst_66 : f32 to vector<16x64xf32>
    %99 = arith.mulf %98, %95 : vector<16x64xf32>
    %100 = arith.select %97, %95, %99 : vector<16x64xi1>, vector<16x64xf32>
    %c1_67 = arith.constant 1 : index
    %c0_68 = arith.constant 0 : index
    %101 = vector.load %arg10[%c1_67, %c0_68] : memref<18x64xf32, #tpu.memory_space<vmem>>, vector<16x64xf32>
    tpu.vector_store %arg10[%c1_67, %c0_68], %100 {strides = array<i32>} : memref<18x64xf32, #tpu.memory_space<vmem>>, vector<16x64xf32>,
    %c0_69 = arith.constant 0 : index
    %c0_70 = arith.constant 0 : index
    %102 = vector.load %arg10[%c0_69, %c0_70] : memref<18x64xf32, #tpu.memory_space<vmem>>, vector<16x64xf32>
    %103 = arith.truncf %102 : vector<16x64xf32> to vector<16x64xbf16>
    %c1_71 = arith.constant 1 : index
    %c0_72 = arith.constant 0 : index
    %104 = vector.load %arg10[%c1_71, %c0_72] : memref<18x64xf32, #tpu.memory_space<vmem>>, vector<16x64xf32>
    %105 = arith.truncf %104 : vector<16x64xf32> to vector<16x64xbf16>
    %c2_73 = arith.constant 2 : index
    %c0_74 = arith.constant 0 : index
    %106 = vector.load %arg10[%c2_73, %c0_74] : memref<18x64xf32, #tpu.memory_space<vmem>>, vector<16x64xf32>
    %107 = arith.truncf %106 : vector<16x64xf32> to vector<16x64xbf16>
    %108 = vector.extract_strided_slice %103 {offsets = [0, 48], sizes = [16, 16], strides = [1, 1]} : vector<16x64xbf16> to vector<16x16xbf16>
    %109 = vector.extract_strided_slice %105 {offsets = [0, 0], sizes = [16, 16], strides = [1, 1]} : vector<16x64xbf16> to vector<16x16xbf16>
    %110 = vector.extract_strided_slice %105 {offsets = [0, 16], sizes = [16, 16], strides = [1, 1]} : vector<16x64xbf16> to vector<16x16xbf16>
    %111 = tpu.concatenate %108, %109, %110 in 1 : vector<16x16xbf16>, vector<16x16xbf16>, vector<16x16xbf16> -> vector<16x48xbf16>
    %cst_75 = arith.constant dense<0.000000e+00> : vector<16x16xf32>
    %112 = tpu.matmul %111, %51, %cst_75 {dimension_numbers = #tpu.dot_dimension_numbers<[1], [0], [0], [1], [0, 0, 1, 1], [], []>} : vector<16x48xbf16>, vector<48x16xbf16>, vector<16x16xf32> -> vector<16x16xf32>
    %113 = vector.broadcast %53 : vector<1x16xf32> to vector<16x16xf32>
    %114 = arith.addf %112, %113 : vector<16x16xf32>
    %115 = vector.extract_strided_slice %105 {offsets = [0, 0], sizes = [16, 16], strides = [1, 1]} : vector<16x64xbf16> to vector<16x16xbf16>
    %116 = vector.extract_strided_slice %105 {offsets = [0, 16], sizes = [16, 16], strides = [1, 1]} : vector<16x64xbf16> to vector<16x16xbf16>
    %117 = vector.extract_strided_slice %105 {offsets = [0, 32], sizes = [16, 16], strides = [1, 1]} : vector<16x64xbf16> to vector<16x16xbf16>
    %118 = tpu.concatenate %115, %116, %117 in 1 : vector<16x16xbf16>, vector<16x16xbf16>, vector<16x16xbf16> -> vector<16x48xbf16>
    %cst_76 = arith.constant dense<0.000000e+00> : vector<16x16xf32>
    %119 = tpu.matmul %118, %51, %cst_76 {dimension_numbers = #tpu.dot_dimension_numbers<[1], [0], [0], [1], [0, 0, 1, 1], [], []>} : vector<16x48xbf16>, vector<48x16xbf16>, vector<16x16xf32> -> vector<16x16xf32>
    %120 = vector.broadcast %53 : vector<1x16xf32> to vector<16x16xf32>
    %121 = arith.addf %119, %120 : vector<16x16xf32>
    %122 = vector.extract_strided_slice %105 {offsets = [0, 16], sizes = [16, 16], strides = [1, 1]} : vector<16x64xbf16> to vector<16x16xbf16>
    %123 = vector.extract_strided_slice %105 {offsets = [0, 32], sizes = [16, 16], strides = [1, 1]} : vector<16x64xbf16> to vector<16x16xbf16>
    %124 = vector.extract_strided_slice %105 {offsets = [0, 48], sizes = [16, 16], strides = [1, 1]} : vector<16x64xbf16> to vector<16x16xbf16>
    %125 = tpu.concatenate %122, %123, %124 in 1 : vector<16x16xbf16>, vector<16x16xbf16>, vector<16x16xbf16> -> vector<16x48xbf16>
    %cst_77 = arith.constant dense<0.000000e+00> : vector<16x16xf32>
    %126 = tpu.matmul %125, %51, %cst_77 {dimension_numbers = #tpu.dot_dimension_numbers<[1], [0], [0], [1], [0, 0, 1, 1], [], []>} : vector<16x48xbf16>, vector<48x16xbf16>, vector<16x16xf32> -> vector<16x16xf32>
    %127 = vector.broadcast %53 : vector<1x16xf32> to vector<16x16xf32>
    %128 = arith.addf %126, %127 : vector<16x16xf32>
    %129 = vector.extract_strided_slice %105 {offsets = [0, 32], sizes = [16, 16], strides = [1, 1]} : vector<16x64xbf16> to vector<16x16xbf16>
    %130 = vector.extract_strided_slice %105 {offsets = [0, 48], sizes = [16, 16], strides = [1, 1]} : vector<16x64xbf16> to vector<16x16xbf16>
    %131 = vector.extract_strided_slice %107 {offsets = [0, 0], sizes = [16, 16], strides = [1, 1]} : vector<16x64xbf16> to vector<16x16xbf16>
    %132 = tpu.concatenate %129, %130, %131 in 1 : vector<16x16xbf16>, vector<16x16xbf16>, vector<16x16xbf16> -> vector<16x48xbf16>
    %cst_78 = arith.constant dense<0.000000e+00> : vector<16x16xf32>
    %133 = tpu.matmul %132, %51, %cst_78 {dimension_numbers = #tpu.dot_dimension_numbers<[1], [0], [0], [1], [0, 0, 1, 1], [], []>} : vector<16x48xbf16>, vector<48x16xbf16>, vector<16x16xf32> -> vector<16x16xf32>
    %134 = vector.broadcast %53 : vector<1x16xf32> to vector<16x16xf32>
    %135 = arith.addf %133, %134 : vector<16x16xf32>
    %136 = tpu.concatenate %114, %121, %128, %135 in 1 : vector<16x16xf32>, vector<16x16xf32>, vector<16x16xf32>, vector<16x16xf32> -> vector<16x64xf32>
    %c0_79 = arith.constant 0 : index
    %c0_80 = arith.constant 0 : index
    %137 = vector.load %arg12[%c0_79, %c0_80] : memref<16x64xf32, #tpu.memory_space<vmem>>, vector<16x64xf32>
    %138 = arith.addf %137, %136 : vector<16x64xf32>
    %c0_81 = arith.constant 0 : index
    %c0_82 = arith.constant 0 : index
    %139 = vector.load %arg12[%c0_81, %c0_82] : memref<16x64xf32, #tpu.memory_space<vmem>>, vector<16x64xf32>
    tpu.vector_store %arg12[%c0_81, %c0_82], %138 {strides = array<i32>} : memref<16x64xf32, #tpu.memory_space<vmem>>, vector<16x64xf32>,
    %c1_83 = arith.constant 1 : index
    %c0_84 = arith.constant 0 : index
    %c0_85 = arith.constant 0 : index
    %140 = vector.load %arg4[%c1_83, %c0_84, %c0_85] : memref<2x48x16xbf16, #tpu.memory_space<vmem>>, vector<1x48x16xbf16>
    %141 = vector.shape_cast %140 : vector<1x48x16xbf16> to vector<48x16xbf16>
    %c1_86 = arith.constant 1 : index
    %c0_87 = arith.constant 0 : index
    %c0_88 = arith.constant 0 : index
    %142 = vector.load %arg5[%c1_86, %c0_87, %c0_88] : memref<2x1x16xf32, #tpu.memory_space<vmem>>, vector<1x1x16xf32>
    %143 = vector.shape_cast %142 : vector<1x1x16xf32> to vector<1x16xf32>
    %c1_89 = arith.constant 1 : index
    %c0_90 = arith.constant 0 : index
    %c0_91 = arith.constant 0 : index
    %144 = vector.load %arg6[%c1_89, %c0_90, %c0_91] : memref<2x48x16xbf16, #tpu.memory_space<vmem>>, vector<1x48x16xbf16>
    %145 = vector.shape_cast %144 : vector<1x48x16xbf16> to vector<48x16xbf16>
    %c1_92 = arith.constant 1 : index
    %c0_93 = arith.constant 0 : index
    %c0_94 = arith.constant 0 : index
    %146 = vector.load %arg7[%c1_92, %c0_93, %c0_94] : memref<2x1x16xf32, #tpu.memory_space<vmem>>, vector<1x1x16xf32>
    %147 = vector.shape_cast %146 : vector<1x1x16xf32> to vector<1x16xf32>
    %c0_95 = arith.constant 0 : index
    %c0_96 = arith.constant 0 : index
    %148 = vector.load %arg12[%c0_95, %c0_96] : memref<16x64xf32, #tpu.memory_space<vmem>>, vector<16x64xf32>
    %cst_97 = arith.constant 0.000000e+00 : f32
    %149 = vector.broadcast %cst_97 : f32 to vector<16x64xf32>
    %150 = arith.cmpf oge, %148, %149 : vector<16x64xf32>
    %cst_98 = arith.constant 1.000000e-01 : f32
    %151 = vector.broadcast %cst_98 : f32 to vector<16x64xf32>
    %152 = arith.mulf %151, %148 : vector<16x64xf32>
    %153 = arith.select %150, %148, %152 : vector<16x64xi1>, vector<16x64xf32>
    %c1_99 = arith.constant 1 : index
    %c0_100 = arith.constant 0 : index
    %154 = vector.load %arg10[%c1_99, %c0_100] : memref<18x64xf32, #tpu.memory_space<vmem>>, vector<16x64xf32>
    tpu.vector_store %arg10[%c1_99, %c0_100], %153 {strides = array<i32>} : memref<18x64xf32, #tpu.memory_space<vmem>>, vector<16x64xf32>,
    %c0_101 = arith.constant 0 : index
    %c0_102 = arith.constant 0 : index
    %155 = vector.load %arg10[%c0_101, %c0_102] : memref<18x64xf32, #tpu.memory_space<vmem>>, vector<16x64xf32>
    %156 = arith.truncf %155 : vector<16x64xf32> to vector<16x64xbf16>
    %c1_103 = arith.constant 1 : index
    %c0_104 = arith.constant 0 : index
    %157 = vector.load %arg10[%c1_103, %c0_104] : memref<18x64xf32, #tpu.memory_space<vmem>>, vector<16x64xf32>
    %158 = arith.truncf %157 : vector<16x64xf32> to vector<16x64xbf16>
    %c2_105 = arith.constant 2 : index
    %c0_106 = arith.constant 0 : index
    %159 = vector.load %arg10[%c2_105, %c0_106] : memref<18x64xf32, #tpu.memory_space<vmem>>, vector<16x64xf32>
    %160 = arith.truncf %159 : vector<16x64xf32> to vector<16x64xbf16>
    %161 = vector.extract_strided_slice %156 {offsets = [0, 16], sizes = [16, 16], strides = [1, 1]} : vector<16x64xbf16> to vector<16x16xbf16>
    %162 = vector.extract_strided_slice %158 {offsets = [0, 0], sizes = [16, 16], strides = [1, 1]} : vector<16x64xbf16> to vector<16x16xbf16>
    %163 = vector.extract_strided_slice %158 {offsets = [0, 48], sizes = [16, 16], strides = [1, 1]} : vector<16x64xbf16> to vector<16x16xbf16>
    %164 = tpu.concatenate %161, %162, %163 in 1 : vector<16x16xbf16>, vector<16x16xbf16>, vector<16x16xbf16> -> vector<16x48xbf16>
    %cst_107 = arith.constant dense<0.000000e+00> : vector<16x16xf32>
    %165 = tpu.matmul %164, %141, %cst_107 {dimension_numbers = #tpu.dot_dimension_numbers<[1], [0], [0], [1], [0, 0, 1, 1], [], []>} : vector<16x48xbf16>, vector<48x16xbf16>, vector<16x16xf32> -> vector<16x16xf32>
    %166 = vector.broadcast %143 : vector<1x16xf32> to vector<16x16xf32>
    %167 = arith.addf %165, %166 : vector<16x16xf32>
    %168 = vector.extract_strided_slice %156 {offsets = [0, 32], sizes = [16, 16], strides = [1, 1]} : vector<16x64xbf16> to vector<16x16xbf16>
    %169 = vector.extract_strided_slice %158 {offsets = [0, 16], sizes = [16, 16], strides = [1, 1]} : vector<16x64xbf16> to vector<16x16xbf16>
    %170 = vector.extract_strided_slice %160 {offsets = [0, 0], sizes = [16, 16], strides = [1, 1]} : vector<16x64xbf16> to vector<16x16xbf16>
    %171 = tpu.concatenate %168, %169, %170 in 1 : vector<16x16xbf16>, vector<16x16xbf16>, vector<16x16xbf16> -> vector<16x48xbf16>
    %cst_108 = arith.constant dense<0.000000e+00> : vector<16x16xf32>
    %172 = tpu.matmul %171, %141, %cst_108 {dimension_numbers = #tpu.dot_dimension_numbers<[1], [0], [0], [1], [0, 0, 1, 1], [], []>} : vector<16x48xbf16>, vector<48x16xbf16>, vector<16x16xf32> -> vector<16x16xf32>
    %173 = vector.broadcast %143 : vector<1x16xf32> to vector<16x16xf32>
    %174 = arith.addf %172, %173 : vector<16x16xf32>
    %175 = vector.extract_strided_slice %156 {offsets = [0, 48], sizes = [16, 16], strides = [1, 1]} : vector<16x64xbf16> to vector<16x16xbf16>
    %176 = vector.extract_strided_slice %158 {offsets = [0, 32], sizes = [16, 16], strides = [1, 1]} : vector<16x64xbf16> to vector<16x16xbf16>
    %177 = vector.extract_strided_slice %160 {offsets = [0, 16], sizes = [16, 16], strides = [1, 1]} : vector<16x64xbf16> to vector<16x16xbf16>
    %178 = tpu.concatenate %175, %176, %177 in 1 : vector<16x16xbf16>, vector<16x16xbf16>, vector<16x16xbf16> -> vector<16x48xbf16>
    %cst_109 = arith.constant dense<0.000000e+00> : vector<16x16xf32>
    %179 = tpu.matmul %178, %141, %cst_109 {dimension_numbers = #tpu.dot_dimension_numbers<[1], [0], [0], [1], [0, 0, 1, 1], [], []>} : vector<16x48xbf16>, vector<48x16xbf16>, vector<16x16xf32> -> vector<16x16xf32>
    %180 = vector.broadcast %143 : vector<1x16xf32> to vector<16x16xf32>
    %181 = arith.addf %179, %180 : vector<16x16xf32>
    %182 = vector.extract_strided_slice %158 {offsets = [0, 0], sizes = [16, 16], strides = [1, 1]} : vector<16x64xbf16> to vector<16x16xbf16>
    %183 = vector.extract_strided_slice %158 {offsets = [0, 48], sizes = [16, 16], strides = [1, 1]} : vector<16x64xbf16> to vector<16x16xbf16>
    %184 = vector.extract_strided_slice %160 {offsets = [0, 32], sizes = [16, 16], strides = [1, 1]} : vector<16x64xbf16> to vector<16x16xbf16>
    %185 = tpu.concatenate %182, %183, %184 in 1 : vector<16x16xbf16>, vector<16x16xbf16>, vector<16x16xbf16> -> vector<16x48xbf16>
    %cst_110 = arith.constant dense<0.000000e+00> : vector<16x16xf32>
    %186 = tpu.matmul %185, %141, %cst_110 {dimension_numbers = #tpu.dot_dimension_numbers<[1], [0], [0], [1], [0, 0, 1, 1], [], []>} : vector<16x48xbf16>, vector<48x16xbf16>, vector<16x16xf32> -> vector<16x16xf32>
    %187 = vector.broadcast %143 : vector<1x16xf32> to vector<16x16xf32>
    %188 = arith.addf %186, %187 : vector<16x16xf32>
    %189 = tpu.concatenate %167, %174, %181, %188 in 1 : vector<16x16xf32>, vector<16x16xf32>, vector<16x16xf32>, vector<16x16xf32> -> vector<16x64xf32>
    %cst_111 = arith.constant 0.000000e+00 : f32
    %190 = vector.broadcast %cst_111 : f32 to vector<16x64xf32>
    %191 = arith.cmpf oge, %189, %190 : vector<16x64xf32>
    %cst_112 = arith.constant 1.000000e-01 : f32
    %192 = vector.broadcast %cst_112 : f32 to vector<16x64xf32>
    %193 = arith.mulf %192, %189 : vector<16x64xf32>
    %194 = arith.select %191, %189, %193 : vector<16x64xi1>, vector<16x64xf32>
    %c1_113 = arith.constant 1 : index
    %c0_114 = arith.constant 0 : index
    %195 = vector.load %arg10[%c1_113, %c0_114] : memref<18x64xf32, #tpu.memory_space<vmem>>, vector<16x64xf32>
    tpu.vector_store %arg10[%c1_113, %c0_114], %194 {strides = array<i32>} : memref<18x64xf32, #tpu.memory_space<vmem>>, vector<16x64xf32>,
    %c0_115 = arith.constant 0 : index
    %c0_116 = arith.constant 0 : index
    %196 = vector.load %arg10[%c0_115, %c0_116] : memref<18x64xf32, #tpu.memory_space<vmem>>, vector<16x64xf32>
    %197 = arith.truncf %196 : vector<16x64xf32> to vector<16x64xbf16>
    %c1_117 = arith.constant 1 : index
    %c0_118 = arith.constant 0 : index
    %198 = vector.load %arg10[%c1_117, %c0_118] : memref<18x64xf32, #tpu.memory_space<vmem>>, vector<16x64xf32>
    %199 = arith.truncf %198 : vector<16x64xf32> to vector<16x64xbf16>
    %c2_119 = arith.constant 2 : index
    %c0_120 = arith.constant 0 : index
    %200 = vector.load %arg10[%c2_119, %c0_120] : memref<18x64xf32, #tpu.memory_space<vmem>>, vector<16x64xf32>
    %201 = arith.truncf %200 : vector<16x64xf32> to vector<16x64xbf16>
    %202 = vector.extract_strided_slice %197 {offsets = [0, 48], sizes = [16, 16], strides = [1, 1]} : vector<16x64xbf16> to vector<16x16xbf16>
    %203 = vector.extract_strided_slice %199 {offsets = [0, 0], sizes = [16, 16], strides = [1, 1]} : vector<16x64xbf16> to vector<16x16xbf16>
    %204 = vector.extract_strided_slice %199 {offsets = [0, 16], sizes = [16, 16], strides = [1, 1]} : vector<16x64xbf16> to vector<16x16xbf16>
    %205 = tpu.concatenate %202, %203, %204 in 1 : vector<16x16xbf16>, vector<16x16xbf16>, vector<16x16xbf16> -> vector<16x48xbf16>
    %cst_121 = arith.constant dense<0.000000e+00> : vector<16x16xf32>
    %206 = tpu.matmul %205, %145, %cst_121 {dimension_numbers = #tpu.dot_dimension_numbers<[1], [0], [0], [1], [0, 0, 1, 1], [], []>} : vector<16x48xbf16>, vector<48x16xbf16>, vector<16x16xf32> -> vector<16x16xf32>
    %207 = vector.broadcast %147 : vector<1x16xf32> to vector<16x16xf32>
    %208 = arith.addf %206, %207 : vector<16x16xf32>
    %209 = vector.extract_strided_slice %199 {offsets = [0, 0], sizes = [16, 16], strides = [1, 1]} : vector<16x64xbf16> to vector<16x16xbf16>
    %210 = vector.extract_strided_slice %199 {offsets = [0, 16], sizes = [16, 16], strides = [1, 1]} : vector<16x64xbf16> to vector<16x16xbf16>
    %211 = vector.extract_strided_slice %199 {offsets = [0, 32], sizes = [16, 16], strides = [1, 1]} : vector<16x64xbf16> to vector<16x16xbf16>
    %212 = tpu.concatenate %209, %210, %211 in 1 : vector<16x16xbf16>, vector<16x16xbf16>, vector<16x16xbf16> -> vector<16x48xbf16>
    %cst_122 = arith.constant dense<0.000000e+00> : vector<16x16xf32>
    %213 = tpu.matmul %212, %145, %cst_122 {dimension_numbers = #tpu.dot_dimension_numbers<[1], [0], [0], [1], [0, 0, 1, 1], [], []>} : vector<16x48xbf16>, vector<48x16xbf16>, vector<16x16xf32> -> vector<16x16xf32>
    %214 = vector.broadcast %147 : vector<1x16xf32> to vector<16x16xf32>
    %215 = arith.addf %213, %214 : vector<16x16xf32>
    %216 = vector.extract_strided_slice %199 {offsets = [0, 16], sizes = [16, 16], strides = [1, 1]} : vector<16x64xbf16> to vector<16x16xbf16>
    %217 = vector.extract_strided_slice %199 {offsets = [0, 32], sizes = [16, 16], strides = [1, 1]} : vector<16x64xbf16> to vector<16x16xbf16>
    %218 = vector.extract_strided_slice %199 {offsets = [0, 48], sizes = [16, 16], strides = [1, 1]} : vector<16x64xbf16> to vector<16x16xbf16>
    %219 = tpu.concatenate %216, %217, %218 in 1 : vector<16x16xbf16>, vector<16x16xbf16>, vector<16x16xbf16> -> vector<16x48xbf16>
    %cst_123 = arith.constant dense<0.000000e+00> : vector<16x16xf32>
    %220 = tpu.matmul %219, %145, %cst_123 {dimension_numbers = #tpu.dot_dimension_numbers<[1], [0], [0], [1], [0, 0, 1, 1], [], []>} : vector<16x48xbf16>, vector<48x16xbf16>, vector<16x16xf32> -> vector<16x16xf32>
    %221 = vector.broadcast %147 : vector<1x16xf32> to vector<16x16xf32>
    %222 = arith.addf %220, %221 : vector<16x16xf32>
    %223 = vector.extract_strided_slice %199 {offsets = [0, 32], sizes = [16, 16], strides = [1, 1]} : vector<16x64xbf16> to vector<16x16xbf16>
    %224 = vector.extract_strided_slice %199 {offsets = [0, 48], sizes = [16, 16], strides = [1, 1]} : vector<16x64xbf16> to vector<16x16xbf16>
    %225 = vector.extract_strided_slice %201 {offsets = [0, 0], sizes = [16, 16], strides = [1, 1]} : vector<16x64xbf16> to vector<16x16xbf16>
    %226 = tpu.concatenate %223, %224, %225 in 1 : vector<16x16xbf16>, vector<16x16xbf16>, vector<16x16xbf16> -> vector<16x48xbf16>
    %cst_124 = arith.constant dense<0.000000e+00> : vector<16x16xf32>
    %227 = tpu.matmul %226, %145, %cst_124 {dimension_numbers = #tpu.dot_dimension_numbers<[1], [0], [0], [1], [0, 0, 1, 1], [], []>} : vector<16x48xbf16>, vector<48x16xbf16>, vector<16x16xf32> -> vector<16x16xf32>
    %228 = vector.broadcast %147 : vector<1x16xf32> to vector<16x16xf32>
    %229 = arith.addf %227, %228 : vector<16x16xf32>
    %230 = tpu.concatenate %208, %215, %222, %229 in 1 : vector<16x16xf32>, vector<16x16xf32>, vector<16x16xf32>, vector<16x16xf32> -> vector<16x64xf32>
    %c0_125 = arith.constant 0 : index
    %c0_126 = arith.constant 0 : index
    %231 = vector.load %arg12[%c0_125, %c0_126] : memref<16x64xf32, #tpu.memory_space<vmem>>, vector<16x64xf32>
    %232 = arith.addf %231, %230 : vector<16x64xf32>
    %c0_127 = arith.constant 0 : index
    %c0_128 = arith.constant 0 : index
    %233 = vector.load %arg12[%c0_127, %c0_128] : memref<16x64xf32, #tpu.memory_space<vmem>>, vector<16x64xf32>
    tpu.vector_store %arg12[%c0_127, %c0_128], %232 {strides = array<i32>} : memref<16x64xf32, #tpu.memory_space<vmem>>, vector<16x64xf32>,
    %c0_129 = arith.constant 0 : index
    %c0_130 = arith.constant 0 : index
    %234 = vector.load %arg12[%c0_129, %c0_130] : memref<16x64xf32, #tpu.memory_space<vmem>>, vector<16x64xf32>
    %c0_131 = arith.constant 0 : index
    %c0_132 = arith.constant 0 : index
    %235 = vector.load %arg8[%c0_131, %c0_132] : memref<16x64xf32, #tpu.memory_space<vmem>>, vector<16x64xf32>
    tpu.vector_store %arg8[%c0_131, %c0_132], %234 {strides = array<i32>} : memref<16x64xf32, #tpu.memory_space<vmem>>, vector<16x64xf32>,
    return
  }
  func.func @transform_0(%arg0: i32) -> (i32, i32) {
    %c0_i32 = arith.constant 0 : i32
    %c0_i32_0 = arith.constant 0 : i32
    %c0_i32_1 = arith.constant 0 : i32
    return %c0_i32, %c0_i32_0 : i32, i32
  }
  func.func @transform_1(%arg0: i32) -> (i32, i32, i32) {
    %c0_i32 = arith.constant 0 : i32
    %c0_i32_0 = arith.constant 0 : i32
    %c0_i32_1 = arith.constant 0 : i32
    %c0_i32_2 = arith.constant 0 : i32
    return %c0_i32, %c0_i32_0, %c0_i32_1 : i32, i32, i32
  }
  func.func @transform_2(%arg0: i32) -> (i32, i32) {
    %c0_i32 = arith.constant 0 : i32
    %c0_i32_0 = arith.constant 0 : i32
    %c0_i32_1 = arith.constant 0 : i32
    return %c0_i32, %c0_i32_0 : i32, i32
  }
  func.func @transform_3(%arg0: i32) -> (i32, i32, i32) {
    %c0_i32 = arith.constant 0 : i32
    %c0_i32_0 = arith.constant 0 : i32
    %c0_i32_1 = arith.constant 0 : i32
    %c0_i32_2 = arith.constant 0 : i32
    return %c0_i32, %c0_i32_0, %c0_i32_1 : i32, i32, i32
  }
  func.func @transform_4(%arg0: i32) -> (i32, i32, i32) {
    %c0_i32 = arith.constant 0 : i32
    %c0_i32_0 = arith.constant 0 : i32
    %c0_i32_1 = arith.constant 0 : i32
    %c0_i32_2 = arith.constant 0 : i32
    return %c0_i32, %c0_i32_0, %c0_i32_1 : i32, i32, i32
  }
  func.func @transform_5(%arg0: i32) -> (i32, i32, i32) {
    %c0_i32 = arith.constant 0 : i32
    %c0_i32_0 = arith.constant 0 : i32
    %c0_i32_1 = arith.constant 0 : i32
    %c0_i32_2 = arith.constant 0 : i32
    return %c0_i32, %c0_i32_0, %c0_i32_1 : i32, i32, i32
  }
  func.func @transform_6(%arg0: i32) -> (i32, i32, i32) {
    %c0_i32 = arith.constant 0 : i32
    %c0_i32_0 = arith.constant 0 : i32
    %c0_i32_1 = arith.constant 0 : i32
    %c0_i32_2 = arith.constant 0 : i32
    return %c0_i32, %c0_i32_0, %c0_i32_1 : i32, i32, i32
  }
  func.func @transform_7(%arg0: i32) -> (i32, i32) {
    %c0_i32 = arith.constant 0 : i32
    %c0_i32_0 = arith.constant 0 : i32
    %c0_i32_1 = arith.constant 0 : i32
    return %c0_i32, %c0_i32_0 : i32, i32
  }
}

module attributes {stable_mosaic.version = 11 : i64} {
  func.func @kernel(%arg0: i32, %arg1: memref<16x64xf32, #tpu.memory_space<vmem>>, %arg2: memref<4x32x8xbf16, #tpu.memory_space<vmem>>, %arg3: memref<1x8xf32, #tpu.memory_space<vmem>>, %arg4: memref<2x24x8xbf16, #tpu.memory_space<vmem>>, %arg5: memref<2x1x8xf32, #tpu.memory_space<vmem>>, %arg6: memref<2x24x8xbf16, #tpu.memory_space<vmem>>, %arg7: memref<2x1x8xf32, #tpu.memory_space<vmem>>, %arg8: memref<56x1xbf16, #tpu.memory_space<vmem>>, %arg9: memref<1x1xf32, #tpu.memory_space<vmem>>, %arg10: memref<16x16xf32, #tpu.memory_space<vmem>>, %arg11: memref<18x64xf32, #tpu.memory_space<vmem>>, %arg12: memref<18x128xf32, #tpu.memory_space<vmem>>, %arg13: memref<16x128xf32, #tpu.memory_space<vmem>>, %arg14: memref<16x128xf32, #tpu.memory_space<vmem>>, %arg15: memref<16x128xf32, #tpu.memory_space<vmem>>) attributes {dimension_semantics = [#tpu.dimension_semantics<arbitrary>], iteration_bounds = array<i64: 1>, scalar_prefetch = 0 : i64, scratch_operands = 5 : i64, tpu.core_type = #tpu.core_type<tc>, window_params = [{pipeline_mode = #tpu.pipeline_mode<synchronous>, transform_indices = @transform_0, window_bounds = array<i64: 16, 64>}, {pipeline_mode = #tpu.pipeline_mode<synchronous>, transform_indices = @transform_1, window_bounds = array<i64: 4, 32, 8>}, {pipeline_mode = #tpu.pipeline_mode<synchronous>, transform_indices = @transform_2, window_bounds = array<i64: 1, 8>}, {pipeline_mode = #tpu.pipeline_mode<synchronous>, transform_indices = @transform_3, window_bounds = array<i64: 2, 24, 8>}, {pipeline_mode = #tpu.pipeline_mode<synchronous>, transform_indices = @transform_4, window_bounds = array<i64: 2, 1, 8>}, {pipeline_mode = #tpu.pipeline_mode<synchronous>, transform_indices = @transform_5, window_bounds = array<i64: 2, 24, 8>}, {pipeline_mode = #tpu.pipeline_mode<synchronous>, transform_indices = @transform_6, window_bounds = array<i64: 2, 1, 8>}, {pipeline_mode = #tpu.pipeline_mode<synchronous>, transform_indices = @transform_7, window_bounds = array<i64: 56, 1>}, {pipeline_mode = #tpu.pipeline_mode<synchronous>, transform_indices = @transform_8, window_bounds = array<i64: 1, 1>}, {pipeline_mode = #tpu.pipeline_mode<synchronous>, transform_indices = @transform_9, window_bounds = array<i64: 16, 16>}]} {
    %cst = arith.constant 0.000000e+00 : f32
    %0 = vector.broadcast %cst : f32 to vector<18x64xf32>
    %c0 = arith.constant 0 : index
    %c0_0 = arith.constant 0 : index
    %1 = vector.load %arg11[%c0, %c0_0] : memref<18x64xf32, #tpu.memory_space<vmem>>, vector<18x64xf32>
    tpu.vector_store %arg11[%c0, %c0_0], %0 {strides = array<i32>} : memref<18x64xf32, #tpu.memory_space<vmem>>, vector<18x64xf32>,
    %cst_1 = arith.constant 0.000000e+00 : f32
    %2 = vector.broadcast %cst_1 : f32 to vector<18x128xf32>
    %c0_2 = arith.constant 0 : index
    %c0_3 = arith.constant 0 : index
    %3 = vector.load %arg12[%c0_2, %c0_3] : memref<18x128xf32, #tpu.memory_space<vmem>>, vector<18x128xf32>
    tpu.vector_store %arg12[%c0_2, %c0_3], %2 {strides = array<i32>} : memref<18x128xf32, #tpu.memory_space<vmem>>, vector<18x128xf32>,
    %c0_4 = arith.constant 0 : index
    %c0_5 = arith.constant 0 : index
    %4 = vector.load %arg1[%c0_4, %c0_5] : memref<16x64xf32, #tpu.memory_space<vmem>>, vector<16x64xf32>
    %cst_6 = arith.constant 0.000000e+00 : f32
    %5 = vector.broadcast %cst_6 : f32 to vector<16x64xf32>
    %6 = arith.cmpf oge, %4, %5 : vector<16x64xf32>
    %cst_7 = arith.constant 1.000000e-01 : f32
    %7 = vector.broadcast %cst_7 : f32 to vector<16x64xf32>
    %8 = arith.mulf %7, %4 : vector<16x64xf32>
    %9 = arith.select %6, %4, %8 : vector<16x64xi1>, vector<16x64xf32>
    %c1 = arith.constant 1 : index
    %c0_8 = arith.constant 0 : index
    %10 = vector.load %arg11[%c1, %c0_8] : memref<18x64xf32, #tpu.memory_space<vmem>>, vector<16x64xf32>
    tpu.vector_store %arg11[%c1, %c0_8], %9 {strides = array<i32>} : memref<18x64xf32, #tpu.memory_space<vmem>>, vector<16x64xf32>,
    %c0_9 = arith.constant 0 : index
    %c0_10 = arith.constant 0 : index
    %c0_11 = arith.constant 0 : index
    %11 = vector.load %arg2[%c0_9, %c0_10, %c0_11] : memref<4x32x8xbf16, #tpu.memory_space<vmem>>, vector<1x32x8xbf16>
    %12 = vector.shape_cast %11 : vector<1x32x8xbf16> to vector<32x8xbf16>
    %c1_12 = arith.constant 1 : index
    %c0_13 = arith.constant 0 : index
    %c0_14 = arith.constant 0 : index
    %13 = vector.load %arg2[%c1_12, %c0_13, %c0_14] : memref<4x32x8xbf16, #tpu.memory_space<vmem>>, vector<1x32x8xbf16>
    %14 = vector.shape_cast %13 : vector<1x32x8xbf16> to vector<32x8xbf16>
    %c2 = arith.constant 2 : index
    %c0_15 = arith.constant 0 : index
    %c0_16 = arith.constant 0 : index
    %15 = vector.load %arg2[%c2, %c0_15, %c0_16] : memref<4x32x8xbf16, #tpu.memory_space<vmem>>, vector<1x32x8xbf16>
    %16 = vector.shape_cast %15 : vector<1x32x8xbf16> to vector<32x8xbf16>
    %c3 = arith.constant 3 : index
    %c0_17 = arith.constant 0 : index
    %c0_18 = arith.constant 0 : index
    %17 = vector.load %arg2[%c3, %c0_17, %c0_18] : memref<4x32x8xbf16, #tpu.memory_space<vmem>>, vector<1x32x8xbf16>
    %18 = vector.shape_cast %17 : vector<1x32x8xbf16> to vector<32x8xbf16>
    %c0_19 = arith.constant 0 : index
    %c0_20 = arith.constant 0 : index
    %19 = vector.load %arg3[%c0_19, %c0_20] : memref<1x8xf32, #tpu.memory_space<vmem>>, vector<1x8xf32>
    %c0_21 = arith.constant 0 : index
    %c0_22 = arith.constant 0 : index
    %20 = vector.load %arg11[%c0_21, %c0_22] : memref<18x64xf32, #tpu.memory_space<vmem>>, vector<16x64xf32>
    %21 = arith.truncf %20 : vector<16x64xf32> to vector<16x64xbf16>
    %c1_23 = arith.constant 1 : index
    %c0_24 = arith.constant 0 : index
    %22 = vector.load %arg11[%c1_23, %c0_24] : memref<18x64xf32, #tpu.memory_space<vmem>>, vector<16x64xf32>
    %23 = arith.truncf %22 : vector<16x64xf32> to vector<16x64xbf16>
    %c2_25 = arith.constant 2 : index
    %c0_26 = arith.constant 0 : index
    %24 = vector.load %arg11[%c2_25, %c0_26] : memref<18x64xf32, #tpu.memory_space<vmem>>, vector<16x64xf32>
    %25 = arith.truncf %24 : vector<16x64xf32> to vector<16x64xbf16>
    %26 = vector.extract_strided_slice %23 {offsets = [0, 0], sizes = [16, 16], strides = [1, 1]} : vector<16x64xbf16> to vector<16x16xbf16>
    %27 = vector.extract_strided_slice %21 {offsets = [0, 48], sizes = [16, 16], strides = [1, 1]} : vector<16x64xbf16> to vector<16x16xbf16>
    %28 = tpu.concatenate %26, %27 in 1 : vector<16x16xbf16>, vector<16x16xbf16> -> vector<16x32xbf16>
    %cst_27 = arith.constant dense<0.000000e+00> : vector<16x8xf32>
    %29 = tpu.matmul %28, %12, %cst_27 {dimension_numbers = #tpu.dot_dimension_numbers<[1], [0], [0], [1], [0, 0, 1, 1], [], []>} : vector<16x32xbf16>, vector<32x8xbf16>, vector<16x8xf32> -> vector<16x8xf32>
    %30 = vector.broadcast %19 : vector<1x8xf32> to vector<16x8xf32>
    %31 = arith.addf %29, %30 : vector<16x8xf32>
    %32 = vector.extract_strided_slice %23 {offsets = [0, 0], sizes = [16, 16], strides = [1, 1]} : vector<16x64xbf16> to vector<16x16xbf16>
    %33 = vector.extract_strided_slice %21 {offsets = [0, 48], sizes = [16, 16], strides = [1, 1]} : vector<16x64xbf16> to vector<16x16xbf16>
    %34 = tpu.concatenate %32, %33 in 1 : vector<16x16xbf16>, vector<16x16xbf16> -> vector<16x32xbf16>
    %cst_28 = arith.constant dense<0.000000e+00> : vector<16x8xf32>
    %35 = tpu.matmul %34, %14, %cst_28 {dimension_numbers = #tpu.dot_dimension_numbers<[1], [0], [0], [1], [0, 0, 1, 1], [], []>} : vector<16x32xbf16>, vector<32x8xbf16>, vector<16x8xf32> -> vector<16x8xf32>
    %36 = vector.broadcast %19 : vector<1x8xf32> to vector<16x8xf32>
    %37 = arith.addf %35, %36 : vector<16x8xf32>
    %38 = vector.extract_strided_slice %23 {offsets = [0, 16], sizes = [16, 16], strides = [1, 1]} : vector<16x64xbf16> to vector<16x16xbf16>
    %39 = vector.extract_strided_slice %23 {offsets = [0, 0], sizes = [16, 16], strides = [1, 1]} : vector<16x64xbf16> to vector<16x16xbf16>
    %40 = tpu.concatenate %38, %39 in 1 : vector<16x16xbf16>, vector<16x16xbf16> -> vector<16x32xbf16>
    %cst_29 = arith.constant dense<0.000000e+00> : vector<16x8xf32>
    %41 = tpu.matmul %40, %16, %cst_29 {dimension_numbers = #tpu.dot_dimension_numbers<[1], [0], [0], [1], [0, 0, 1, 1], [], []>} : vector<16x32xbf16>, vector<32x8xbf16>, vector<16x8xf32> -> vector<16x8xf32>
    %42 = vector.broadcast %19 : vector<1x8xf32> to vector<16x8xf32>
    %43 = arith.addf %41, %42 : vector<16x8xf32>
    %44 = vector.extract_strided_slice %23 {offsets = [0, 16], sizes = [16, 16], strides = [1, 1]} : vector<16x64xbf16> to vector<16x16xbf16>
    %45 = vector.extract_strided_slice %23 {offsets = [0, 0], sizes = [16, 16], strides = [1, 1]} : vector<16x64xbf16> to vector<16x16xbf16>
    %46 = tpu.concatenate %44, %45 in 1 : vector<16x16xbf16>, vector<16x16xbf16> -> vector<16x32xbf16>
    %cst_30 = arith.constant dense<0.000000e+00> : vector<16x8xf32>
    %47 = tpu.matmul %46, %18, %cst_30 {dimension_numbers = #tpu.dot_dimension_numbers<[1], [0], [0], [1], [0, 0, 1, 1], [], []>} : vector<16x32xbf16>, vector<32x8xbf16>, vector<16x8xf32> -> vector<16x8xf32>
    %48 = vector.broadcast %19 : vector<1x8xf32> to vector<16x8xf32>
    %49 = arith.addf %47, %48 : vector<16x8xf32>
    %50 = vector.extract_strided_slice %23 {offsets = [0, 16], sizes = [16, 16], strides = [1, 1]} : vector<16x64xbf16> to vector<16x16xbf16>
    %51 = vector.extract_strided_slice %23 {offsets = [0, 0], sizes = [16, 16], strides = [1, 1]} : vector<16x64xbf16> to vector<16x16xbf16>
    %52 = tpu.concatenate %50, %51 in 1 : vector<16x16xbf16>, vector<16x16xbf16> -> vector<16x32xbf16>
    %cst_31 = arith.constant dense<0.000000e+00> : vector<16x8xf32>
    %53 = tpu.matmul %52, %12, %cst_31 {dimension_numbers = #tpu.dot_dimension_numbers<[1], [0], [0], [1], [0, 0, 1, 1], [], []>} : vector<16x32xbf16>, vector<32x8xbf16>, vector<16x8xf32> -> vector<16x8xf32>
    %54 = vector.broadcast %19 : vector<1x8xf32> to vector<16x8xf32>
    %55 = arith.addf %53, %54 : vector<16x8xf32>
    %56 = vector.extract_strided_slice %23 {offsets = [0, 16], sizes = [16, 16], strides = [1, 1]} : vector<16x64xbf16> to vector<16x16xbf16>
    %57 = vector.extract_strided_slice %23 {offsets = [0, 0], sizes = [16, 16], strides = [1, 1]} : vector<16x64xbf16> to vector<16x16xbf16>
    %58 = tpu.concatenate %56, %57 in 1 : vector<16x16xbf16>, vector<16x16xbf16> -> vector<16x32xbf16>
    %cst_32 = arith.constant dense<0.000000e+00> : vector<16x8xf32>
    %59 = tpu.matmul %58, %14, %cst_32 {dimension_numbers = #tpu.dot_dimension_numbers<[1], [0], [0], [1], [0, 0, 1, 1], [], []>} : vector<16x32xbf16>, vector<32x8xbf16>, vector<16x8xf32> -> vector<16x8xf32>
    %60 = vector.broadcast %19 : vector<1x8xf32> to vector<16x8xf32>
    %61 = arith.addf %59, %60 : vector<16x8xf32>
    %62 = vector.extract_strided_slice %23 {offsets = [0, 32], sizes = [16, 16], strides = [1, 1]} : vector<16x64xbf16> to vector<16x16xbf16>
    %63 = vector.extract_strided_slice %23 {offsets = [0, 16], sizes = [16, 16], strides = [1, 1]} : vector<16x64xbf16> to vector<16x16xbf16>
    %64 = tpu.concatenate %62, %63 in 1 : vector<16x16xbf16>, vector<16x16xbf16> -> vector<16x32xbf16>
    %cst_33 = arith.constant dense<0.000000e+00> : vector<16x8xf32>
    %65 = tpu.matmul %64, %16, %cst_33 {dimension_numbers = #tpu.dot_dimension_numbers<[1], [0], [0], [1], [0, 0, 1, 1], [], []>} : vector<16x32xbf16>, vector<32x8xbf16>, vector<16x8xf32> -> vector<16x8xf32>
    %66 = vector.broadcast %19 : vector<1x8xf32> to vector<16x8xf32>
    %67 = arith.addf %65, %66 : vector<16x8xf32>
    %68 = vector.extract_strided_slice %23 {offsets = [0, 32], sizes = [16, 16], strides = [1, 1]} : vector<16x64xbf16> to vector<16x16xbf16>
    %69 = vector.extract_strided_slice %23 {offsets = [0, 16], sizes = [16, 16], strides = [1, 1]} : vector<16x64xbf16> to vector<16x16xbf16>
    %70 = tpu.concatenate %68, %69 in 1 : vector<16x16xbf16>, vector<16x16xbf16> -> vector<16x32xbf16>
    %cst_34 = arith.constant dense<0.000000e+00> : vector<16x8xf32>
    %71 = tpu.matmul %70, %18, %cst_34 {dimension_numbers = #tpu.dot_dimension_numbers<[1], [0], [0], [1], [0, 0, 1, 1], [], []>} : vector<16x32xbf16>, vector<32x8xbf16>, vector<16x8xf32> -> vector<16x8xf32>
    %72 = vector.broadcast %19 : vector<1x8xf32> to vector<16x8xf32>
    %73 = arith.addf %71, %72 : vector<16x8xf32>
    %74 = vector.extract_strided_slice %23 {offsets = [0, 32], sizes = [16, 16], strides = [1, 1]} : vector<16x64xbf16> to vector<16x16xbf16>
    %75 = vector.extract_strided_slice %23 {offsets = [0, 16], sizes = [16, 16], strides = [1, 1]} : vector<16x64xbf16> to vector<16x16xbf16>
    %76 = tpu.concatenate %74, %75 in 1 : vector<16x16xbf16>, vector<16x16xbf16> -> vector<16x32xbf16>
    %cst_35 = arith.constant dense<0.000000e+00> : vector<16x8xf32>
    %77 = tpu.matmul %76, %12, %cst_35 {dimension_numbers = #tpu.dot_dimension_numbers<[1], [0], [0], [1], [0, 0, 1, 1], [], []>} : vector<16x32xbf16>, vector<32x8xbf16>, vector<16x8xf32> -> vector<16x8xf32>
    %78 = vector.broadcast %19 : vector<1x8xf32> to vector<16x8xf32>
    %79 = arith.addf %77, %78 : vector<16x8xf32>
    %80 = vector.extract_strided_slice %23 {offsets = [0, 32], sizes = [16, 16], strides = [1, 1]} : vector<16x64xbf16> to vector<16x16xbf16>
    %81 = vector.extract_strided_slice %23 {offsets = [0, 16], sizes = [16, 16], strides = [1, 1]} : vector<16x64xbf16> to vector<16x16xbf16>
    %82 = tpu.concatenate %80, %81 in 1 : vector<16x16xbf16>, vector<16x16xbf16> -> vector<16x32xbf16>
    %cst_36 = arith.constant dense<0.000000e+00> : vector<16x8xf32>
    %83 = tpu.matmul %82, %14, %cst_36 {dimension_numbers = #tpu.dot_dimension_numbers<[1], [0], [0], [1], [0, 0, 1, 1], [], []>} : vector<16x32xbf16>, vector<32x8xbf16>, vector<16x8xf32> -> vector<16x8xf32>
    %84 = vector.broadcast %19 : vector<1x8xf32> to vector<16x8xf32>
    %85 = arith.addf %83, %84 : vector<16x8xf32>
    %86 = vector.extract_strided_slice %23 {offsets = [0, 48], sizes = [16, 16], strides = [1, 1]} : vector<16x64xbf16> to vector<16x16xbf16>
    %87 = vector.extract_strided_slice %23 {offsets = [0, 32], sizes = [16, 16], strides = [1, 1]} : vector<16x64xbf16> to vector<16x16xbf16>
    %88 = tpu.concatenate %86, %87 in 1 : vector<16x16xbf16>, vector<16x16xbf16> -> vector<16x32xbf16>
    %cst_37 = arith.constant dense<0.000000e+00> : vector<16x8xf32>
    %89 = tpu.matmul %88, %16, %cst_37 {dimension_numbers = #tpu.dot_dimension_numbers<[1], [0], [0], [1], [0, 0, 1, 1], [], []>} : vector<16x32xbf16>, vector<32x8xbf16>, vector<16x8xf32> -> vector<16x8xf32>
    %90 = vector.broadcast %19 : vector<1x8xf32> to vector<16x8xf32>
    %91 = arith.addf %89, %90 : vector<16x8xf32>
    %92 = vector.extract_strided_slice %23 {offsets = [0, 48], sizes = [16, 16], strides = [1, 1]} : vector<16x64xbf16> to vector<16x16xbf16>
    %93 = vector.extract_strided_slice %23 {offsets = [0, 32], sizes = [16, 16], strides = [1, 1]} : vector<16x64xbf16> to vector<16x16xbf16>
    %94 = tpu.concatenate %92, %93 in 1 : vector<16x16xbf16>, vector<16x16xbf16> -> vector<16x32xbf16>
    %cst_38 = arith.constant dense<0.000000e+00> : vector<16x8xf32>
    %95 = tpu.matmul %94, %18, %cst_38 {dimension_numbers = #tpu.dot_dimension_numbers<[1], [0], [0], [1], [0, 0, 1, 1], [], []>} : vector<16x32xbf16>, vector<32x8xbf16>, vector<16x8xf32> -> vector<16x8xf32>
    %96 = vector.broadcast %19 : vector<1x8xf32> to vector<16x8xf32>
    %97 = arith.addf %95, %96 : vector<16x8xf32>
    %98 = vector.extract_strided_slice %23 {offsets = [0, 48], sizes = [16, 16], strides = [1, 1]} : vector<16x64xbf16> to vector<16x16xbf16>
    %99 = vector.extract_strided_slice %23 {offsets = [0, 32], sizes = [16, 16], strides = [1, 1]} : vector<16x64xbf16> to vector<16x16xbf16>
    %100 = tpu.concatenate %98, %99 in 1 : vector<16x16xbf16>, vector<16x16xbf16> -> vector<16x32xbf16>
    %cst_39 = arith.constant dense<0.000000e+00> : vector<16x8xf32>
    %101 = tpu.matmul %100, %12, %cst_39 {dimension_numbers = #tpu.dot_dimension_numbers<[1], [0], [0], [1], [0, 0, 1, 1], [], []>} : vector<16x32xbf16>, vector<32x8xbf16>, vector<16x8xf32> -> vector<16x8xf32>
    %102 = vector.broadcast %19 : vector<1x8xf32> to vector<16x8xf32>
    %103 = arith.addf %101, %102 : vector<16x8xf32>
    %104 = vector.extract_strided_slice %23 {offsets = [0, 48], sizes = [16, 16], strides = [1, 1]} : vector<16x64xbf16> to vector<16x16xbf16>
    %105 = vector.extract_strided_slice %23 {offsets = [0, 32], sizes = [16, 16], strides = [1, 1]} : vector<16x64xbf16> to vector<16x16xbf16>
    %106 = tpu.concatenate %104, %105 in 1 : vector<16x16xbf16>, vector<16x16xbf16> -> vector<16x32xbf16>
    %cst_40 = arith.constant dense<0.000000e+00> : vector<16x8xf32>
    %107 = tpu.matmul %106, %14, %cst_40 {dimension_numbers = #tpu.dot_dimension_numbers<[1], [0], [0], [1], [0, 0, 1, 1], [], []>} : vector<16x32xbf16>, vector<32x8xbf16>, vector<16x8xf32> -> vector<16x8xf32>
    %108 = vector.broadcast %19 : vector<1x8xf32> to vector<16x8xf32>
    %109 = arith.addf %107, %108 : vector<16x8xf32>
    %110 = vector.extract_strided_slice %25 {offsets = [0, 0], sizes = [16, 16], strides = [1, 1]} : vector<16x64xbf16> to vector<16x16xbf16>
    %111 = vector.extract_strided_slice %23 {offsets = [0, 48], sizes = [16, 16], strides = [1, 1]} : vector<16x64xbf16> to vector<16x16xbf16>
    %112 = tpu.concatenate %110, %111 in 1 : vector<16x16xbf16>, vector<16x16xbf16> -> vector<16x32xbf16>
    %cst_41 = arith.constant dense<0.000000e+00> : vector<16x8xf32>
    %113 = tpu.matmul %112, %16, %cst_41 {dimension_numbers = #tpu.dot_dimension_numbers<[1], [0], [0], [1], [0, 0, 1, 1], [], []>} : vector<16x32xbf16>, vector<32x8xbf16>, vector<16x8xf32> -> vector<16x8xf32>
    %114 = vector.broadcast %19 : vector<1x8xf32> to vector<16x8xf32>
    %115 = arith.addf %113, %114 : vector<16x8xf32>
    %116 = vector.extract_strided_slice %25 {offsets = [0, 0], sizes = [16, 16], strides = [1, 1]} : vector<16x64xbf16> to vector<16x16xbf16>
    %117 = vector.extract_strided_slice %23 {offsets = [0, 48], sizes = [16, 16], strides = [1, 1]} : vector<16x64xbf16> to vector<16x16xbf16>
    %118 = tpu.concatenate %116, %117 in 1 : vector<16x16xbf16>, vector<16x16xbf16> -> vector<16x32xbf16>
    %cst_42 = arith.constant dense<0.000000e+00> : vector<16x8xf32>
    %119 = tpu.matmul %118, %18, %cst_42 {dimension_numbers = #tpu.dot_dimension_numbers<[1], [0], [0], [1], [0, 0, 1, 1], [], []>} : vector<16x32xbf16>, vector<32x8xbf16>, vector<16x8xf32> -> vector<16x8xf32>
    %120 = vector.broadcast %19 : vector<1x8xf32> to vector<16x8xf32>
    %121 = arith.addf %119, %120 : vector<16x8xf32>
    %122 = tpu.concatenate %31, %37, %43, %49, %55, %61, %67, %73, %79, %85, %91, %97, %103, %109, %115, %121 in 1 : vector<16x8xf32>, vector<16x8xf32>, vector<16x8xf32>, vector<16x8xf32>, vector<16x8xf32>, vector<16x8xf32>, vector<16x8xf32>, vector<16x8xf32>, vector<16x8xf32>, vector<16x8xf32>, vector<16x8xf32>, vector<16x8xf32>, vector<16x8xf32>, vector<16x8xf32>, vector<16x8xf32>, vector<16x8xf32> -> vector<16x128xf32>
    %c0_43 = arith.constant 0 : index
    %c0_44 = arith.constant 0 : index
    %123 = vector.load %arg13[%c0_43, %c0_44] : memref<16x128xf32, #tpu.memory_space<vmem>>, vector<16x128xf32>
    tpu.vector_store %arg13[%c0_43, %c0_44], %122 {strides = array<i32>} : memref<16x128xf32, #tpu.memory_space<vmem>>, vector<16x128xf32>,
    %c0_45 = arith.constant 0 : index
    %c0_46 = arith.constant 0 : index
    %124 = vector.load %arg13[%c0_45, %c0_46] : memref<16x128xf32, #tpu.memory_space<vmem>>, vector<16x128xf32>
    %c0_47 = arith.constant 0 : index
    %c0_48 = arith.constant 0 : index
    %125 = vector.load %arg14[%c0_47, %c0_48] : memref<16x128xf32, #tpu.memory_space<vmem>>, vector<16x128xf32>
    tpu.vector_store %arg14[%c0_47, %c0_48], %124 {strides = array<i32>} : memref<16x128xf32, #tpu.memory_space<vmem>>, vector<16x128xf32>,
    %c0_49 = arith.constant 0 : index
    %c0_50 = arith.constant 0 : index
    %c0_51 = arith.constant 0 : index
    %126 = vector.load %arg4[%c0_49, %c0_50, %c0_51] : memref<2x24x8xbf16, #tpu.memory_space<vmem>>, vector<1x24x8xbf16>
    %127 = vector.shape_cast %126 : vector<1x24x8xbf16> to vector<24x8xbf16>
    %c0_52 = arith.constant 0 : index
    %c0_53 = arith.constant 0 : index
    %c0_54 = arith.constant 0 : index
    %128 = vector.load %arg5[%c0_52, %c0_53, %c0_54] : memref<2x1x8xf32, #tpu.memory_space<vmem>>, vector<1x1x8xf32>
    %129 = vector.shape_cast %128 : vector<1x1x8xf32> to vector<1x8xf32>
    %c0_55 = arith.constant 0 : index
    %c0_56 = arith.constant 0 : index
    %c0_57 = arith.constant 0 : index
    %130 = vector.load %arg6[%c0_55, %c0_56, %c0_57] : memref<2x24x8xbf16, #tpu.memory_space<vmem>>, vector<1x24x8xbf16>
    %131 = vector.shape_cast %130 : vector<1x24x8xbf16> to vector<24x8xbf16>
    %c0_58 = arith.constant 0 : index
    %c0_59 = arith.constant 0 : index
    %c0_60 = arith.constant 0 : index
    %132 = vector.load %arg7[%c0_58, %c0_59, %c0_60] : memref<2x1x8xf32, #tpu.memory_space<vmem>>, vector<1x1x8xf32>
    %133 = vector.shape_cast %132 : vector<1x1x8xf32> to vector<1x8xf32>
    %c0_61 = arith.constant 0 : index
    %c0_62 = arith.constant 0 : index
    %134 = vector.load %arg14[%c0_61, %c0_62] : memref<16x128xf32, #tpu.memory_space<vmem>>, vector<16x128xf32>
    %cst_63 = arith.constant 0.000000e+00 : f32
    %135 = vector.broadcast %cst_63 : f32 to vector<16x128xf32>
    %136 = arith.cmpf oge, %134, %135 : vector<16x128xf32>
    %cst_64 = arith.constant 1.000000e-01 : f32
    %137 = vector.broadcast %cst_64 : f32 to vector<16x128xf32>
    %138 = arith.mulf %137, %134 : vector<16x128xf32>
    %139 = arith.select %136, %134, %138 : vector<16x128xi1>, vector<16x128xf32>
    %c1_65 = arith.constant 1 : index
    %c0_66 = arith.constant 0 : index
    %140 = vector.load %arg12[%c1_65, %c0_66] : memref<18x128xf32, #tpu.memory_space<vmem>>, vector<16x128xf32>
    tpu.vector_store %arg12[%c1_65, %c0_66], %139 {strides = array<i32>} : memref<18x128xf32, #tpu.memory_space<vmem>>, vector<16x128xf32>,
    %c0_67 = arith.constant 0 : index
    %c0_68 = arith.constant 0 : index
    %141 = vector.load %arg12[%c0_67, %c0_68] : memref<18x128xf32, #tpu.memory_space<vmem>>, vector<16x128xf32>
    %142 = arith.truncf %141 : vector<16x128xf32> to vector<16x128xbf16>
    %c1_69 = arith.constant 1 : index
    %c0_70 = arith.constant 0 : index
    %143 = vector.load %arg12[%c1_69, %c0_70] : memref<18x128xf32, #tpu.memory_space<vmem>>, vector<16x128xf32>
    %144 = arith.truncf %143 : vector<16x128xf32> to vector<16x128xbf16>
    %c2_71 = arith.constant 2 : index
    %c0_72 = arith.constant 0 : index
    %145 = vector.load %arg12[%c2_71, %c0_72] : memref<18x128xf32, #tpu.memory_space<vmem>>, vector<16x128xf32>
    %146 = arith.truncf %145 : vector<16x128xf32> to vector<16x128xbf16>
    %147 = vector.extract_strided_slice %142 {offsets = [0, 120], sizes = [16, 8], strides = [1, 1]} : vector<16x128xbf16> to vector<16x8xbf16>
    %148 = vector.extract_strided_slice %144 {offsets = [0, 0], sizes = [16, 8], strides = [1, 1]} : vector<16x128xbf16> to vector<16x8xbf16>
    %149 = vector.extract_strided_slice %144 {offsets = [0, 8], sizes = [16, 8], strides = [1, 1]} : vector<16x128xbf16> to vector<16x8xbf16>
    %150 = tpu.concatenate %147, %148, %149 in 1 : vector<16x8xbf16>, vector<16x8xbf16>, vector<16x8xbf16> -> vector<16x24xbf16>
    %cst_73 = arith.constant dense<0.000000e+00> : vector<16x8xf32>
    %151 = tpu.matmul %150, %127, %cst_73 {dimension_numbers = #tpu.dot_dimension_numbers<[1], [0], [0], [1], [0, 0, 1, 1], [], []>} : vector<16x24xbf16>, vector<24x8xbf16>, vector<16x8xf32> -> vector<16x8xf32>
    %152 = vector.broadcast %129 : vector<1x8xf32> to vector<16x8xf32>
    %153 = arith.addf %151, %152 : vector<16x8xf32>
    %154 = vector.extract_strided_slice %144 {offsets = [0, 0], sizes = [16, 8], strides = [1, 1]} : vector<16x128xbf16> to vector<16x8xbf16>
    %155 = vector.extract_strided_slice %144 {offsets = [0, 8], sizes = [16, 8], strides = [1, 1]} : vector<16x128xbf16> to vector<16x8xbf16>
    %156 = vector.extract_strided_slice %144 {offsets = [0, 16], sizes = [16, 8], strides = [1, 1]} : vector<16x128xbf16> to vector<16x8xbf16>
    %157 = tpu.concatenate %154, %155, %156 in 1 : vector<16x8xbf16>, vector<16x8xbf16>, vector<16x8xbf16> -> vector<16x24xbf16>
    %cst_74 = arith.constant dense<0.000000e+00> : vector<16x8xf32>
    %158 = tpu.matmul %157, %127, %cst_74 {dimension_numbers = #tpu.dot_dimension_numbers<[1], [0], [0], [1], [0, 0, 1, 1], [], []>} : vector<16x24xbf16>, vector<24x8xbf16>, vector<16x8xf32> -> vector<16x8xf32>
    %159 = vector.broadcast %129 : vector<1x8xf32> to vector<16x8xf32>
    %160 = arith.addf %158, %159 : vector<16x8xf32>
    %161 = vector.extract_strided_slice %144 {offsets = [0, 8], sizes = [16, 8], strides = [1, 1]} : vector<16x128xbf16> to vector<16x8xbf16>
    %162 = vector.extract_strided_slice %144 {offsets = [0, 16], sizes = [16, 8], strides = [1, 1]} : vector<16x128xbf16> to vector<16x8xbf16>
    %163 = vector.extract_strided_slice %144 {offsets = [0, 24], sizes = [16, 8], strides = [1, 1]} : vector<16x128xbf16> to vector<16x8xbf16>
    %164 = tpu.concatenate %161, %162, %163 in 1 : vector<16x8xbf16>, vector<16x8xbf16>, vector<16x8xbf16> -> vector<16x24xbf16>
    %cst_75 = arith.constant dense<0.000000e+00> : vector<16x8xf32>
    %165 = tpu.matmul %164, %127, %cst_75 {dimension_numbers = #tpu.dot_dimension_numbers<[1], [0], [0], [1], [0, 0, 1, 1], [], []>} : vector<16x24xbf16>, vector<24x8xbf16>, vector<16x8xf32> -> vector<16x8xf32>
    %166 = vector.broadcast %129 : vector<1x8xf32> to vector<16x8xf32>
    %167 = arith.addf %165, %166 : vector<16x8xf32>
    %168 = vector.extract_strided_slice %144 {offsets = [0, 16], sizes = [16, 8], strides = [1, 1]} : vector<16x128xbf16> to vector<16x8xbf16>
    %169 = vector.extract_strided_slice %144 {offsets = [0, 24], sizes = [16, 8], strides = [1, 1]} : vector<16x128xbf16> to vector<16x8xbf16>
    %170 = vector.extract_strided_slice %144 {offsets = [0, 32], sizes = [16, 8], strides = [1, 1]} : vector<16x128xbf16> to vector<16x8xbf16>
    %171 = tpu.concatenate %168, %169, %170 in 1 : vector<16x8xbf16>, vector<16x8xbf16>, vector<16x8xbf16> -> vector<16x24xbf16>
    %cst_76 = arith.constant dense<0.000000e+00> : vector<16x8xf32>
    %172 = tpu.matmul %171, %127, %cst_76 {dimension_numbers = #tpu.dot_dimension_numbers<[1], [0], [0], [1], [0, 0, 1, 1], [], []>} : vector<16x24xbf16>, vector<24x8xbf16>, vector<16x8xf32> -> vector<16x8xf32>
    %173 = vector.broadcast %129 : vector<1x8xf32> to vector<16x8xf32>
    %174 = arith.addf %172, %173 : vector<16x8xf32>
    %175 = vector.extract_strided_slice %144 {offsets = [0, 24], sizes = [16, 8], strides = [1, 1]} : vector<16x128xbf16> to vector<16x8xbf16>
    %176 = vector.extract_strided_slice %144 {offsets = [0, 32], sizes = [16, 8], strides = [1, 1]} : vector<16x128xbf16> to vector<16x8xbf16>
    %177 = vector.extract_strided_slice %144 {offsets = [0, 40], sizes = [16, 8], strides = [1, 1]} : vector<16x128xbf16> to vector<16x8xbf16>
    %178 = tpu.concatenate %175, %176, %177 in 1 : vector<16x8xbf16>, vector<16x8xbf16>, vector<16x8xbf16> -> vector<16x24xbf16>
    %cst_77 = arith.constant dense<0.000000e+00> : vector<16x8xf32>
    %179 = tpu.matmul %178, %127, %cst_77 {dimension_numbers = #tpu.dot_dimension_numbers<[1], [0], [0], [1], [0, 0, 1, 1], [], []>} : vector<16x24xbf16>, vector<24x8xbf16>, vector<16x8xf32> -> vector<16x8xf32>
    %180 = vector.broadcast %129 : vector<1x8xf32> to vector<16x8xf32>
    %181 = arith.addf %179, %180 : vector<16x8xf32>
    %182 = vector.extract_strided_slice %144 {offsets = [0, 32], sizes = [16, 8], strides = [1, 1]} : vector<16x128xbf16> to vector<16x8xbf16>
    %183 = vector.extract_strided_slice %144 {offsets = [0, 40], sizes = [16, 8], strides = [1, 1]} : vector<16x128xbf16> to vector<16x8xbf16>
    %184 = vector.extract_strided_slice %144 {offsets = [0, 48], sizes = [16, 8], strides = [1, 1]} : vector<16x128xbf16> to vector<16x8xbf16>
    %185 = tpu.concatenate %182, %183, %184 in 1 : vector<16x8xbf16>, vector<16x8xbf16>, vector<16x8xbf16> -> vector<16x24xbf16>
    %cst_78 = arith.constant dense<0.000000e+00> : vector<16x8xf32>
    %186 = tpu.matmul %185, %127, %cst_78 {dimension_numbers = #tpu.dot_dimension_numbers<[1], [0], [0], [1], [0, 0, 1, 1], [], []>} : vector<16x24xbf16>, vector<24x8xbf16>, vector<16x8xf32> -> vector<16x8xf32>
    %187 = vector.broadcast %129 : vector<1x8xf32> to vector<16x8xf32>
    %188 = arith.addf %186, %187 : vector<16x8xf32>
    %189 = vector.extract_strided_slice %144 {offsets = [0, 40], sizes = [16, 8], strides = [1, 1]} : vector<16x128xbf16> to vector<16x8xbf16>
    %190 = vector.extract_strided_slice %144 {offsets = [0, 48], sizes = [16, 8], strides = [1, 1]} : vector<16x128xbf16> to vector<16x8xbf16>
    %191 = vector.extract_strided_slice %144 {offsets = [0, 56], sizes = [16, 8], strides = [1, 1]} : vector<16x128xbf16> to vector<16x8xbf16>
    %192 = tpu.concatenate %189, %190, %191 in 1 : vector<16x8xbf16>, vector<16x8xbf16>, vector<16x8xbf16> -> vector<16x24xbf16>
    %cst_79 = arith.constant dense<0.000000e+00> : vector<16x8xf32>
    %193 = tpu.matmul %192, %127, %cst_79 {dimension_numbers = #tpu.dot_dimension_numbers<[1], [0], [0], [1], [0, 0, 1, 1], [], []>} : vector<16x24xbf16>, vector<24x8xbf16>, vector<16x8xf32> -> vector<16x8xf32>
    %194 = vector.broadcast %129 : vector<1x8xf32> to vector<16x8xf32>
    %195 = arith.addf %193, %194 : vector<16x8xf32>
    %196 = vector.extract_strided_slice %144 {offsets = [0, 48], sizes = [16, 8], strides = [1, 1]} : vector<16x128xbf16> to vector<16x8xbf16>
    %197 = vector.extract_strided_slice %144 {offsets = [0, 56], sizes = [16, 8], strides = [1, 1]} : vector<16x128xbf16> to vector<16x8xbf16>
    %198 = vector.extract_strided_slice %144 {offsets = [0, 64], sizes = [16, 8], strides = [1, 1]} : vector<16x128xbf16> to vector<16x8xbf16>
    %199 = tpu.concatenate %196, %197, %198 in 1 : vector<16x8xbf16>, vector<16x8xbf16>, vector<16x8xbf16> -> vector<16x24xbf16>
    %cst_80 = arith.constant dense<0.000000e+00> : vector<16x8xf32>
    %200 = tpu.matmul %199, %127, %cst_80 {dimension_numbers = #tpu.dot_dimension_numbers<[1], [0], [0], [1], [0, 0, 1, 1], [], []>} : vector<16x24xbf16>, vector<24x8xbf16>, vector<16x8xf32> -> vector<16x8xf32>
    %201 = vector.broadcast %129 : vector<1x8xf32> to vector<16x8xf32>
    %202 = arith.addf %200, %201 : vector<16x8xf32>
    %203 = vector.extract_strided_slice %144 {offsets = [0, 56], sizes = [16, 8], strides = [1, 1]} : vector<16x128xbf16> to vector<16x8xbf16>
    %204 = vector.extract_strided_slice %144 {offsets = [0, 64], sizes = [16, 8], strides = [1, 1]} : vector<16x128xbf16> to vector<16x8xbf16>
    %205 = vector.extract_strided_slice %144 {offsets = [0, 72], sizes = [16, 8], strides = [1, 1]} : vector<16x128xbf16> to vector<16x8xbf16>
    %206 = tpu.concatenate %203, %204, %205 in 1 : vector<16x8xbf16>, vector<16x8xbf16>, vector<16x8xbf16> -> vector<16x24xbf16>
    %cst_81 = arith.constant dense<0.000000e+00> : vector<16x8xf32>
    %207 = tpu.matmul %206, %127, %cst_81 {dimension_numbers = #tpu.dot_dimension_numbers<[1], [0], [0], [1], [0, 0, 1, 1], [], []>} : vector<16x24xbf16>, vector<24x8xbf16>, vector<16x8xf32> -> vector<16x8xf32>
    %208 = vector.broadcast %129 : vector<1x8xf32> to vector<16x8xf32>
    %209 = arith.addf %207, %208 : vector<16x8xf32>
    %210 = vector.extract_strided_slice %144 {offsets = [0, 64], sizes = [16, 8], strides = [1, 1]} : vector<16x128xbf16> to vector<16x8xbf16>
    %211 = vector.extract_strided_slice %144 {offsets = [0, 72], sizes = [16, 8], strides = [1, 1]} : vector<16x128xbf16> to vector<16x8xbf16>
    %212 = vector.extract_strided_slice %144 {offsets = [0, 80], sizes = [16, 8], strides = [1, 1]} : vector<16x128xbf16> to vector<16x8xbf16>
    %213 = tpu.concatenate %210, %211, %212 in 1 : vector<16x8xbf16>, vector<16x8xbf16>, vector<16x8xbf16> -> vector<16x24xbf16>
    %cst_82 = arith.constant dense<0.000000e+00> : vector<16x8xf32>
    %214 = tpu.matmul %213, %127, %cst_82 {dimension_numbers = #tpu.dot_dimension_numbers<[1], [0], [0], [1], [0, 0, 1, 1], [], []>} : vector<16x24xbf16>, vector<24x8xbf16>, vector<16x8xf32> -> vector<16x8xf32>
    %215 = vector.broadcast %129 : vector<1x8xf32> to vector<16x8xf32>
    %216 = arith.addf %214, %215 : vector<16x8xf32>
    %217 = vector.extract_strided_slice %144 {offsets = [0, 72], sizes = [16, 8], strides = [1, 1]} : vector<16x128xbf16> to vector<16x8xbf16>
    %218 = vector.extract_strided_slice %144 {offsets = [0, 80], sizes = [16, 8], strides = [1, 1]} : vector<16x128xbf16> to vector<16x8xbf16>
    %219 = vector.extract_strided_slice %144 {offsets = [0, 88], sizes = [16, 8], strides = [1, 1]} : vector<16x128xbf16> to vector<16x8xbf16>
    %220 = tpu.concatenate %217, %218, %219 in 1 : vector<16x8xbf16>, vector<16x8xbf16>, vector<16x8xbf16> -> vector<16x24xbf16>
    %cst_83 = arith.constant dense<0.000000e+00> : vector<16x8xf32>
    %221 = tpu.matmul %220, %127, %cst_83 {dimension_numbers = #tpu.dot_dimension_numbers<[1], [0], [0], [1], [0, 0, 1, 1], [], []>} : vector<16x24xbf16>, vector<24x8xbf16>, vector<16x8xf32> -> vector<16x8xf32>
    %222 = vector.broadcast %129 : vector<1x8xf32> to vector<16x8xf32>
    %223 = arith.addf %221, %222 : vector<16x8xf32>
    %224 = vector.extract_strided_slice %144 {offsets = [0, 80], sizes = [16, 8], strides = [1, 1]} : vector<16x128xbf16> to vector<16x8xbf16>
    %225 = vector.extract_strided_slice %144 {offsets = [0, 88], sizes = [16, 8], strides = [1, 1]} : vector<16x128xbf16> to vector<16x8xbf16>
    %226 = vector.extract_strided_slice %144 {offsets = [0, 96], sizes = [16, 8], strides = [1, 1]} : vector<16x128xbf16> to vector<16x8xbf16>
    %227 = tpu.concatenate %224, %225, %226 in 1 : vector<16x8xbf16>, vector<16x8xbf16>, vector<16x8xbf16> -> vector<16x24xbf16>
    %cst_84 = arith.constant dense<0.000000e+00> : vector<16x8xf32>
    %228 = tpu.matmul %227, %127, %cst_84 {dimension_numbers = #tpu.dot_dimension_numbers<[1], [0], [0], [1], [0, 0, 1, 1], [], []>} : vector<16x24xbf16>, vector<24x8xbf16>, vector<16x8xf32> -> vector<16x8xf32>
    %229 = vector.broadcast %129 : vector<1x8xf32> to vector<16x8xf32>
    %230 = arith.addf %228, %229 : vector<16x8xf32>
    %231 = vector.extract_strided_slice %144 {offsets = [0, 88], sizes = [16, 8], strides = [1, 1]} : vector<16x128xbf16> to vector<16x8xbf16>
    %232 = vector.extract_strided_slice %144 {offsets = [0, 96], sizes = [16, 8], strides = [1, 1]} : vector<16x128xbf16> to vector<16x8xbf16>
    %233 = vector.extract_strided_slice %144 {offsets = [0, 104], sizes = [16, 8], strides = [1, 1]} : vector<16x128xbf16> to vector<16x8xbf16>
    %234 = tpu.concatenate %231, %232, %233 in 1 : vector<16x8xbf16>, vector<16x8xbf16>, vector<16x8xbf16> -> vector<16x24xbf16>
    %cst_85 = arith.constant dense<0.000000e+00> : vector<16x8xf32>
    %235 = tpu.matmul %234, %127, %cst_85 {dimension_numbers = #tpu.dot_dimension_numbers<[1], [0], [0], [1], [0, 0, 1, 1], [], []>} : vector<16x24xbf16>, vector<24x8xbf16>, vector<16x8xf32> -> vector<16x8xf32>
    %236 = vector.broadcast %129 : vector<1x8xf32> to vector<16x8xf32>
    %237 = arith.addf %235, %236 : vector<16x8xf32>
    %238 = vector.extract_strided_slice %144 {offsets = [0, 96], sizes = [16, 8], strides = [1, 1]} : vector<16x128xbf16> to vector<16x8xbf16>
    %239 = vector.extract_strided_slice %144 {offsets = [0, 104], sizes = [16, 8], strides = [1, 1]} : vector<16x128xbf16> to vector<16x8xbf16>
    %240 = vector.extract_strided_slice %144 {offsets = [0, 112], sizes = [16, 8], strides = [1, 1]} : vector<16x128xbf16> to vector<16x8xbf16>
    %241 = tpu.concatenate %238, %239, %240 in 1 : vector<16x8xbf16>, vector<16x8xbf16>, vector<16x8xbf16> -> vector<16x24xbf16>
    %cst_86 = arith.constant dense<0.000000e+00> : vector<16x8xf32>
    %242 = tpu.matmul %241, %127, %cst_86 {dimension_numbers = #tpu.dot_dimension_numbers<[1], [0], [0], [1], [0, 0, 1, 1], [], []>} : vector<16x24xbf16>, vector<24x8xbf16>, vector<16x8xf32> -> vector<16x8xf32>
    %243 = vector.broadcast %129 : vector<1x8xf32> to vector<16x8xf32>
    %244 = arith.addf %242, %243 : vector<16x8xf32>
    %245 = vector.extract_strided_slice %144 {offsets = [0, 104], sizes = [16, 8], strides = [1, 1]} : vector<16x128xbf16> to vector<16x8xbf16>
    %246 = vector.extract_strided_slice %144 {offsets = [0, 112], sizes = [16, 8], strides = [1, 1]} : vector<16x128xbf16> to vector<16x8xbf16>
    %247 = vector.extract_strided_slice %144 {offsets = [0, 120], sizes = [16, 8], strides = [1, 1]} : vector<16x128xbf16> to vector<16x8xbf16>
    %248 = tpu.concatenate %245, %246, %247 in 1 : vector<16x8xbf16>, vector<16x8xbf16>, vector<16x8xbf16> -> vector<16x24xbf16>
    %cst_87 = arith.constant dense<0.000000e+00> : vector<16x8xf32>
    %249 = tpu.matmul %248, %127, %cst_87 {dimension_numbers = #tpu.dot_dimension_numbers<[1], [0], [0], [1], [0, 0, 1, 1], [], []>} : vector<16x24xbf16>, vector<24x8xbf16>, vector<16x8xf32> -> vector<16x8xf32>
    %250 = vector.broadcast %129 : vector<1x8xf32> to vector<16x8xf32>
    %251 = arith.addf %249, %250 : vector<16x8xf32>
    %252 = vector.extract_strided_slice %144 {offsets = [0, 112], sizes = [16, 8], strides = [1, 1]} : vector<16x128xbf16> to vector<16x8xbf16>
    %253 = vector.extract_strided_slice %144 {offsets = [0, 120], sizes = [16, 8], strides = [1, 1]} : vector<16x128xbf16> to vector<16x8xbf16>
    %254 = vector.extract_strided_slice %146 {offsets = [0, 0], sizes = [16, 8], strides = [1, 1]} : vector<16x128xbf16> to vector<16x8xbf16>
    %255 = tpu.concatenate %252, %253, %254 in 1 : vector<16x8xbf16>, vector<16x8xbf16>, vector<16x8xbf16> -> vector<16x24xbf16>
    %cst_88 = arith.constant dense<0.000000e+00> : vector<16x8xf32>
    %256 = tpu.matmul %255, %127, %cst_88 {dimension_numbers = #tpu.dot_dimension_numbers<[1], [0], [0], [1], [0, 0, 1, 1], [], []>} : vector<16x24xbf16>, vector<24x8xbf16>, vector<16x8xf32> -> vector<16x8xf32>
    %257 = vector.broadcast %129 : vector<1x8xf32> to vector<16x8xf32>
    %258 = arith.addf %256, %257 : vector<16x8xf32>
    %259 = tpu.concatenate %153, %160, %167, %174, %181, %188, %195, %202, %209, %216, %223, %230, %237, %244, %251, %258 in 1 : vector<16x8xf32>, vector<16x8xf32>, vector<16x8xf32>, vector<16x8xf32>, vector<16x8xf32>, vector<16x8xf32>, vector<16x8xf32>, vector<16x8xf32>, vector<16x8xf32>, vector<16x8xf32>, vector<16x8xf32>, vector<16x8xf32>, vector<16x8xf32>, vector<16x8xf32>, vector<16x8xf32>, vector<16x8xf32> -> vector<16x128xf32>
    %cst_89 = arith.constant 0.000000e+00 : f32
    %260 = vector.broadcast %cst_89 : f32 to vector<16x128xf32>
    %261 = arith.cmpf oge, %259, %260 : vector<16x128xf32>
    %cst_90 = arith.constant 1.000000e-01 : f32
    %262 = vector.broadcast %cst_90 : f32 to vector<16x128xf32>
    %263 = arith.mulf %262, %259 : vector<16x128xf32>
    %264 = arith.select %261, %259, %263 : vector<16x128xi1>, vector<16x128xf32>
    %c1_91 = arith.constant 1 : index
    %c0_92 = arith.constant 0 : index
    %265 = vector.load %arg12[%c1_91, %c0_92] : memref<18x128xf32, #tpu.memory_space<vmem>>, vector<16x128xf32>
    tpu.vector_store %arg12[%c1_91, %c0_92], %264 {strides = array<i32>} : memref<18x128xf32, #tpu.memory_space<vmem>>, vector<16x128xf32>,
    %c0_93 = arith.constant 0 : index
    %c0_94 = arith.constant 0 : index
    %266 = vector.load %arg12[%c0_93, %c0_94] : memref<18x128xf32, #tpu.memory_space<vmem>>, vector<16x128xf32>
    %267 = arith.truncf %266 : vector<16x128xf32> to vector<16x128xbf16>
    %c1_95 = arith.constant 1 : index
    %c0_96 = arith.constant 0 : index
    %268 = vector.load %arg12[%c1_95, %c0_96] : memref<18x128xf32, #tpu.memory_space<vmem>>, vector<16x128xf32>
    %269 = arith.truncf %268 : vector<16x128xf32> to vector<16x128xbf16>
    %c2_97 = arith.constant 2 : index
    %c0_98 = arith.constant 0 : index
    %270 = vector.load %arg12[%c2_97, %c0_98] : memref<18x128xf32, #tpu.memory_space<vmem>>, vector<16x128xf32>
    %271 = arith.truncf %270 : vector<16x128xf32> to vector<16x128xbf16>
    %272 = vector.extract_strided_slice %267 {offsets = [0, 120], sizes = [16, 8], strides = [1, 1]} : vector<16x128xbf16> to vector<16x8xbf16>
    %273 = vector.extract_strided_slice %269 {offsets = [0, 0], sizes = [16, 8], strides = [1, 1]} : vector<16x128xbf16> to vector<16x8xbf16>
    %274 = vector.extract_strided_slice %269 {offsets = [0, 8], sizes = [16, 8], strides = [1, 1]} : vector<16x128xbf16> to vector<16x8xbf16>
    %275 = tpu.concatenate %272, %273, %274 in 1 : vector<16x8xbf16>, vector<16x8xbf16>, vector<16x8xbf16> -> vector<16x24xbf16>
    %cst_99 = arith.constant dense<0.000000e+00> : vector<16x8xf32>
    %276 = tpu.matmul %275, %131, %cst_99 {dimension_numbers = #tpu.dot_dimension_numbers<[1], [0], [0], [1], [0, 0, 1, 1], [], []>} : vector<16x24xbf16>, vector<24x8xbf16>, vector<16x8xf32> -> vector<16x8xf32>
    %277 = vector.broadcast %133 : vector<1x8xf32> to vector<16x8xf32>
    %278 = arith.addf %276, %277 : vector<16x8xf32>
    %279 = vector.extract_strided_slice %269 {offsets = [0, 0], sizes = [16, 8], strides = [1, 1]} : vector<16x128xbf16> to vector<16x8xbf16>
    %280 = vector.extract_strided_slice %269 {offsets = [0, 8], sizes = [16, 8], strides = [1, 1]} : vector<16x128xbf16> to vector<16x8xbf16>
    %281 = vector.extract_strided_slice %269 {offsets = [0, 16], sizes = [16, 8], strides = [1, 1]} : vector<16x128xbf16> to vector<16x8xbf16>
    %282 = tpu.concatenate %279, %280, %281 in 1 : vector<16x8xbf16>, vector<16x8xbf16>, vector<16x8xbf16> -> vector<16x24xbf16>
    %cst_100 = arith.constant dense<0.000000e+00> : vector<16x8xf32>
    %283 = tpu.matmul %282, %131, %cst_100 {dimension_numbers = #tpu.dot_dimension_numbers<[1], [0], [0], [1], [0, 0, 1, 1], [], []>} : vector<16x24xbf16>, vector<24x8xbf16>, vector<16x8xf32> -> vector<16x8xf32>
    %284 = vector.broadcast %133 : vector<1x8xf32> to vector<16x8xf32>
    %285 = arith.addf %283, %284 : vector<16x8xf32>
    %286 = vector.extract_strided_slice %269 {offsets = [0, 8], sizes = [16, 8], strides = [1, 1]} : vector<16x128xbf16> to vector<16x8xbf16>
    %287 = vector.extract_strided_slice %269 {offsets = [0, 16], sizes = [16, 8], strides = [1, 1]} : vector<16x128xbf16> to vector<16x8xbf16>
    %288 = vector.extract_strided_slice %269 {offsets = [0, 24], sizes = [16, 8], strides = [1, 1]} : vector<16x128xbf16> to vector<16x8xbf16>
    %289 = tpu.concatenate %286, %287, %288 in 1 : vector<16x8xbf16>, vector<16x8xbf16>, vector<16x8xbf16> -> vector<16x24xbf16>
    %cst_101 = arith.constant dense<0.000000e+00> : vector<16x8xf32>
    %290 = tpu.matmul %289, %131, %cst_101 {dimension_numbers = #tpu.dot_dimension_numbers<[1], [0], [0], [1], [0, 0, 1, 1], [], []>} : vector<16x24xbf16>, vector<24x8xbf16>, vector<16x8xf32> -> vector<16x8xf32>
    %291 = vector.broadcast %133 : vector<1x8xf32> to vector<16x8xf32>
    %292 = arith.addf %290, %291 : vector<16x8xf32>
    %293 = vector.extract_strided_slice %269 {offsets = [0, 16], sizes = [16, 8], strides = [1, 1]} : vector<16x128xbf16> to vector<16x8xbf16>
    %294 = vector.extract_strided_slice %269 {offsets = [0, 24], sizes = [16, 8], strides = [1, 1]} : vector<16x128xbf16> to vector<16x8xbf16>
    %295 = vector.extract_strided_slice %269 {offsets = [0, 32], sizes = [16, 8], strides = [1, 1]} : vector<16x128xbf16> to vector<16x8xbf16>
    %296 = tpu.concatenate %293, %294, %295 in 1 : vector<16x8xbf16>, vector<16x8xbf16>, vector<16x8xbf16> -> vector<16x24xbf16>
    %cst_102 = arith.constant dense<0.000000e+00> : vector<16x8xf32>
    %297 = tpu.matmul %296, %131, %cst_102 {dimension_numbers = #tpu.dot_dimension_numbers<[1], [0], [0], [1], [0, 0, 1, 1], [], []>} : vector<16x24xbf16>, vector<24x8xbf16>, vector<16x8xf32> -> vector<16x8xf32>
    %298 = vector.broadcast %133 : vector<1x8xf32> to vector<16x8xf32>
    %299 = arith.addf %297, %298 : vector<16x8xf32>
    %300 = vector.extract_strided_slice %269 {offsets = [0, 24], sizes = [16, 8], strides = [1, 1]} : vector<16x128xbf16> to vector<16x8xbf16>
    %301 = vector.extract_strided_slice %269 {offsets = [0, 32], sizes = [16, 8], strides = [1, 1]} : vector<16x128xbf16> to vector<16x8xbf16>
    %302 = vector.extract_strided_slice %269 {offsets = [0, 40], sizes = [16, 8], strides = [1, 1]} : vector<16x128xbf16> to vector<16x8xbf16>
    %303 = tpu.concatenate %300, %301, %302 in 1 : vector<16x8xbf16>, vector<16x8xbf16>, vector<16x8xbf16> -> vector<16x24xbf16>
    %cst_103 = arith.constant dense<0.000000e+00> : vector<16x8xf32>
    %304 = tpu.matmul %303, %131, %cst_103 {dimension_numbers = #tpu.dot_dimension_numbers<[1], [0], [0], [1], [0, 0, 1, 1], [], []>} : vector<16x24xbf16>, vector<24x8xbf16>, vector<16x8xf32> -> vector<16x8xf32>
    %305 = vector.broadcast %133 : vector<1x8xf32> to vector<16x8xf32>
    %306 = arith.addf %304, %305 : vector<16x8xf32>
    %307 = vector.extract_strided_slice %269 {offsets = [0, 32], sizes = [16, 8], strides = [1, 1]} : vector<16x128xbf16> to vector<16x8xbf16>
    %308 = vector.extract_strided_slice %269 {offsets = [0, 40], sizes = [16, 8], strides = [1, 1]} : vector<16x128xbf16> to vector<16x8xbf16>
    %309 = vector.extract_strided_slice %269 {offsets = [0, 48], sizes = [16, 8], strides = [1, 1]} : vector<16x128xbf16> to vector<16x8xbf16>
    %310 = tpu.concatenate %307, %308, %309 in 1 : vector<16x8xbf16>, vector<16x8xbf16>, vector<16x8xbf16> -> vector<16x24xbf16>
    %cst_104 = arith.constant dense<0.000000e+00> : vector<16x8xf32>
    %311 = tpu.matmul %310, %131, %cst_104 {dimension_numbers = #tpu.dot_dimension_numbers<[1], [0], [0], [1], [0, 0, 1, 1], [], []>} : vector<16x24xbf16>, vector<24x8xbf16>, vector<16x8xf32> -> vector<16x8xf32>
    %312 = vector.broadcast %133 : vector<1x8xf32> to vector<16x8xf32>
    %313 = arith.addf %311, %312 : vector<16x8xf32>
    %314 = vector.extract_strided_slice %269 {offsets = [0, 40], sizes = [16, 8], strides = [1, 1]} : vector<16x128xbf16> to vector<16x8xbf16>
    %315 = vector.extract_strided_slice %269 {offsets = [0, 48], sizes = [16, 8], strides = [1, 1]} : vector<16x128xbf16> to vector<16x8xbf16>
    %316 = vector.extract_strided_slice %269 {offsets = [0, 56], sizes = [16, 8], strides = [1, 1]} : vector<16x128xbf16> to vector<16x8xbf16>
    %317 = tpu.concatenate %314, %315, %316 in 1 : vector<16x8xbf16>, vector<16x8xbf16>, vector<16x8xbf16> -> vector<16x24xbf16>
    %cst_105 = arith.constant dense<0.000000e+00> : vector<16x8xf32>
    %318 = tpu.matmul %317, %131, %cst_105 {dimension_numbers = #tpu.dot_dimension_numbers<[1], [0], [0], [1], [0, 0, 1, 1], [], []>} : vector<16x24xbf16>, vector<24x8xbf16>, vector<16x8xf32> -> vector<16x8xf32>
    %319 = vector.broadcast %133 : vector<1x8xf32> to vector<16x8xf32>
    %320 = arith.addf %318, %319 : vector<16x8xf32>
    %321 = vector.extract_strided_slice %269 {offsets = [0, 48], sizes = [16, 8], strides = [1, 1]} : vector<16x128xbf16> to vector<16x8xbf16>
    %322 = vector.extract_strided_slice %269 {offsets = [0, 56], sizes = [16, 8], strides = [1, 1]} : vector<16x128xbf16> to vector<16x8xbf16>
    %323 = vector.extract_strided_slice %269 {offsets = [0, 64], sizes = [16, 8], strides = [1, 1]} : vector<16x128xbf16> to vector<16x8xbf16>
    %324 = tpu.concatenate %321, %322, %323 in 1 : vector<16x8xbf16>, vector<16x8xbf16>, vector<16x8xbf16> -> vector<16x24xbf16>
    %cst_106 = arith.constant dense<0.000000e+00> : vector<16x8xf32>
    %325 = tpu.matmul %324, %131, %cst_106 {dimension_numbers = #tpu.dot_dimension_numbers<[1], [0], [0], [1], [0, 0, 1, 1], [], []>} : vector<16x24xbf16>, vector<24x8xbf16>, vector<16x8xf32> -> vector<16x8xf32>
    %326 = vector.broadcast %133 : vector<1x8xf32> to vector<16x8xf32>
    %327 = arith.addf %325, %326 : vector<16x8xf32>
    %328 = vector.extract_strided_slice %269 {offsets = [0, 56], sizes = [16, 8], strides = [1, 1]} : vector<16x128xbf16> to vector<16x8xbf16>
    %329 = vector.extract_strided_slice %269 {offsets = [0, 64], sizes = [16, 8], strides = [1, 1]} : vector<16x128xbf16> to vector<16x8xbf16>
    %330 = vector.extract_strided_slice %269 {offsets = [0, 72], sizes = [16, 8], strides = [1, 1]} : vector<16x128xbf16> to vector<16x8xbf16>
    %331 = tpu.concatenate %328, %329, %330 in 1 : vector<16x8xbf16>, vector<16x8xbf16>, vector<16x8xbf16> -> vector<16x24xbf16>
    %cst_107 = arith.constant dense<0.000000e+00> : vector<16x8xf32>
    %332 = tpu.matmul %331, %131, %cst_107 {dimension_numbers = #tpu.dot_dimension_numbers<[1], [0], [0], [1], [0, 0, 1, 1], [], []>} : vector<16x24xbf16>, vector<24x8xbf16>, vector<16x8xf32> -> vector<16x8xf32>
    %333 = vector.broadcast %133 : vector<1x8xf32> to vector<16x8xf32>
    %334 = arith.addf %332, %333 : vector<16x8xf32>
    %335 = vector.extract_strided_slice %269 {offsets = [0, 64], sizes = [16, 8], strides = [1, 1]} : vector<16x128xbf16> to vector<16x8xbf16>
    %336 = vector.extract_strided_slice %269 {offsets = [0, 72], sizes = [16, 8], strides = [1, 1]} : vector<16x128xbf16> to vector<16x8xbf16>
    %337 = vector.extract_strided_slice %269 {offsets = [0, 80], sizes = [16, 8], strides = [1, 1]} : vector<16x128xbf16> to vector<16x8xbf16>
    %338 = tpu.concatenate %335, %336, %337 in 1 : vector<16x8xbf16>, vector<16x8xbf16>, vector<16x8xbf16> -> vector<16x24xbf16>
    %cst_108 = arith.constant dense<0.000000e+00> : vector<16x8xf32>
    %339 = tpu.matmul %338, %131, %cst_108 {dimension_numbers = #tpu.dot_dimension_numbers<[1], [0], [0], [1], [0, 0, 1, 1], [], []>} : vector<16x24xbf16>, vector<24x8xbf16>, vector<16x8xf32> -> vector<16x8xf32>
    %340 = vector.broadcast %133 : vector<1x8xf32> to vector<16x8xf32>
    %341 = arith.addf %339, %340 : vector<16x8xf32>
    %342 = vector.extract_strided_slice %269 {offsets = [0, 72], sizes = [16, 8], strides = [1, 1]} : vector<16x128xbf16> to vector<16x8xbf16>
    %343 = vector.extract_strided_slice %269 {offsets = [0, 80], sizes = [16, 8], strides = [1, 1]} : vector<16x128xbf16> to vector<16x8xbf16>
    %344 = vector.extract_strided_slice %269 {offsets = [0, 88], sizes = [16, 8], strides = [1, 1]} : vector<16x128xbf16> to vector<16x8xbf16>
    %345 = tpu.concatenate %342, %343, %344 in 1 : vector<16x8xbf16>, vector<16x8xbf16>, vector<16x8xbf16> -> vector<16x24xbf16>
    %cst_109 = arith.constant dense<0.000000e+00> : vector<16x8xf32>
    %346 = tpu.matmul %345, %131, %cst_109 {dimension_numbers = #tpu.dot_dimension_numbers<[1], [0], [0], [1], [0, 0, 1, 1], [], []>} : vector<16x24xbf16>, vector<24x8xbf16>, vector<16x8xf32> -> vector<16x8xf32>
    %347 = vector.broadcast %133 : vector<1x8xf32> to vector<16x8xf32>
    %348 = arith.addf %346, %347 : vector<16x8xf32>
    %349 = vector.extract_strided_slice %269 {offsets = [0, 80], sizes = [16, 8], strides = [1, 1]} : vector<16x128xbf16> to vector<16x8xbf16>
    %350 = vector.extract_strided_slice %269 {offsets = [0, 88], sizes = [16, 8], strides = [1, 1]} : vector<16x128xbf16> to vector<16x8xbf16>
    %351 = vector.extract_strided_slice %269 {offsets = [0, 96], sizes = [16, 8], strides = [1, 1]} : vector<16x128xbf16> to vector<16x8xbf16>
    %352 = tpu.concatenate %349, %350, %351 in 1 : vector<16x8xbf16>, vector<16x8xbf16>, vector<16x8xbf16> -> vector<16x24xbf16>
    %cst_110 = arith.constant dense<0.000000e+00> : vector<16x8xf32>
    %353 = tpu.matmul %352, %131, %cst_110 {dimension_numbers = #tpu.dot_dimension_numbers<[1], [0], [0], [1], [0, 0, 1, 1], [], []>} : vector<16x24xbf16>, vector<24x8xbf16>, vector<16x8xf32> -> vector<16x8xf32>
    %354 = vector.broadcast %133 : vector<1x8xf32> to vector<16x8xf32>
    %355 = arith.addf %353, %354 : vector<16x8xf32>
    %356 = vector.extract_strided_slice %269 {offsets = [0, 88], sizes = [16, 8], strides = [1, 1]} : vector<16x128xbf16> to vector<16x8xbf16>
    %357 = vector.extract_strided_slice %269 {offsets = [0, 96], sizes = [16, 8], strides = [1, 1]} : vector<16x128xbf16> to vector<16x8xbf16>
    %358 = vector.extract_strided_slice %269 {offsets = [0, 104], sizes = [16, 8], strides = [1, 1]} : vector<16x128xbf16> to vector<16x8xbf16>
    %359 = tpu.concatenate %356, %357, %358 in 1 : vector<16x8xbf16>, vector<16x8xbf16>, vector<16x8xbf16> -> vector<16x24xbf16>
    %cst_111 = arith.constant dense<0.000000e+00> : vector<16x8xf32>
    %360 = tpu.matmul %359, %131, %cst_111 {dimension_numbers = #tpu.dot_dimension_numbers<[1], [0], [0], [1], [0, 0, 1, 1], [], []>} : vector<16x24xbf16>, vector<24x8xbf16>, vector<16x8xf32> -> vector<16x8xf32>
    %361 = vector.broadcast %133 : vector<1x8xf32> to vector<16x8xf32>
    %362 = arith.addf %360, %361 : vector<16x8xf32>
    %363 = vector.extract_strided_slice %269 {offsets = [0, 96], sizes = [16, 8], strides = [1, 1]} : vector<16x128xbf16> to vector<16x8xbf16>
    %364 = vector.extract_strided_slice %269 {offsets = [0, 104], sizes = [16, 8], strides = [1, 1]} : vector<16x128xbf16> to vector<16x8xbf16>
    %365 = vector.extract_strided_slice %269 {offsets = [0, 112], sizes = [16, 8], strides = [1, 1]} : vector<16x128xbf16> to vector<16x8xbf16>
    %366 = tpu.concatenate %363, %364, %365 in 1 : vector<16x8xbf16>, vector<16x8xbf16>, vector<16x8xbf16> -> vector<16x24xbf16>
    %cst_112 = arith.constant dense<0.000000e+00> : vector<16x8xf32>
    %367 = tpu.matmul %366, %131, %cst_112 {dimension_numbers = #tpu.dot_dimension_numbers<[1], [0], [0], [1], [0, 0, 1, 1], [], []>} : vector<16x24xbf16>, vector<24x8xbf16>, vector<16x8xf32> -> vector<16x8xf32>
    %368 = vector.broadcast %133 : vector<1x8xf32> to vector<16x8xf32>
    %369 = arith.addf %367, %368 : vector<16x8xf32>
    %370 = vector.extract_strided_slice %269 {offsets = [0, 104], sizes = [16, 8], strides = [1, 1]} : vector<16x128xbf16> to vector<16x8xbf16>
    %371 = vector.extract_strided_slice %269 {offsets = [0, 112], sizes = [16, 8], strides = [1, 1]} : vector<16x128xbf16> to vector<16x8xbf16>
    %372 = vector.extract_strided_slice %269 {offsets = [0, 120], sizes = [16, 8], strides = [1, 1]} : vector<16x128xbf16> to vector<16x8xbf16>
    %373 = tpu.concatenate %370, %371, %372 in 1 : vector<16x8xbf16>, vector<16x8xbf16>, vector<16x8xbf16> -> vector<16x24xbf16>
    %cst_113 = arith.constant dense<0.000000e+00> : vector<16x8xf32>
    %374 = tpu.matmul %373, %131, %cst_113 {dimension_numbers = #tpu.dot_dimension_numbers<[1], [0], [0], [1], [0, 0, 1, 1], [], []>} : vector<16x24xbf16>, vector<24x8xbf16>, vector<16x8xf32> -> vector<16x8xf32>
    %375 = vector.broadcast %133 : vector<1x8xf32> to vector<16x8xf32>
    %376 = arith.addf %374, %375 : vector<16x8xf32>
    %377 = vector.extract_strided_slice %269 {offsets = [0, 112], sizes = [16, 8], strides = [1, 1]} : vector<16x128xbf16> to vector<16x8xbf16>
    %378 = vector.extract_strided_slice %269 {offsets = [0, 120], sizes = [16, 8], strides = [1, 1]} : vector<16x128xbf16> to vector<16x8xbf16>
    %379 = vector.extract_strided_slice %271 {offsets = [0, 0], sizes = [16, 8], strides = [1, 1]} : vector<16x128xbf16> to vector<16x8xbf16>
    %380 = tpu.concatenate %377, %378, %379 in 1 : vector<16x8xbf16>, vector<16x8xbf16>, vector<16x8xbf16> -> vector<16x24xbf16>
    %cst_114 = arith.constant dense<0.000000e+00> : vector<16x8xf32>
    %381 = tpu.matmul %380, %131, %cst_114 {dimension_numbers = #tpu.dot_dimension_numbers<[1], [0], [0], [1], [0, 0, 1, 1], [], []>} : vector<16x24xbf16>, vector<24x8xbf16>, vector<16x8xf32> -> vector<16x8xf32>
    %382 = vector.broadcast %133 : vector<1x8xf32> to vector<16x8xf32>
    %383 = arith.addf %381, %382 : vector<16x8xf32>
    %384 = tpu.concatenate %278, %285, %292, %299, %306, %313, %320, %327, %334, %341, %348, %355, %362, %369, %376, %383 in 1 : vector<16x8xf32>, vector<16x8xf32>, vector<16x8xf32>, vector<16x8xf32>, vector<16x8xf32>, vector<16x8xf32>, vector<16x8xf32>, vector<16x8xf32>, vector<16x8xf32>, vector<16x8xf32>, vector<16x8xf32>, vector<16x8xf32>, vector<16x8xf32>, vector<16x8xf32>, vector<16x8xf32>, vector<16x8xf32> -> vector<16x128xf32>
    %c0_115 = arith.constant 0 : index
    %c0_116 = arith.constant 0 : index
    %385 = vector.load %arg14[%c0_115, %c0_116] : memref<16x128xf32, #tpu.memory_space<vmem>>, vector<16x128xf32>
    %386 = arith.addf %385, %384 : vector<16x128xf32>
    %c0_117 = arith.constant 0 : index
    %c0_118 = arith.constant 0 : index
    %387 = vector.load %arg14[%c0_117, %c0_118] : memref<16x128xf32, #tpu.memory_space<vmem>>, vector<16x128xf32>
    tpu.vector_store %arg14[%c0_117, %c0_118], %386 {strides = array<i32>} : memref<16x128xf32, #tpu.memory_space<vmem>>, vector<16x128xf32>,
    %c1_119 = arith.constant 1 : index
    %c0_120 = arith.constant 0 : index
    %c0_121 = arith.constant 0 : index
    %388 = vector.load %arg4[%c1_119, %c0_120, %c0_121] : memref<2x24x8xbf16, #tpu.memory_space<vmem>>, vector<1x24x8xbf16>
    %389 = vector.shape_cast %388 : vector<1x24x8xbf16> to vector<24x8xbf16>
    %c1_122 = arith.constant 1 : index
    %c0_123 = arith.constant 0 : index
    %c0_124 = arith.constant 0 : index
    %390 = vector.load %arg5[%c1_122, %c0_123, %c0_124] : memref<2x1x8xf32, #tpu.memory_space<vmem>>, vector<1x1x8xf32>
    %391 = vector.shape_cast %390 : vector<1x1x8xf32> to vector<1x8xf32>
    %c1_125 = arith.constant 1 : index
    %c0_126 = arith.constant 0 : index
    %c0_127 = arith.constant 0 : index
    %392 = vector.load %arg6[%c1_125, %c0_126, %c0_127] : memref<2x24x8xbf16, #tpu.memory_space<vmem>>, vector<1x24x8xbf16>
    %393 = vector.shape_cast %392 : vector<1x24x8xbf16> to vector<24x8xbf16>
    %c1_128 = arith.constant 1 : index
    %c0_129 = arith.constant 0 : index
    %c0_130 = arith.constant 0 : index
    %394 = vector.load %arg7[%c1_128, %c0_129, %c0_130] : memref<2x1x8xf32, #tpu.memory_space<vmem>>, vector<1x1x8xf32>
    %395 = vector.shape_cast %394 : vector<1x1x8xf32> to vector<1x8xf32>
    %c0_131 = arith.constant 0 : index
    %c0_132 = arith.constant 0 : index
    %396 = vector.load %arg14[%c0_131, %c0_132] : memref<16x128xf32, #tpu.memory_space<vmem>>, vector<16x128xf32>
    %cst_133 = arith.constant 0.000000e+00 : f32
    %397 = vector.broadcast %cst_133 : f32 to vector<16x128xf32>
    %398 = arith.cmpf oge, %396, %397 : vector<16x128xf32>
    %cst_134 = arith.constant 1.000000e-01 : f32
    %399 = vector.broadcast %cst_134 : f32 to vector<16x128xf32>
    %400 = arith.mulf %399, %396 : vector<16x128xf32>
    %401 = arith.select %398, %396, %400 : vector<16x128xi1>, vector<16x128xf32>
    %c1_135 = arith.constant 1 : index
    %c0_136 = arith.constant 0 : index
    %402 = vector.load %arg12[%c1_135, %c0_136] : memref<18x128xf32, #tpu.memory_space<vmem>>, vector<16x128xf32>
    tpu.vector_store %arg12[%c1_135, %c0_136], %401 {strides = array<i32>} : memref<18x128xf32, #tpu.memory_space<vmem>>, vector<16x128xf32>,
    %c0_137 = arith.constant 0 : index
    %c0_138 = arith.constant 0 : index
    %403 = vector.load %arg12[%c0_137, %c0_138] : memref<18x128xf32, #tpu.memory_space<vmem>>, vector<16x128xf32>
    %404 = arith.truncf %403 : vector<16x128xf32> to vector<16x128xbf16>
    %c1_139 = arith.constant 1 : index
    %c0_140 = arith.constant 0 : index
    %405 = vector.load %arg12[%c1_139, %c0_140] : memref<18x128xf32, #tpu.memory_space<vmem>>, vector<16x128xf32>
    %406 = arith.truncf %405 : vector<16x128xf32> to vector<16x128xbf16>
    %c2_141 = arith.constant 2 : index
    %c0_142 = arith.constant 0 : index
    %407 = vector.load %arg12[%c2_141, %c0_142] : memref<18x128xf32, #tpu.memory_space<vmem>>, vector<16x128xf32>
    %408 = arith.truncf %407 : vector<16x128xf32> to vector<16x128xbf16>
    %409 = vector.extract_strided_slice %404 {offsets = [0, 104], sizes = [16, 8], strides = [1, 1]} : vector<16x128xbf16> to vector<16x8xbf16>
    %410 = vector.extract_strided_slice %406 {offsets = [0, 0], sizes = [16, 8], strides = [1, 1]} : vector<16x128xbf16> to vector<16x8xbf16>
    %411 = vector.extract_strided_slice %406 {offsets = [0, 24], sizes = [16, 8], strides = [1, 1]} : vector<16x128xbf16> to vector<16x8xbf16>
    %412 = tpu.concatenate %409, %410, %411 in 1 : vector<16x8xbf16>, vector<16x8xbf16>, vector<16x8xbf16> -> vector<16x24xbf16>
    %cst_143 = arith.constant dense<0.000000e+00> : vector<16x8xf32>
    %413 = tpu.matmul %412, %389, %cst_143 {dimension_numbers = #tpu.dot_dimension_numbers<[1], [0], [0], [1], [0, 0, 1, 1], [], []>} : vector<16x24xbf16>, vector<24x8xbf16>, vector<16x8xf32> -> vector<16x8xf32>
    %414 = vector.broadcast %391 : vector<1x8xf32> to vector<16x8xf32>
    %415 = arith.addf %413, %414 : vector<16x8xf32>
    %416 = vector.extract_strided_slice %404 {offsets = [0, 112], sizes = [16, 8], strides = [1, 1]} : vector<16x128xbf16> to vector<16x8xbf16>
    %417 = vector.extract_strided_slice %406 {offsets = [0, 8], sizes = [16, 8], strides = [1, 1]} : vector<16x128xbf16> to vector<16x8xbf16>
    %418 = vector.extract_strided_slice %406 {offsets = [0, 32], sizes = [16, 8], strides = [1, 1]} : vector<16x128xbf16> to vector<16x8xbf16>
    %419 = tpu.concatenate %416, %417, %418 in 1 : vector<16x8xbf16>, vector<16x8xbf16>, vector<16x8xbf16> -> vector<16x24xbf16>
    %cst_144 = arith.constant dense<0.000000e+00> : vector<16x8xf32>
    %420 = tpu.matmul %419, %389, %cst_144 {dimension_numbers = #tpu.dot_dimension_numbers<[1], [0], [0], [1], [0, 0, 1, 1], [], []>} : vector<16x24xbf16>, vector<24x8xbf16>, vector<16x8xf32> -> vector<16x8xf32>
    %421 = vector.broadcast %391 : vector<1x8xf32> to vector<16x8xf32>
    %422 = arith.addf %420, %421 : vector<16x8xf32>
    %423 = vector.extract_strided_slice %404 {offsets = [0, 120], sizes = [16, 8], strides = [1, 1]} : vector<16x128xbf16> to vector<16x8xbf16>
    %424 = vector.extract_strided_slice %406 {offsets = [0, 16], sizes = [16, 8], strides = [1, 1]} : vector<16x128xbf16> to vector<16x8xbf16>
    %425 = vector.extract_strided_slice %406 {offsets = [0, 40], sizes = [16, 8], strides = [1, 1]} : vector<16x128xbf16> to vector<16x8xbf16>
    %426 = tpu.concatenate %423, %424, %425 in 1 : vector<16x8xbf16>, vector<16x8xbf16>, vector<16x8xbf16> -> vector<16x24xbf16>
    %cst_145 = arith.constant dense<0.000000e+00> : vector<16x8xf32>
    %427 = tpu.matmul %426, %389, %cst_145 {dimension_numbers = #tpu.dot_dimension_numbers<[1], [0], [0], [1], [0, 0, 1, 1], [], []>} : vector<16x24xbf16>, vector<24x8xbf16>, vector<16x8xf32> -> vector<16x8xf32>
    %428 = vector.broadcast %391 : vector<1x8xf32> to vector<16x8xf32>
    %429 = arith.addf %427, %428 : vector<16x8xf32>
    %430 = vector.extract_strided_slice %406 {offsets = [0, 0], sizes = [16, 8], strides = [1, 1]} : vector<16x128xbf16> to vector<16x8xbf16>
    %431 = vector.extract_strided_slice %406 {offsets = [0, 24], sizes = [16, 8], strides = [1, 1]} : vector<16x128xbf16> to vector<16x8xbf16>
    %432 = vector.extract_strided_slice %406 {offsets = [0, 48], sizes = [16, 8], strides = [1, 1]} : vector<16x128xbf16> to vector<16x8xbf16>
    %433 = tpu.concatenate %430, %431, %432 in 1 : vector<16x8xbf16>, vector<16x8xbf16>, vector<16x8xbf16> -> vector<16x24xbf16>
    %cst_146 = arith.constant dense<0.000000e+00> : vector<16x8xf32>
    %434 = tpu.matmul %433, %389, %cst_146 {dimension_numbers = #tpu.dot_dimension_numbers<[1], [0], [0], [1], [0, 0, 1, 1], [], []>} : vector<16x24xbf16>, vector<24x8xbf16>, vector<16x8xf32> -> vector<16x8xf32>
    %435 = vector.broadcast %391 : vector<1x8xf32> to vector<16x8xf32>
    %436 = arith.addf %434, %435 : vector<16x8xf32>
    %437 = vector.extract_strided_slice %406 {offsets = [0, 8], sizes = [16, 8], strides = [1, 1]} : vector<16x128xbf16> to vector<16x8xbf16>
    %438 = vector.extract_strided_slice %406 {offsets = [0, 32], sizes = [16, 8], strides = [1, 1]} : vector<16x128xbf16> to vector<16x8xbf16>
    %439 = vector.extract_strided_slice %406 {offsets = [0, 56], sizes = [16, 8], strides = [1, 1]} : vector<16x128xbf16> to vector<16x8xbf16>
    %440 = tpu.concatenate %437, %438, %439 in 1 : vector<16x8xbf16>, vector<16x8xbf16>, vector<16x8xbf16> -> vector<16x24xbf16>
    %cst_147 = arith.constant dense<0.000000e+00> : vector<16x8xf32>
    %441 = tpu.matmul %440, %389, %cst_147 {dimension_numbers = #tpu.dot_dimension_numbers<[1], [0], [0], [1], [0, 0, 1, 1], [], []>} : vector<16x24xbf16>, vector<24x8xbf16>, vector<16x8xf32> -> vector<16x8xf32>
    %442 = vector.broadcast %391 : vector<1x8xf32> to vector<16x8xf32>
    %443 = arith.addf %441, %442 : vector<16x8xf32>
    %444 = vector.extract_strided_slice %406 {offsets = [0, 16], sizes = [16, 8], strides = [1, 1]} : vector<16x128xbf16> to vector<16x8xbf16>
    %445 = vector.extract_strided_slice %406 {offsets = [0, 40], sizes = [16, 8], strides = [1, 1]} : vector<16x128xbf16> to vector<16x8xbf16>
    %446 = vector.extract_strided_slice %406 {offsets = [0, 64], sizes = [16, 8], strides = [1, 1]} : vector<16x128xbf16> to vector<16x8xbf16>
    %447 = tpu.concatenate %444, %445, %446 in 1 : vector<16x8xbf16>, vector<16x8xbf16>, vector<16x8xbf16> -> vector<16x24xbf16>
    %cst_148 = arith.constant dense<0.000000e+00> : vector<16x8xf32>
    %448 = tpu.matmul %447, %389, %cst_148 {dimension_numbers = #tpu.dot_dimension_numbers<[1], [0], [0], [1], [0, 0, 1, 1], [], []>} : vector<16x24xbf16>, vector<24x8xbf16>, vector<16x8xf32> -> vector<16x8xf32>
    %449 = vector.broadcast %391 : vector<1x8xf32> to vector<16x8xf32>
    %450 = arith.addf %448, %449 : vector<16x8xf32>
    %451 = vector.extract_strided_slice %406 {offsets = [0, 24], sizes = [16, 8], strides = [1, 1]} : vector<16x128xbf16> to vector<16x8xbf16>
    %452 = vector.extract_strided_slice %406 {offsets = [0, 48], sizes = [16, 8], strides = [1, 1]} : vector<16x128xbf16> to vector<16x8xbf16>
    %453 = vector.extract_strided_slice %406 {offsets = [0, 72], sizes = [16, 8], strides = [1, 1]} : vector<16x128xbf16> to vector<16x8xbf16>
    %454 = tpu.concatenate %451, %452, %453 in 1 : vector<16x8xbf16>, vector<16x8xbf16>, vector<16x8xbf16> -> vector<16x24xbf16>
    %cst_149 = arith.constant dense<0.000000e+00> : vector<16x8xf32>
    %455 = tpu.matmul %454, %389, %cst_149 {dimension_numbers = #tpu.dot_dimension_numbers<[1], [0], [0], [1], [0, 0, 1, 1], [], []>} : vector<16x24xbf16>, vector<24x8xbf16>, vector<16x8xf32> -> vector<16x8xf32>
    %456 = vector.broadcast %391 : vector<1x8xf32> to vector<16x8xf32>
    %457 = arith.addf %455, %456 : vector<16x8xf32>
    %458 = vector.extract_strided_slice %406 {offsets = [0, 32], sizes = [16, 8], strides = [1, 1]} : vector<16x128xbf16> to vector<16x8xbf16>
    %459 = vector.extract_strided_slice %406 {offsets = [0, 56], sizes = [16, 8], strides = [1, 1]} : vector<16x128xbf16> to vector<16x8xbf16>
    %460 = vector.extract_strided_slice %406 {offsets = [0, 80], sizes = [16, 8], strides = [1, 1]} : vector<16x128xbf16> to vector<16x8xbf16>
    %461 = tpu.concatenate %458, %459, %460 in 1 : vector<16x8xbf16>, vector<16x8xbf16>, vector<16x8xbf16> -> vector<16x24xbf16>
    %cst_150 = arith.constant dense<0.000000e+00> : vector<16x8xf32>
    %462 = tpu.matmul %461, %389, %cst_150 {dimension_numbers = #tpu.dot_dimension_numbers<[1], [0], [0], [1], [0, 0, 1, 1], [], []>} : vector<16x24xbf16>, vector<24x8xbf16>, vector<16x8xf32> -> vector<16x8xf32>
    %463 = vector.broadcast %391 : vector<1x8xf32> to vector<16x8xf32>
    %464 = arith.addf %462, %463 : vector<16x8xf32>
    %465 = vector.extract_strided_slice %406 {offsets = [0, 40], sizes = [16, 8], strides = [1, 1]} : vector<16x128xbf16> to vector<16x8xbf16>
    %466 = vector.extract_strided_slice %406 {offsets = [0, 64], sizes = [16, 8], strides = [1, 1]} : vector<16x128xbf16> to vector<16x8xbf16>
    %467 = vector.extract_strided_slice %406 {offsets = [0, 88], sizes = [16, 8], strides = [1, 1]} : vector<16x128xbf16> to vector<16x8xbf16>
    %468 = tpu.concatenate %465, %466, %467 in 1 : vector<16x8xbf16>, vector<16x8xbf16>, vector<16x8xbf16> -> vector<16x24xbf16>
    %cst_151 = arith.constant dense<0.000000e+00> : vector<16x8xf32>
    %469 = tpu.matmul %468, %389, %cst_151 {dimension_numbers = #tpu.dot_dimension_numbers<[1], [0], [0], [1], [0, 0, 1, 1], [], []>} : vector<16x24xbf16>, vector<24x8xbf16>, vector<16x8xf32> -> vector<16x8xf32>
    %470 = vector.broadcast %391 : vector<1x8xf32> to vector<16x8xf32>
    %471 = arith.addf %469, %470 : vector<16x8xf32>
    %472 = vector.extract_strided_slice %406 {offsets = [0, 48], sizes = [16, 8], strides = [1, 1]} : vector<16x128xbf16> to vector<16x8xbf16>
    %473 = vector.extract_strided_slice %406 {offsets = [0, 72], sizes = [16, 8], strides = [1, 1]} : vector<16x128xbf16> to vector<16x8xbf16>
    %474 = vector.extract_strided_slice %406 {offsets = [0, 96], sizes = [16, 8], strides = [1, 1]} : vector<16x128xbf16> to vector<16x8xbf16>
    %475 = tpu.concatenate %472, %473, %474 in 1 : vector<16x8xbf16>, vector<16x8xbf16>, vector<16x8xbf16> -> vector<16x24xbf16>
    %cst_152 = arith.constant dense<0.000000e+00> : vector<16x8xf32>
    %476 = tpu.matmul %475, %389, %cst_152 {dimension_numbers = #tpu.dot_dimension_numbers<[1], [0], [0], [1], [0, 0, 1, 1], [], []>} : vector<16x24xbf16>, vector<24x8xbf16>, vector<16x8xf32> -> vector<16x8xf32>
    %477 = vector.broadcast %391 : vector<1x8xf32> to vector<16x8xf32>
    %478 = arith.addf %476, %477 : vector<16x8xf32>
    %479 = vector.extract_strided_slice %406 {offsets = [0, 56], sizes = [16, 8], strides = [1, 1]} : vector<16x128xbf16> to vector<16x8xbf16>
    %480 = vector.extract_strided_slice %406 {offsets = [0, 80], sizes = [16, 8], strides = [1, 1]} : vector<16x128xbf16> to vector<16x8xbf16>
    %481 = vector.extract_strided_slice %406 {offsets = [0, 104], sizes = [16, 8], strides = [1, 1]} : vector<16x128xbf16> to vector<16x8xbf16>
    %482 = tpu.concatenate %479, %480, %481 in 1 : vector<16x8xbf16>, vector<16x8xbf16>, vector<16x8xbf16> -> vector<16x24xbf16>
    %cst_153 = arith.constant dense<0.000000e+00> : vector<16x8xf32>
    %483 = tpu.matmul %482, %389, %cst_153 {dimension_numbers = #tpu.dot_dimension_numbers<[1], [0], [0], [1], [0, 0, 1, 1], [], []>} : vector<16x24xbf16>, vector<24x8xbf16>, vector<16x8xf32> -> vector<16x8xf32>
    %484 = vector.broadcast %391 : vector<1x8xf32> to vector<16x8xf32>
    %485 = arith.addf %483, %484 : vector<16x8xf32>
    %486 = vector.extract_strided_slice %406 {offsets = [0, 64], sizes = [16, 8], strides = [1, 1]} : vector<16x128xbf16> to vector<16x8xbf16>
    %487 = vector.extract_strided_slice %406 {offsets = [0, 88], sizes = [16, 8], strides = [1, 1]} : vector<16x128xbf16> to vector<16x8xbf16>
    %488 = vector.extract_strided_slice %406 {offsets = [0, 112], sizes = [16, 8], strides = [1, 1]} : vector<16x128xbf16> to vector<16x8xbf16>
    %489 = tpu.concatenate %486, %487, %488 in 1 : vector<16x8xbf16>, vector<16x8xbf16>, vector<16x8xbf16> -> vector<16x24xbf16>
    %cst_154 = arith.constant dense<0.000000e+00> : vector<16x8xf32>
    %490 = tpu.matmul %489, %389, %cst_154 {dimension_numbers = #tpu.dot_dimension_numbers<[1], [0], [0], [1], [0, 0, 1, 1], [], []>} : vector<16x24xbf16>, vector<24x8xbf16>, vector<16x8xf32> -> vector<16x8xf32>
    %491 = vector.broadcast %391 : vector<1x8xf32> to vector<16x8xf32>
    %492 = arith.addf %490, %491 : vector<16x8xf32>
    %493 = vector.extract_strided_slice %406 {offsets = [0, 72], sizes = [16, 8], strides = [1, 1]} : vector<16x128xbf16> to vector<16x8xbf16>
    %494 = vector.extract_strided_slice %406 {offsets = [0, 96], sizes = [16, 8], strides = [1, 1]} : vector<16x128xbf16> to vector<16x8xbf16>
    %495 = vector.extract_strided_slice %406 {offsets = [0, 120], sizes = [16, 8], strides = [1, 1]} : vector<16x128xbf16> to vector<16x8xbf16>
    %496 = tpu.concatenate %493, %494, %495 in 1 : vector<16x8xbf16>, vector<16x8xbf16>, vector<16x8xbf16> -> vector<16x24xbf16>
    %cst_155 = arith.constant dense<0.000000e+00> : vector<16x8xf32>
    %497 = tpu.matmul %496, %389, %cst_155 {dimension_numbers = #tpu.dot_dimension_numbers<[1], [0], [0], [1], [0, 0, 1, 1], [], []>} : vector<16x24xbf16>, vector<24x8xbf16>, vector<16x8xf32> -> vector<16x8xf32>
    %498 = vector.broadcast %391 : vector<1x8xf32> to vector<16x8xf32>
    %499 = arith.addf %497, %498 : vector<16x8xf32>
    %500 = vector.extract_strided_slice %406 {offsets = [0, 80], sizes = [16, 8], strides = [1, 1]} : vector<16x128xbf16> to vector<16x8xbf16>
    %501 = vector.extract_strided_slice %406 {offsets = [0, 104], sizes = [16, 8], strides = [1, 1]} : vector<16x128xbf16> to vector<16x8xbf16>
    %502 = vector.extract_strided_slice %408 {offsets = [0, 0], sizes = [16, 8], strides = [1, 1]} : vector<16x128xbf16> to vector<16x8xbf16>
    %503 = tpu.concatenate %500, %501, %502 in 1 : vector<16x8xbf16>, vector<16x8xbf16>, vector<16x8xbf16> -> vector<16x24xbf16>
    %cst_156 = arith.constant dense<0.000000e+00> : vector<16x8xf32>
    %504 = tpu.matmul %503, %389, %cst_156 {dimension_numbers = #tpu.dot_dimension_numbers<[1], [0], [0], [1], [0, 0, 1, 1], [], []>} : vector<16x24xbf16>, vector<24x8xbf16>, vector<16x8xf32> -> vector<16x8xf32>
    %505 = vector.broadcast %391 : vector<1x8xf32> to vector<16x8xf32>
    %506 = arith.addf %504, %505 : vector<16x8xf32>
    %507 = vector.extract_strided_slice %406 {offsets = [0, 88], sizes = [16, 8], strides = [1, 1]} : vector<16x128xbf16> to vector<16x8xbf16>
    %508 = vector.extract_strided_slice %406 {offsets = [0, 112], sizes = [16, 8], strides = [1, 1]} : vector<16x128xbf16> to vector<16x8xbf16>
    %509 = vector.extract_strided_slice %408 {offsets = [0, 8], sizes = [16, 8], strides = [1, 1]} : vector<16x128xbf16> to vector<16x8xbf16>
    %510 = tpu.concatenate %507, %508, %509 in 1 : vector<16x8xbf16>, vector<16x8xbf16>, vector<16x8xbf16> -> vector<16x24xbf16>
    %cst_157 = arith.constant dense<0.000000e+00> : vector<16x8xf32>
    %511 = tpu.matmul %510, %389, %cst_157 {dimension_numbers = #tpu.dot_dimension_numbers<[1], [0], [0], [1], [0, 0, 1, 1], [], []>} : vector<16x24xbf16>, vector<24x8xbf16>, vector<16x8xf32> -> vector<16x8xf32>
    %512 = vector.broadcast %391 : vector<1x8xf32> to vector<16x8xf32>
    %513 = arith.addf %511, %512 : vector<16x8xf32>
    %514 = vector.extract_strided_slice %406 {offsets = [0, 96], sizes = [16, 8], strides = [1, 1]} : vector<16x128xbf16> to vector<16x8xbf16>
    %515 = vector.extract_strided_slice %406 {offsets = [0, 120], sizes = [16, 8], strides = [1, 1]} : vector<16x128xbf16> to vector<16x8xbf16>
    %516 = vector.extract_strided_slice %408 {offsets = [0, 16], sizes = [16, 8], strides = [1, 1]} : vector<16x128xbf16> to vector<16x8xbf16>
    %517 = tpu.concatenate %514, %515, %516 in 1 : vector<16x8xbf16>, vector<16x8xbf16>, vector<16x8xbf16> -> vector<16x24xbf16>
    %cst_158 = arith.constant dense<0.000000e+00> : vector<16x8xf32>
    %518 = tpu.matmul %517, %389, %cst_158 {dimension_numbers = #tpu.dot_dimension_numbers<[1], [0], [0], [1], [0, 0, 1, 1], [], []>} : vector<16x24xbf16>, vector<24x8xbf16>, vector<16x8xf32> -> vector<16x8xf32>
    %519 = vector.broadcast %391 : vector<1x8xf32> to vector<16x8xf32>
    %520 = arith.addf %518, %519 : vector<16x8xf32>
    %521 = tpu.concatenate %415, %422, %429, %436, %443, %450, %457, %464, %471, %478, %485, %492, %499, %506, %513, %520 in 1 : vector<16x8xf32>, vector<16x8xf32>, vector<16x8xf32>, vector<16x8xf32>, vector<16x8xf32>, vector<16x8xf32>, vector<16x8xf32>, vector<16x8xf32>, vector<16x8xf32>, vector<16x8xf32>, vector<16x8xf32>, vector<16x8xf32>, vector<16x8xf32>, vector<16x8xf32>, vector<16x8xf32>, vector<16x8xf32> -> vector<16x128xf32>
    %cst_159 = arith.constant 0.000000e+00 : f32
    %522 = vector.broadcast %cst_159 : f32 to vector<16x128xf32>
    %523 = arith.cmpf oge, %521, %522 : vector<16x128xf32>
    %cst_160 = arith.constant 1.000000e-01 : f32
    %524 = vector.broadcast %cst_160 : f32 to vector<16x128xf32>
    %525 = arith.mulf %524, %521 : vector<16x128xf32>
    %526 = arith.select %523, %521, %525 : vector<16x128xi1>, vector<16x128xf32>
    %c1_161 = arith.constant 1 : index
    %c0_162 = arith.constant 0 : index
    %527 = vector.load %arg12[%c1_161, %c0_162] : memref<18x128xf32, #tpu.memory_space<vmem>>, vector<16x128xf32>
    tpu.vector_store %arg12[%c1_161, %c0_162], %526 {strides = array<i32>} : memref<18x128xf32, #tpu.memory_space<vmem>>, vector<16x128xf32>,
    %c0_163 = arith.constant 0 : index
    %c0_164 = arith.constant 0 : index
    %528 = vector.load %arg12[%c0_163, %c0_164] : memref<18x128xf32, #tpu.memory_space<vmem>>, vector<16x128xf32>
    %529 = arith.truncf %528 : vector<16x128xf32> to vector<16x128xbf16>
    %c1_165 = arith.constant 1 : index
    %c0_166 = arith.constant 0 : index
    %530 = vector.load %arg12[%c1_165, %c0_166] : memref<18x128xf32, #tpu.memory_space<vmem>>, vector<16x128xf32>
    %531 = arith.truncf %530 : vector<16x128xf32> to vector<16x128xbf16>
    %c2_167 = arith.constant 2 : index
    %c0_168 = arith.constant 0 : index
    %532 = vector.load %arg12[%c2_167, %c0_168] : memref<18x128xf32, #tpu.memory_space<vmem>>, vector<16x128xf32>
    %533 = arith.truncf %532 : vector<16x128xf32> to vector<16x128xbf16>
    %534 = vector.extract_strided_slice %529 {offsets = [0, 120], sizes = [16, 8], strides = [1, 1]} : vector<16x128xbf16> to vector<16x8xbf16>
    %535 = vector.extract_strided_slice %531 {offsets = [0, 0], sizes = [16, 8], strides = [1, 1]} : vector<16x128xbf16> to vector<16x8xbf16>
    %536 = vector.extract_strided_slice %531 {offsets = [0, 8], sizes = [16, 8], strides = [1, 1]} : vector<16x128xbf16> to vector<16x8xbf16>
    %537 = tpu.concatenate %534, %535, %536 in 1 : vector<16x8xbf16>, vector<16x8xbf16>, vector<16x8xbf16> -> vector<16x24xbf16>
    %cst_169 = arith.constant dense<0.000000e+00> : vector<16x8xf32>
    %538 = tpu.matmul %537, %393, %cst_169 {dimension_numbers = #tpu.dot_dimension_numbers<[1], [0], [0], [1], [0, 0, 1, 1], [], []>} : vector<16x24xbf16>, vector<24x8xbf16>, vector<16x8xf32> -> vector<16x8xf32>
    %539 = vector.broadcast %395 : vector<1x8xf32> to vector<16x8xf32>
    %540 = arith.addf %538, %539 : vector<16x8xf32>
    %541 = vector.extract_strided_slice %531 {offsets = [0, 0], sizes = [16, 8], strides = [1, 1]} : vector<16x128xbf16> to vector<16x8xbf16>
    %542 = vector.extract_strided_slice %531 {offsets = [0, 8], sizes = [16, 8], strides = [1, 1]} : vector<16x128xbf16> to vector<16x8xbf16>
    %543 = vector.extract_strided_slice %531 {offsets = [0, 16], sizes = [16, 8], strides = [1, 1]} : vector<16x128xbf16> to vector<16x8xbf16>
    %544 = tpu.concatenate %541, %542, %543 in 1 : vector<16x8xbf16>, vector<16x8xbf16>, vector<16x8xbf16> -> vector<16x24xbf16>
    %cst_170 = arith.constant dense<0.000000e+00> : vector<16x8xf32>
    %545 = tpu.matmul %544, %393, %cst_170 {dimension_numbers = #tpu.dot_dimension_numbers<[1], [0], [0], [1], [0, 0, 1, 1], [], []>} : vector<16x24xbf16>, vector<24x8xbf16>, vector<16x8xf32> -> vector<16x8xf32>
    %546 = vector.broadcast %395 : vector<1x8xf32> to vector<16x8xf32>
    %547 = arith.addf %545, %546 : vector<16x8xf32>
    %548 = vector.extract_strided_slice %531 {offsets = [0, 8], sizes = [16, 8], strides = [1, 1]} : vector<16x128xbf16> to vector<16x8xbf16>
    %549 = vector.extract_strided_slice %531 {offsets = [0, 16], sizes = [16, 8], strides = [1, 1]} : vector<16x128xbf16> to vector<16x8xbf16>
    %550 = vector.extract_strided_slice %531 {offsets = [0, 24], sizes = [16, 8], strides = [1, 1]} : vector<16x128xbf16> to vector<16x8xbf16>
    %551 = tpu.concatenate %548, %549, %550 in 1 : vector<16x8xbf16>, vector<16x8xbf16>, vector<16x8xbf16> -> vector<16x24xbf16>
    %cst_171 = arith.constant dense<0.000000e+00> : vector<16x8xf32>
    %552 = tpu.matmul %551, %393, %cst_171 {dimension_numbers = #tpu.dot_dimension_numbers<[1], [0], [0], [1], [0, 0, 1, 1], [], []>} : vector<16x24xbf16>, vector<24x8xbf16>, vector<16x8xf32> -> vector<16x8xf32>
    %553 = vector.broadcast %395 : vector<1x8xf32> to vector<16x8xf32>
    %554 = arith.addf %552, %553 : vector<16x8xf32>
    %555 = vector.extract_strided_slice %531 {offsets = [0, 16], sizes = [16, 8], strides = [1, 1]} : vector<16x128xbf16> to vector<16x8xbf16>
    %556 = vector.extract_strided_slice %531 {offsets = [0, 24], sizes = [16, 8], strides = [1, 1]} : vector<16x128xbf16> to vector<16x8xbf16>
    %557 = vector.extract_strided_slice %531 {offsets = [0, 32], sizes = [16, 8], strides = [1, 1]} : vector<16x128xbf16> to vector<16x8xbf16>
    %558 = tpu.concatenate %555, %556, %557 in 1 : vector<16x8xbf16>, vector<16x8xbf16>, vector<16x8xbf16> -> vector<16x24xbf16>
    %cst_172 = arith.constant dense<0.000000e+00> : vector<16x8xf32>
    %559 = tpu.matmul %558, %393, %cst_172 {dimension_numbers = #tpu.dot_dimension_numbers<[1], [0], [0], [1], [0, 0, 1, 1], [], []>} : vector<16x24xbf16>, vector<24x8xbf16>, vector<16x8xf32> -> vector<16x8xf32>
    %560 = vector.broadcast %395 : vector<1x8xf32> to vector<16x8xf32>
    %561 = arith.addf %559, %560 : vector<16x8xf32>
    %562 = vector.extract_strided_slice %531 {offsets = [0, 24], sizes = [16, 8], strides = [1, 1]} : vector<16x128xbf16> to vector<16x8xbf16>
    %563 = vector.extract_strided_slice %531 {offsets = [0, 32], sizes = [16, 8], strides = [1, 1]} : vector<16x128xbf16> to vector<16x8xbf16>
    %564 = vector.extract_strided_slice %531 {offsets = [0, 40], sizes = [16, 8], strides = [1, 1]} : vector<16x128xbf16> to vector<16x8xbf16>
    %565 = tpu.concatenate %562, %563, %564 in 1 : vector<16x8xbf16>, vector<16x8xbf16>, vector<16x8xbf16> -> vector<16x24xbf16>
    %cst_173 = arith.constant dense<0.000000e+00> : vector<16x8xf32>
    %566 = tpu.matmul %565, %393, %cst_173 {dimension_numbers = #tpu.dot_dimension_numbers<[1], [0], [0], [1], [0, 0, 1, 1], [], []>} : vector<16x24xbf16>, vector<24x8xbf16>, vector<16x8xf32> -> vector<16x8xf32>
    %567 = vector.broadcast %395 : vector<1x8xf32> to vector<16x8xf32>
    %568 = arith.addf %566, %567 : vector<16x8xf32>
    %569 = vector.extract_strided_slice %531 {offsets = [0, 32], sizes = [16, 8], strides = [1, 1]} : vector<16x128xbf16> to vector<16x8xbf16>
    %570 = vector.extract_strided_slice %531 {offsets = [0, 40], sizes = [16, 8], strides = [1, 1]} : vector<16x128xbf16> to vector<16x8xbf16>
    %571 = vector.extract_strided_slice %531 {offsets = [0, 48], sizes = [16, 8], strides = [1, 1]} : vector<16x128xbf16> to vector<16x8xbf16>
    %572 = tpu.concatenate %569, %570, %571 in 1 : vector<16x8xbf16>, vector<16x8xbf16>, vector<16x8xbf16> -> vector<16x24xbf16>
    %cst_174 = arith.constant dense<0.000000e+00> : vector<16x8xf32>
    %573 = tpu.matmul %572, %393, %cst_174 {dimension_numbers = #tpu.dot_dimension_numbers<[1], [0], [0], [1], [0, 0, 1, 1], [], []>} : vector<16x24xbf16>, vector<24x8xbf16>, vector<16x8xf32> -> vector<16x8xf32>
    %574 = vector.broadcast %395 : vector<1x8xf32> to vector<16x8xf32>
    %575 = arith.addf %573, %574 : vector<16x8xf32>
    %576 = vector.extract_strided_slice %531 {offsets = [0, 40], sizes = [16, 8], strides = [1, 1]} : vector<16x128xbf16> to vector<16x8xbf16>
    %577 = vector.extract_strided_slice %531 {offsets = [0, 48], sizes = [16, 8], strides = [1, 1]} : vector<16x128xbf16> to vector<16x8xbf16>
    %578 = vector.extract_strided_slice %531 {offsets = [0, 56], sizes = [16, 8], strides = [1, 1]} : vector<16x128xbf16> to vector<16x8xbf16>
    %579 = tpu.concatenate %576, %577, %578 in 1 : vector<16x8xbf16>, vector<16x8xbf16>, vector<16x8xbf16> -> vector<16x24xbf16>
    %cst_175 = arith.constant dense<0.000000e+00> : vector<16x8xf32>
    %580 = tpu.matmul %579, %393, %cst_175 {dimension_numbers = #tpu.dot_dimension_numbers<[1], [0], [0], [1], [0, 0, 1, 1], [], []>} : vector<16x24xbf16>, vector<24x8xbf16>, vector<16x8xf32> -> vector<16x8xf32>
    %581 = vector.broadcast %395 : vector<1x8xf32> to vector<16x8xf32>
    %582 = arith.addf %580, %581 : vector<16x8xf32>
    %583 = vector.extract_strided_slice %531 {offsets = [0, 48], sizes = [16, 8], strides = [1, 1]} : vector<16x128xbf16> to vector<16x8xbf16>
    %584 = vector.extract_strided_slice %531 {offsets = [0, 56], sizes = [16, 8], strides = [1, 1]} : vector<16x128xbf16> to vector<16x8xbf16>
    %585 = vector.extract_strided_slice %531 {offsets = [0, 64], sizes = [16, 8], strides = [1, 1]} : vector<16x128xbf16> to vector<16x8xbf16>
    %586 = tpu.concatenate %583, %584, %585 in 1 : vector<16x8xbf16>, vector<16x8xbf16>, vector<16x8xbf16> -> vector<16x24xbf16>
    %cst_176 = arith.constant dense<0.000000e+00> : vector<16x8xf32>
    %587 = tpu.matmul %586, %393, %cst_176 {dimension_numbers = #tpu.dot_dimension_numbers<[1], [0], [0], [1], [0, 0, 1, 1], [], []>} : vector<16x24xbf16>, vector<24x8xbf16>, vector<16x8xf32> -> vector<16x8xf32>
    %588 = vector.broadcast %395 : vector<1x8xf32> to vector<16x8xf32>
    %589 = arith.addf %587, %588 : vector<16x8xf32>
    %590 = vector.extract_strided_slice %531 {offsets = [0, 56], sizes = [16, 8], strides = [1, 1]} : vector<16x128xbf16> to vector<16x8xbf16>
    %591 = vector.extract_strided_slice %531 {offsets = [0, 64], sizes = [16, 8], strides = [1, 1]} : vector<16x128xbf16> to vector<16x8xbf16>
    %592 = vector.extract_strided_slice %531 {offsets = [0, 72], sizes = [16, 8], strides = [1, 1]} : vector<16x128xbf16> to vector<16x8xbf16>
    %593 = tpu.concatenate %590, %591, %592 in 1 : vector<16x8xbf16>, vector<16x8xbf16>, vector<16x8xbf16> -> vector<16x24xbf16>
    %cst_177 = arith.constant dense<0.000000e+00> : vector<16x8xf32>
    %594 = tpu.matmul %593, %393, %cst_177 {dimension_numbers = #tpu.dot_dimension_numbers<[1], [0], [0], [1], [0, 0, 1, 1], [], []>} : vector<16x24xbf16>, vector<24x8xbf16>, vector<16x8xf32> -> vector<16x8xf32>
    %595 = vector.broadcast %395 : vector<1x8xf32> to vector<16x8xf32>
    %596 = arith.addf %594, %595 : vector<16x8xf32>
    %597 = vector.extract_strided_slice %531 {offsets = [0, 64], sizes = [16, 8], strides = [1, 1]} : vector<16x128xbf16> to vector<16x8xbf16>
    %598 = vector.extract_strided_slice %531 {offsets = [0, 72], sizes = [16, 8], strides = [1, 1]} : vector<16x128xbf16> to vector<16x8xbf16>
    %599 = vector.extract_strided_slice %531 {offsets = [0, 80], sizes = [16, 8], strides = [1, 1]} : vector<16x128xbf16> to vector<16x8xbf16>
    %600 = tpu.concatenate %597, %598, %599 in 1 : vector<16x8xbf16>, vector<16x8xbf16>, vector<16x8xbf16> -> vector<16x24xbf16>
    %cst_178 = arith.constant dense<0.000000e+00> : vector<16x8xf32>
    %601 = tpu.matmul %600, %393, %cst_178 {dimension_numbers = #tpu.dot_dimension_numbers<[1], [0], [0], [1], [0, 0, 1, 1], [], []>} : vector<16x24xbf16>, vector<24x8xbf16>, vector<16x8xf32> -> vector<16x8xf32>
    %602 = vector.broadcast %395 : vector<1x8xf32> to vector<16x8xf32>
    %603 = arith.addf %601, %602 : vector<16x8xf32>
    %604 = vector.extract_strided_slice %531 {offsets = [0, 72], sizes = [16, 8], strides = [1, 1]} : vector<16x128xbf16> to vector<16x8xbf16>
    %605 = vector.extract_strided_slice %531 {offsets = [0, 80], sizes = [16, 8], strides = [1, 1]} : vector<16x128xbf16> to vector<16x8xbf16>
    %606 = vector.extract_strided_slice %531 {offsets = [0, 88], sizes = [16, 8], strides = [1, 1]} : vector<16x128xbf16> to vector<16x8xbf16>
    %607 = tpu.concatenate %604, %605, %606 in 1 : vector<16x8xbf16>, vector<16x8xbf16>, vector<16x8xbf16> -> vector<16x24xbf16>
    %cst_179 = arith.constant dense<0.000000e+00> : vector<16x8xf32>
    %608 = tpu.matmul %607, %393, %cst_179 {dimension_numbers = #tpu.dot_dimension_numbers<[1], [0], [0], [1], [0, 0, 1, 1], [], []>} : vector<16x24xbf16>, vector<24x8xbf16>, vector<16x8xf32> -> vector<16x8xf32>
    %609 = vector.broadcast %395 : vector<1x8xf32> to vector<16x8xf32>
    %610 = arith.addf %608, %609 : vector<16x8xf32>
    %611 = vector.extract_strided_slice %531 {offsets = [0, 80], sizes = [16, 8], strides = [1, 1]} : vector<16x128xbf16> to vector<16x8xbf16>
    %612 = vector.extract_strided_slice %531 {offsets = [0, 88], sizes = [16, 8], strides = [1, 1]} : vector<16x128xbf16> to vector<16x8xbf16>
    %613 = vector.extract_strided_slice %531 {offsets = [0, 96], sizes = [16, 8], strides = [1, 1]} : vector<16x128xbf16> to vector<16x8xbf16>
    %614 = tpu.concatenate %611, %612, %613 in 1 : vector<16x8xbf16>, vector<16x8xbf16>, vector<16x8xbf16> -> vector<16x24xbf16>
    %cst_180 = arith.constant dense<0.000000e+00> : vector<16x8xf32>
    %615 = tpu.matmul %614, %393, %cst_180 {dimension_numbers = #tpu.dot_dimension_numbers<[1], [0], [0], [1], [0, 0, 1, 1], [], []>} : vector<16x24xbf16>, vector<24x8xbf16>, vector<16x8xf32> -> vector<16x8xf32>
    %616 = vector.broadcast %395 : vector<1x8xf32> to vector<16x8xf32>
    %617 = arith.addf %615, %616 : vector<16x8xf32>
    %618 = vector.extract_strided_slice %531 {offsets = [0, 88], sizes = [16, 8], strides = [1, 1]} : vector<16x128xbf16> to vector<16x8xbf16>
    %619 = vector.extract_strided_slice %531 {offsets = [0, 96], sizes = [16, 8], strides = [1, 1]} : vector<16x128xbf16> to vector<16x8xbf16>
    %620 = vector.extract_strided_slice %531 {offsets = [0, 104], sizes = [16, 8], strides = [1, 1]} : vector<16x128xbf16> to vector<16x8xbf16>
    %621 = tpu.concatenate %618, %619, %620 in 1 : vector<16x8xbf16>, vector<16x8xbf16>, vector<16x8xbf16> -> vector<16x24xbf16>
    %cst_181 = arith.constant dense<0.000000e+00> : vector<16x8xf32>
    %622 = tpu.matmul %621, %393, %cst_181 {dimension_numbers = #tpu.dot_dimension_numbers<[1], [0], [0], [1], [0, 0, 1, 1], [], []>} : vector<16x24xbf16>, vector<24x8xbf16>, vector<16x8xf32> -> vector<16x8xf32>
    %623 = vector.broadcast %395 : vector<1x8xf32> to vector<16x8xf32>
    %624 = arith.addf %622, %623 : vector<16x8xf32>
    %625 = vector.extract_strided_slice %531 {offsets = [0, 96], sizes = [16, 8], strides = [1, 1]} : vector<16x128xbf16> to vector<16x8xbf16>
    %626 = vector.extract_strided_slice %531 {offsets = [0, 104], sizes = [16, 8], strides = [1, 1]} : vector<16x128xbf16> to vector<16x8xbf16>
    %627 = vector.extract_strided_slice %531 {offsets = [0, 112], sizes = [16, 8], strides = [1, 1]} : vector<16x128xbf16> to vector<16x8xbf16>
    %628 = tpu.concatenate %625, %626, %627 in 1 : vector<16x8xbf16>, vector<16x8xbf16>, vector<16x8xbf16> -> vector<16x24xbf16>
    %cst_182 = arith.constant dense<0.000000e+00> : vector<16x8xf32>
    %629 = tpu.matmul %628, %393, %cst_182 {dimension_numbers = #tpu.dot_dimension_numbers<[1], [0], [0], [1], [0, 0, 1, 1], [], []>} : vector<16x24xbf16>, vector<24x8xbf16>, vector<16x8xf32> -> vector<16x8xf32>
    %630 = vector.broadcast %395 : vector<1x8xf32> to vector<16x8xf32>
    %631 = arith.addf %629, %630 : vector<16x8xf32>
    %632 = vector.extract_strided_slice %531 {offsets = [0, 104], sizes = [16, 8], strides = [1, 1]} : vector<16x128xbf16> to vector<16x8xbf16>
    %633 = vector.extract_strided_slice %531 {offsets = [0, 112], sizes = [16, 8], strides = [1, 1]} : vector<16x128xbf16> to vector<16x8xbf16>
    %634 = vector.extract_strided_slice %531 {offsets = [0, 120], sizes = [16, 8], strides = [1, 1]} : vector<16x128xbf16> to vector<16x8xbf16>
    %635 = tpu.concatenate %632, %633, %634 in 1 : vector<16x8xbf16>, vector<16x8xbf16>, vector<16x8xbf16> -> vector<16x24xbf16>
    %cst_183 = arith.constant dense<0.000000e+00> : vector<16x8xf32>
    %636 = tpu.matmul %635, %393, %cst_183 {dimension_numbers = #tpu.dot_dimension_numbers<[1], [0], [0], [1], [0, 0, 1, 1], [], []>} : vector<16x24xbf16>, vector<24x8xbf16>, vector<16x8xf32> -> vector<16x8xf32>
    %637 = vector.broadcast %395 : vector<1x8xf32> to vector<16x8xf32>
    %638 = arith.addf %636, %637 : vector<16x8xf32>
    %639 = vector.extract_strided_slice %531 {offsets = [0, 112], sizes = [16, 8], strides = [1, 1]} : vector<16x128xbf16> to vector<16x8xbf16>
    %640 = vector.extract_strided_slice %531 {offsets = [0, 120], sizes = [16, 8], strides = [1, 1]} : vector<16x128xbf16> to vector<16x8xbf16>
    %641 = vector.extract_strided_slice %533 {offsets = [0, 0], sizes = [16, 8], strides = [1, 1]} : vector<16x128xbf16> to vector<16x8xbf16>
    %642 = tpu.concatenate %639, %640, %641 in 1 : vector<16x8xbf16>, vector<16x8xbf16>, vector<16x8xbf16> -> vector<16x24xbf16>
    %cst_184 = arith.constant dense<0.000000e+00> : vector<16x8xf32>
    %643 = tpu.matmul %642, %393, %cst_184 {dimension_numbers = #tpu.dot_dimension_numbers<[1], [0], [0], [1], [0, 0, 1, 1], [], []>} : vector<16x24xbf16>, vector<24x8xbf16>, vector<16x8xf32> -> vector<16x8xf32>
    %644 = vector.broadcast %395 : vector<1x8xf32> to vector<16x8xf32>
    %645 = arith.addf %643, %644 : vector<16x8xf32>
    %646 = tpu.concatenate %540, %547, %554, %561, %568, %575, %582, %589, %596, %603, %610, %617, %624, %631, %638, %645 in 1 : vector<16x8xf32>, vector<16x8xf32>, vector<16x8xf32>, vector<16x8xf32>, vector<16x8xf32>, vector<16x8xf32>, vector<16x8xf32>, vector<16x8xf32>, vector<16x8xf32>, vector<16x8xf32>, vector<16x8xf32>, vector<16x8xf32>, vector<16x8xf32>, vector<16x8xf32>, vector<16x8xf32>, vector<16x8xf32> -> vector<16x128xf32>
    %c0_185 = arith.constant 0 : index
    %c0_186 = arith.constant 0 : index
    %647 = vector.load %arg14[%c0_185, %c0_186] : memref<16x128xf32, #tpu.memory_space<vmem>>, vector<16x128xf32>
    %648 = arith.addf %647, %646 : vector<16x128xf32>
    %c0_187 = arith.constant 0 : index
    %c0_188 = arith.constant 0 : index
    %649 = vector.load %arg14[%c0_187, %c0_188] : memref<16x128xf32, #tpu.memory_space<vmem>>, vector<16x128xf32>
    tpu.vector_store %arg14[%c0_187, %c0_188], %648 {strides = array<i32>} : memref<16x128xf32, #tpu.memory_space<vmem>>, vector<16x128xf32>,
    %c0_189 = arith.constant 0 : index
    %c0_190 = arith.constant 0 : index
    %650 = vector.load %arg14[%c0_189, %c0_190] : memref<16x128xf32, #tpu.memory_space<vmem>>, vector<16x128xf32>
    %c0_191 = arith.constant 0 : index
    %c0_192 = arith.constant 0 : index
    %651 = vector.load %arg15[%c0_191, %c0_192] : memref<16x128xf32, #tpu.memory_space<vmem>>, vector<16x128xf32>
    tpu.vector_store %arg15[%c0_191, %c0_192], %650 {strides = array<i32>} : memref<16x128xf32, #tpu.memory_space<vmem>>, vector<16x128xf32>,
    %c0_193 = arith.constant 0 : index
    %c0_194 = arith.constant 0 : index
    %652 = vector.load %arg15[%c0_193, %c0_194] : memref<16x128xf32, #tpu.memory_space<vmem>>, vector<16x128xf32>
    %cst_195 = arith.constant 0.000000e+00 : f32
    %653 = vector.broadcast %cst_195 : f32 to vector<16x128xf32>
    %654 = arith.cmpf oge, %652, %653 : vector<16x128xf32>
    %cst_196 = arith.constant 0.00999999977 : f32
    %655 = vector.broadcast %cst_196 : f32 to vector<16x128xf32>
    %656 = arith.mulf %655, %652 : vector<16x128xf32>
    %657 = arith.select %654, %652, %656 : vector<16x128xi1>, vector<16x128xf32>
    %c1_197 = arith.constant 1 : index
    %c0_198 = arith.constant 0 : index
    %658 = vector.load %arg12[%c1_197, %c0_198] : memref<18x128xf32, #tpu.memory_space<vmem>>, vector<16x128xf32>
    tpu.vector_store %arg12[%c1_197, %c0_198], %657 {strides = array<i32>} : memref<18x128xf32, #tpu.memory_space<vmem>>, vector<16x128xf32>,
    %c0_199 = arith.constant 0 : index
    %c0_200 = arith.constant 0 : index
    %659 = vector.load %arg8[%c0_199, %c0_200] : memref<56x1xbf16, #tpu.memory_space<vmem>>, vector<56x1xbf16>
    %c0_201 = arith.constant 0 : index
    %c0_202 = arith.constant 0 : index
    %660 = vector.load %arg9[%c0_201, %c0_202] : memref<1x1xf32, #tpu.memory_space<vmem>>, vector<1x1xf32>
    %c0_203 = arith.constant 0 : index
    %c0_204 = arith.constant 0 : index
    %661 = vector.load %arg12[%c0_203, %c0_204] : memref<18x128xf32, #tpu.memory_space<vmem>>, vector<16x128xf32>
    %662 = arith.truncf %661 : vector<16x128xf32> to vector<16x128xbf16>
    %c1_205 = arith.constant 1 : index
    %c0_206 = arith.constant 0 : index
    %663 = vector.load %arg12[%c1_205, %c0_206] : memref<18x128xf32, #tpu.memory_space<vmem>>, vector<16x128xf32>
    %664 = arith.truncf %663 : vector<16x128xf32> to vector<16x128xbf16>
    %c2_207 = arith.constant 2 : index
    %c0_208 = arith.constant 0 : index
    %665 = vector.load %arg12[%c2_207, %c0_208] : memref<18x128xf32, #tpu.memory_space<vmem>>, vector<16x128xf32>
    %666 = arith.truncf %665 : vector<16x128xf32> to vector<16x128xbf16>
    %667 = vector.extract_strided_slice %662 {offsets = [0, 104], sizes = [16, 8], strides = [1, 1]} : vector<16x128xbf16> to vector<16x8xbf16>
    %668 = vector.extract_strided_slice %662 {offsets = [0, 112], sizes = [16, 8], strides = [1, 1]} : vector<16x128xbf16> to vector<16x8xbf16>
    %669 = vector.extract_strided_slice %662 {offsets = [0, 120], sizes = [16, 8], strides = [1, 1]} : vector<16x128xbf16> to vector<16x8xbf16>
    %670 = vector.extract_strided_slice %664 {offsets = [0, 0], sizes = [16, 8], strides = [1, 1]} : vector<16x128xbf16> to vector<16x8xbf16>
    %671 = vector.extract_strided_slice %664 {offsets = [0, 8], sizes = [16, 8], strides = [1, 1]} : vector<16x128xbf16> to vector<16x8xbf16>
    %672 = vector.extract_strided_slice %664 {offsets = [0, 16], sizes = [16, 8], strides = [1, 1]} : vector<16x128xbf16> to vector<16x8xbf16>
    %673 = vector.extract_strided_slice %664 {offsets = [0, 24], sizes = [16, 8], strides = [1, 1]} : vector<16x128xbf16> to vector<16x8xbf16>
    %674 = tpu.concatenate %667, %668, %669, %670, %671, %672, %673 in 1 : vector<16x8xbf16>, vector<16x8xbf16>, vector<16x8xbf16>, vector<16x8xbf16>, vector<16x8xbf16>, vector<16x8xbf16>, vector<16x8xbf16> -> vector<16x56xbf16>
    %cst_209 = arith.constant dense<0.000000e+00> : vector<16x1xf32>
    %675 = tpu.matmul %674, %659, %cst_209 {dimension_numbers = #tpu.dot_dimension_numbers<[1], [0], [0], [1], [0, 0, 1, 1], [], []>} : vector<16x56xbf16>, vector<56x1xbf16>, vector<16x1xf32> -> vector<16x1xf32>
    %676 = vector.broadcast %660 : vector<1x1xf32> to vector<16x1xf32>
    %677 = arith.addf %675, %676 : vector<16x1xf32>
    %678 = vector.extract_strided_slice %662 {offsets = [0, 112], sizes = [16, 8], strides = [1, 1]} : vector<16x128xbf16> to vector<16x8xbf16>
    %679 = vector.extract_strided_slice %662 {offsets = [0, 120], sizes = [16, 8], strides = [1, 1]} : vector<16x128xbf16> to vector<16x8xbf16>
    %680 = vector.extract_strided_slice %664 {offsets = [0, 0], sizes = [16, 8], strides = [1, 1]} : vector<16x128xbf16> to vector<16x8xbf16>
    %681 = vector.extract_strided_slice %664 {offsets = [0, 8], sizes = [16, 8], strides = [1, 1]} : vector<16x128xbf16> to vector<16x8xbf16>
    %682 = vector.extract_strided_slice %664 {offsets = [0, 16], sizes = [16, 8], strides = [1, 1]} : vector<16x128xbf16> to vector<16x8xbf16>
    %683 = vector.extract_strided_slice %664 {offsets = [0, 24], sizes = [16, 8], strides = [1, 1]} : vector<16x128xbf16> to vector<16x8xbf16>
    %684 = vector.extract_strided_slice %664 {offsets = [0, 32], sizes = [16, 8], strides = [1, 1]} : vector<16x128xbf16> to vector<16x8xbf16>
    %685 = tpu.concatenate %678, %679, %680, %681, %682, %683, %684 in 1 : vector<16x8xbf16>, vector<16x8xbf16>, vector<16x8xbf16>, vector<16x8xbf16>, vector<16x8xbf16>, vector<16x8xbf16>, vector<16x8xbf16> -> vector<16x56xbf16>
    %cst_210 = arith.constant dense<0.000000e+00> : vector<16x1xf32>
    %686 = tpu.matmul %685, %659, %cst_210 {dimension_numbers = #tpu.dot_dimension_numbers<[1], [0], [0], [1], [0, 0, 1, 1], [], []>} : vector<16x56xbf16>, vector<56x1xbf16>, vector<16x1xf32> -> vector<16x1xf32>
    %687 = vector.broadcast %660 : vector<1x1xf32> to vector<16x1xf32>
    %688 = arith.addf %686, %687 : vector<16x1xf32>
    %689 = vector.extract_strided_slice %662 {offsets = [0, 120], sizes = [16, 8], strides = [1, 1]} : vector<16x128xbf16> to vector<16x8xbf16>
    %690 = vector.extract_strided_slice %664 {offsets = [0, 0], sizes = [16, 8], strides = [1, 1]} : vector<16x128xbf16> to vector<16x8xbf16>
    %691 = vector.extract_strided_slice %664 {offsets = [0, 8], sizes = [16, 8], strides = [1, 1]} : vector<16x128xbf16> to vector<16x8xbf16>
    %692 = vector.extract_strided_slice %664 {offsets = [0, 16], sizes = [16, 8], strides = [1, 1]} : vector<16x128xbf16> to vector<16x8xbf16>
    %693 = vector.extract_strided_slice %664 {offsets = [0, 24], sizes = [16, 8], strides = [1, 1]} : vector<16x128xbf16> to vector<16x8xbf16>
    %694 = vector.extract_strided_slice %664 {offsets = [0, 32], sizes = [16, 8], strides = [1, 1]} : vector<16x128xbf16> to vector<16x8xbf16>
    %695 = vector.extract_strided_slice %664 {offsets = [0, 40], sizes = [16, 8], strides = [1, 1]} : vector<16x128xbf16> to vector<16x8xbf16>
    %696 = tpu.concatenate %689, %690, %691, %692, %693, %694, %695 in 1 : vector<16x8xbf16>, vector<16x8xbf16>, vector<16x8xbf16>, vector<16x8xbf16>, vector<16x8xbf16>, vector<16x8xbf16>, vector<16x8xbf16> -> vector<16x56xbf16>
    %cst_211 = arith.constant dense<0.000000e+00> : vector<16x1xf32>
    %697 = tpu.matmul %696, %659, %cst_211 {dimension_numbers = #tpu.dot_dimension_numbers<[1], [0], [0], [1], [0, 0, 1, 1], [], []>} : vector<16x56xbf16>, vector<56x1xbf16>, vector<16x1xf32> -> vector<16x1xf32>
    %698 = vector.broadcast %660 : vector<1x1xf32> to vector<16x1xf32>
    %699 = arith.addf %697, %698 : vector<16x1xf32>
    %700 = vector.extract_strided_slice %664 {offsets = [0, 0], sizes = [16, 8], strides = [1, 1]} : vector<16x128xbf16> to vector<16x8xbf16>
    %701 = vector.extract_strided_slice %664 {offsets = [0, 8], sizes = [16, 8], strides = [1, 1]} : vector<16x128xbf16> to vector<16x8xbf16>
    %702 = vector.extract_strided_slice %664 {offsets = [0, 16], sizes = [16, 8], strides = [1, 1]} : vector<16x128xbf16> to vector<16x8xbf16>
    %703 = vector.extract_strided_slice %664 {offsets = [0, 24], sizes = [16, 8], strides = [1, 1]} : vector<16x128xbf16> to vector<16x8xbf16>
    %704 = vector.extract_strided_slice %664 {offsets = [0, 32], sizes = [16, 8], strides = [1, 1]} : vector<16x128xbf16> to vector<16x8xbf16>
    %705 = vector.extract_strided_slice %664 {offsets = [0, 40], sizes = [16, 8], strides = [1, 1]} : vector<16x128xbf16> to vector<16x8xbf16>
    %706 = vector.extract_strided_slice %664 {offsets = [0, 48], sizes = [16, 8], strides = [1, 1]} : vector<16x128xbf16> to vector<16x8xbf16>
    %707 = tpu.concatenate %700, %701, %702, %703, %704, %705, %706 in 1 : vector<16x8xbf16>, vector<16x8xbf16>, vector<16x8xbf16>, vector<16x8xbf16>, vector<16x8xbf16>, vector<16x8xbf16>, vector<16x8xbf16> -> vector<16x56xbf16>
    %cst_212 = arith.constant dense<0.000000e+00> : vector<16x1xf32>
    %708 = tpu.matmul %707, %659, %cst_212 {dimension_numbers = #tpu.dot_dimension_numbers<[1], [0], [0], [1], [0, 0, 1, 1], [], []>} : vector<16x56xbf16>, vector<56x1xbf16>, vector<16x1xf32> -> vector<16x1xf32>
    %709 = vector.broadcast %660 : vector<1x1xf32> to vector<16x1xf32>
    %710 = arith.addf %708, %709 : vector<16x1xf32>
    %711 = vector.extract_strided_slice %664 {offsets = [0, 8], sizes = [16, 8], strides = [1, 1]} : vector<16x128xbf16> to vector<16x8xbf16>
    %712 = vector.extract_strided_slice %664 {offsets = [0, 16], sizes = [16, 8], strides = [1, 1]} : vector<16x128xbf16> to vector<16x8xbf16>
    %713 = vector.extract_strided_slice %664 {offsets = [0, 24], sizes = [16, 8], strides = [1, 1]} : vector<16x128xbf16> to vector<16x8xbf16>
    %714 = vector.extract_strided_slice %664 {offsets = [0, 32], sizes = [16, 8], strides = [1, 1]} : vector<16x128xbf16> to vector<16x8xbf16>
    %715 = vector.extract_strided_slice %664 {offsets = [0, 40], sizes = [16, 8], strides = [1, 1]} : vector<16x128xbf16> to vector<16x8xbf16>
    %716 = vector.extract_strided_slice %664 {offsets = [0, 48], sizes = [16, 8], strides = [1, 1]} : vector<16x128xbf16> to vector<16x8xbf16>
    %717 = vector.extract_strided_slice %664 {offsets = [0, 56], sizes = [16, 8], strides = [1, 1]} : vector<16x128xbf16> to vector<16x8xbf16>
    %718 = tpu.concatenate %711, %712, %713, %714, %715, %716, %717 in 1 : vector<16x8xbf16>, vector<16x8xbf16>, vector<16x8xbf16>, vector<16x8xbf16>, vector<16x8xbf16>, vector<16x8xbf16>, vector<16x8xbf16> -> vector<16x56xbf16>
    %cst_213 = arith.constant dense<0.000000e+00> : vector<16x1xf32>
    %719 = tpu.matmul %718, %659, %cst_213 {dimension_numbers = #tpu.dot_dimension_numbers<[1], [0], [0], [1], [0, 0, 1, 1], [], []>} : vector<16x56xbf16>, vector<56x1xbf16>, vector<16x1xf32> -> vector<16x1xf32>
    %720 = vector.broadcast %660 : vector<1x1xf32> to vector<16x1xf32>
    %721 = arith.addf %719, %720 : vector<16x1xf32>
    %722 = vector.extract_strided_slice %664 {offsets = [0, 16], sizes = [16, 8], strides = [1, 1]} : vector<16x128xbf16> to vector<16x8xbf16>
    %723 = vector.extract_strided_slice %664 {offsets = [0, 24], sizes = [16, 8], strides = [1, 1]} : vector<16x128xbf16> to vector<16x8xbf16>
    %724 = vector.extract_strided_slice %664 {offsets = [0, 32], sizes = [16, 8], strides = [1, 1]} : vector<16x128xbf16> to vector<16x8xbf16>
    %725 = vector.extract_strided_slice %664 {offsets = [0, 40], sizes = [16, 8], strides = [1, 1]} : vector<16x128xbf16> to vector<16x8xbf16>
    %726 = vector.extract_strided_slice %664 {offsets = [0, 48], sizes = [16, 8], strides = [1, 1]} : vector<16x128xbf16> to vector<16x8xbf16>
    %727 = vector.extract_strided_slice %664 {offsets = [0, 56], sizes = [16, 8], strides = [1, 1]} : vector<16x128xbf16> to vector<16x8xbf16>
    %728 = vector.extract_strided_slice %664 {offsets = [0, 64], sizes = [16, 8], strides = [1, 1]} : vector<16x128xbf16> to vector<16x8xbf16>
    %729 = tpu.concatenate %722, %723, %724, %725, %726, %727, %728 in 1 : vector<16x8xbf16>, vector<16x8xbf16>, vector<16x8xbf16>, vector<16x8xbf16>, vector<16x8xbf16>, vector<16x8xbf16>, vector<16x8xbf16> -> vector<16x56xbf16>
    %cst_214 = arith.constant dense<0.000000e+00> : vector<16x1xf32>
    %730 = tpu.matmul %729, %659, %cst_214 {dimension_numbers = #tpu.dot_dimension_numbers<[1], [0], [0], [1], [0, 0, 1, 1], [], []>} : vector<16x56xbf16>, vector<56x1xbf16>, vector<16x1xf32> -> vector<16x1xf32>
    %731 = vector.broadcast %660 : vector<1x1xf32> to vector<16x1xf32>
    %732 = arith.addf %730, %731 : vector<16x1xf32>
    %733 = vector.extract_strided_slice %664 {offsets = [0, 24], sizes = [16, 8], strides = [1, 1]} : vector<16x128xbf16> to vector<16x8xbf16>
    %734 = vector.extract_strided_slice %664 {offsets = [0, 32], sizes = [16, 8], strides = [1, 1]} : vector<16x128xbf16> to vector<16x8xbf16>
    %735 = vector.extract_strided_slice %664 {offsets = [0, 40], sizes = [16, 8], strides = [1, 1]} : vector<16x128xbf16> to vector<16x8xbf16>
    %736 = vector.extract_strided_slice %664 {offsets = [0, 48], sizes = [16, 8], strides = [1, 1]} : vector<16x128xbf16> to vector<16x8xbf16>
    %737 = vector.extract_strided_slice %664 {offsets = [0, 56], sizes = [16, 8], strides = [1, 1]} : vector<16x128xbf16> to vector<16x8xbf16>
    %738 = vector.extract_strided_slice %664 {offsets = [0, 64], sizes = [16, 8], strides = [1, 1]} : vector<16x128xbf16> to vector<16x8xbf16>
    %739 = vector.extract_strided_slice %664 {offsets = [0, 72], sizes = [16, 8], strides = [1, 1]} : vector<16x128xbf16> to vector<16x8xbf16>
    %740 = tpu.concatenate %733, %734, %735, %736, %737, %738, %739 in 1 : vector<16x8xbf16>, vector<16x8xbf16>, vector<16x8xbf16>, vector<16x8xbf16>, vector<16x8xbf16>, vector<16x8xbf16>, vector<16x8xbf16> -> vector<16x56xbf16>
    %cst_215 = arith.constant dense<0.000000e+00> : vector<16x1xf32>
    %741 = tpu.matmul %740, %659, %cst_215 {dimension_numbers = #tpu.dot_dimension_numbers<[1], [0], [0], [1], [0, 0, 1, 1], [], []>} : vector<16x56xbf16>, vector<56x1xbf16>, vector<16x1xf32> -> vector<16x1xf32>
    %742 = vector.broadcast %660 : vector<1x1xf32> to vector<16x1xf32>
    %743 = arith.addf %741, %742 : vector<16x1xf32>
    %744 = vector.extract_strided_slice %664 {offsets = [0, 32], sizes = [16, 8], strides = [1, 1]} : vector<16x128xbf16> to vector<16x8xbf16>
    %745 = vector.extract_strided_slice %664 {offsets = [0, 40], sizes = [16, 8], strides = [1, 1]} : vector<16x128xbf16> to vector<16x8xbf16>
    %746 = vector.extract_strided_slice %664 {offsets = [0, 48], sizes = [16, 8], strides = [1, 1]} : vector<16x128xbf16> to vector<16x8xbf16>
    %747 = vector.extract_strided_slice %664 {offsets = [0, 56], sizes = [16, 8], strides = [1, 1]} : vector<16x128xbf16> to vector<16x8xbf16>
    %748 = vector.extract_strided_slice %664 {offsets = [0, 64], sizes = [16, 8], strides = [1, 1]} : vector<16x128xbf16> to vector<16x8xbf16>
    %749 = vector.extract_strided_slice %664 {offsets = [0, 72], sizes = [16, 8], strides = [1, 1]} : vector<16x128xbf16> to vector<16x8xbf16>
    %750 = vector.extract_strided_slice %664 {offsets = [0, 80], sizes = [16, 8], strides = [1, 1]} : vector<16x128xbf16> to vector<16x8xbf16>
    %751 = tpu.concatenate %744, %745, %746, %747, %748, %749, %750 in 1 : vector<16x8xbf16>, vector<16x8xbf16>, vector<16x8xbf16>, vector<16x8xbf16>, vector<16x8xbf16>, vector<16x8xbf16>, vector<16x8xbf16> -> vector<16x56xbf16>
    %cst_216 = arith.constant dense<0.000000e+00> : vector<16x1xf32>
    %752 = tpu.matmul %751, %659, %cst_216 {dimension_numbers = #tpu.dot_dimension_numbers<[1], [0], [0], [1], [0, 0, 1, 1], [], []>} : vector<16x56xbf16>, vector<56x1xbf16>, vector<16x1xf32> -> vector<16x1xf32>
    %753 = vector.broadcast %660 : vector<1x1xf32> to vector<16x1xf32>
    %754 = arith.addf %752, %753 : vector<16x1xf32>
    %755 = vector.extract_strided_slice %664 {offsets = [0, 40], sizes = [16, 8], strides = [1, 1]} : vector<16x128xbf16> to vector<16x8xbf16>
    %756 = vector.extract_strided_slice %664 {offsets = [0, 48], sizes = [16, 8], strides = [1, 1]} : vector<16x128xbf16> to vector<16x8xbf16>
    %757 = vector.extract_strided_slice %664 {offsets = [0, 56], sizes = [16, 8], strides = [1, 1]} : vector<16x128xbf16> to vector<16x8xbf16>
    %758 = vector.extract_strided_slice %664 {offsets = [0, 64], sizes = [16, 8], strides = [1, 1]} : vector<16x128xbf16> to vector<16x8xbf16>
    %759 = vector.extract_strided_slice %664 {offsets = [0, 72], sizes = [16, 8], strides = [1, 1]} : vector<16x128xbf16> to vector<16x8xbf16>
    %760 = vector.extract_strided_slice %664 {offsets = [0, 80], sizes = [16, 8], strides = [1, 1]} : vector<16x128xbf16> to vector<16x8xbf16>
    %761 = vector.extract_strided_slice %664 {offsets = [0, 88], sizes = [16, 8], strides = [1, 1]} : vector<16x128xbf16> to vector<16x8xbf16>
    %762 = tpu.concatenate %755, %756, %757, %758, %759, %760, %761 in 1 : vector<16x8xbf16>, vector<16x8xbf16>, vector<16x8xbf16>, vector<16x8xbf16>, vector<16x8xbf16>, vector<16x8xbf16>, vector<16x8xbf16> -> vector<16x56xbf16>
    %cst_217 = arith.constant dense<0.000000e+00> : vector<16x1xf32>
    %763 = tpu.matmul %762, %659, %cst_217 {dimension_numbers = #tpu.dot_dimension_numbers<[1], [0], [0], [1], [0, 0, 1, 1], [], []>} : vector<16x56xbf16>, vector<56x1xbf16>, vector<16x1xf32> -> vector<16x1xf32>
    %764 = vector.broadcast %660 : vector<1x1xf32> to vector<16x1xf32>
    %765 = arith.addf %763, %764 : vector<16x1xf32>
    %766 = vector.extract_strided_slice %664 {offsets = [0, 48], sizes = [16, 8], strides = [1, 1]} : vector<16x128xbf16> to vector<16x8xbf16>
    %767 = vector.extract_strided_slice %664 {offsets = [0, 56], sizes = [16, 8], strides = [1, 1]} : vector<16x128xbf16> to vector<16x8xbf16>
    %768 = vector.extract_strided_slice %664 {offsets = [0, 64], sizes = [16, 8], strides = [1, 1]} : vector<16x128xbf16> to vector<16x8xbf16>
    %769 = vector.extract_strided_slice %664 {offsets = [0, 72], sizes = [16, 8], strides = [1, 1]} : vector<16x128xbf16> to vector<16x8xbf16>
    %770 = vector.extract_strided_slice %664 {offsets = [0, 80], sizes = [16, 8], strides = [1, 1]} : vector<16x128xbf16> to vector<16x8xbf16>
    %771 = vector.extract_strided_slice %664 {offsets = [0, 88], sizes = [16, 8], strides = [1, 1]} : vector<16x128xbf16> to vector<16x8xbf16>
    %772 = vector.extract_strided_slice %664 {offsets = [0, 96], sizes = [16, 8], strides = [1, 1]} : vector<16x128xbf16> to vector<16x8xbf16>
    %773 = tpu.concatenate %766, %767, %768, %769, %770, %771, %772 in 1 : vector<16x8xbf16>, vector<16x8xbf16>, vector<16x8xbf16>, vector<16x8xbf16>, vector<16x8xbf16>, vector<16x8xbf16>, vector<16x8xbf16> -> vector<16x56xbf16>
    %cst_218 = arith.constant dense<0.000000e+00> : vector<16x1xf32>
    %774 = tpu.matmul %773, %659, %cst_218 {dimension_numbers = #tpu.dot_dimension_numbers<[1], [0], [0], [1], [0, 0, 1, 1], [], []>} : vector<16x56xbf16>, vector<56x1xbf16>, vector<16x1xf32> -> vector<16x1xf32>
    %775 = vector.broadcast %660 : vector<1x1xf32> to vector<16x1xf32>
    %776 = arith.addf %774, %775 : vector<16x1xf32>
    %777 = vector.extract_strided_slice %664 {offsets = [0, 56], sizes = [16, 8], strides = [1, 1]} : vector<16x128xbf16> to vector<16x8xbf16>
    %778 = vector.extract_strided_slice %664 {offsets = [0, 64], sizes = [16, 8], strides = [1, 1]} : vector<16x128xbf16> to vector<16x8xbf16>
    %779 = vector.extract_strided_slice %664 {offsets = [0, 72], sizes = [16, 8], strides = [1, 1]} : vector<16x128xbf16> to vector<16x8xbf16>
    %780 = vector.extract_strided_slice %664 {offsets = [0, 80], sizes = [16, 8], strides = [1, 1]} : vector<16x128xbf16> to vector<16x8xbf16>
    %781 = vector.extract_strided_slice %664 {offsets = [0, 88], sizes = [16, 8], strides = [1, 1]} : vector<16x128xbf16> to vector<16x8xbf16>
    %782 = vector.extract_strided_slice %664 {offsets = [0, 96], sizes = [16, 8], strides = [1, 1]} : vector<16x128xbf16> to vector<16x8xbf16>
    %783 = vector.extract_strided_slice %664 {offsets = [0, 104], sizes = [16, 8], strides = [1, 1]} : vector<16x128xbf16> to vector<16x8xbf16>
    %784 = tpu.concatenate %777, %778, %779, %780, %781, %782, %783 in 1 : vector<16x8xbf16>, vector<16x8xbf16>, vector<16x8xbf16>, vector<16x8xbf16>, vector<16x8xbf16>, vector<16x8xbf16>, vector<16x8xbf16> -> vector<16x56xbf16>
    %cst_219 = arith.constant dense<0.000000e+00> : vector<16x1xf32>
    %785 = tpu.matmul %784, %659, %cst_219 {dimension_numbers = #tpu.dot_dimension_numbers<[1], [0], [0], [1], [0, 0, 1, 1], [], []>} : vector<16x56xbf16>, vector<56x1xbf16>, vector<16x1xf32> -> vector<16x1xf32>
    %786 = vector.broadcast %660 : vector<1x1xf32> to vector<16x1xf32>
    %787 = arith.addf %785, %786 : vector<16x1xf32>
    %788 = vector.extract_strided_slice %664 {offsets = [0, 64], sizes = [16, 8], strides = [1, 1]} : vector<16x128xbf16> to vector<16x8xbf16>
    %789 = vector.extract_strided_slice %664 {offsets = [0, 72], sizes = [16, 8], strides = [1, 1]} : vector<16x128xbf16> to vector<16x8xbf16>
    %790 = vector.extract_strided_slice %664 {offsets = [0, 80], sizes = [16, 8], strides = [1, 1]} : vector<16x128xbf16> to vector<16x8xbf16>
    %791 = vector.extract_strided_slice %664 {offsets = [0, 88], sizes = [16, 8], strides = [1, 1]} : vector<16x128xbf16> to vector<16x8xbf16>
    %792 = vector.extract_strided_slice %664 {offsets = [0, 96], sizes = [16, 8], strides = [1, 1]} : vector<16x128xbf16> to vector<16x8xbf16>
    %793 = vector.extract_strided_slice %664 {offsets = [0, 104], sizes = [16, 8], strides = [1, 1]} : vector<16x128xbf16> to vector<16x8xbf16>
    %794 = vector.extract_strided_slice %664 {offsets = [0, 112], sizes = [16, 8], strides = [1, 1]} : vector<16x128xbf16> to vector<16x8xbf16>
    %795 = tpu.concatenate %788, %789, %790, %791, %792, %793, %794 in 1 : vector<16x8xbf16>, vector<16x8xbf16>, vector<16x8xbf16>, vector<16x8xbf16>, vector<16x8xbf16>, vector<16x8xbf16>, vector<16x8xbf16> -> vector<16x56xbf16>
    %cst_220 = arith.constant dense<0.000000e+00> : vector<16x1xf32>
    %796 = tpu.matmul %795, %659, %cst_220 {dimension_numbers = #tpu.dot_dimension_numbers<[1], [0], [0], [1], [0, 0, 1, 1], [], []>} : vector<16x56xbf16>, vector<56x1xbf16>, vector<16x1xf32> -> vector<16x1xf32>
    %797 = vector.broadcast %660 : vector<1x1xf32> to vector<16x1xf32>
    %798 = arith.addf %796, %797 : vector<16x1xf32>
    %799 = vector.extract_strided_slice %664 {offsets = [0, 72], sizes = [16, 8], strides = [1, 1]} : vector<16x128xbf16> to vector<16x8xbf16>
    %800 = vector.extract_strided_slice %664 {offsets = [0, 80], sizes = [16, 8], strides = [1, 1]} : vector<16x128xbf16> to vector<16x8xbf16>
    %801 = vector.extract_strided_slice %664 {offsets = [0, 88], sizes = [16, 8], strides = [1, 1]} : vector<16x128xbf16> to vector<16x8xbf16>
    %802 = vector.extract_strided_slice %664 {offsets = [0, 96], sizes = [16, 8], strides = [1, 1]} : vector<16x128xbf16> to vector<16x8xbf16>
    %803 = vector.extract_strided_slice %664 {offsets = [0, 104], sizes = [16, 8], strides = [1, 1]} : vector<16x128xbf16> to vector<16x8xbf16>
    %804 = vector.extract_strided_slice %664 {offsets = [0, 112], sizes = [16, 8], strides = [1, 1]} : vector<16x128xbf16> to vector<16x8xbf16>
    %805 = vector.extract_strided_slice %664 {offsets = [0, 120], sizes = [16, 8], strides = [1, 1]} : vector<16x128xbf16> to vector<16x8xbf16>
    %806 = tpu.concatenate %799, %800, %801, %802, %803, %804, %805 in 1 : vector<16x8xbf16>, vector<16x8xbf16>, vector<16x8xbf16>, vector<16x8xbf16>, vector<16x8xbf16>, vector<16x8xbf16>, vector<16x8xbf16> -> vector<16x56xbf16>
    %cst_221 = arith.constant dense<0.000000e+00> : vector<16x1xf32>
    %807 = tpu.matmul %806, %659, %cst_221 {dimension_numbers = #tpu.dot_dimension_numbers<[1], [0], [0], [1], [0, 0, 1, 1], [], []>} : vector<16x56xbf16>, vector<56x1xbf16>, vector<16x1xf32> -> vector<16x1xf32>
    %808 = vector.broadcast %660 : vector<1x1xf32> to vector<16x1xf32>
    %809 = arith.addf %807, %808 : vector<16x1xf32>
    %810 = vector.extract_strided_slice %664 {offsets = [0, 80], sizes = [16, 8], strides = [1, 1]} : vector<16x128xbf16> to vector<16x8xbf16>
    %811 = vector.extract_strided_slice %664 {offsets = [0, 88], sizes = [16, 8], strides = [1, 1]} : vector<16x128xbf16> to vector<16x8xbf16>
    %812 = vector.extract_strided_slice %664 {offsets = [0, 96], sizes = [16, 8], strides = [1, 1]} : vector<16x128xbf16> to vector<16x8xbf16>
    %813 = vector.extract_strided_slice %664 {offsets = [0, 104], sizes = [16, 8], strides = [1, 1]} : vector<16x128xbf16> to vector<16x8xbf16>
    %814 = vector.extract_strided_slice %664 {offsets = [0, 112], sizes = [16, 8], strides = [1, 1]} : vector<16x128xbf16> to vector<16x8xbf16>
    %815 = vector.extract_strided_slice %664 {offsets = [0, 120], sizes = [16, 8], strides = [1, 1]} : vector<16x128xbf16> to vector<16x8xbf16>
    %816 = vector.extract_strided_slice %666 {offsets = [0, 0], sizes = [16, 8], strides = [1, 1]} : vector<16x128xbf16> to vector<16x8xbf16>
    %817 = tpu.concatenate %810, %811, %812, %813, %814, %815, %816 in 1 : vector<16x8xbf16>, vector<16x8xbf16>, vector<16x8xbf16>, vector<16x8xbf16>, vector<16x8xbf16>, vector<16x8xbf16>, vector<16x8xbf16> -> vector<16x56xbf16>
    %cst_222 = arith.constant dense<0.000000e+00> : vector<16x1xf32>
    %818 = tpu.matmul %817, %659, %cst_222 {dimension_numbers = #tpu.dot_dimension_numbers<[1], [0], [0], [1], [0, 0, 1, 1], [], []>} : vector<16x56xbf16>, vector<56x1xbf16>, vector<16x1xf32> -> vector<16x1xf32>
    %819 = vector.broadcast %660 : vector<1x1xf32> to vector<16x1xf32>
    %820 = arith.addf %818, %819 : vector<16x1xf32>
    %821 = vector.extract_strided_slice %664 {offsets = [0, 88], sizes = [16, 8], strides = [1, 1]} : vector<16x128xbf16> to vector<16x8xbf16>
    %822 = vector.extract_strided_slice %664 {offsets = [0, 96], sizes = [16, 8], strides = [1, 1]} : vector<16x128xbf16> to vector<16x8xbf16>
    %823 = vector.extract_strided_slice %664 {offsets = [0, 104], sizes = [16, 8], strides = [1, 1]} : vector<16x128xbf16> to vector<16x8xbf16>
    %824 = vector.extract_strided_slice %664 {offsets = [0, 112], sizes = [16, 8], strides = [1, 1]} : vector<16x128xbf16> to vector<16x8xbf16>
    %825 = vector.extract_strided_slice %664 {offsets = [0, 120], sizes = [16, 8], strides = [1, 1]} : vector<16x128xbf16> to vector<16x8xbf16>
    %826 = vector.extract_strided_slice %666 {offsets = [0, 0], sizes = [16, 8], strides = [1, 1]} : vector<16x128xbf16> to vector<16x8xbf16>
    %827 = vector.extract_strided_slice %666 {offsets = [0, 8], sizes = [16, 8], strides = [1, 1]} : vector<16x128xbf16> to vector<16x8xbf16>
    %828 = tpu.concatenate %821, %822, %823, %824, %825, %826, %827 in 1 : vector<16x8xbf16>, vector<16x8xbf16>, vector<16x8xbf16>, vector<16x8xbf16>, vector<16x8xbf16>, vector<16x8xbf16>, vector<16x8xbf16> -> vector<16x56xbf16>
    %cst_223 = arith.constant dense<0.000000e+00> : vector<16x1xf32>
    %829 = tpu.matmul %828, %659, %cst_223 {dimension_numbers = #tpu.dot_dimension_numbers<[1], [0], [0], [1], [0, 0, 1, 1], [], []>} : vector<16x56xbf16>, vector<56x1xbf16>, vector<16x1xf32> -> vector<16x1xf32>
    %830 = vector.broadcast %660 : vector<1x1xf32> to vector<16x1xf32>
    %831 = arith.addf %829, %830 : vector<16x1xf32>
    %832 = vector.extract_strided_slice %664 {offsets = [0, 96], sizes = [16, 8], strides = [1, 1]} : vector<16x128xbf16> to vector<16x8xbf16>
    %833 = vector.extract_strided_slice %664 {offsets = [0, 104], sizes = [16, 8], strides = [1, 1]} : vector<16x128xbf16> to vector<16x8xbf16>
    %834 = vector.extract_strided_slice %664 {offsets = [0, 112], sizes = [16, 8], strides = [1, 1]} : vector<16x128xbf16> to vector<16x8xbf16>
    %835 = vector.extract_strided_slice %664 {offsets = [0, 120], sizes = [16, 8], strides = [1, 1]} : vector<16x128xbf16> to vector<16x8xbf16>
    %836 = vector.extract_strided_slice %666 {offsets = [0, 0], sizes = [16, 8], strides = [1, 1]} : vector<16x128xbf16> to vector<16x8xbf16>
    %837 = vector.extract_strided_slice %666 {offsets = [0, 8], sizes = [16, 8], strides = [1, 1]} : vector<16x128xbf16> to vector<16x8xbf16>
    %838 = vector.extract_strided_slice %666 {offsets = [0, 16], sizes = [16, 8], strides = [1, 1]} : vector<16x128xbf16> to vector<16x8xbf16>
    %839 = tpu.concatenate %832, %833, %834, %835, %836, %837, %838 in 1 : vector<16x8xbf16>, vector<16x8xbf16>, vector<16x8xbf16>, vector<16x8xbf16>, vector<16x8xbf16>, vector<16x8xbf16>, vector<16x8xbf16> -> vector<16x56xbf16>
    %cst_224 = arith.constant dense<0.000000e+00> : vector<16x1xf32>
    %840 = tpu.matmul %839, %659, %cst_224 {dimension_numbers = #tpu.dot_dimension_numbers<[1], [0], [0], [1], [0, 0, 1, 1], [], []>} : vector<16x56xbf16>, vector<56x1xbf16>, vector<16x1xf32> -> vector<16x1xf32>
    %841 = vector.broadcast %660 : vector<1x1xf32> to vector<16x1xf32>
    %842 = arith.addf %840, %841 : vector<16x1xf32>
    %843 = tpu.concatenate %677, %688, %699, %710, %721, %732, %743, %754, %765, %776, %787, %798, %809, %820, %831, %842 in 1 : vector<16x1xf32>, vector<16x1xf32>, vector<16x1xf32>, vector<16x1xf32>, vector<16x1xf32>, vector<16x1xf32>, vector<16x1xf32>, vector<16x1xf32>, vector<16x1xf32>, vector<16x1xf32>, vector<16x1xf32>, vector<16x1xf32>, vector<16x1xf32>, vector<16x1xf32>, vector<16x1xf32>, vector<16x1xf32> -> vector<16x16xf32>
    %844 = math.tanh %843 : vector<16x16xf32>
    %c0_225 = arith.constant 0 : index
    %c0_226 = arith.constant 0 : index
    %845 = vector.load %arg10[%c0_225, %c0_226] : memref<16x16xf32, #tpu.memory_space<vmem>>, vector<16x16xf32>
    tpu.vector_store %arg10[%c0_225, %c0_226], %844 {strides = array<i32>} : memref<16x16xf32, #tpu.memory_space<vmem>>, vector<16x16xf32>,
    return
  }
  func.func @transform_0(%arg0: i32) -> (i32, i32) {
    %c0_i32 = arith.constant 0 : i32
    %c0_i32_0 = arith.constant 0 : i32
    %c0_i32_1 = arith.constant 0 : i32
    return %c0_i32, %c0_i32_0 : i32, i32
  }
  func.func @transform_1(%arg0: i32) -> (i32, i32, i32) {
    %c0_i32 = arith.constant 0 : i32
    %c0_i32_0 = arith.constant 0 : i32
    %c0_i32_1 = arith.constant 0 : i32
    %c0_i32_2 = arith.constant 0 : i32
    return %c0_i32, %c0_i32_0, %c0_i32_1 : i32, i32, i32
  }
  func.func @transform_2(%arg0: i32) -> (i32, i32) {
    %c0_i32 = arith.constant 0 : i32
    %c0_i32_0 = arith.constant 0 : i32
    %c0_i32_1 = arith.constant 0 : i32
    return %c0_i32, %c0_i32_0 : i32, i32
  }
  func.func @transform_3(%arg0: i32) -> (i32, i32, i32) {
    %c0_i32 = arith.constant 0 : i32
    %c0_i32_0 = arith.constant 0 : i32
    %c0_i32_1 = arith.constant 0 : i32
    %c0_i32_2 = arith.constant 0 : i32
    return %c0_i32, %c0_i32_0, %c0_i32_1 : i32, i32, i32
  }
  func.func @transform_4(%arg0: i32) -> (i32, i32, i32) {
    %c0_i32 = arith.constant 0 : i32
    %c0_i32_0 = arith.constant 0 : i32
    %c0_i32_1 = arith.constant 0 : i32
    %c0_i32_2 = arith.constant 0 : i32
    return %c0_i32, %c0_i32_0, %c0_i32_1 : i32, i32, i32
  }
  func.func @transform_5(%arg0: i32) -> (i32, i32, i32) {
    %c0_i32 = arith.constant 0 : i32
    %c0_i32_0 = arith.constant 0 : i32
    %c0_i32_1 = arith.constant 0 : i32
    %c0_i32_2 = arith.constant 0 : i32
    return %c0_i32, %c0_i32_0, %c0_i32_1 : i32, i32, i32
  }
  func.func @transform_6(%arg0: i32) -> (i32, i32, i32) {
    %c0_i32 = arith.constant 0 : i32
    %c0_i32_0 = arith.constant 0 : i32
    %c0_i32_1 = arith.constant 0 : i32
    %c0_i32_2 = arith.constant 0 : i32
    return %c0_i32, %c0_i32_0, %c0_i32_1 : i32, i32, i32
  }
  func.func @transform_7(%arg0: i32) -> (i32, i32) {
    %c0_i32 = arith.constant 0 : i32
    %c0_i32_0 = arith.constant 0 : i32
    %c0_i32_1 = arith.constant 0 : i32
    return %c0_i32, %c0_i32_0 : i32, i32
  }
  func.func @transform_8(%arg0: i32) -> (i32, i32) {
    %c0_i32 = arith.constant 0 : i32
    %c0_i32_0 = arith.constant 0 : i32
    %c0_i32_1 = arith.constant 0 : i32
    return %c0_i32, %c0_i32_0 : i32, i32
  }
  func.func @transform_9(%arg0: i32) -> (i32, i32) {
    %c0_i32 = arith.constant 0 : i32
    %c0_i32_0 = arith.constant 0 : i32
    %c0_i32_1 = arith.constant 0 : i32
    return %c0_i32, %c0_i32_0 : i32, i32
  }
}

</mosaic_0001>

<bundles_post_ra>
// kernel: _lambda_.3
= control target key start
LH: loop header
LB: loop body
LE: loop exit
PB: predicated region body
PF: predicated region fallthrough
CT: control target
= control target key end

     0   :  { %8 = vsyncpa [#allocation4], 0  ;;  %s301_s12 = smov [#allocation3]   ;;  %s369_s0 = inlined_call_operand.vmem [shape: f32[16,8], index: 0, kind: input, shape index: {}]   ;;  %s370_s1 = inlined_call_operand.hbm [shape: bf16[56,32], index: 1, kind: input, shape index: {}]   ;;  %s371_s2 = inlined_call_operand.vmem [shape: f32[1,32], index: 2, kind: input, shape index: {}]   ;;  %s372_s3 = inlined_call_operand.vmem [shape: f32[16,32], index: 3, kind: output, shape index: {}]  }
   0x1   :  { %s16_s13 = sshll.u32 %s301_s12, 4  ;;  %s277_s16 = scalar_lea.hbm %s370_s1, 448  ;;  %s17_s13 = int_to_ptr.vmem [resolvable:$true] %s16_s13 }
   0x2   :  { %p278_p0 = scmp.ne.s32.totalorder %s370_s1, %s277_s16  ;;  %p281_p1 = scmp.lt.u32.totalorder %s277_s16, %s370_s1 }
   0x4   :  { %p283_p2 = pnand %p281_p1, %p278_p0 }
   0x6   :  { %286 = shalt.err (!%p283_p2)
}
   0x7   :  { %s287_s21 = scalar_lea.vmem %s17_s13, 448  ;;  %p292_p4 = scmp.lt.s32.totalorder %s17_s13, %s17_s13 }
   0x8   :  { %p288_p3 = scmp.ne.s32.totalorder %s17_s13, %s287_s21  ;;  %p293_p5 = scmp.lt.s32.totalorder %s287_s21, %s287_s21 }
   0xa   :  { %p294_p6 = por %p293_p5, %p292_p4 }
   0xc   :  { %p295_p7 = pnand %p294_p6, %p288_p3 }
   0xe   :  { %298 = shalt.err (!%p295_p7)
}
   0xf   :  { %s302_s22 = smov 64   ;;  %s303_s23 = smov 4  }
  0x10   :  { %22 = dma.hbm_to_vmem [thread:$0]  %s370_s1, 448, %s17_s13, [#allocation4], %s302_s22, %s302_s22, %s303_s23  }
  0x11   :  { %299 = dma.done.wait [#allocation4], 448  }
  0x12   :  { %300 = vsyncadd [#allocation4], 4294966848  ;;  %vm29_vm0 = vcmask 64512   ;;  %vm32_vm1 = vcmask 62464   ;;  %v304_v0 = vmov 0.0   ;;  %v34_v1 = vld [vmem:[%s369_s0] sm:$0xff] }
  0x13   :  { %30 = vst.msk [vmem:[#allocation2] sm:$0xff] %vm29_vm0, %v304_v0  ;;  %31 = vst.msk [vmem:[#allocation2 + $0x8] sm:$0xff] %vm29_vm0, %v304_v0  ;;  %220 = vmatprep.subr.bf16.mxu0 %v304_v0  ;;  %v35_v2 = vld [vmem:[%s369_s0 + $0x8] sm:$0xff]  ;;  %v273_v3 = vld [vmem:[#allocation3] sm:$0xff]   ;;  %vm157_vm2 = vcmask 1043456   ;;  %s305_s0 = smov 8  }
  0x14   :  { %33 = vst.msk [vmem:[#allocation2 + $0x10] sm:$0x3f] %vm32_vm1, %v304_v0  ;;  %221 = vmatpush3.bf16.msra.mxu0 %v273_v3  ;;  %v274_v4 = vld [vmem:[#allocation3 + $0x8] sm:$0xff]   ;;  %v275_v5 = vld [vmem:[#allocation3 + $0x10] sm:$0xff]   ;;  %v276_v6 = vld [vmem:[#allocation3 + $0x18] ss:$0 sps:$4 sm:$0xff]  }
  0x15   :  { %36 = vst.msk [vmem:[#allocation2 + $0x3] sm:$0xff] %vm29_vm0, %v34_v1  ;;  %37 = vst.msk [vmem:[#allocation2 + $0xb] sm:$0xff] %vm29_vm0, %v35_v2  ;;  %222 = vmatprep.subr.bf16.mxu0 %v304_v0  ;;  %s306_s1 = smov 24   ;;  %v159_v21 = vsel %vm157_vm2, %v276_v6, 0  ;;  %vm307_vm3 = vmmov 0   ;;  %s308_s30 = smov 16  }
  0x16   :  { %228 = vmatprep.mubr.msk.bf16.mxu0 %vm307_vm3, %v304_v0  ;;  %s309_s4 = smov 32   ;;  %s310_s5 = smov 40   ;;  %vm102_vm4 = vcmask 130048   ;;  %vm105_vm5 = vcmask 195584   ;;  %vm108_vm6 = vcmask 261120   ;;  %vm111_vm7 = vcmask 326656  }
  0x17   :  { %s311_s6 = smov 48   ;;  %vm114_vm8 = vcmask 392192   ;;  %vm153_vm9 = vcmask 457728   ;;  %v209_v59 = vld [vmem:[%s371_s2] ss:$0 sm:$0xff] }
  0x18   :  { %223 = vmatpush3.bf16.msra.mxu0 %v274_v4 }
  0x19   :  { %224 = vmatprep.subr.bf16.mxu0 %v304_v0 }
  0x1c   :  { %v40_v7 = vld [vmem:[#allocation2 + $0x1] sm:$0xff]  ;;  %v41_v8 = vld [vmem:[#allocation2 + $0x9] sm:$0xff]  ;;  %225 = vmatpush3.bf16.msra.mxu0 %v275_v5 }
  0x1d   :  { %v44_v9 = vld [vmem:[#allocation2 + $0x3] sm:$0xff]  ;;  %v243_v10 = vpack.i.bf16 %v41_v8, %v40_v7  ;;  %v45_v11 = vld [vmem:[#allocation2 + $0xb] sm:$0xff]  ;;  %226 = vmatprep.subr.bf16.mxu0 %v304_v0 }
  0x1e   :  { %v42_v12 = vld [vmem:[#allocation2 + $0x2] sm:$0xff]  ;;  %v43_v13 = vld [vmem:[#allocation2 + $0xa] sm:$0xff]  ;;  %v253_v14 = vpack.i.bf16 %v45_v11, %v44_v9 }
  0x1f   :  { %v46_v15 = vld [vmem:[#allocation2 + $0x4] sm:$0xff]  ;;  %v47_v16 = vld [vmem:[#allocation2 + $0xc] sm:$0xff]  ;;  %244 = vrot.lane.b32.xlu0 %v243_v10, %s305_s0  ;;  %v248_v17 = vpack.i.bf16 %v43_v13, %v42_v12 }
  0x20   :  { %254 = vrot.lane.b32.xlu1 %v253_v14, %s306_s1  ;;  %v258_v18 = vpack.i.bf16 %v47_v16, %v46_v15  ;;  %v48_v19 = vld [vmem:[#allocation2 + $0x5] sm:$0xff]  ;;  %v49_v20 = vld [vmem:[#allocation2 + $0xd] sm:$0xff]  ;;  %227 = vmatpush3.bf16.msra.mxu0 %v159_v21 }
  0x21   :  { %v50_v22 = vld [vmem:[#allocation2 + $0x6] sm:$0xff]  ;;  %v51_v23 = vld [vmem:[#allocation2 + $0xe] sm:$0xff]  ;;  %v263_v24 = vpack.i.bf16 %v49_v20, %v48_v19 }
  0x22   :  { %v268_v25 = vpack.i.bf16 %v51_v23, %v50_v22  ;;  %v38_v30 = vld [vmem:[#allocation2] sm:$0xff]  ;;  %v39_v31 = vld [vmem:[#allocation2 + $0x8] sm:$0xff] }
  0x23   :  { %249 = vrot.lane.b32.xlu0 %v248_v17, %s308_s30 }
  0x24   :  { %259 = vrot.lane.b32.xlu1 %v258_v18, %s309_s4 }
  0x27   :  { %264 = vrot.lane.b32.xlu0 %v263_v24, %s310_s5 }
  0x28   :  { %269 = vrot.lane.b32.xlu1 %v268_v25, %s311_s6 }
  0x91   :  { %v245_v26 = vpop.permute.xlu0 %244 }
  0x92   :  { %v255_v27 = vpop.permute.xlu1 %254  ;;  %v247_v28 = vunpack.i.h.bf16 %v245_v26  ;;  %v246_v29 = vunpack.i.l.bf16 %v245_v26 }
  0x93   :  { %v257_v33 = vunpack.i.h.bf16 %v255_v27  ;;  %v256_v34 = vunpack.i.l.bf16 %v255_v27 }
  0x94   :  { %v100_v38 = vsel %vm29_vm0, %v38_v30, %v246_v29  ;;  %v101_v39 = vsel %vm29_vm0, %v39_v31, %v247_v28 }
  0x95   :  { %v250_v32 = vpop.permute.xlu0 %249 }
  0x96   :  { %v252_v35 = vunpack.i.h.bf16 %v250_v32  ;;  %v251_v36 = vunpack.i.l.bf16 %v250_v32  ;;  %v260_v37 = vpop.permute.xlu1 %259 }
  0x97   :  { %v262_v40 = vunpack.i.h.bf16 %v260_v37  ;;  %v261_v41 = vunpack.i.l.bf16 %v260_v37 }
  0x98   :  { %v103_v42 = vsel %vm102_vm4, %v100_v38, %v251_v36  ;;  %v104_v43 = vsel %vm102_vm4, %v101_v39, %v252_v35 }
  0x99   :  { %v106_v44 = vsel %vm105_vm5, %v103_v42, %v256_v34  ;;  %v107_v45 = vsel %vm105_vm5, %v104_v43, %v257_v33  ;;  %v265_v46 = vpop.permute.xlu0 %264 }
  0x9a   :  { %v109_v47 = vsel %vm108_vm6, %v106_v44, %v261_v41  ;;  %v110_v48 = vsel %vm108_vm6, %v107_v45, %v262_v40  ;;  %v267_v49 = vunpack.i.h.bf16 %v265_v46  ;;  %v266_v50 = vunpack.i.l.bf16 %v265_v46  ;;  %v270_v51 = vpop.permute.xlu1 %269 }
  0x9b   :  { %v272_v52 = vunpack.i.h.bf16 %v270_v51  ;;  %v271_v53 = vunpack.i.l.bf16 %v270_v51 }
  0x9c   :  { %v112_v54 = vsel %vm111_vm7, %v109_v47, %v266_v50  ;;  %v113_v55 = vsel %vm111_vm7, %v110_v48, %v267_v49 }
  0x9d   :  { %v115_v56 = vsel %vm114_vm8, %v112_v54, %v271_v53  ;;  %v116_v57 = vsel %vm114_vm8, %v113_v55, %v272_v52 }
  0x9e   :  { %v117_v58 = vpack.c.bf16 %v116_v57, %v115_v56 }
  0xa0   :  { %229 = vmatmul.mubr.msk.bf16.vlgmr.msra.gmra.mrb[0].mxu0 %vm153_vm9, %v117_v58 }
 0x173   :  { %v195_v60 = vpop.f32.mrb[0].mxu0 }
 0x174   :  { %v196_v61 = vadd.f32 %v209_v59, %v195_v60  ;;  %v230_v62 = vpop.f32.mrb[1].mxu0 }
 0x175   :  { %v198_v63 = vpop.f32.mrb[2].mxu0 }
 0x176   :  { %202 = vst.msk [vmem:[%s372_s3] sm:$0xff] %vm108_vm6, %v196_v61  ;;  %v199_v0 = vadd.f32 %v209_v59, %v198_v63  ;;  %v231_v1 = vpop.f32.mrb[3].mxu0 }
 0x178   :  { %203 = vst.msk [vmem:[%s372_s3 + $0x8] sm:$0xff] %vm108_vm6, %v199_v0 }
 0x179   :  { %208 = vsyncpa [#allocation4], 1 }

// kernel: _lambda_.4
= control target key start
LH: loop header
LB: loop body
LE: loop exit
PB: predicated region body
PF: predicated region fallthrough
CT: control target
= control target key end

     0   :  { %12 = vsyncpa [#allocation7], 0  ;;  %s2004_s24 = smov [#allocation6]   ;;  %s2508_s0 = inlined_call_operand.vmem [shape: f32[16,32], index: 0, kind: input, shape index: {}]   ;;  %s2509_s1 = inlined_call_operand.vmem [shape: bf16[4,64,16], index: 1, kind: input, shape index: {}]   ;;  %s2510_s2 = inlined_call_operand.vmem [shape: f32[1,16], index: 2, kind: input, shape index: {}]   ;;  %s2511_s3 = inlined_call_operand.vmem [shape: bf16[2,48,16], index: 3, kind: input, shape index: {}]   ;;  %s2512_s4 = inlined_call_operand.vmem [shape: f32[2,1,16], index: 4, kind: input, shape index: {}]   ;;  %s2513_s5 = inlined_call_operand.hbm [shape: bf16[2,48,16], index: 5, kind: input, shape index: {}]   ;;  %s2514_s6 = inlined_call_operand.vmem [shape: f32[2,1,16], index: 6, kind: input, shape index: {}]   ;;  %s2515_s7 = inlined_call_operand.vmem [shape: f32[16,64], index: 7, kind: output, shape index: {}]  }
   0x1   :  { %s28_s25 = sshll.u32 %s2004_s24, 4  ;;  %s1980_s28 = scalar_lea.hbm %s2513_s5, 768  ;;  %s29_s25 = int_to_ptr.vmem [resolvable:$true] %s28_s25 }
   0x2   :  { %p1981_p0 = scmp.ne.s32.totalorder %s2513_s5, %s1980_s28  ;;  %p1984_p1 = scmp.lt.u32.totalorder %s1980_s28, %s2513_s5 }
   0x4   :  { %p1986_p2 = pnand %p1984_p1, %p1981_p0 }
   0x6   :  { %1989 = shalt.err (!%p1986_p2)
}
   0x7   :  { %s1990_s10 = scalar_lea.vmem %s29_s25, 768  ;;  %p1995_p4 = scmp.lt.s32.totalorder %s29_s25, %s29_s25 }
   0x8   :  { %p1991_p3 = scmp.ne.s32.totalorder %s29_s25, %s1990_s10  ;;  %p1996_p5 = scmp.lt.s32.totalorder %s1990_s10, %s1990_s10 }
   0xa   :  { %p1997_p6 = por %p1996_p5, %p1995_p4 }
   0xc   :  { %p1998_p7 = pnand %p1997_p6, %p1991_p3 }
   0xe   :  { %2001 = shalt.err (!%p1998_p7)
}
   0xf   :  { %s2005_s11 = smov 64   ;;  %s2006_s12 = smov 4  }
  0x10   :  { %34 = dma.hbm_to_vmem [thread:$0]  %s2513_s5, 768, %s29_s25, [#allocation7], %s2005_s11, %s2005_s11, %s2006_s12  }
  0x11   :  { %2002 = dma.done.wait [#allocation7], 768  }
  0x12   :  { %2003 = vsyncadd [#allocation7], 4294966528  ;;  %vm41_vm0 = vcmask 261120   ;;  %vm44_vm1 = vcmask 254976   ;;  %v2007_v0 = vmov 0.0   ;;  %v51_v1 = vld [vmem:[%s2508_s0] sm:$0xff] }
  0x13   :  { %42 = vst.msk [vmem:[#allocation2] sm:$0xff] %vm41_vm0, %v2007_v0  ;;  %43 = vst.msk [vmem:[#allocation2 + $0x8] sm:$0xff] %vm41_vm0, %v2007_v0  ;;  %1733 = vmatprep.subr.bf16.mxu0 %v2007_v0  ;;  %1745 = vmatprep.subr.bf16.mxu1 %v2007_v0  ;;  %v52_v2 = vld [vmem:[%s2508_s0 + $0x8] sm:$0xff]  ;;  %vm53_vm2 = vcmp.ge.f32.partialorder %v51_v1, 0.0  ;;  %v55_v3 = vmul.f32 0.1, %v51_v1 }
  0x14   :  { %45 = vst.msk [vmem:[#allocation2 + $0x10] sm:$0x3] %vm44_vm1, %v2007_v0  ;;  %vm54_vm3 = vcmp.ge.f32.partialorder %v52_v2, 0.0  ;;  %v56_v4 = vmul.f32 0.1, %v52_v2  ;;  %vm2008_vm4 = vmmov 0  }
  0x15   :  { %1741 = vmatprep.mubr.msk.bf16.mxu0 %vm2008_vm4, %v2007_v0  ;;  %1753 = vmatprep.mubr.msk.bf16.mxu1 %vm2008_vm4, %v2007_v0  ;;  %v1952_v5 = vld [vmem:[%s2509_s1] sm:$0xff]   ;;  %vm46_vm5 = vcmask 523264   ;;  %v57_v6 = vsel %vm53_vm2, %v51_v1, %v55_v3  ;;  %v1954_v9 = vld [vmem:[%s2509_s1 + $0x8] sm:$0xff]   ;;  %v1956_v11 = vld [vmem:[%s2509_s1 + $0x10] sm:$0xff]   ;;  %s2009_s10 = smov 32   ;;  %s2010_s26 = smov 16  }
  0x16   :  { %v58_v7 = vsel %vm54_vm3, %v52_v2, %v56_v4  ;;  %v1953_v8 = vld [vmem:[%s2509_s1 + $0x20] sm:$0xff]   ;;  %47 = vst.msk [vmem:[#allocation3] sm:$0xff] %vm46_vm5, %v2007_v0  ;;  %48 = vst.msk [vmem:[#allocation3 + $0x8] sm:$0xff] %vm46_vm5, %v2007_v0  ;;  %1734 = vmatpush3.bf16.msra.mxu0 %v1952_v5  ;;  %v1955_v10 = vld [vmem:[%s2509_s1 + $0x28] sm:$0xff]   ;;  %vm49_vm6 = vcmask 517120   ;;  %s2011_s28 = smov 48  }
  0x17   :  { %59 = vst.msk [vmem:[#allocation2 + $0x1] sm:$0xff] %vm41_vm0, %v57_v6  ;;  %60 = vst.msk [vmem:[#allocation2 + $0x9] sm:$0xff] %vm41_vm0, %v58_v7  ;;  %1746 = vmatpush3.bf16.msra.mxu1 %v1953_v8  ;;  %1735 = vmatprep.subr.bf16.mxu0 %v2007_v0  ;;  %v1957_v12 = vld [vmem:[%s2509_s1 + $0x30] sm:$0xff]   ;;  %v1958_v18 = vld [vmem:[%s2509_s1 + $0x18] sm:$0xff]   ;;  %vm412_vm7 = vcmask 130048   ;;  %vm417_vm8 = vcmask 392192  }
  0x18   :  { %1747 = vmatprep.subr.bf16.mxu1 %v2007_v0  ;;  %v1959_v19 = vld [vmem:[%s2509_s1 + $0x38] sm:$0xff]   ;;  %v1960_v21 = vld [vmem:[%s2509_s1 + $0x40] sm:$0xff]   ;;  %v1962_v25 = vld [vmem:[%s2509_s1 + $0x48] sm:$0xff]   ;;  %50 = vst.msk [vmem:[#allocation3 + $0x10] sm:$0x3] %vm49_vm6, %v2007_v0  ;;  %s2012_s11 = smov 80  }
  0x19   :  { %v1961_v22 = vld [vmem:[%s2509_s1 + $0x60] sm:$0xff]   ;;  %v1963_v26 = vld [vmem:[%s2509_s1 + $0x68] sm:$0xff]   ;;  %v1964_v27 = vld [vmem:[%s2509_s1 + $0x50] sm:$0xff]   ;;  %s2013_s12 = smov 96   ;;  %s2014_s13 = smov 112  }
  0x1a   :  { %1736 = vmatpush3.bf16.msra.mxu0 %v1954_v9  ;;  %v1965_v28 = vld [vmem:[%s2509_s1 + $0x70] sm:$0xff]   ;;  %v1966_v31 = vld [vmem:[%s2509_s1 + $0x58] sm:$0xff]   ;;  %v1588_v36 = vld [vmem:[%s2510_s2] ss:$0 sm:$0xff] }
  0x1b   :  { %1748 = vmatpush3.bf16.msra.mxu1 %v1955_v10  ;;  %1737 = vmatprep.subr.bf16.mxu0 %v2007_v0  ;;  %v1967_v32 = vld [vmem:[%s2509_s1 + $0x78] sm:$0xff]   ;;  %v2180_v60 = vld [vmem:[%s2511_s3] sm:$0xff]   ;;  %v2188_v62 = vld [vmem:[%s2511_s3 + $0x8] sm:$0xff]  }
  0x1c   :  { %1749 = vmatprep.subr.bf16.mxu1 %v2007_v0  ;;  %v2198_v63 = vld [vmem:[%s2511_s3 + $0x10] sm:$0xff]  }
  0x1e   :  { %v97_v13 = vld [vmem:[#allocation2] sm:$0xff]  ;;  %v98_v14 = vld [vmem:[#allocation2 + $0x8] sm:$0xff]  ;;  %1738 = vmatpush3.bf16.msra.mxu0 %v1956_v11 }
  0x1f   :  { %v100_v15 = vld [vmem:[#allocation2 + $0x1] sm:$0xff]  ;;  %v99_v16 = vpack.c.bf16 %v98_v14, %v97_v13  ;;  %v101_v17 = vld [vmem:[#allocation2 + $0x9] sm:$0xff]  ;;  %1750 = vmatpush3.bf16.msra.mxu1 %v1957_v12  ;;  %1739 = vmatprep.subr.bf16.mxu0 %v2007_v0 }
  0x20   :  { %v102_v20 = vpack.c.bf16 %v101_v17, %v100_v15  ;;  %1751 = vmatprep.subr.bf16.mxu1 %v2007_v0  ;;  %v103_v29 = vld [vmem:[#allocation2 + $0x2] sm:$0xff]  ;;  %v104_v30 = vld [vmem:[#allocation2 + $0xa] sm:$0xff] }
  0x21   :  { %107 = vrot.lane.b32.xlu0 %v99_v16, %s2009_s10  ;;  %v105_v33 = vpack.c.bf16 %v104_v30, %v103_v29 }
  0x22   :  { %1740 = vmatpush3.bf16.msra.mxu0 %v1958_v18 }
  0x23   :  { %1752 = vmatpush3.bf16.msra.mxu1 %v1959_v19  ;;  %1757 = vmatprep.subr.bf16.mxu0 %v2007_v0 }
  0x24   :  { %1769 = vmatprep.subr.bf16.mxu1 %v2007_v0 }
  0x25   :  { %251 = vrot.lane.b32.xlu0 %v102_v20, %s2009_s10 }
  0x93   :  { %v108_v23 = vpop.permute.xlu0 %107 }
  0x94   :  { %v111_v24 = vsel %vm41_vm0, %v102_v20, %v108_v23 }
  0x95   :  { %1742 = vmatmul.mubr.msk.bf16.vlgmr.msra.gmra.mrb[0].mxu0 %vm46_vm5, %v111_v24  ;;  %1754 = vmatmul.mubr.msk.bf16.vlgmr.msra.gmra.mrb[0].mxu1 %vm46_vm5, %v111_v24 }
  0x96   :  { %1758 = vmatpush3.bf16.msra.mxu0 %v1960_v21  ;;  %1770 = vmatpush3.bf16.msra.mxu1 %v1961_v22 }
  0x97   :  { %1759 = vmatprep.subr.bf16.mxu0 %v2007_v0  ;;  %1771 = vmatprep.subr.bf16.mxu1 %v2007_v0  ;;  %v252_v34 = vpop.permute.xlu0 %251 }
  0x98   :  { %1765 = vmatprep.mubr.msk.bf16.mxu0 %vm2008_vm4, %v2007_v0  ;;  %1777 = vmatprep.mubr.msk.bf16.mxu1 %vm2008_vm4, %v2007_v0  ;;  %v255_v35 = vsel %vm41_vm0, %v105_v33, %v252_v34 }
  0x9a   :  { %1760 = vmatpush3.bf16.msra.mxu0 %v1962_v25  ;;  %1772 = vmatpush3.bf16.msra.mxu1 %v1963_v26 }
  0x9b   :  { %1761 = vmatprep.subr.bf16.mxu0 %v2007_v0  ;;  %1773 = vmatprep.subr.bf16.mxu1 %v2007_v0 }
  0x9e   :  { %1762 = vmatpush3.bf16.msra.mxu0 %v1964_v27  ;;  %1774 = vmatpush3.bf16.msra.mxu1 %v1965_v28 }
  0x9f   :  { %1763 = vmatprep.subr.bf16.mxu0 %v2007_v0  ;;  %1775 = vmatprep.subr.bf16.mxu1 %v2007_v0 }
  0xa2   :  { %1764 = vmatpush3.bf16.msra.mxu0 %v1966_v31  ;;  %1776 = vmatpush3.bf16.msra.mxu1 %v1967_v32 }
  0xa3   :  { %1791 = vmatprep.subr.bf16.mxu1 %v2007_v0  ;;  %1781 = vmatprep.subr.bf16.mxu0 %v2007_v0 }
  0xa5   :  { %1766 = vmatmul.mubr.msk.bf16.vlgmr.msra.gmra.mrb[4].mxu0 %vm46_vm5, %v255_v35  ;;  %1778 = vmatmul.mubr.msk.bf16.vlgmr.msra.gmra.mrb[4].mxu1 %vm46_vm5, %v255_v35 }
  0xa6   :  { %1797 = vmatprep.mubr.msk.bf16.mxu1 %vm2008_vm4, %v2007_v0  ;;  %1787 = vmatprep.mubr.msk.bf16.mxu0 %vm2008_vm4, %v2007_v0 }
  0xa7   :  { %1792 = vmatpush3.bf16.msra.mxu1 %v2180_v60  ;;  %1782 = vmatpush3.bf16.msra.mxu0 %v2180_v60 }
  0xa8   :  { %1793 = vmatprep.subr.bf16.mxu1 %v2007_v0  ;;  %1783 = vmatprep.subr.bf16.mxu0 %v2007_v0 }
  0xab   :  { %1794 = vmatpush3.bf16.msra.mxu1 %v2188_v62  ;;  %1784 = vmatpush3.bf16.msra.mxu0 %v2188_v62 }
  0xac   :  { %1795 = vmatprep.subr.bf16.mxu1 %v2007_v0  ;;  %1785 = vmatprep.subr.bf16.mxu0 %v2007_v0 }
  0xaf   :  { %1796 = vmatpush3.bf16.msra.mxu1 %v2198_v63  ;;  %1786 = vmatpush3.bf16.msra.mxu0 %v2198_v63 }
  0xb0   :  { %1811 = vmatprep.subr.bf16.mxu1 %v2007_v0  ;;  %1801 = vmatprep.subr.bf16.mxu0 %v2007_v0 }
 0x168   :  { %v178_v37 = vpop.f32.mrb[0].mxu0  ;;  %v243_v38 = vpop.f32.mrb[0].mxu1 }
 0x169   :  { %v179_v39 = vadd.f32 %v1588_v36, %v178_v37  ;;  %v244_v40 = vadd.f32 %v1588_v36, %v243_v38  ;;  %v1743_v41 = vpop.f32.mrb[1].mxu0  ;;  %v1755_v42 = vpop.f32.mrb[1].mxu1  ;;  %v1609_v38 = vld [vmem:[%s2512_s4] ss:$0 sm:$0xff] }
 0x16a   :  { %v181_v43 = vpop.f32.mrb[2].mxu0  ;;  %v246_v44 = vpop.f32.mrb[2].mxu1 }
 0x16b   :  { %v182_v45 = vadd.f32 %v1588_v36, %v181_v43  ;;  %390 = vrot.lane.b32.xlu1 %v244_v40, %s2010_s26  ;;  %v1744_v46 = vpop.f32.mrb[3].mxu0  ;;  %v1756_v47 = vpop.f32.mrb[3].mxu1  ;;  %v247_v48 = vadd.f32 %v1588_v36, %v246_v44 }
 0x16f   :  { %392 = vrot.lane.b32.xlu1 %v247_v48, %s2010_s26 }
 0x178   :  { %v316_v49 = vpop.f32.mrb[4].mxu0  ;;  %v381_v50 = vpop.f32.mrb[4].mxu1 }
 0x179   :  { %v317_v51 = vadd.f32 %v1588_v36, %v316_v49  ;;  %v1767_v52 = vpop.f32.mrb[5].mxu0  ;;  %v1779_v53 = vpop.f32.mrb[5].mxu1  ;;  %v382_v59 = vadd.f32 %v1588_v36, %v381_v50 }
 0x17a   :  { %v319_v54 = vpop.f32.mrb[6].mxu0  ;;  %v384_v55 = vpop.f32.mrb[6].mxu1  ;;  %v2266_v52 = vld [vmem:[#allocation6] sm:$0xff]  }
 0x17b   :  { %v320_v56 = vadd.f32 %v1588_v36, %v319_v54  ;;  %v1780_v57 = vpop.f32.mrb[7].mxu1  ;;  %398 = vrot.lane.b32.xlu0 %v317_v51, %s2009_s10  ;;  %v1768_v58 = vpop.f32.mrb[7].mxu0  ;;  %v385_v61 = vadd.f32 %v1588_v36, %v384_v55  ;;  %v2271_v55 = vld [vmem:[#allocation6 + $0x8] sm:$0xff]  }
 0x17d   :  { %400 = vrot.lane.b32.xlu1 %v320_v56, %s2009_s10 }
 0x17f   :  { %406 = vrot.lane.b32.xlu0 %v382_v59, %s2011_s28 }
 0x181   :  { %408 = vrot.lane.b32.xlu1 %v385_v61, %s2011_s28  ;;  %v2276_v61 = vld [vmem:[#allocation6 + $0x10] sm:$0xff]  }
 0x1dd   :  { %v391_v1 = vpop.permute.xlu1 %390 }
 0x1de   :  { %v413_v5 = vsel %vm412_vm7, %v179_v39, %v391_v1 }
 0x1e1   :  { %v393_v2 = vpop.permute.xlu1 %392 }
 0x1e2   :  { %v414_v8 = vsel %vm412_vm7, %v182_v45, %v393_v2 }
 0x1ed   :  { %v399_v3 = vpop.permute.xlu0 %398 }
 0x1ee   :  { %v415_v6 = vsel %vm41_vm0, %v413_v5, %v399_v3 }
 0x1ef   :  { %v401_v4 = vpop.permute.xlu1 %400 }
 0x1f0   :  { %v416_v10 = vsel %vm41_vm0, %v414_v8, %v401_v4 }
 0x1f1   :  { %v407_v7 = vpop.permute.xlu0 %406 }
 0x1f2   :  { %v418_v9 = vsel %vm417_vm8, %v415_v6, %v407_v7 }
 0x1f3   :  { %420 = vst.msk [vmem:[#allocation4] sm:$0xff] %vm46_vm5, %v418_v9  ;;  %v409_v11 = vpop.permute.xlu1 %408 }
 0x1f4   :  { %v419_v12 = vsel %vm417_vm8, %v416_v10, %v409_v11 }
 0x1f5   :  { %421 = vst.msk [vmem:[#allocation4 + $0x8] sm:$0xff] %vm46_vm5, %v419_v12 }
 0x1fa   :  { %v422_v13 = vld [vmem:[#allocation4] sm:$0xff] }
 0x1fb   :  { %424 = vst.msk [vmem:[#allocation5] sm:$0xff] %vm46_vm5, %v422_v13 }
 0x1fc   :  { %v423_v14 = vld [vmem:[#allocation4 + $0x8] sm:$0xff] }
 0x1fd   :  { %425 = vst.msk [vmem:[#allocation5 + $0x8] sm:$0xff] %vm46_vm5, %v423_v14 }
 0x202   :  { %v2217_v15 = vld [vmem:[#allocation5] sm:$0xff] }
 0x203   :  { %vm442_vm9 = vcmp.ge.f32.partialorder %v2217_v15, 0.0  ;;  %v444_v16 = vmul.f32 0.1, %v2217_v15 }
 0x204   :  { %v2221_v17 = vld [vmem:[#allocation5 + $0x8] sm:$0xff] }
 0x205   :  { %vm443_vm10 = vcmp.ge.f32.partialorder %v2221_v17, 0.0  ;;  %v445_v18 = vmul.f32 0.1, %v2221_v17  ;;  %v446_v19 = vsel %vm442_vm9, %v2217_v15, %v444_v16 }
 0x206   :  { %448 = vst.msk [vmem:[#allocation3 + $0x1] sm:$0xff] %vm46_vm5, %v446_v19 }
 0x207   :  { %v447_v20 = vsel %vm443_vm10, %v2221_v17, %v445_v18 }
 0x208   :  { %449 = vst.msk [vmem:[#allocation3 + $0x9] sm:$0xff] %vm46_vm5, %v447_v20 }
 0x20d   :  { %v453_v21 = vld [vmem:[#allocation3 + $0x1] sm:$0xff] }
 0x20e   :  { %v450_v23 = vld [vmem:[#allocation3] sm:$0xff] }
 0x20f   :  { %v454_v22 = vld [vmem:[#allocation3 + $0x9] sm:$0xff] }
 0x210   :  { %v451_v24 = vld [vmem:[#allocation3 + $0x8] sm:$0xff]  ;;  %v455_v25 = vpack.c.bf16 %v454_v22, %v453_v21 }
 0x211   :  { %v452_v26 = vpack.c.bf16 %v451_v24, %v450_v23  ;;  %v456_v27 = vld [vmem:[#allocation3 + $0x2] sm:$0xff]  ;;  %v457_v28 = vld [vmem:[#allocation3 + $0xa] sm:$0xff] }
 0x212   :  { %463 = vrot.lane.b32.xlu1 %v455_v25, %s2010_s26  ;;  %1798 = vmatmul.mubr.msk.bf16.vlgmr.msra.gmra.mrb[8].mxu1 %vm417_vm8, %v455_v25  ;;  %v458_v29 = vpack.c.bf16 %v457_v28, %v456_v27 }
 0x213   :  { %460 = vrot.lane.b32.xlu0 %v452_v26, %s2012_s11  ;;  %1812 = vmatpush3.bf16.msra.mxu1 %v2180_v60 }
 0x214   :  { %1813 = vmatprep.subr.bf16.mxu1 %v2007_v0  ;;  %1817 = vmatprep.mubr.msk.bf16.mxu1 %vm2008_vm4, %v2007_v0 }
 0x216   :  { %628 = vrot.lane.b32.xlu1 %v455_v25, %s2013_s12 }
 0x217   :  { %581 = vrot.lane.b32.xlu0 %v455_v25, %s2014_s13  ;;  %1814 = vmatpush3.bf16.msra.mxu1 %v2188_v62 }
 0x218   :  { %1815 = vmatprep.subr.bf16.mxu1 %v2007_v0 }
 0x21b   :  { %631 = vrot.lane.b32.xlu0 %v458_v29, %s2009_s10  ;;  %1816 = vmatpush3.bf16.msra.mxu1 %v2198_v63 }
 0x21c   :  { %1831 = vmatprep.subr.bf16.mxu1 %v2007_v0 }
 0x284   :  { %v464_v30 = vpop.permute.xlu1 %463 }
 0x285   :  { %v461_v31 = vpop.permute.xlu0 %460 }
 0x286   :  { %v467_v32 = vsel %vm412_vm7, %v461_v31, %v464_v30 }
 0x287   :  { %v468_v33 = vsel %vm41_vm0, %v467_v32, %v464_v30 }
 0x288   :  { %1788 = vmatmul.mubr.msk.bf16.vlgmr.msra.gmra.mrb[8].mxu0 %vm417_vm8, %v468_v33  ;;  %v629_v35 = vpop.permute.xlu1 %628 }
 0x289   :  { %1802 = vmatpush3.bf16.msra.mxu0 %v2180_v60  ;;  %v582_v34 = vpop.permute.xlu0 %581  ;;  %1807 = vmatprep.mubr.msk.bf16.mxu0 %vm2008_vm4, %v2007_v0 }
 0x28a   :  { %1803 = vmatprep.subr.bf16.mxu0 %v2007_v0 }
 0x28d   :  { %1804 = vmatpush3.bf16.msra.mxu0 %v2188_v62  ;;  %v632_v36 = vpop.permute.xlu0 %631 }
 0x28e   :  { %v635_v37 = vsel %vm41_vm0, %v629_v35, %v632_v36  ;;  %1805 = vmatprep.subr.bf16.mxu0 %v2007_v0 }
 0x28f   :  { %1818 = vmatmul.mubr.msk.bf16.vlgmr.msra.gmra.mrb[12].mxu1 %vm417_vm8, %v635_v37 }
 0x290   :  { %1837 = vmatprep.mubr.msk.bf16.mxu1 %vm2008_vm4, %v2007_v0  ;;  %1832 = vmatpush3.bf16.msra.mxu1 %v2266_v52 }
 0x291   :  { %1806 = vmatpush3.bf16.msra.mxu0 %v2198_v63  ;;  %1833 = vmatprep.subr.bf16.mxu1 %v2007_v0 }
 0x292   :  { %1821 = vmatprep.subr.bf16.mxu0 %v2007_v0 }
 0x294   :  { %1808 = vmatmul.mubr.msk.bf16.vlgmr.msra.gmra.mrb[12].mxu0 %vm417_vm8, %v582_v34  ;;  %1834 = vmatpush3.bf16.msra.mxu1 %v2271_v55 }
 0x295   :  { %1827 = vmatprep.mubr.msk.bf16.mxu0 %vm2008_vm4, %v2007_v0  ;;  %1822 = vmatpush3.bf16.msra.mxu0 %v2266_v52 }
 0x296   :  { %1823 = vmatprep.subr.bf16.mxu0 %v2007_v0  ;;  %1835 = vmatprep.subr.bf16.mxu1 %v2007_v0 }
 0x298   :  { %1836 = vmatpush3.bf16.msra.mxu1 %v2276_v61 }
 0x299   :  { %1824 = vmatpush3.bf16.msra.mxu0 %v2271_v55  ;;  %1851 = vmatprep.subr.bf16.mxu1 %v2007_v0 }
 0x29a   :  { %1825 = vmatprep.subr.bf16.mxu0 %v2007_v0 }
 0x29d   :  { %1826 = vmatpush3.bf16.msra.mxu0 %v2276_v61 }
 0x29e   :  { %1841 = vmatprep.subr.bf16.mxu0 %v2007_v0 }
 0x2e5   :  { %v574_v39 = vpop.f32.mrb[8].mxu1 }
 0x2e6   :  { %v575_v40 = vadd.f32 %v1609_v38, %v574_v39  ;;  %v1799_v41 = vpop.f32.mrb[9].mxu1 }
 0x2e7   :  { %v577_v42 = vpop.f32.mrb[10].mxu1 }
 0x2e8   :  { %v578_v43 = vadd.f32 %v1609_v38, %v577_v42  ;;  %681 = vrot.lane.b32.xlu1 %v575_v40, %s2010_s26  ;;  %v1800_v44 = vpop.f32.mrb[11].mxu1 }
 0x2ea   :  { %683 = vrot.lane.b32.xlu0 %v578_v43, %s2010_s26 }
 0x35a   :  { %v682_v1 = vpop.permute.xlu1 %681 }
 0x35b   :  { %v529_v45 = vpop.f32.mrb[8].mxu0 }
 0x35c   :  { %v1789_v46 = vpop.f32.mrb[9].mxu0  ;;  %v684_v2 = vpop.permute.xlu0 %683  ;;  %v530_v3 = vadd.f32 %v1609_v38, %v529_v45 }
 0x35d   :  { %v532_v47 = vpop.f32.mrb[10].mxu0 }
 0x35e   :  { %v1790_v48 = vpop.f32.mrb[11].mxu0  ;;  %v533_v5 = vadd.f32 %v1609_v38, %v532_v47  ;;  %v703_v7 = vsel %vm412_vm7, %v530_v3, %v682_v1 }
 0x360   :  { %v704_v10 = vsel %vm412_vm7, %v533_v5, %v684_v2 }
 0x362   :  { %v672_v49 = vpop.f32.mrb[12].mxu1 }
 0x363   :  { %v1819_v50 = vpop.f32.mrb[13].mxu1  ;;  %v673_v62 = vadd.f32 %v1609_v38, %v672_v49 }
 0x364   :  { %v675_v51 = vpop.f32.mrb[14].mxu1 }
 0x365   :  { %v1820_v53 = vpop.f32.mrb[15].mxu1  ;;  %v676_v63 = vadd.f32 %v1609_v38, %v675_v51 }
 0x367   :  { %v621_v54 = vpop.f32.mrb[12].mxu0 }
 0x368   :  { %v622_v56 = vadd.f32 %v1609_v38, %v621_v54  ;;  %v1809_v57 = vpop.f32.mrb[13].mxu0 }
 0x369   :  { %v624_v58 = vpop.f32.mrb[14].mxu0 }
 0x36a   :  { %v625_v59 = vadd.f32 %v1609_v38, %v624_v58  ;;  %689 = vrot.lane.b32.xlu1 %v622_v56, %s2009_s10  ;;  %v1810_v60 = vpop.f32.mrb[15].mxu0  ;;  %v1617_v38 = vld [vmem:[%s2514_s6] ss:$0 sm:$0xff] }
 0x36c   :  { %691 = vrot.lane.b32.xlu0 %v625_v59, %s2009_s10 }
 0x36e   :  { %697 = vrot.lane.b32.xlu1 %v673_v62, %s2011_s28  ;;  %v2346_v62 = vld [vmem:[%s2511_s3 + $0x20] sm:$0xff]  }
 0x370   :  { %699 = vrot.lane.b32.xlu0 %v676_v63, %s2011_s28 }
 0x3dc   :  { %v690_v4 = vpop.permute.xlu1 %689 }
 0x3dd   :  { %v705_v8 = vsel %vm41_vm0, %v703_v7, %v690_v4 }
 0x3de   :  { %v692_v6 = vpop.permute.xlu0 %691 }
 0x3df   :  { %v706_v12 = vsel %vm41_vm0, %v704_v10, %v692_v6 }
 0x3e0   :  { %v698_v9 = vpop.permute.xlu1 %697 }
 0x3e1   :  { %v707_v11 = vsel %vm417_vm8, %v705_v8, %v698_v9 }
 0x3e2   :  { %vm709_vm11 = vcmp.ge.f32.partialorder %v707_v11, 0.0  ;;  %v711_v13 = vmul.f32 0.1, %v707_v11  ;;  %v700_v14 = vpop.permute.xlu0 %699 }
 0x3e3   :  { %v708_v16 = vsel %vm417_vm8, %v706_v12, %v700_v14 }
 0x3e4   :  { %v713_v18 = vsel %vm709_vm11, %v707_v11, %v711_v13  ;;  %vm710_vm12 = vcmp.ge.f32.partialorder %v708_v16, 0.0  ;;  %v712_v19 = vmul.f32 0.1, %v708_v16 }
 0x3e5   :  { %715 = vst.msk [vmem:[#allocation3 + $0x1] sm:$0xff] %vm46_vm5, %v713_v18 }
 0x3e6   :  { %v714_v20 = vsel %vm710_vm12, %v708_v16, %v712_v19 }
 0x3e7   :  { %716 = vst.msk [vmem:[#allocation3 + $0x9] sm:$0xff] %vm46_vm5, %v714_v20 }
 0x3ec   :  { %v720_v21 = vld [vmem:[#allocation3 + $0x1] sm:$0xff] }
 0x3ed   :  { %v717_v23 = vld [vmem:[#allocation3] sm:$0xff] }
 0x3ee   :  { %v721_v22 = vld [vmem:[#allocation3 + $0x9] sm:$0xff] }
 0x3ef   :  { %v718_v24 = vld [vmem:[#allocation3 + $0x8] sm:$0xff]  ;;  %v722_v25 = vpack.c.bf16 %v721_v22, %v720_v21 }
 0x3f0   :  { %v719_v26 = vpack.c.bf16 %v718_v24, %v717_v23  ;;  %v723_v27 = vld [vmem:[#allocation3 + $0x2] sm:$0xff]  ;;  %v724_v28 = vld [vmem:[#allocation3 + $0xa] sm:$0xff] }
 0x3f1   :  { %730 = vrot.lane.b32.xlu0 %v722_v25, %s2010_s26  ;;  %1838 = vmatmul.mubr.msk.bf16.vlgmr.msra.gmra.mrb[16].mxu1 %vm417_vm8, %v722_v25  ;;  %v725_v29 = vpack.c.bf16 %v724_v28, %v723_v27 }
 0x3f2   :  { %727 = vrot.lane.b32.xlu1 %v719_v26, %s2012_s11  ;;  %1852 = vmatpush3.bf16.msra.mxu1 %v2266_v52 }
 0x3f3   :  { %1853 = vmatprep.subr.bf16.mxu1 %v2007_v0  ;;  %1857 = vmatprep.mubr.msk.bf16.mxu1 %vm2008_vm4, %v2007_v0 }
 0x3f5   :  { %895 = vrot.lane.b32.xlu0 %v722_v25, %s2013_s12 }
 0x3f6   :  { %848 = vrot.lane.b32.xlu1 %v722_v25, %s2014_s13  ;;  %1854 = vmatpush3.bf16.msra.mxu1 %v2271_v55 }
 0x3f7   :  { %1855 = vmatprep.subr.bf16.mxu1 %v2007_v0 }
 0x3fa   :  { %898 = vrot.lane.b32.xlu1 %v725_v29, %s2009_s10  ;;  %1856 = vmatpush3.bf16.msra.mxu1 %v2276_v61 }
 0x3fb   :  { %1871 = vmatprep.subr.bf16.mxu1 %v2007_v0 }
 0x463   :  { %v731_v30 = vpop.permute.xlu0 %730 }
 0x464   :  { %v728_v31 = vpop.permute.xlu1 %727 }
 0x465   :  { %v734_v32 = vsel %vm412_vm7, %v728_v31, %v731_v30 }
 0x466   :  { %v735_v33 = vsel %vm41_vm0, %v734_v32, %v731_v30 }
 0x467   :  { %1828 = vmatmul.mubr.msk.bf16.vlgmr.msra.gmra.mrb[16].mxu0 %vm417_vm8, %v735_v33  ;;  %v896_v35 = vpop.permute.xlu0 %895 }
 0x468   :  { %1842 = vmatpush3.bf16.msra.mxu0 %v2266_v52  ;;  %v849_v34 = vpop.permute.xlu1 %848  ;;  %1847 = vmatprep.mubr.msk.bf16.mxu0 %vm2008_vm4, %v2007_v0 }
 0x469   :  { %1843 = vmatprep.subr.bf16.mxu0 %v2007_v0 }
 0x46c   :  { %1844 = vmatpush3.bf16.msra.mxu0 %v2271_v55  ;;  %v899_v36 = vpop.permute.xlu1 %898 }
 0x46d   :  { %v902_v37 = vsel %vm41_vm0, %v896_v35, %v899_v36  ;;  %1845 = vmatprep.subr.bf16.mxu0 %v2007_v0 }
 0x46e   :  { %1858 = vmatmul.mubr.msk.bf16.vlgmr.msra.gmra.mrb[20].mxu1 %vm417_vm8, %v902_v37 }
 0x46f   :  { %1877 = vmatprep.mubr.msk.bf16.mxu1 %vm2008_vm4, %v2007_v0 }
 0x470   :  { %1846 = vmatpush3.bf16.msra.mxu0 %v2276_v61  ;;  %v2340_v61 = vld [vmem:[%s2511_s3 + $0x18] sm:$0xff]  }
 0x471   :  { %1861 = vmatprep.subr.bf16.mxu0 %v2007_v0  ;;  %1872 = vmatpush3.bf16.msra.mxu1 %v2340_v61 }
 0x472   :  { %1873 = vmatprep.subr.bf16.mxu1 %v2007_v0 }
 0x473   :  { %1848 = vmatmul.mubr.msk.bf16.vlgmr.msra.gmra.mrb[20].mxu0 %vm417_vm8, %v849_v34 }
 0x474   :  { %1867 = vmatprep.mubr.msk.bf16.mxu0 %vm2008_vm4, %v2007_v0  ;;  %1862 = vmatpush3.bf16.msra.mxu0 %v2340_v61 }
 0x475   :  { %1863 = vmatprep.subr.bf16.mxu0 %v2007_v0  ;;  %1874 = vmatpush3.bf16.msra.mxu1 %v2346_v62 }
 0x476   :  { %1875 = vmatprep.subr.bf16.mxu1 %v2007_v0 }
 0x478   :  { %1864 = vmatpush3.bf16.msra.mxu0 %v2346_v62 }
 0x479   :  { %1865 = vmatprep.subr.bf16.mxu0 %v2007_v0 }
 0x4c4   :  { %v841_v39 = vpop.f32.mrb[16].mxu1 }
 0x4c5   :  { %v842_v40 = vadd.f32 %v1617_v38, %v841_v39  ;;  %v1839_v41 = vpop.f32.mrb[17].mxu1 }
 0x4c6   :  { %v844_v42 = vpop.f32.mrb[18].mxu1 }
 0x4c7   :  { %v845_v43 = vadd.f32 %v1617_v38, %v844_v42  ;;  %948 = vrot.lane.b32.xlu0 %v842_v40, %s2010_s26  ;;  %v1840_v44 = vpop.f32.mrb[19].mxu1 }
 0x4c9   :  { %950 = vrot.lane.b32.xlu1 %v845_v43, %s2010_s26 }
 0x539   :  { %v949_v63 = vpop.permute.xlu0 %948 }
 0x53a   :  { %v796_v45 = vpop.f32.mrb[16].mxu0 }
 0x53b   :  { %v1829_v46 = vpop.f32.mrb[17].mxu0  ;;  %v951_v1 = vpop.permute.xlu1 %950  ;;  %v797_v2 = vadd.f32 %v1617_v38, %v796_v45 }
 0x53c   :  { %v799_v47 = vpop.f32.mrb[18].mxu0 }
 0x53d   :  { %v1830_v48 = vpop.f32.mrb[19].mxu0  ;;  %v800_v4 = vadd.f32 %v1617_v38, %v799_v47  ;;  %v970_v6 = vsel %vm412_vm7, %v797_v2, %v949_v63  ;;  %v2430_v63 = vld [vmem:[#allocation6 + $0x20] sm:$0xff]  }
 0x53e   :  { %v1633_v48 = vld [vmem:[%s2512_s4 + $0x1] ss:$0 sm:$0xff] }
 0x53f   :  { %v971_v9 = vsel %vm412_vm7, %v800_v4, %v951_v1 }
 0x541   :  { %v939_v49 = vpop.f32.mrb[20].mxu1 }
 0x542   :  { %v1859_v50 = vpop.f32.mrb[21].mxu1  ;;  %v940_v59 = vadd.f32 %v1617_v38, %v939_v49 }
 0x543   :  { %v942_v51 = vpop.f32.mrb[22].mxu1 }
 0x544   :  { %v1860_v52 = vpop.f32.mrb[23].mxu1  ;;  %v943_v60 = vadd.f32 %v1617_v38, %v942_v51 }
 0x546   :  { %v888_v53 = vpop.f32.mrb[20].mxu0 }
 0x547   :  { %v889_v54 = vadd.f32 %v1617_v38, %v888_v53  ;;  %v1849_v55 = vpop.f32.mrb[21].mxu0 }
 0x548   :  { %v891_v56 = vpop.f32.mrb[22].mxu0 }
 0x549   :  { %v892_v57 = vadd.f32 %v1617_v38, %v891_v56  ;;  %956 = vrot.lane.b32.xlu0 %v889_v54, %s2009_s10  ;;  %v1850_v58 = vpop.f32.mrb[23].mxu0 }
 0x54b   :  { %958 = vrot.lane.b32.xlu1 %v892_v57, %s2009_s10 }
 0x54d   :  { %964 = vrot.lane.b32.xlu0 %v940_v59, %s2011_s28 }
 0x54f   :  { %966 = vrot.lane.b32.xlu1 %v943_v60, %s2011_s28 }
 0x5bb   :  { %v957_v3 = vpop.permute.xlu0 %956 }
 0x5bc   :  { %v972_v7 = vsel %vm41_vm0, %v970_v6, %v957_v3  ;;  %v2435_v6 = vld [vmem:[#allocation6 + $0x28] sm:$0xff]  }
 0x5bd   :  { %v959_v5 = vpop.permute.xlu1 %958 }
 0x5be   :  { %v973_v11 = vsel %vm41_vm0, %v971_v9, %v959_v5 }
 0x5bf   :  { %v965_v8 = vpop.permute.xlu0 %964 }
 0x5c0   :  { %v974_v10 = vsel %vm417_vm8, %v972_v7, %v965_v8 }
 0x5c1   :  { %v978_v12 = vadd.f32 %v974_v10, %v2217_v15  ;;  %v967_v13 = vpop.permute.xlu1 %966 }
 0x5c2   :  { %v975_v14 = vsel %vm417_vm8, %v973_v11, %v967_v13 }
 0x5c3   :  { %980 = vst.msk [vmem:[#allocation5] sm:$0xff] %vm46_vm5, %v978_v12  ;;  %v979_v16 = vadd.f32 %v975_v14, %v2221_v17  ;;  %v1976_v17 = vld [vmem:[%s2511_s3 + $0x28] sm:$0xff]  }
 0x5c4   :  { %1866 = vmatpush3.bf16.msra.mxu0 %v1976_v17  ;;  %1876 = vmatpush3.bf16.msra.mxu1 %v1976_v17 }
 0x5c5   :  { %981 = vst.msk [vmem:[#allocation5 + $0x8] sm:$0xff] %vm46_vm5, %v979_v16  ;;  %1881 = vmatprep.subr.bf16.mxu0 %v2007_v0  ;;  %1891 = vmatprep.subr.bf16.mxu1 %v2007_v0 }
 0x5ca   :  { %v2365_v18 = vld [vmem:[#allocation5] sm:$0xff] }
 0x5cb   :  { %vm1002_vm13 = vcmp.ge.f32.partialorder %v2365_v18, 0.0  ;;  %v1004_v19 = vmul.f32 0.1, %v2365_v18 }
 0x5cc   :  { %v2369_v20 = vld [vmem:[#allocation5 + $0x8] sm:$0xff] }
 0x5cd   :  { %v1006_v21 = vsel %vm1002_vm13, %v2365_v18, %v1004_v19  ;;  %vm1003_vm14 = vcmp.ge.f32.partialorder %v2369_v20, 0.0  ;;  %v1005_v15 = vmul.f32 0.1, %v2369_v20 }
 0x5ce   :  { %1008 = vst.msk [vmem:[#allocation3 + $0x1] sm:$0xff] %vm46_vm5, %v1006_v21 }
 0x5cf   :  { %v1007_v22 = vsel %vm1003_vm14, %v2369_v20, %v1005_v15 }
 0x5d0   :  { %1009 = vst.msk [vmem:[#allocation3 + $0x9] sm:$0xff] %vm46_vm5, %v1007_v22 }
 0x5d5   :  { %v1013_v23 = vld [vmem:[#allocation3 + $0x1] sm:$0xff] }
 0x5d6   :  { %v1010_v25 = vld [vmem:[#allocation3] sm:$0xff] }
 0x5d7   :  { %v1014_v24 = vld [vmem:[#allocation3 + $0x9] sm:$0xff] }
 0x5d8   :  { %v1011_v26 = vld [vmem:[#allocation3 + $0x8] sm:$0xff]  ;;  %v1015_v27 = vpack.c.bf16 %v1014_v24, %v1013_v23 }
 0x5d9   :  { %v1012_v28 = vpack.c.bf16 %v1011_v26, %v1010_v25  ;;  %v1016_v29 = vld [vmem:[#allocation3 + $0x2] sm:$0xff]  ;;  %v1017_v30 = vld [vmem:[#allocation3 + $0xa] sm:$0xff] }
 0x5da   :  { %1023 = vrot.lane.b32.xlu1 %v1015_v27, %s2010_s26  ;;  %v1018_v31 = vpack.c.bf16 %v1017_v30, %v1016_v29 }
 0x5db   :  { %1020 = vrot.lane.b32.xlu0 %v1012_v28, %s2014_s13 }
 0x5de   :  { %1099 = vrot.lane.b32.xlu1 %v1012_v28, %s2013_s12 }
 0x5df   :  { %1025 = vrot.lane.b32.xlu0 %v1015_v27, %s2014_s13 }
 0x5e2   :  { %1152 = vrot.lane.b32.xlu1 %v1012_v28, %s2012_s11 }
 0x5e3   :  { %1102 = vrot.lane.b32.xlu0 %v1018_v31, %s2009_s10 }
 0x5e6   :  { %1203 = vrot.lane.b32.xlu1 %v1015_v27, %s2013_s12 }
 0x5e7   :  { %1154 = vrot.lane.b32.xlu0 %v1018_v31, %s2010_s26 }
 0x64c   :  { %v1024_v32 = vpop.permute.xlu1 %1023 }
 0x64d   :  { %v1021_v33 = vpop.permute.xlu0 %1020 }
 0x64e   :  { %v1029_v34 = vsel %vm412_vm7, %v1021_v33, %v1024_v32 }
 0x650   :  { %v1100_v35 = vpop.permute.xlu1 %1099 }
 0x651   :  { %v1026_v36 = vpop.permute.xlu0 %1025  ;;  %v1106_v38 = vsel %vm412_vm7, %v1100_v35, %v1015_v27 }
 0x652   :  { %v1031_v37 = vsel %vm41_vm0, %v1029_v34, %v1026_v36 }
 0x653   :  { %1868 = vmatmul.mubr.msk.bf16.vlgmr.msra.gmra.mrb[24].mxu0 %vm417_vm8, %v1031_v37 }
 0x654   :  { %1882 = vmatpush3.bf16.msra.mxu0 %v2340_v61  ;;  %1887 = vmatprep.mubr.msk.bf16.mxu0 %vm2008_vm4, %v2007_v0  ;;  %v1153_v40 = vpop.permute.xlu1 %1152 }
 0x655   :  { %v1103_v39 = vpop.permute.xlu0 %1102  ;;  %1883 = vmatprep.subr.bf16.mxu0 %v2007_v0  ;;  %v1157_v44 = vsel %vm412_vm7, %v1153_v40, %v1026_v36 }
 0x656   :  { %v1108_v41 = vsel %vm41_vm0, %v1106_v38, %v1103_v39 }
 0x657   :  { %1878 = vmatmul.mubr.msk.bf16.vlgmr.msra.gmra.mrb[24].mxu1 %vm417_vm8, %v1108_v41 }
 0x658   :  { %1884 = vmatpush3.bf16.msra.mxu0 %v2346_v62  ;;  %1892 = vmatpush3.bf16.msra.mxu1 %v2340_v61  ;;  %v1204_v43 = vpop.permute.xlu1 %1203  ;;  %v2425_v61 = vld [vmem:[#allocation6 + $0x18] sm:$0xff]  }
 0x659   :  { %1885 = vmatprep.subr.bf16.mxu0 %v2007_v0  ;;  %1893 = vmatprep.subr.bf16.mxu1 %v2007_v0  ;;  %v1155_v42 = vpop.permute.xlu0 %1154  ;;  %v1206_v46 = vsel %vm412_vm7, %v1015_v27, %v1204_v43 }
 0x65a   :  { %1897 = vmatprep.mubr.msk.bf16.mxu1 %vm2008_vm4, %v2007_v0  ;;  %v1159_v45 = vsel %vm41_vm0, %v1157_v44, %v1155_v42  ;;  %v1208_v47 = vsel %vm41_vm0, %v1206_v46, %v1018_v31 }
 0x65c   :  { %1886 = vmatpush3.bf16.msra.mxu0 %v1976_v17  ;;  %1894 = vmatpush3.bf16.msra.mxu1 %v2346_v62 }
 0x65d   :  { %1895 = vmatprep.subr.bf16.mxu1 %v2007_v0  ;;  %1901 = vmatprep.subr.bf16.mxu0 %v2007_v0 }
 0x65f   :  { %1888 = vmatmul.mubr.msk.bf16.vlgmr.msra.gmra.mrb[28].mxu0 %vm417_vm8, %v1159_v45 }
 0x660   :  { %1896 = vmatpush3.bf16.msra.mxu1 %v1976_v17  ;;  %1907 = vmatprep.mubr.msk.bf16.mxu0 %vm2008_vm4, %v2007_v0 }
 0x661   :  { %1911 = vmatprep.subr.bf16.mxu1 %v2007_v0  ;;  %1902 = vmatpush3.bf16.msra.mxu0 %v2425_v61 }
 0x662   :  { %1903 = vmatprep.subr.bf16.mxu0 %v2007_v0 }
 0x663   :  { %1898 = vmatmul.mubr.msk.bf16.vlgmr.msra.gmra.mrb[28].mxu1 %vm417_vm8, %v1208_v47 }
 0x664   :  { %1917 = vmatprep.mubr.msk.bf16.mxu1 %vm2008_vm4, %v2007_v0  ;;  %1912 = vmatpush3.bf16.msra.mxu1 %v2425_v61 }
 0x665   :  { %1913 = vmatprep.subr.bf16.mxu1 %v2007_v0  ;;  %1904 = vmatpush3.bf16.msra.mxu0 %v2430_v63 }
 0x666   :  { %1905 = vmatprep.subr.bf16.mxu0 %v2007_v0 }
 0x668   :  { %1914 = vmatpush3.bf16.msra.mxu1 %v2430_v63 }
 0x669   :  { %1915 = vmatprep.subr.bf16.mxu1 %v2007_v0  ;;  %1906 = vmatpush3.bf16.msra.mxu0 %v2435_v6 }
 0x66a   :  { %1921 = vmatprep.subr.bf16.mxu0 %v2007_v0 }
 0x66c   :  { %1916 = vmatpush3.bf16.msra.mxu1 %v2435_v6 }
 0x66d   :  { %1931 = vmatprep.subr.bf16.mxu1 %v2007_v0 }
 0x726   :  { %v1092_v49 = vpop.f32.mrb[24].mxu0 }
 0x727   :  { %v1093_v50 = vadd.f32 %v1633_v48, %v1092_v49  ;;  %v1869_v51 = vpop.f32.mrb[25].mxu0 }
 0x728   :  { %v1095_v52 = vpop.f32.mrb[26].mxu0 }
 0x729   :  { %v1096_v53 = vadd.f32 %v1633_v48, %v1095_v52  ;;  %v1870_v54 = vpop.f32.mrb[27].mxu0 }
 0x72a   :  { %v1145_v55 = vpop.f32.mrb[24].mxu1 }
 0x72b   :  { %v1146_v56 = vadd.f32 %v1633_v48, %v1145_v55  ;;  %v1879_v57 = vpop.f32.mrb[25].mxu1 }
 0x72c   :  { %v1148_v58 = vpop.f32.mrb[26].mxu1 }
 0x72d   :  { %v1149_v59 = vadd.f32 %v1633_v48, %v1148_v58  ;;  %1254 = vrot.lane.b32.xlu0 %v1146_v56, %s2010_s26  ;;  %v1880_v60 = vpop.f32.mrb[27].mxu1 }
 0x72f   :  { %1256 = vrot.lane.b32.xlu1 %v1149_v59, %s2010_s26 }
 0x732   :  { %v1196_v62 = vpop.f32.mrb[28].mxu0 }
 0x733   :  { %v1197_v1 = vadd.f32 %v1633_v48, %v1196_v62  ;;  %v1889_v2 = vpop.f32.mrb[29].mxu0 }
 0x734   :  { %v1199_v3 = vpop.f32.mrb[30].mxu0 }
 0x735   :  { %v1200_v4 = vadd.f32 %v1633_v48, %v1199_v3  ;;  %1262 = vrot.lane.b32.xlu0 %v1197_v1, %s2009_s10  ;;  %v1890_v5 = vpop.f32.mrb[31].mxu0 }
 0x736   :  { %v1245_v7 = vpop.f32.mrb[28].mxu1 }
 0x737   :  { %v1246_v8 = vadd.f32 %v1633_v48, %v1245_v7  ;;  %v1899_v9 = vpop.f32.mrb[29].mxu1  ;;  %1264 = vrot.lane.b32.xlu1 %v1200_v4, %s2009_s10 }
 0x738   :  { %v1248_v10 = vpop.f32.mrb[30].mxu1 }
 0x739   :  { %v1249_v11 = vadd.f32 %v1633_v48, %v1248_v10  ;;  %v1900_v12 = vpop.f32.mrb[31].mxu1  ;;  %1270 = vrot.lane.b32.xlu0 %v1246_v8, %s2011_s28  ;;  %v1641_v48 = vld [vmem:[%s2514_s6 + $0x1] ss:$0 sm:$0xff] }
 0x73b   :  { %1272 = vrot.lane.b32.xlu1 %v1249_v11, %s2011_s28 }
 0x79f   :  { %v1255_v13 = vpop.permute.xlu0 %1254 }
 0x7a0   :  { %v1276_v21 = vsel %vm412_vm7, %v1093_v50, %v1255_v13 }
 0x7a1   :  { %v1257_v14 = vpop.permute.xlu1 %1256 }
 0x7a2   :  { %v1277_v22 = vsel %vm412_vm7, %v1096_v53, %v1257_v14 }
 0x7a7   :  { %v1263_v16 = vpop.permute.xlu0 %1262 }
 0x7a8   :  { %v1278_v15 = vsel %vm41_vm0, %v1276_v21, %v1263_v16 }
 0x7a9   :  { %v1265_v19 = vpop.permute.xlu1 %1264 }
 0x7aa   :  { %v1279_v24 = vsel %vm41_vm0, %v1277_v22, %v1265_v19 }
 0x7ab   :  { %v1271_v17 = vpop.permute.xlu0 %1270 }
 0x7ac   :  { %v1280_v23 = vsel %vm417_vm8, %v1278_v15, %v1271_v17 }
 0x7ad   :  { %vm1282_vm15 = vcmp.ge.f32.partialorder %v1280_v23, 0.0  ;;  %v1284_v25 = vmul.f32 0.1, %v1280_v23  ;;  %v1273_v26 = vpop.permute.xlu1 %1272 }
 0x7ae   :  { %v1281_v27 = vsel %vm417_vm8, %v1279_v24, %v1273_v26 }
 0x7af   :  { %v1286_v28 = vsel %vm1282_vm15, %v1280_v23, %v1284_v25  ;;  %vm1283_vm1 = vcmp.ge.f32.partialorder %v1281_v27, 0.0  ;;  %v1285_v29 = vmul.f32 0.1, %v1281_v27 }
 0x7b0   :  { %1288 = vst.msk [vmem:[#allocation3 + $0x1] sm:$0xff] %vm46_vm5, %v1286_v28 }
 0x7b1   :  { %v1287_v30 = vsel %vm1283_vm1, %v1281_v27, %v1285_v29 }
 0x7b2   :  { %1289 = vst.msk [vmem:[#allocation3 + $0x9] sm:$0xff] %vm46_vm5, %v1287_v30 }
 0x7b7   :  { %v1293_v31 = vld [vmem:[#allocation3 + $0x1] sm:$0xff] }
 0x7b8   :  { %v1290_v33 = vld [vmem:[#allocation3] sm:$0xff] }
 0x7b9   :  { %v1294_v32 = vld [vmem:[#allocation3 + $0x9] sm:$0xff] }
 0x7ba   :  { %v1291_v34 = vld [vmem:[#allocation3 + $0x8] sm:$0xff]  ;;  %v1295_v35 = vpack.c.bf16 %v1294_v32, %v1293_v31 }
 0x7bb   :  { %v1292_v36 = vpack.c.bf16 %v1291_v34, %v1290_v33  ;;  %v1296_v37 = vld [vmem:[#allocation3 + $0x2] sm:$0xff]  ;;  %v1297_v38 = vld [vmem:[#allocation3 + $0xa] sm:$0xff] }
 0x7bc   :  { %1303 = vrot.lane.b32.xlu1 %v1295_v35, %s2010_s26  ;;  %1918 = vmatmul.mubr.msk.bf16.vlgmr.msra.gmra.mrb[32].mxu1 %vm417_vm8, %v1295_v35  ;;  %v1298_v39 = vpack.c.bf16 %v1297_v38, %v1296_v37 }
 0x7bd   :  { %1300 = vrot.lane.b32.xlu0 %v1292_v36, %s2012_s11  ;;  %1932 = vmatpush3.bf16.msra.mxu1 %v2425_v61 }
 0x7be   :  { %1933 = vmatprep.subr.bf16.mxu1 %v2007_v0  ;;  %1937 = vmatprep.mubr.msk.bf16.mxu1 %vm2008_vm4, %v2007_v0 }
 0x7c0   :  { %1468 = vrot.lane.b32.xlu1 %v1295_v35, %s2013_s12 }
 0x7c1   :  { %1421 = vrot.lane.b32.xlu0 %v1295_v35, %s2014_s13  ;;  %1934 = vmatpush3.bf16.msra.mxu1 %v2430_v63 }
 0x7c2   :  { %1935 = vmatprep.subr.bf16.mxu1 %v2007_v0 }
 0x7c5   :  { %1471 = vrot.lane.b32.xlu0 %v1298_v39, %s2009_s10  ;;  %1936 = vmatpush3.bf16.msra.mxu1 %v2435_v6 }
 0x82e   :  { %v1304_v40 = vpop.permute.xlu1 %1303 }
 0x82f   :  { %v1301_v41 = vpop.permute.xlu0 %1300 }
 0x830   :  { %v1307_v42 = vsel %vm412_vm7, %v1301_v41, %v1304_v40 }
 0x831   :  { %v1308_v43 = vsel %vm41_vm0, %v1307_v42, %v1304_v40 }
 0x832   :  { %1908 = vmatmul.mubr.msk.bf16.vlgmr.msra.gmra.mrb[32].mxu0 %vm417_vm8, %v1308_v43  ;;  %v1469_v45 = vpop.permute.xlu1 %1468 }
 0x833   :  { %1922 = vmatpush3.bf16.msra.mxu0 %v2425_v61  ;;  %v1422_v44 = vpop.permute.xlu0 %1421  ;;  %1927 = vmatprep.mubr.msk.bf16.mxu0 %vm2008_vm4, %v2007_v0 }
 0x834   :  { %1923 = vmatprep.subr.bf16.mxu0 %v2007_v0 }
 0x837   :  { %1924 = vmatpush3.bf16.msra.mxu0 %v2430_v63  ;;  %v1472_v46 = vpop.permute.xlu0 %1471 }
 0x838   :  { %v1475_v47 = vsel %vm41_vm0, %v1469_v45, %v1472_v46  ;;  %1925 = vmatprep.subr.bf16.mxu0 %v2007_v0 }
 0x839   :  { %1938 = vmatmul.mubr.msk.bf16.vlgmr.msra.gmra.mrb[36].mxu1 %vm417_vm8, %v1475_v47 }
 0x83b   :  { %1926 = vmatpush3.bf16.msra.mxu0 %v2435_v6 }
 0x83e   :  { %1928 = vmatmul.mubr.msk.bf16.vlgmr.msra.gmra.mrb[36].mxu0 %vm417_vm8, %v1422_v44 }
 0x88f   :  { %v1414_v49 = vpop.f32.mrb[32].mxu1 }
 0x890   :  { %v1415_v50 = vadd.f32 %v1641_v48, %v1414_v49  ;;  %v1919_v51 = vpop.f32.mrb[33].mxu1 }
 0x891   :  { %v1417_v52 = vpop.f32.mrb[34].mxu1 }
 0x892   :  { %v1418_v53 = vadd.f32 %v1641_v48, %v1417_v52  ;;  %1521 = vrot.lane.b32.xlu1 %v1415_v50, %s2010_s26  ;;  %v1920_v54 = vpop.f32.mrb[35].mxu1 }
 0x894   :  { %1523 = vrot.lane.b32.xlu0 %v1418_v53, %s2010_s26 }
 0x904   :  { %v1522_v7 = vpop.permute.xlu1 %1521 }
 0x905   :  { %v1369_v0 = vpop.f32.mrb[32].mxu0 }
 0x906   :  { %v1909_v55 = vpop.f32.mrb[33].mxu0  ;;  %v1524_v8 = vpop.permute.xlu0 %1523  ;;  %v1370_v9 = vadd.f32 %v1641_v48, %v1369_v0 }
 0x907   :  { %v1372_v56 = vpop.f32.mrb[34].mxu0 }
 0x908   :  { %v1910_v57 = vpop.f32.mrb[35].mxu0  ;;  %v1373_v11 = vadd.f32 %v1641_v48, %v1372_v56  ;;  %v1543_v13 = vsel %vm412_vm7, %v1370_v9, %v1522_v7 }
 0x90a   :  { %v1544_v19 = vsel %vm412_vm7, %v1373_v11, %v1524_v8 }
 0x90c   :  { %v1512_v58 = vpop.f32.mrb[36].mxu1 }
 0x90d   :  { %v1939_v59 = vpop.f32.mrb[37].mxu1  ;;  %v1513_v5 = vadd.f32 %v1641_v48, %v1512_v58 }
 0x90e   :  { %v1515_v60 = vpop.f32.mrb[38].mxu1 }
 0x90f   :  { %v1940_v61 = vpop.f32.mrb[39].mxu1  ;;  %v1516_v6 = vadd.f32 %v1641_v48, %v1515_v60 }
 0x911   :  { %v1461_v62 = vpop.f32.mrb[36].mxu0 }
 0x912   :  { %v1462_v63 = vadd.f32 %v1641_v48, %v1461_v62  ;;  %v1929_v1 = vpop.f32.mrb[37].mxu0 }
 0x913   :  { %v1464_v2 = vpop.f32.mrb[38].mxu0 }
 0x914   :  { %v1465_v3 = vadd.f32 %v1641_v48, %v1464_v2  ;;  %1529 = vrot.lane.b32.xlu1 %v1462_v63, %s2009_s10  ;;  %v1930_v4 = vpop.f32.mrb[39].mxu0 }
 0x916   :  { %1531 = vrot.lane.b32.xlu0 %v1465_v3, %s2009_s10 }
 0x918   :  { %1537 = vrot.lane.b32.xlu1 %v1513_v5, %s2011_s28 }
 0x91a   :  { %1539 = vrot.lane.b32.xlu0 %v1516_v6, %s2011_s28 }
 0x986   :  { %v1530_v10 = vpop.permute.xlu1 %1529 }
 0x987   :  { %v1545_v14 = vsel %vm41_vm0, %v1543_v13, %v1530_v10 }
 0x988   :  { %v1532_v12 = vpop.permute.xlu0 %1531 }
 0x989   :  { %v1546_v15 = vsel %vm41_vm0, %v1544_v19, %v1532_v12 }
 0x98a   :  { %v1538_v16 = vpop.permute.xlu1 %1537 }
 0x98b   :  { %v1547_v21 = vsel %vm417_vm8, %v1545_v14, %v1538_v16 }
 0x98c   :  { %v1551_v17 = vadd.f32 %v1547_v21, %v2365_v18  ;;  %v1540_v22 = vpop.permute.xlu0 %1539 }
 0x98d   :  { %v1548_v23 = vsel %vm417_vm8, %v1546_v15, %v1540_v22 }
 0x98e   :  { %1553 = vst.msk [vmem:[#allocation5] sm:$0xff] %vm46_vm5, %v1551_v17  ;;  %v1552_v24 = vadd.f32 %v1548_v23, %v2369_v20 }
 0x990   :  { %1554 = vst.msk [vmem:[#allocation5 + $0x8] sm:$0xff] %vm46_vm5, %v1552_v24 }
 0x995   :  { %v1555_v25 = vld [vmem:[#allocation5] sm:$0xff] }
 0x996   :  { %1557 = vst.msk [vmem:[%s2515_s7] sm:$0xff] %vm46_vm5, %v1555_v25 }
 0x997   :  { %v1556_v26 = vld [vmem:[#allocation5 + $0x8] sm:$0xff] }
 0x998   :  { %1558 = vst.msk [vmem:[%s2515_s7 + $0x8] sm:$0xff] %vm46_vm5, %v1556_v26 }
 0x999   :  { %1563 = vsyncpa [#allocation7], 1 }

// kernel: _lambda_.5
= control target key start
LH: loop header
LB: loop body
LE: loop exit
PB: predicated region body
PF: predicated region fallthrough
CT: control target
= control target key end

     0   :  { %vm35_vm0 = vcmask 523264   ;;  %vm38_vm1 = vcmask 517120   ;;  %v7256_v0 = vmov 0.0   ;;  %vm7257_vm4 = vmmov 0   ;;  %s7258_s20 = smov 96   ;;  %s7259_s21 = smov 16   ;;  %s8977_s0 = inlined_call_operand.vmem [shape: f32[16,64], index: 0, kind: input, shape index: {}]   ;;  %s8978_s1 = inlined_call_operand.vmem [shape: bf16[4,32,8], index: 1, kind: input, shape index: {}]   ;;  %s8979_s2 = inlined_call_operand.vmem [shape: f32[1,8], index: 2, kind: input, shape index: {}]   ;;  %s8980_s3 = inlined_call_operand.vmem [shape: bf16[2,24,8], index: 3, kind: input, shape index: {}]   ;;  %s8981_s4 = inlined_call_operand.vmem [shape: f32[2,1,8], index: 4, kind: input, shape index: {}]   ;;  %s8982_s5 = inlined_call_operand.vmem [shape: bf16[2,24,8], index: 5, kind: input, shape index: {}]   ;;  %s8983_s6 = inlined_call_operand.vmem [shape: f32[2,1,8], index: 6, kind: input, shape index: {}]   ;;  %s8984_s7 = inlined_call_operand.vmem [shape: bf16[56,1], index: 7, kind: input, shape index: {}]   ;;  %s8985_s8 = inlined_call_operand.<no memory space> [shape: f32[1,1], index: 8, kind: input, shape index: {}]   ;;  %s8986_s9 = inlined_call_operand.vmem [shape: f32[16,16], index: 9, kind: output, shape index: {}]  }
   0x1   :  { %36 = vst.msk [vmem:[#allocation2] sm:$0xff] %vm35_vm0, %v7256_v0  ;;  %37 = vst.msk [vmem:[#allocation2 + $0x8] sm:$0xff] %vm35_vm0, %v7256_v0  ;;  %v43_v1 = vld [vmem:[%s8977_s0] sm:$0xff]  ;;  %v44_v2 = vld [vmem:[%s8977_s0 + $0x8] sm:$0xff]  ;;  %6369 = vmatprep.subr.bf16.mxu0 %v7256_v0  ;;  %6377 = vmatprep.subr.bf16.mxu1 %v7256_v0  ;;  %s7260_s22 = smov 112   ;;  %s7261_s23 = smov 80  }
   0x2   :  { %39 = vst.msk [vmem:[#allocation2 + $0x10] sm:$0x3] %vm38_vm1, %v7256_v0  ;;  %40 = vst [vmem:[#allocation3] sm:$0xff] %v7256_v0  ;;  %vm45_vm2 = vcmp.ge.f32.partialorder %v43_v1, 0.0  ;;  %vm46_vm3 = vcmp.ge.f32.partialorder %v44_v2, 0.0  ;;  %v7356_v5 = vld [vmem:[%s8978_s1] sm:$0xff]   ;;  %6373 = vmatprep.mubr.msk.bf16.mxu0 %vm7257_vm4, %v7256_v0  ;;  %6381 = vmatprep.mubr.msk.bf16.mxu1 %vm7257_vm4, %v7256_v0 }
   0x3   :  { %41 = vst [vmem:[#allocation3 + $0x8] sm:$0xff] %v7256_v0  ;;  %42 = vst [vmem:[#allocation3 + $0x10] sm:$0x3] %v7256_v0  ;;  %v47_v3 = vmul.f32 0.1, %v43_v1  ;;  %v7361_v8 = vld [vmem:[%s8978_s1 + $0x10] sm:$0xff]   ;;  %6370 = vmatpush3.bf16.msra.mxu0 %v7356_v5 }
   0x4   :  { %v48_v4 = vmul.f32 0.1, %v44_v2  ;;  %v7373_v9 = vld [vmem:[%s8978_s1 + $0x8] sm:$0xff]   ;;  %6378 = vmatpush3.bf16.msra.mxu1 %v7361_v8  ;;  %6371 = vmatprep.subr.bf16.mxu0 %v7256_v0  ;;  %v7380_v10 = vld [vmem:[%s8978_s1 + $0x18] sm:$0xff]   ;;  %vm85_vm5 = vcmask 130048   ;;  %vm107_vm6 = vcmask 261120  }
   0x5   :  { %v49_v6 = vsel %vm45_vm2, %v43_v1, %v47_v3  ;;  %6379 = vmatprep.subr.bf16.mxu1 %v7256_v0  ;;  %v7395_v17 = vld [vmem:[%s8978_s1 + $0x20] sm:$0xff]   ;;  %v7400_v18 = vld [vmem:[%s8978_s1 + $0x30] sm:$0xff]   ;;  %v7410_v21 = vld [vmem:[%s8978_s1 + $0x28] sm:$0xff]   ;;  %s7262_s12 = smov 8   ;;  %s7264_s13 = smov 32   ;;  %vm8990_vm7 = vcmask 1043456  }
   0x6   :  { %v50_v7 = vsel %vm46_vm3, %v44_v2, %v48_v4  ;;  %51 = vst.msk [vmem:[#allocation2 + $0x1] sm:$0xff] %vm35_vm0, %v49_v6  ;;  %v7415_v22 = vld [vmem:[%s8978_s1 + $0x38] sm:$0xff]   ;;  %v7524_v34 = vld [vmem:[%s8979_s2] ss:$0 sm:$0xff]  ;;  %s7263_s2 = smov 24   ;;  %s7265_s14 = smov 40  }
   0x7   :  { %52 = vst.msk [vmem:[#allocation2 + $0x9] sm:$0xff] %vm35_vm0, %v50_v7  ;;  %6372 = vmatpush3.bf16.msra.mxu0 %v7373_v9  ;;  %s7266_s0 = smov 48   ;;  %s7267_s15 = smov 56   ;;  %vm948_vm8 = vcmask 64512   ;;  %vm953_vm9 = vcmask 195584   ;;  %vm8991_vm10 = vcmask 326656  }
   0x8   :  { %6380 = vmatpush3.bf16.msra.mxu1 %v7380_v10  ;;  %6385 = vmatprep.subr.bf16.mxu0 %v7256_v0  ;;  %s7268_s16 = smov 64   ;;  %s7269_s17 = smov 72   ;;  %vm961_vm11 = vcmask 392192   ;;  %vm8987_vm12 = vcmask 457728   ;;  %vm969_vm13 = vcmask 588800   ;;  %vm8988_vm14 = vcmask 654336  }
   0x9   :  { %6393 = vmatprep.subr.bf16.mxu1 %v7256_v0  ;;  %s7270_s18 = smov 88   ;;  %s7271_s27 = smov 104   ;;  %vm975_vm15 = vcmask 719872   ;;  %vm8989_vm1 = vcmask 785408   ;;  %vm981_vm2 = vcmask 850944   ;;  %vm984_vm3 = vcmask 916480  }
   0xa   :  { %s7272_s28 = smov 120  }
   0xd   :  { %v73_v11 = vld [vmem:[#allocation2] sm:$0xff] }
   0xe   :  { %v74_v12 = vld [vmem:[#allocation2 + $0x8] sm:$0xff] }
   0xf   :  { %v76_v13 = vld [vmem:[#allocation2 + $0x1] sm:$0xff]  ;;  %v75_v14 = vpack.c.bf16 %v74_v12, %v73_v11  ;;  %v77_v15 = vld [vmem:[#allocation2 + $0x9] sm:$0xff] }
  0x10   :  { %v78_v16 = vpack.c.bf16 %v77_v15, %v76_v13  ;;  %v79_v30 = vld [vmem:[#allocation2 + $0x2] sm:$0xff]  ;;  %v80_v31 = vld [vmem:[#allocation2 + $0xa] sm:$0xff] }
  0x11   :  { %83 = vrot.lane.b32.xlu0 %v75_v14, %s7258_s20  ;;  %v81_v32 = vpack.c.bf16 %v80_v31, %v79_v30 }
  0x12   :  { %207 = vrot.lane.b32.xlu1 %v78_v16, %s7259_s21 }
  0x15   :  { %205 = vrot.lane.b32.xlu0 %v78_v16, %s7260_s22 }
  0x16   :  { %402 = vrot.lane.b32.xlu1 %v78_v16, %s7258_s20 }
  0x19   :  { %572 = vrot.lane.b32.xlu0 %v78_v16, %s7261_s23 }
  0x83   :  { %v84_v19 = vpop.permute.xlu0 %83 }
  0x84   :  { %v88_v20 = vsel %vm85_vm5, %v78_v16, %v84_v19  ;;  %v208_v23 = vpop.permute.xlu1 %207 }
  0x85   :  { %6374 = vmatmul.mubr.msk.bf16.vlgmr.msra.gmra.mrb[0].mxu0 %vm107_vm6, %v88_v20  ;;  %6382 = vmatmul.mubr.msk.bf16.vlgmr.msra.gmra.mrb[0].mxu1 %vm107_vm6, %v88_v20 }
  0x86   :  { %6386 = vmatpush3.bf16.msra.mxu0 %v7395_v17  ;;  %6394 = vmatpush3.bf16.msra.mxu1 %v7400_v18 }
  0x87   :  { %6387 = vmatprep.subr.bf16.mxu0 %v7256_v0  ;;  %6395 = vmatprep.subr.bf16.mxu1 %v7256_v0  ;;  %v206_v24 = vpop.permute.xlu0 %205 }
  0x88   :  { %6389 = vmatprep.mubr.msk.bf16.mxu0 %vm7257_vm4, %v7256_v0  ;;  %6397 = vmatprep.mubr.msk.bf16.mxu1 %vm7257_vm4, %v7256_v0  ;;  %v211_v25 = vsel %vm85_vm5, %v206_v24, %v208_v23  ;;  %v403_v26 = vpop.permute.xlu1 %402 }
  0x89   :  { %v405_v27 = vsel %vm85_vm5, %v403_v26, %v78_v16  ;;  %v743_v33 = vsel %vm85_vm5, %v81_v32, %v403_v26 }
  0x8a   :  { %6388 = vmatpush3.bf16.msra.mxu0 %v7410_v21  ;;  %6396 = vmatpush3.bf16.msra.mxu1 %v7415_v22 }
  0x8b   :  { %6401 = vmatprep.subr.bf16.mxu0 %v7256_v0  ;;  %6409 = vmatprep.subr.bf16.mxu1 %v7256_v0  ;;  %v573_v28 = vpop.permute.xlu0 %572 }
  0x8c   :  { %v575_v29 = vsel %vm85_vm5, %v573_v28, %v206_v24 }
  0x8d   :  { %6390 = vmatmul.mubr.msk.bf16.vlgmr.msra.gmra.mrb[4].mxu0 %vm107_vm6, %v211_v25  ;;  %6398 = vmatmul.mubr.msk.bf16.vlgmr.msra.gmra.mrb[4].mxu1 %vm107_vm6, %v211_v25 }
  0x8e   :  { %6402 = vmatpush3.bf16.msra.mxu0 %v7356_v5  ;;  %6410 = vmatpush3.bf16.msra.mxu1 %v7361_v8 }
  0x8f   :  { %6403 = vmatprep.subr.bf16.mxu0 %v7256_v0  ;;  %6411 = vmatprep.subr.bf16.mxu1 %v7256_v0 }
  0x90   :  { %6405 = vmatprep.mubr.msk.bf16.mxu0 %vm7257_vm4, %v7256_v0  ;;  %6413 = vmatprep.mubr.msk.bf16.mxu1 %vm7257_vm4, %v7256_v0 }
  0x92   :  { %6404 = vmatpush3.bf16.msra.mxu0 %v7373_v9  ;;  %6412 = vmatpush3.bf16.msra.mxu1 %v7380_v10 }
  0x93   :  { %6417 = vmatprep.subr.bf16.mxu0 %v7256_v0  ;;  %6425 = vmatprep.subr.bf16.mxu1 %v7256_v0 }
  0x95   :  { %6406 = vmatmul.mubr.msk.bf16.vlgmr.msra.gmra.mrb[8].mxu0 %vm107_vm6, %v211_v25  ;;  %6414 = vmatmul.mubr.msk.bf16.vlgmr.msra.gmra.mrb[8].mxu1 %vm107_vm6, %v211_v25 }
  0x96   :  { %6418 = vmatpush3.bf16.msra.mxu0 %v7395_v17  ;;  %6426 = vmatpush3.bf16.msra.mxu1 %v7400_v18 }
  0x97   :  { %6419 = vmatprep.subr.bf16.mxu0 %v7256_v0  ;;  %6427 = vmatprep.subr.bf16.mxu1 %v7256_v0 }
  0x98   :  { %6421 = vmatprep.mubr.msk.bf16.mxu0 %vm7257_vm4, %v7256_v0  ;;  %6429 = vmatprep.mubr.msk.bf16.mxu1 %vm7257_vm4, %v7256_v0 }
  0x9a   :  { %6420 = vmatpush3.bf16.msra.mxu0 %v7410_v21  ;;  %6428 = vmatpush3.bf16.msra.mxu1 %v7415_v22 }
  0x9b   :  { %6433 = vmatprep.subr.bf16.mxu0 %v7256_v0  ;;  %6441 = vmatprep.subr.bf16.mxu1 %v7256_v0 }
  0x9d   :  { %6422 = vmatmul.mubr.msk.bf16.vlgmr.msra.gmra.mrb[12].mxu0 %vm107_vm6, %v405_v27  ;;  %6430 = vmatmul.mubr.msk.bf16.vlgmr.msra.gmra.mrb[12].mxu1 %vm107_vm6, %v405_v27 }
  0x9e   :  { %6434 = vmatpush3.bf16.msra.mxu0 %v7356_v5  ;;  %6442 = vmatpush3.bf16.msra.mxu1 %v7361_v8 }
  0x9f   :  { %6435 = vmatprep.subr.bf16.mxu0 %v7256_v0  ;;  %6443 = vmatprep.subr.bf16.mxu1 %v7256_v0 }
  0xa0   :  { %6437 = vmatprep.mubr.msk.bf16.mxu0 %vm7257_vm4, %v7256_v0  ;;  %6445 = vmatprep.mubr.msk.bf16.mxu1 %vm7257_vm4, %v7256_v0 }
  0xa2   :  { %6436 = vmatpush3.bf16.msra.mxu0 %v7373_v9  ;;  %6444 = vmatpush3.bf16.msra.mxu1 %v7380_v10 }
  0xa3   :  { %6449 = vmatprep.subr.bf16.mxu0 %v7256_v0  ;;  %6457 = vmatprep.subr.bf16.mxu1 %v7256_v0 }
  0xa5   :  { %6438 = vmatmul.mubr.msk.bf16.vlgmr.msra.gmra.mrb[16].mxu0 %vm107_vm6, %v405_v27  ;;  %6446 = vmatmul.mubr.msk.bf16.vlgmr.msra.gmra.mrb[16].mxu1 %vm107_vm6, %v405_v27 }
  0xa6   :  { %6450 = vmatpush3.bf16.msra.mxu0 %v7395_v17  ;;  %6458 = vmatpush3.bf16.msra.mxu1 %v7400_v18 }
  0xa7   :  { %6451 = vmatprep.subr.bf16.mxu0 %v7256_v0  ;;  %6459 = vmatprep.subr.bf16.mxu1 %v7256_v0 }
  0xa8   :  { %6453 = vmatprep.mubr.msk.bf16.mxu0 %vm7257_vm4, %v7256_v0  ;;  %6461 = vmatprep.mubr.msk.bf16.mxu1 %vm7257_vm4, %v7256_v0 }
  0xaa   :  { %6452 = vmatpush3.bf16.msra.mxu0 %v7410_v21  ;;  %6460 = vmatpush3.bf16.msra.mxu1 %v7415_v22 }
  0xab   :  { %6465 = vmatprep.subr.bf16.mxu0 %v7256_v0  ;;  %6473 = vmatprep.subr.bf16.mxu1 %v7256_v0 }
  0xad   :  { %6454 = vmatmul.mubr.msk.bf16.vlgmr.msra.gmra.mrb[20].mxu0 %vm107_vm6, %v575_v29  ;;  %6462 = vmatmul.mubr.msk.bf16.vlgmr.msra.gmra.mrb[20].mxu1 %vm107_vm6, %v575_v29 }
  0xae   :  { %6466 = vmatpush3.bf16.msra.mxu0 %v7356_v5  ;;  %6474 = vmatpush3.bf16.msra.mxu1 %v7361_v8 }
  0xaf   :  { %6467 = vmatprep.subr.bf16.mxu0 %v7256_v0  ;;  %6475 = vmatprep.subr.bf16.mxu1 %v7256_v0 }
  0xb0   :  { %6469 = vmatprep.mubr.msk.bf16.mxu0 %vm7257_vm4, %v7256_v0  ;;  %6477 = vmatprep.mubr.msk.bf16.mxu1 %vm7257_vm4, %v7256_v0 }
  0xb2   :  { %6468 = vmatpush3.bf16.msra.mxu0 %v7373_v9  ;;  %6476 = vmatpush3.bf16.msra.mxu1 %v7380_v10 }
  0xb3   :  { %6481 = vmatprep.subr.bf16.mxu0 %v7256_v0  ;;  %6489 = vmatprep.subr.bf16.mxu1 %v7256_v0 }
  0xb5   :  { %6470 = vmatmul.mubr.msk.bf16.vlgmr.msra.gmra.mrb[24].mxu0 %vm107_vm6, %v575_v29  ;;  %6478 = vmatmul.mubr.msk.bf16.vlgmr.msra.gmra.mrb[24].mxu1 %vm107_vm6, %v575_v29 }
  0xb6   :  { %6482 = vmatpush3.bf16.msra.mxu0 %v7395_v17  ;;  %6490 = vmatpush3.bf16.msra.mxu1 %v7400_v18 }
  0xb7   :  { %6483 = vmatprep.subr.bf16.mxu0 %v7256_v0  ;;  %6491 = vmatprep.subr.bf16.mxu1 %v7256_v0 }
  0xb8   :  { %6485 = vmatprep.mubr.msk.bf16.mxu0 %vm7257_vm4, %v7256_v0  ;;  %6493 = vmatprep.mubr.msk.bf16.mxu1 %vm7257_vm4, %v7256_v0 }
  0xba   :  { %6484 = vmatpush3.bf16.msra.mxu0 %v7410_v21  ;;  %6492 = vmatpush3.bf16.msra.mxu1 %v7415_v22 }
  0xbb   :  { %6505 = vmatprep.subr.bf16.mxu1 %v7256_v0  ;;  %6497 = vmatprep.subr.bf16.mxu0 %v7256_v0 }
  0xbd   :  { %6486 = vmatmul.mubr.msk.bf16.vlgmr.msra.gmra.mrb[28].mxu0 %vm107_vm6, %v743_v33  ;;  %6494 = vmatmul.mubr.msk.bf16.vlgmr.msra.gmra.mrb[28].mxu1 %vm107_vm6, %v743_v33 }
  0xbe   :  { %6509 = vmatprep.mubr.msk.bf16.mxu1 %vm7257_vm4, %v7256_v0  ;;  %6501 = vmatprep.mubr.msk.bf16.mxu0 %vm7257_vm4, %v7256_v0 }
 0x158   :  { %v144_v35 = vpop.f32.mrb[0].mxu0  ;;  %v197_v36 = vpop.f32.mrb[0].mxu1 }
 0x159   :  { %v7527_v37 = vadd.f32 %v7524_v34, %v144_v35  ;;  %v198_v38 = vadd.f32 %v7524_v34, %v197_v36  ;;  %v6375_v39 = vpop.f32.mrb[1].mxu0  ;;  %v6383_v40 = vpop.f32.mrb[1].mxu1 }
 0x15a   :  { %v147_v41 = vpop.f32.mrb[2].mxu0  ;;  %v200_v42 = vpop.f32.mrb[2].mxu1 }
 0x15b   :  { %v7531_v43 = vadd.f32 %v7524_v34, %v147_v41  ;;  %v201_v44 = vadd.f32 %v7524_v34, %v200_v42  ;;  %830 = vrot.lane.b32.xlu1 %v198_v38, %s7262_s12  ;;  %v6376_v45 = vpop.f32.mrb[3].mxu0  ;;  %v6384_v46 = vpop.f32.mrb[3].mxu1 }
 0x15d   :  { %832 = vrot.lane.b32.xlu0 %v201_v44, %s7262_s12 }
 0x160   :  { %v260_v47 = vpop.f32.mrb[4].mxu0  ;;  %v313_v48 = vpop.f32.mrb[4].mxu1 }
 0x161   :  { %v261_v49 = vadd.f32 %v7524_v34, %v260_v47  ;;  %v6391_v50 = vpop.f32.mrb[5].mxu0  ;;  %v6399_v51 = vpop.f32.mrb[5].mxu1  ;;  %v314_v57 = vadd.f32 %v7524_v34, %v313_v48 }
 0x162   :  { %v263_v52 = vpop.f32.mrb[6].mxu0  ;;  %v316_v53 = vpop.f32.mrb[6].mxu1 }
 0x163   :  { %v264_v54 = vadd.f32 %v7524_v34, %v263_v52  ;;  %v6400_v55 = vpop.f32.mrb[7].mxu1  ;;  %838 = vrot.lane.b32.xlu1 %v261_v49, %s7259_s21  ;;  %v6392_v56 = vpop.f32.mrb[7].mxu0  ;;  %v317_v58 = vadd.f32 %v7524_v34, %v316_v53 }
 0x165   :  { %840 = vrot.lane.b32.xlu0 %v264_v54, %s7259_s21  ;;  %v7580_v54 = vld [vmem:[%s8980_s3] sm:$0xff]  }
 0x166   :  { %6506 = vmatpush3.bf16.msra.mxu1 %v7580_v54  ;;  %6498 = vmatpush3.bf16.msra.mxu0 %v7580_v54 }
 0x167   :  { %846 = vrot.lane.b32.xlu1 %v314_v57, %s7263_s2  ;;  %6507 = vmatprep.subr.bf16.mxu1 %v7256_v0 }
 0x168   :  { %v354_v59 = vpop.f32.mrb[8].mxu0  ;;  %v395_v60 = vpop.f32.mrb[8].mxu1  ;;  %6499 = vmatprep.subr.bf16.mxu0 %v7256_v0 }
 0x169   :  { %v355_v61 = vadd.f32 %v7524_v34, %v354_v59  ;;  %v6415_v62 = vpop.f32.mrb[9].mxu1  ;;  %848 = vrot.lane.b32.xlu0 %v317_v58, %s7263_s2  ;;  %v6407_v63 = vpop.f32.mrb[9].mxu0  ;;  %v396_v6 = vadd.f32 %v7524_v34, %v395_v60  ;;  %v7241_v58 = vld [vmem:[%s8980_s3 + $0x8] ss:$0 sps:$4 sm:$0xff]  }
 0x16a   :  { %v357_v1 = vpop.f32.mrb[10].mxu0  ;;  %v398_v2 = vpop.f32.mrb[10].mxu1  ;;  %v7593_v60 = vsel %vm8990_vm7, %v7241_v58, 0 }
 0x16b   :  { %v358_v3 = vadd.f32 %v7524_v34, %v357_v1  ;;  %v6416_v4 = vpop.f32.mrb[11].mxu1  ;;  %854 = vrot.lane.b32.xlu1 %v355_v61, %s7264_s13  ;;  %v6408_v5 = vpop.f32.mrb[11].mxu0  ;;  %v399_v7 = vadd.f32 %v7524_v34, %v398_v2  ;;  %6508 = vmatpush3.bf16.msra.mxu1 %v7593_v60 }
 0x16c   :  { %6500 = vmatpush3.bf16.msra.mxu0 %v7593_v60  ;;  %6521 = vmatprep.subr.bf16.mxu1 %v7256_v0 }
 0x16d   :  { %856 = vrot.lane.b32.xlu0 %v358_v3, %s7264_s13  ;;  %6513 = vmatprep.subr.bf16.mxu0 %v7256_v0 }
 0x16f   :  { %862 = vrot.lane.b32.xlu1 %v396_v6, %s7265_s14 }
 0x170   :  { %v442_v8 = vpop.f32.mrb[12].mxu0  ;;  %v483_v9 = vpop.f32.mrb[12].mxu1 }
 0x171   :  { %v443_v10 = vadd.f32 %v7524_v34, %v442_v8  ;;  %v6431_v11 = vpop.f32.mrb[13].mxu1  ;;  %864 = vrot.lane.b32.xlu0 %v399_v7, %s7265_s14  ;;  %v6423_v12 = vpop.f32.mrb[13].mxu0  ;;  %v484_v18 = vadd.f32 %v7524_v34, %v483_v9 }
 0x172   :  { %v445_v13 = vpop.f32.mrb[14].mxu0  ;;  %v486_v14 = vpop.f32.mrb[14].mxu1 }
 0x173   :  { %v446_v15 = vadd.f32 %v7524_v34, %v445_v13  ;;  %v6432_v16 = vpop.f32.mrb[15].mxu1  ;;  %870 = vrot.lane.b32.xlu1 %v443_v10, %s7266_s0  ;;  %v6424_v17 = vpop.f32.mrb[15].mxu0  ;;  %v487_v19 = vadd.f32 %v7524_v34, %v486_v14 }
 0x175   :  { %872 = vrot.lane.b32.xlu0 %v446_v15, %s7266_s0 }
 0x177   :  { %878 = vrot.lane.b32.xlu1 %v484_v18, %s7267_s15 }
 0x178   :  { %v524_v20 = vpop.f32.mrb[16].mxu0  ;;  %v565_v21 = vpop.f32.mrb[16].mxu1 }
 0x179   :  { %v525_v22 = vadd.f32 %v7524_v34, %v524_v20  ;;  %v6447_v23 = vpop.f32.mrb[17].mxu1  ;;  %880 = vrot.lane.b32.xlu0 %v487_v19, %s7267_s15  ;;  %v6439_v24 = vpop.f32.mrb[17].mxu0  ;;  %v566_v30 = vadd.f32 %v7524_v34, %v565_v21 }
 0x17a   :  { %v527_v25 = vpop.f32.mrb[18].mxu0  ;;  %v568_v26 = vpop.f32.mrb[18].mxu1 }
 0x17b   :  { %v528_v27 = vadd.f32 %v7524_v34, %v527_v25  ;;  %v6448_v28 = vpop.f32.mrb[19].mxu1  ;;  %886 = vrot.lane.b32.xlu1 %v525_v22, %s7268_s16  ;;  %v6440_v29 = vpop.f32.mrb[19].mxu0  ;;  %v569_v31 = vadd.f32 %v7524_v34, %v568_v26 }
 0x17d   :  { %888 = vrot.lane.b32.xlu0 %v528_v27, %s7268_s16 }
 0x17f   :  { %894 = vrot.lane.b32.xlu1 %v566_v30, %s7269_s17 }
 0x180   :  { %v612_v32 = vpop.f32.mrb[20].mxu0  ;;  %v653_v33 = vpop.f32.mrb[20].mxu1 }
 0x181   :  { %v613_v35 = vadd.f32 %v7524_v34, %v612_v32  ;;  %896 = vrot.lane.b32.xlu0 %v569_v31, %s7269_s17  ;;  %v6455_v36 = vpop.f32.mrb[21].mxu0  ;;  %v6463_v38 = vpop.f32.mrb[21].mxu1  ;;  %v654_v45 = vadd.f32 %v7524_v34, %v653_v33 }
 0x182   :  { %v615_v39 = vpop.f32.mrb[22].mxu0  ;;  %v656_v40 = vpop.f32.mrb[22].mxu1 }
 0x183   :  { %v616_v41 = vadd.f32 %v7524_v34, %v615_v39  ;;  %v6464_v42 = vpop.f32.mrb[23].mxu1  ;;  %902 = vrot.lane.b32.xlu1 %v613_v35, %s7261_s23  ;;  %v6456_v44 = vpop.f32.mrb[23].mxu0  ;;  %v657_v46 = vadd.f32 %v7524_v34, %v656_v40 }
 0x185   :  { %904 = vrot.lane.b32.xlu0 %v616_v41, %s7261_s23 }
 0x187   :  { %910 = vrot.lane.b32.xlu1 %v654_v45, %s7270_s18 }
 0x188   :  { %v694_v47 = vpop.f32.mrb[24].mxu0  ;;  %v735_v48 = vpop.f32.mrb[24].mxu1 }
 0x189   :  { %v695_v49 = vadd.f32 %v7524_v34, %v694_v47  ;;  %v6479_v50 = vpop.f32.mrb[25].mxu1  ;;  %912 = vrot.lane.b32.xlu0 %v657_v46, %s7270_s18  ;;  %v6471_v51 = vpop.f32.mrb[25].mxu0  ;;  %v736_v59 = vadd.f32 %v7524_v34, %v735_v48 }
 0x18a   :  { %v697_v52 = vpop.f32.mrb[26].mxu0  ;;  %v738_v53 = vpop.f32.mrb[26].mxu1 }
 0x18b   :  { %v698_v55 = vadd.f32 %v7524_v34, %v697_v52  ;;  %v6480_v56 = vpop.f32.mrb[27].mxu1  ;;  %918 = vrot.lane.b32.xlu1 %v695_v49, %s7258_s20  ;;  %v6472_v57 = vpop.f32.mrb[27].mxu0  ;;  %v739_v61 = vadd.f32 %v7524_v34, %v738_v53 }
 0x18d   :  { %920 = vrot.lane.b32.xlu0 %v698_v55, %s7258_s20 }
 0x18f   :  { %926 = vrot.lane.b32.xlu1 %v736_v59, %s7271_s27 }
 0x190   :  { %v780_v62 = vpop.f32.mrb[28].mxu0  ;;  %v821_v63 = vpop.f32.mrb[28].mxu1 }
 0x191   :  { %v781_v1 = vadd.f32 %v7524_v34, %v780_v62  ;;  %v6495_v2 = vpop.f32.mrb[29].mxu1  ;;  %928 = vrot.lane.b32.xlu0 %v739_v61, %s7271_s27  ;;  %v6487_v3 = vpop.f32.mrb[29].mxu0  ;;  %v822_v9 = vadd.f32 %v7524_v34, %v821_v63 }
 0x192   :  { %v783_v4 = vpop.f32.mrb[30].mxu0  ;;  %v824_v5 = vpop.f32.mrb[30].mxu1 }
 0x193   :  { %v784_v6 = vadd.f32 %v7524_v34, %v783_v4  ;;  %v6496_v7 = vpop.f32.mrb[31].mxu1  ;;  %934 = vrot.lane.b32.xlu1 %v781_v1, %s7260_s22  ;;  %v6488_v8 = vpop.f32.mrb[31].mxu0  ;;  %v825_v10 = vadd.f32 %v7524_v34, %v824_v5 }
 0x195   :  { %936 = vrot.lane.b32.xlu0 %v784_v6, %s7260_s22 }
 0x197   :  { %942 = vrot.lane.b32.xlu1 %v822_v9, %s7272_s28 }
 0x199   :  { %944 = vrot.lane.b32.xlu0 %v825_v10, %s7272_s28 }
 0x1cd   :  { %v831_v11 = vpop.permute.xlu1 %830 }
 0x1ce   :  { %v949_v32 = vsel %vm948_vm8, %v7527_v37, %v831_v11 }
 0x1cf   :  { %v833_v12 = vpop.permute.xlu0 %832 }
 0x1d0   :  { %v950_v36 = vsel %vm948_vm8, %v7531_v43, %v833_v12 }
 0x1d5   :  { %v839_v13 = vpop.permute.xlu1 %838 }
 0x1d6   :  { %v951_v33 = vsel %vm85_vm5, %v949_v32, %v839_v13 }
 0x1d7   :  { %v841_v14 = vpop.permute.xlu0 %840 }
 0x1d8   :  { %v952_v39 = vsel %vm85_vm5, %v950_v36, %v841_v14 }
 0x1d9   :  { %v847_v15 = vpop.permute.xlu1 %846 }
 0x1da   :  { %v954_v38 = vsel %vm953_vm9, %v951_v33, %v847_v15 }
 0x1db   :  { %v849_v16 = vpop.permute.xlu0 %848 }
 0x1dc   :  { %v955_v42 = vsel %vm953_vm9, %v952_v39, %v849_v16 }
 0x1dd   :  { %v855_v17 = vpop.permute.xlu1 %854 }
 0x1de   :  { %v956_v40 = vsel %vm107_vm6, %v954_v38, %v855_v17 }
 0x1df   :  { %v857_v18 = vpop.permute.xlu0 %856 }
 0x1e0   :  { %v957_v44 = vsel %vm107_vm6, %v955_v42, %v857_v18  ;;  %v7780_v42 = vld [vmem:[%s8981_s4] ss:$0 sm:$0xff] }
 0x1e1   :  { %v863_v19 = vpop.permute.xlu1 %862 }
 0x1e2   :  { %v959_v37 = vsel %vm8991_vm10, %v956_v40, %v863_v19 }
 0x1e3   :  { %v865_v20 = vpop.permute.xlu0 %864 }
 0x1e4   :  { %v960_v43 = vsel %vm8991_vm10, %v957_v44, %v865_v20 }
 0x1e5   :  { %v871_v21 = vpop.permute.xlu1 %870 }
 0x1e6   :  { %v962_v45 = vsel %vm961_vm11, %v959_v37, %v871_v21 }
 0x1e7   :  { %v873_v22 = vpop.permute.xlu0 %872 }
 0x1e8   :  { %v963_v48 = vsel %vm961_vm11, %v960_v43, %v873_v22 }
 0x1e9   :  { %v879_v23 = vpop.permute.xlu1 %878 }
 0x1ea   :  { %v965_v47 = vsel %vm8987_vm12, %v962_v45, %v879_v23 }
 0x1eb   :  { %v881_v24 = vpop.permute.xlu0 %880 }
 0x1ec   :  { %v966_v51 = vsel %vm8987_vm12, %v963_v48, %v881_v24  ;;  %vm987_vm12 = vcmask 982016  }
 0x1ed   :  { %v887_v34 = vpop.permute.xlu1 %886 }
 0x1ee   :  { %v967_v49 = vsel %vm35_vm0, %v965_v47, %v887_v34 }
 0x1ef   :  { %v889_v25 = vpop.permute.xlu0 %888 }
 0x1f0   :  { %v968_v53 = vsel %vm35_vm0, %v966_v51, %v889_v25 }
 0x1f1   :  { %v895_v26 = vpop.permute.xlu1 %894 }
 0x1f2   :  { %v970_v52 = vsel %vm969_vm13, %v967_v49, %v895_v26 }
 0x1f3   :  { %v897_v27 = vpop.permute.xlu0 %896 }
 0x1f4   :  { %v971_v57 = vsel %vm969_vm13, %v968_v53, %v897_v27 }
 0x1f5   :  { %v903_v28 = vpop.permute.xlu1 %902 }
 0x1f6   :  { %v973_v55 = vsel %vm8988_vm14, %v970_v52, %v903_v28 }
 0x1f7   :  { %v905_v29 = vpop.permute.xlu0 %904 }
 0x1f8   :  { %v974_v59 = vsel %vm8988_vm14, %v971_v57, %v905_v29 }
 0x1f9   :  { %v911_v30 = vpop.permute.xlu1 %910 }
 0x1fa   :  { %v976_v58 = vsel %vm975_vm15, %v973_v55, %v911_v30 }
 0x1fb   :  { %v913_v31 = vpop.permute.xlu0 %912 }
 0x1fc   :  { %v977_v63 = vsel %vm975_vm15, %v974_v59, %v913_v31 }
 0x1fd   :  { %v919_v35 = vpop.permute.xlu1 %918 }
 0x1fe   :  { %v979_v61 = vsel %vm8989_vm1, %v976_v58, %v919_v35 }
 0x1ff   :  { %v921_v41 = vpop.permute.xlu0 %920 }
 0x200   :  { %v980_v2 = vsel %vm8989_vm1, %v977_v63, %v921_v41 }
 0x201   :  { %v927_v46 = vpop.permute.xlu1 %926 }
 0x202   :  { %v982_v1 = vsel %vm981_vm2, %v979_v61, %v927_v46 }
 0x203   :  { %v929_v50 = vpop.permute.xlu0 %928 }
 0x204   :  { %v983_v5 = vsel %vm981_vm2, %v980_v2, %v929_v50 }
 0x205   :  { %v935_v56 = vpop.permute.xlu1 %934 }
 0x206   :  { %v985_v3 = vsel %vm984_vm3, %v982_v1, %v935_v56 }
 0x207   :  { %v937_v62 = vpop.permute.xlu0 %936 }
 0x208   :  { %v986_v7 = vsel %vm984_vm3, %v983_v5, %v937_v62 }
 0x209   :  { %v943_v4 = vpop.permute.xlu1 %942 }
 0x20a   :  { %v7641_v6 = vsel %vm987_vm12, %v985_v3, %v943_v4 }
 0x20b   :  { %vm1006_vm14 = vcmp.ge.f32.partialorder %v7641_v6, 0.0  ;;  %v1008_v8 = vmul.f32 0.1, %v7641_v6  ;;  %v945_v9 = vpop.permute.xlu0 %944 }
 0x20c   :  { %v7647_v10 = vsel %vm987_vm12, %v986_v7, %v945_v9 }
 0x20d   :  { %v1010_v11 = vsel %vm1006_vm14, %v7641_v6, %v1008_v8  ;;  %vm1007_vm1 = vcmp.ge.f32.partialorder %v7647_v10, 0.0  ;;  %v1009_v12 = vmul.f32 0.1, %v7647_v10  ;;  %vm8992_vm14 = vcmask 457728  }
 0x20e   :  { %1012 = vst [vmem:[#allocation3 + $0x1] sm:$0xff] %v1010_v11 }
 0x20f   :  { %v1011_v13 = vsel %vm1007_vm1, %v7647_v10, %v1009_v12  ;;  %vm8993_vm1 = vmmov %vm8992_vm14 }
 0x210   :  { %1013 = vst [vmem:[#allocation3 + $0x9] sm:$0xff] %v1011_v13  ;;  %v1019_v14 = vpack.c.bf16 %v1011_v13, %v1010_v11 }
 0x212   :  { %1027 = vrot.lane.b32.xlu0 %v1019_v14, %s7262_s12  ;;  %6510 = vmatmul.mubr.msk.bf16.vlgmr.msra.gmra.mrb[32].mxu1 %vm953_vm9, %v1019_v14 }
 0x213   :  { %6522 = vmatpush3.bf16.msra.mxu1 %v7580_v54  ;;  %6525 = vmatprep.mubr.msk.bf16.mxu1 %vm7257_vm4, %v7256_v0 }
 0x214   :  { %6523 = vmatprep.subr.bf16.mxu1 %v7256_v0 }
 0x215   :  { %v1014_v15 = vld [vmem:[#allocation3] sm:$0xff] }
 0x216   :  { %1187 = vrot.lane.b32.xlu0 %v1019_v14, %s7260_s22 }
 0x217   :  { %v1015_v16 = vld [vmem:[#allocation3 + $0x8] sm:$0xff]  ;;  %6524 = vmatpush3.bf16.msra.mxu1 %v7593_v60 }
 0x218   :  { %v1016_v17 = vpack.c.bf16 %v1015_v16, %v1014_v15  ;;  %6537 = vmatprep.subr.bf16.mxu1 %v7256_v0  ;;  %v1020_v18 = vld [vmem:[#allocation3 + $0x2] sm:$0xff]  ;;  %v1021_v19 = vld [vmem:[#allocation3 + $0xa] sm:$0xff] }
 0x219   :  { %v1022_v20 = vpack.c.bf16 %v1021_v19, %v1020_v18 }
 0x21a   :  { %1024 = vrot.lane.b32.xlu1 %v1016_v17, %s7262_s12  ;;  %1281 = vrot.lane.b32.xlu0 %v1019_v14, %s7258_s20 }
 0x21e   :  { %1140 = vrot.lane.b32.xlu1 %v1019_v14, %s7272_s28  ;;  %1375 = vrot.lane.b32.xlu0 %v1019_v14, %s7261_s23 }
 0x222   :  { %1234 = vrot.lane.b32.xlu1 %v1019_v14, %s7271_s27  ;;  %1469 = vrot.lane.b32.xlu0 %v1019_v14, %s7268_s16 }
 0x226   :  { %1328 = vrot.lane.b32.xlu1 %v1019_v14, %s7270_s18  ;;  %1563 = vrot.lane.b32.xlu0 %v1019_v14, %s7266_s0 }
 0x22a   :  { %1422 = vrot.lane.b32.xlu1 %v1019_v14, %s7269_s17  ;;  %1657 = vrot.lane.b32.xlu0 %v1019_v14, %s7264_s13 }
 0x22e   :  { %1516 = vrot.lane.b32.xlu1 %v1019_v14, %s7267_s15  ;;  %1751 = vrot.lane.b32.xlu0 %v1019_v14, %s7259_s21 }
 0x232   :  { %1610 = vrot.lane.b32.xlu1 %v1019_v14, %s7265_s14 }
 0x236   :  { %1704 = vrot.lane.b32.xlu1 %v1019_v14, %s7263_s2 }
 0x23a   :  { %1754 = vrot.lane.b32.xlu1 %v1022_v20, %s7259_s21 }
 0x284   :  { %v1028_v21 = vpop.permute.xlu0 %1027 }
 0x288   :  { %v1188_v22 = vpop.permute.xlu0 %1187 }
 0x289   :  { %6526 = vmatmul.mubr.msk.bf16.vlgmr.msra.gmra.mrb[36].mxu1 %vm953_vm9, %v1188_v22 }
 0x28a   :  { %6538 = vmatpush3.bf16.msra.mxu1 %v7580_v54  ;;  %6541 = vmatprep.mubr.msk.bf16.mxu1 %vm7257_vm4, %v7256_v0 }
 0x28b   :  { %6539 = vmatprep.subr.bf16.mxu1 %v7256_v0 }
 0x28c   :  { %v1025_v23 = vpop.permute.xlu1 %1024  ;;  %v1282_v26 = vpop.permute.xlu0 %1281 }
 0x28d   :  { %v1031_v24 = vsel %vm948_vm8, %v1025_v23, %v1028_v21 }
 0x28e   :  { %v1032_v34 = vsel %vm85_vm5, %v1031_v24, %v1028_v21  ;;  %6540 = vmatpush3.bf16.msra.mxu1 %v7593_v60 }
 0x28f   :  { %6502 = vmatmul.mubr.msk.bf16.vlgmr.msra.gmra.mrb[32].mxu0 %vm953_vm9, %v1032_v34  ;;  %6553 = vmatprep.subr.bf16.mxu1 %v7256_v0 }
 0x290   :  { %6514 = vmatpush3.bf16.msra.mxu0 %v7580_v54  ;;  %v1141_v25 = vpop.permute.xlu1 %1140  ;;  %6517 = vmatprep.mubr.msk.bf16.mxu0 %vm7257_vm4, %v7256_v0  ;;  %v1376_v28 = vpop.permute.xlu0 %1375 }
 0x291   :  { %6515 = vmatprep.subr.bf16.mxu0 %v7256_v0  ;;  %6542 = vmatmul.mubr.msk.bf16.vlgmr.msra.gmra.mrb[40].mxu1 %vm953_vm9, %v1282_v26 }
 0x292   :  { %6554 = vmatpush3.bf16.msra.mxu1 %v7580_v54  ;;  %6557 = vmatprep.mubr.msk.bf16.mxu1 %vm7257_vm4, %v7256_v0 }
 0x293   :  { %6555 = vmatprep.subr.bf16.mxu1 %v7256_v0 }
 0x294   :  { %6516 = vmatpush3.bf16.msra.mxu0 %v7593_v60  ;;  %v1235_v27 = vpop.permute.xlu1 %1234  ;;  %v1470_v31 = vpop.permute.xlu0 %1469 }
 0x295   :  { %6529 = vmatprep.subr.bf16.mxu0 %v7256_v0 }
 0x296   :  { %6556 = vmatpush3.bf16.msra.mxu1 %v7593_v60 }
 0x297   :  { %6518 = vmatmul.mubr.msk.bf16.vlgmr.msra.gmra.mrb[36].mxu0 %vm953_vm9, %v1141_v25  ;;  %6569 = vmatprep.subr.bf16.mxu1 %v7256_v0 }
 0x298   :  { %6530 = vmatpush3.bf16.msra.mxu0 %v7580_v54  ;;  %v1329_v29 = vpop.permute.xlu1 %1328  ;;  %6533 = vmatprep.mubr.msk.bf16.mxu0 %vm7257_vm4, %v7256_v0  ;;  %v1564_v33 = vpop.permute.xlu0 %1563 }
 0x299   :  { %6531 = vmatprep.subr.bf16.mxu0 %v7256_v0  ;;  %6558 = vmatmul.mubr.msk.bf16.vlgmr.msra.gmra.mrb[44].mxu1 %vm953_vm9, %v1376_v28 }
 0x29a   :  { %6570 = vmatpush3.bf16.msra.mxu1 %v7580_v54  ;;  %6573 = vmatprep.mubr.msk.bf16.mxu1 %vm7257_vm4, %v7256_v0 }
 0x29b   :  { %6571 = vmatprep.subr.bf16.mxu1 %v7256_v0 }
 0x29c   :  { %6532 = vmatpush3.bf16.msra.mxu0 %v7593_v60  ;;  %v1423_v30 = vpop.permute.xlu1 %1422  ;;  %v1658_v38 = vpop.permute.xlu0 %1657 }
 0x29d   :  { %6545 = vmatprep.subr.bf16.mxu0 %v7256_v0 }
 0x29e   :  { %6572 = vmatpush3.bf16.msra.mxu1 %v7593_v60 }
 0x29f   :  { %6534 = vmatmul.mubr.msk.bf16.vlgmr.msra.gmra.mrb[40].mxu0 %vm953_vm9, %v1235_v27  ;;  %6585 = vmatprep.subr.bf16.mxu1 %v7256_v0 }
 0x2a0   :  { %6546 = vmatpush3.bf16.msra.mxu0 %v7580_v54  ;;  %6549 = vmatprep.mubr.msk.bf16.mxu0 %vm7257_vm4, %v7256_v0  ;;  %v1517_v32 = vpop.permute.xlu1 %1516  ;;  %v1752_v40 = vpop.permute.xlu0 %1751 }
 0x2a1   :  { %6547 = vmatprep.subr.bf16.mxu0 %v7256_v0  ;;  %6574 = vmatmul.mubr.msk.bf16.vlgmr.msra.gmra.mrb[48].mxu1 %vm953_vm9, %v1470_v31 }
 0x2a2   :  { %6586 = vmatpush3.bf16.msra.mxu1 %v7580_v54  ;;  %6589 = vmatprep.mubr.msk.bf16.mxu1 %vm7257_vm4, %v7256_v0 }
 0x2a3   :  { %6587 = vmatprep.subr.bf16.mxu1 %v7256_v0 }
 0x2a4   :  { %6548 = vmatpush3.bf16.msra.mxu0 %v7593_v60  ;;  %v1611_v35 = vpop.permute.xlu1 %1610 }
 0x2a5   :  { %6561 = vmatprep.subr.bf16.mxu0 %v7256_v0 }
 0x2a6   :  { %6588 = vmatpush3.bf16.msra.mxu1 %v7593_v60 }
 0x2a7   :  { %6550 = vmatmul.mubr.msk.bf16.vlgmr.msra.gmra.mrb[44].mxu0 %vm953_vm9, %v1329_v29  ;;  %6601 = vmatprep.subr.bf16.mxu1 %v7256_v0 }
 0x2a8   :  { %6562 = vmatpush3.bf16.msra.mxu0 %v7580_v54  ;;  %6565 = vmatprep.mubr.msk.bf16.mxu0 %vm7257_vm4, %v7256_v0  ;;  %v1705_v36 = vpop.permute.xlu1 %1704 }
 0x2a9   :  { %6563 = vmatprep.subr.bf16.mxu0 %v7256_v0  ;;  %6590 = vmatmul.mubr.msk.bf16.vlgmr.msra.gmra.mrb[52].mxu1 %vm953_vm9, %v1564_v33 }
 0x2aa   :  { %6602 = vmatpush3.bf16.msra.mxu1 %v7580_v54  ;;  %6605 = vmatprep.mubr.msk.bf16.mxu1 %vm7257_vm4, %v7256_v0 }
 0x2ab   :  { %6603 = vmatprep.subr.bf16.mxu1 %v7256_v0 }
 0x2ac   :  { %6564 = vmatpush3.bf16.msra.mxu0 %v7593_v60  ;;  %v1755_v39 = vpop.permute.xlu1 %1754 }
 0x2ad   :  { %6577 = vmatprep.subr.bf16.mxu0 %v7256_v0  ;;  %v1758_v41 = vsel %vm85_vm5, %v1752_v40, %v1755_v39 }
 0x2ae   :  { %6604 = vmatpush3.bf16.msra.mxu1 %v7593_v60 }
 0x2af   :  { %6566 = vmatmul.mubr.msk.bf16.vlgmr.msra.gmra.mrb[48].mxu0 %vm953_vm9, %v1423_v30  ;;  %6617 = vmatprep.subr.bf16.mxu1 %v7256_v0 }
 0x2b0   :  { %6578 = vmatpush3.bf16.msra.mxu0 %v7580_v54  ;;  %6581 = vmatprep.mubr.msk.bf16.mxu0 %vm7257_vm4, %v7256_v0 }
 0x2b1   :  { %6579 = vmatprep.subr.bf16.mxu0 %v7256_v0  ;;  %6606 = vmatmul.mubr.msk.bf16.vlgmr.msra.gmra.mrb[56].mxu1 %vm953_vm9, %v1658_v38 }
 0x2b2   :  { %6618 = vmatpush3.bf16.msra.mxu1 %v7580_v54  ;;  %6621 = vmatprep.mubr.msk.bf16.mxu1 %vm7257_vm4, %v7256_v0 }
 0x2b3   :  { %6619 = vmatprep.subr.bf16.mxu1 %v7256_v0 }
 0x2b4   :  { %6580 = vmatpush3.bf16.msra.mxu0 %v7593_v60 }
 0x2b5   :  { %6593 = vmatprep.subr.bf16.mxu0 %v7256_v0 }
 0x2b6   :  { %6620 = vmatpush3.bf16.msra.mxu1 %v7593_v60 }
 0x2b7   :  { %6582 = vmatmul.mubr.msk.bf16.vlgmr.msra.gmra.mrb[52].mxu0 %vm953_vm9, %v1517_v32  ;;  %6633 = vmatprep.subr.bf16.mxu1 %v7256_v0 }
 0x2b8   :  { %6594 = vmatpush3.bf16.msra.mxu0 %v7580_v54  ;;  %6597 = vmatprep.mubr.msk.bf16.mxu0 %vm7257_vm4, %v7256_v0 }
 0x2b9   :  { %6595 = vmatprep.subr.bf16.mxu0 %v7256_v0  ;;  %6622 = vmatmul.mubr.msk.bf16.vlgmr.msra.gmra.mrb[60].mxu1 %vm953_vm9, %v1758_v41 }
 0x2ba   :  { %6637 = vmatprep.mubr.msk.bf16.mxu1 %vm7257_vm4, %v7256_v0 }
 0x2bc   :  { %6596 = vmatpush3.bf16.msra.mxu0 %v7593_v60 }
 0x2bd   :  { %6609 = vmatprep.subr.bf16.mxu0 %v7256_v0 }
 0x2bf   :  { %6598 = vmatmul.mubr.msk.bf16.vlgmr.msra.gmra.mrb[56].mxu0 %vm953_vm9, %v1611_v35 }
 0x2c0   :  { %6610 = vmatpush3.bf16.msra.mxu0 %v7580_v54  ;;  %6613 = vmatprep.mubr.msk.bf16.mxu0 %vm7257_vm4, %v7256_v0 }
 0x2c1   :  { %6611 = vmatprep.subr.bf16.mxu0 %v7256_v0 }
 0x2c4   :  { %6612 = vmatpush3.bf16.msra.mxu0 %v7593_v60 }
 0x2c5   :  { %6625 = vmatprep.subr.bf16.mxu0 %v7256_v0 }
 0x2c7   :  { %6614 = vmatmul.mubr.msk.bf16.vlgmr.msra.gmra.mrb[60].mxu0 %vm953_vm9, %v1705_v36 }
 0x2c8   :  { %6629 = vmatprep.mubr.msk.bf16.mxu0 %vm7257_vm4, %v7256_v0 }
 0x2e5   :  { %v1133_v54 = vpop.f32.mrb[32].mxu1 }
 0x2e6   :  { %v1134_v37 = vadd.f32 %v7780_v42, %v1133_v54  ;;  %v6511_v44 = vpop.f32.mrb[33].mxu1 }
 0x2e7   :  { %v1136_v45 = vpop.f32.mrb[34].mxu1 }
 0x2e8   :  { %v1137_v46 = vadd.f32 %v7780_v42, %v1136_v45  ;;  %1804 = vrot.lane.b32.xlu0 %v1134_v37, %s7262_s12  ;;  %v6512_v60 = vpop.f32.mrb[35].mxu1 }
 0x2ea   :  { %1806 = vrot.lane.b32.xlu1 %v1137_v46, %s7262_s12 }
 0x35c   :  { %v1227_v43 = vpop.f32.mrb[36].mxu1 }
 0x35d   :  { %v1228_v47 = vadd.f32 %v7780_v42, %v1227_v43  ;;  %v6527_v48 = vpop.f32.mrb[37].mxu1 }
 0x35e   :  { %v1230_v49 = vpop.f32.mrb[38].mxu1 }
 0x35f   :  { %v1231_v50 = vadd.f32 %v7780_v42, %v1230_v49  ;;  %1820 = vrot.lane.b32.xlu0 %v1228_v47, %s7263_s2  ;;  %v6528_v51 = vpop.f32.mrb[39].mxu1 }
 0x361   :  { %1822 = vrot.lane.b32.xlu1 %v1231_v50, %s7263_s2 }
 0x362   :  { %v7790_v52 = vpop.f32.mrb[32].mxu0 }
 0x363   :  { %v6503_v53 = vpop.f32.mrb[33].mxu0 }
 0x364   :  { %v7792_v55 = vpop.f32.mrb[34].mxu0  ;;  %v1321_v56 = vpop.f32.mrb[40].mxu1 }
 0x365   :  { %v6504_v57 = vpop.f32.mrb[35].mxu0  ;;  %v1322_v58 = vadd.f32 %v7780_v42, %v1321_v56  ;;  %v6543_v59 = vpop.f32.mrb[41].mxu1 }
 0x366   :  { %v1324_v61 = vpop.f32.mrb[42].mxu1 }
 0x367   :  { %v1325_v62 = vadd.f32 %v7780_v42, %v1324_v61  ;;  %1836 = vrot.lane.b32.xlu0 %v1322_v58, %s7265_s14  ;;  %v6544_v63 = vpop.f32.mrb[43].mxu1 }
 0x369   :  { %1838 = vrot.lane.b32.xlu1 %v1325_v62, %s7265_s14 }
 0x36a   :  { %v1180_v1 = vpop.f32.mrb[36].mxu0 }
 0x36b   :  { %v1181_v2 = vadd.f32 %v7780_v42, %v1180_v1  ;;  %v6519_v3 = vpop.f32.mrb[37].mxu0 }
 0x36c   :  { %v1183_v4 = vpop.f32.mrb[38].mxu0  ;;  %v1415_v5 = vpop.f32.mrb[44].mxu1 }
 0x36d   :  { %v1184_v7 = vadd.f32 %v7780_v42, %v1183_v4  ;;  %v6520_v8 = vpop.f32.mrb[39].mxu0  ;;  %1812 = vrot.lane.b32.xlu0 %v1181_v2, %s7259_s21  ;;  %v6559_v9 = vpop.f32.mrb[45].mxu1  ;;  %v1416_v12 = vadd.f32 %v7780_v42, %v1415_v5  ;;  %v7838_v4 = vld [vmem:[%s8982_s5] sm:$0xff]  }
 0x36e   :  { %v1418_v11 = vpop.f32.mrb[46].mxu1  ;;  %6634 = vmatpush3.bf16.msra.mxu1 %v7838_v4  ;;  %v7243_v9 = vld [vmem:[%s8982_s5 + $0x8] ss:$0 sps:$4 sm:$0xff]   ;;  %6626 = vmatpush3.bf16.msra.mxu0 %v7838_v4 }
 0x36f   :  { %1814 = vrot.lane.b32.xlu1 %v1184_v7, %s7259_s21  ;;  %v6560_v13 = vpop.f32.mrb[47].mxu1  ;;  %v1419_v14 = vadd.f32 %v7780_v42, %v1418_v11  ;;  %6635 = vmatprep.subr.bf16.mxu1 %v7256_v0  ;;  %v7851_v11 = vsel %vm8990_vm7, %v7243_v9, 0  ;;  %vm8994_vm7 = vcmask 654336  }
 0x370   :  { %6627 = vmatprep.subr.bf16.mxu0 %v7256_v0 }
 0x371   :  { %1852 = vrot.lane.b32.xlu0 %v1416_v12, %s7267_s15 }
 0x372   :  { %v1274_v15 = vpop.f32.mrb[40].mxu0  ;;  %6636 = vmatpush3.bf16.msra.mxu1 %v7851_v11  ;;  %6628 = vmatpush3.bf16.msra.mxu0 %v7851_v11 }
 0x373   :  { %v1275_v16 = vadd.f32 %v7780_v42, %v1274_v15  ;;  %v6535_v17 = vpop.f32.mrb[41].mxu0  ;;  %1854 = vrot.lane.b32.xlu1 %v1419_v14, %s7267_s15  ;;  %6649 = vmatprep.subr.bf16.mxu1 %v7256_v0 }
 0x374   :  { %v1277_v18 = vpop.f32.mrb[42].mxu0  ;;  %v1509_v19 = vpop.f32.mrb[48].mxu1  ;;  %6641 = vmatprep.subr.bf16.mxu0 %v7256_v0 }
 0x375   :  { %v1278_v20 = vadd.f32 %v7780_v42, %v1277_v18  ;;  %v6536_v21 = vpop.f32.mrb[43].mxu0  ;;  %1828 = vrot.lane.b32.xlu0 %v1275_v16, %s7264_s13  ;;  %v6575_v22 = vpop.f32.mrb[49].mxu1  ;;  %v1510_v24 = vadd.f32 %v7780_v42, %v1509_v19 }
 0x376   :  { %v1512_v23 = vpop.f32.mrb[50].mxu1  ;;  %v1807_v21 = vpop.permute.xlu1 %1806 }
 0x377   :  { %1830 = vrot.lane.b32.xlu1 %v1278_v20, %s7264_s13  ;;  %v6576_v34 = vpop.f32.mrb[51].mxu1  ;;  %v1513_v25 = vadd.f32 %v7780_v42, %v1512_v23  ;;  %v1805_v20 = vpop.permute.xlu0 %1804 }
 0x379   :  { %1868 = vrot.lane.b32.xlu0 %v1510_v24, %s7269_s17 }
 0x37a   :  { %v1368_v26 = vpop.f32.mrb[44].mxu0 }
 0x37b   :  { %v1369_v27 = vadd.f32 %v7780_v42, %v1368_v26  ;;  %v6551_v28 = vpop.f32.mrb[45].mxu0  ;;  %1870 = vrot.lane.b32.xlu1 %v1513_v25, %s7269_s17 }
 0x37c   :  { %v1371_v29 = vpop.f32.mrb[46].mxu0  ;;  %v1603_v30 = vpop.f32.mrb[52].mxu1 }
 0x37d   :  { %v1372_v31 = vadd.f32 %v7780_v42, %v1371_v29  ;;  %v6552_v32 = vpop.f32.mrb[47].mxu0  ;;  %1844 = vrot.lane.b32.xlu0 %v1369_v27, %s7266_s0  ;;  %v6591_v33 = vpop.f32.mrb[53].mxu1  ;;  %v1604_v36 = vadd.f32 %v7780_v42, %v1603_v30 }
 0x37e   :  { %v1606_v35 = vpop.f32.mrb[54].mxu1 }
 0x37f   :  { %1846 = vrot.lane.b32.xlu1 %v1372_v31, %s7266_s0  ;;  %v6592_v38 = vpop.f32.mrb[55].mxu1  ;;  %v1607_v39 = vadd.f32 %v7780_v42, %v1606_v35 }
 0x380   :  { %v1089_v38 = vadd.f32 %v7780_v42, %v7790_v52 }
 0x381   :  { %1884 = vrot.lane.b32.xlu0 %v1604_v36, %s7270_s18 }
 0x382   :  { %v1462_v40 = vpop.f32.mrb[48].mxu0 }
 0x383   :  { %v1463_v41 = vadd.f32 %v7780_v42, %v1462_v40  ;;  %v6567_v54 = vpop.f32.mrb[49].mxu0  ;;  %1886 = vrot.lane.b32.xlu1 %v1607_v39, %s7270_s18  ;;  %v1092_v40 = vadd.f32 %v7780_v42, %v7792_v55 }
 0x384   :  { %v1465_v37 = vpop.f32.mrb[50].mxu0  ;;  %v1697_v44 = vpop.f32.mrb[56].mxu1 }
 0x385   :  { %v1466_v45 = vadd.f32 %v7780_v42, %v1465_v37  ;;  %v6568_v46 = vpop.f32.mrb[51].mxu0  ;;  %1860 = vrot.lane.b32.xlu0 %v1463_v41, %s7268_s16  ;;  %v6607_v60 = vpop.f32.mrb[57].mxu1  ;;  %v1698_v47 = vadd.f32 %v7780_v42, %v1697_v44  ;;  %v1922_v41 = vsel %vm948_vm8, %v1089_v38, %v1805_v20  ;;  %v1923_v44 = vsel %vm948_vm8, %v1092_v40, %v1807_v21 }
 0x386   :  { %v1700_v43 = vpop.f32.mrb[58].mxu1 }
 0x387   :  { %1862 = vrot.lane.b32.xlu1 %v1466_v45, %s7268_s16  ;;  %v6608_v48 = vpop.f32.mrb[59].mxu1  ;;  %v1701_v49 = vadd.f32 %v7780_v42, %v1700_v43 }
 0x389   :  { %1900 = vrot.lane.b32.xlu0 %v1698_v47, %s7271_s27 }
 0x38a   :  { %v1556_v50 = vpop.f32.mrb[52].mxu0 }
 0x38b   :  { %v1557_v51 = vadd.f32 %v7780_v42, %v1556_v50  ;;  %v6583_v53 = vpop.f32.mrb[53].mxu0  ;;  %1902 = vrot.lane.b32.xlu1 %v1701_v49, %s7271_s27 }
 0x38c   :  { %v1559_v56 = vpop.f32.mrb[54].mxu0  ;;  %v1795_v57 = vpop.f32.mrb[60].mxu1 }
 0x38d   :  { %v1560_v58 = vadd.f32 %v7780_v42, %v1559_v56  ;;  %v6584_v59 = vpop.f32.mrb[55].mxu0  ;;  %1876 = vrot.lane.b32.xlu0 %v1557_v51, %s7261_s23  ;;  %v6623_v61 = vpop.f32.mrb[61].mxu1  ;;  %v1796_v18 = vadd.f32 %v7780_v42, %v1795_v57 }
 0x38e   :  { %v1798_v62 = vpop.f32.mrb[62].mxu1 }
 0x38f   :  { %1878 = vrot.lane.b32.xlu1 %v1560_v58, %s7261_s23  ;;  %v6624_v63 = vpop.f32.mrb[63].mxu1  ;;  %v1799_v19 = vadd.f32 %v7780_v42, %v1798_v62 }
 0x392   :  { %v1650_v1 = vpop.f32.mrb[56].mxu0 }
 0x393   :  { %v1651_v2 = vadd.f32 %v7780_v42, %v1650_v1  ;;  %v6599_v3 = vpop.f32.mrb[57].mxu0 }
 0x394   :  { %v1653_v5 = vpop.f32.mrb[58].mxu0 }
 0x395   :  { %v1654_v7 = vadd.f32 %v7780_v42, %v1653_v5  ;;  %v6600_v8 = vpop.f32.mrb[59].mxu0  ;;  %1892 = vrot.lane.b32.xlu0 %v1651_v2, %s7258_s20 }
 0x397   :  { %1894 = vrot.lane.b32.xlu1 %v1654_v7, %s7258_s20 }
 0x39a   :  { %v1744_v12 = vpop.f32.mrb[60].mxu0 }
 0x39b   :  { %v1745_v13 = vadd.f32 %v7780_v42, %v1744_v12  ;;  %v6615_v14 = vpop.f32.mrb[61].mxu0 }
 0x39c   :  { %v1747_v15 = vpop.f32.mrb[62].mxu0 }
 0x39d   :  { %v1748_v16 = vadd.f32 %v7780_v42, %v1747_v15  ;;  %1908 = vrot.lane.b32.xlu0 %v1745_v13, %s7260_s22  ;;  %v6616_v17 = vpop.f32.mrb[63].mxu0 }
 0x39f   :  { %1910 = vrot.lane.b32.xlu1 %v1748_v16, %s7260_s22 }
 0x3a1   :  { %1916 = vrot.lane.b32.xlu0 %v1796_v18, %s7272_s28 }
 0x3a3   :  { %1918 = vrot.lane.b32.xlu1 %v1799_v19, %s7272_s28 }
 0x3d1   :  { %v1821_v22 = vpop.permute.xlu0 %1820 }
 0x3d3   :  { %v1823_v23 = vpop.permute.xlu1 %1822 }
 0x3d9   :  { %v1837_v24 = vpop.permute.xlu0 %1836 }
 0x3db   :  { %v1839_v34 = vpop.permute.xlu1 %1838 }
 0x3df   :  { %v1813_v25 = vpop.permute.xlu0 %1812 }
 0x3e0   :  { %v1924_v54 = vsel %vm85_vm5, %v1922_v41, %v1813_v25 }
 0x3e1   :  { %v1815_v26 = vpop.permute.xlu1 %1814  ;;  %v1926_v60 = vsel %vm953_vm9, %v1924_v54, %v1821_v22 }
 0x3e2   :  { %v1925_v45 = vsel %vm85_vm5, %v1923_v44, %v1815_v26 }
 0x3e3   :  { %v1853_v27 = vpop.permute.xlu0 %1852  ;;  %v1927_v52 = vsel %vm953_vm9, %v1925_v45, %v1823_v23 }
 0x3e5   :  { %v1855_v28 = vpop.permute.xlu1 %1854 }
 0x3e7   :  { %v1829_v29 = vpop.permute.xlu0 %1828 }
 0x3e8   :  { %v1928_v43 = vsel %vm107_vm6, %v1926_v60, %v1829_v29 }
 0x3e9   :  { %v1831_v30 = vpop.permute.xlu1 %1830  ;;  %v1930_v42 = vsel %vm8991_vm10, %v1928_v43, %v1837_v24 }
 0x3ea   :  { %v1929_v47 = vsel %vm107_vm6, %v1927_v52, %v1831_v30 }
 0x3eb   :  { %v1869_v31 = vpop.permute.xlu0 %1868  ;;  %v1931_v50 = vsel %vm8991_vm10, %v1929_v47, %v1839_v34  ;;  %vm8995_vm10 = vmmov %vm8994_vm7 }
 0x3ed   :  { %v1871_v32 = vpop.permute.xlu1 %1870 }
 0x3ef   :  { %v1845_v33 = vpop.permute.xlu0 %1844 }
 0x3f0   :  { %v1932_v55 = vsel %vm961_vm11, %v1930_v42, %v1845_v33 }
 0x3f1   :  { %v1847_v35 = vpop.permute.xlu1 %1846  ;;  %v1934_v53 = vsel %vm8992_vm14, %v1932_v55, %v1853_v27  ;;  %vm8996_vm14 = vcmask 785408  }
 0x3f2   :  { %v1933_v51 = vsel %vm961_vm11, %v1931_v50, %v1847_v35  ;;  %v8026_v50 = vld [vmem:[%s8983_s6] ss:$0 sm:$0xff] }
 0x3f3   :  { %v1885_v36 = vpop.permute.xlu0 %1884  ;;  %v1935_v58 = vsel %vm8993_vm1, %v1933_v51, %v1855_v28  ;;  %vm8997_vm1 = vmmov %vm8996_vm14 }
 0x3f5   :  { %v1887_v39 = vpop.permute.xlu1 %1886 }
 0x3f7   :  { %v1861_v37 = vpop.permute.xlu0 %1860 }
 0x3f8   :  { %v1936_v56 = vsel %vm35_vm0, %v1934_v53, %v1861_v37 }
 0x3f9   :  { %v1863_v46 = vpop.permute.xlu1 %1862  ;;  %v1938_v62 = vsel %vm969_vm13, %v1936_v56, %v1869_v31 }
 0x3fa   :  { %v1937_v59 = vsel %vm35_vm0, %v1935_v58, %v1863_v46 }
 0x3fb   :  { %v1901_v48 = vpop.permute.xlu0 %1900  ;;  %v1939_v2 = vsel %vm969_vm13, %v1937_v59, %v1871_v32 }
 0x3fd   :  { %v1903_v49 = vpop.permute.xlu1 %1902 }
 0x3ff   :  { %v1877_v57 = vpop.permute.xlu0 %1876 }
 0x400   :  { %v1940_v63 = vsel %vm8994_vm7, %v1938_v62, %v1877_v57 }
 0x401   :  { %v1879_v61 = vpop.permute.xlu1 %1878  ;;  %v1942_v7 = vsel %vm975_vm15, %v1940_v63, %v1885_v36 }
 0x402   :  { %v1941_v3 = vsel %vm8995_vm10, %v1939_v2, %v1879_v61 }
 0x403   :  { %v1943_v12 = vsel %vm975_vm15, %v1941_v3, %v1887_v39 }
 0x407   :  { %v1893_v1 = vpop.permute.xlu0 %1892 }
 0x408   :  { %v1944_v8 = vsel %vm8996_vm14, %v1942_v7, %v1893_v1  ;;  %vm8998_vm14 = vcmask 326656  }
 0x409   :  { %v1895_v5 = vpop.permute.xlu1 %1894  ;;  %v1946_v15 = vsel %vm981_vm2, %v1944_v8, %v1901_v48 }
 0x40a   :  { %v1945_v13 = vsel %vm8997_vm1, %v1943_v12, %v1895_v5  ;;  %vm8999_vm1 = vmmov %vm8998_vm14 }
 0x40b   :  { %v1947_v18 = vsel %vm981_vm2, %v1945_v13, %v1903_v49 }
 0x40f   :  { %v1909_v9 = vpop.permute.xlu0 %1908 }
 0x410   :  { %v1948_v16 = vsel %vm984_vm3, %v1946_v15, %v1909_v9 }
 0x411   :  { %v1911_v14 = vpop.permute.xlu1 %1910 }
 0x412   :  { %v1949_v20 = vsel %vm984_vm3, %v1947_v18, %v1911_v14 }
 0x413   :  { %v1917_v17 = vpop.permute.xlu0 %1916 }
 0x414   :  { %v1950_v19 = vsel %vm987_vm12, %v1948_v16, %v1917_v17 }
 0x415   :  { %vm1952_vm7 = vcmp.ge.f32.partialorder %v1950_v19, 0.0  ;;  %v1954_v21 = vmul.f32 0.1, %v1950_v19  ;;  %v1919_v22 = vpop.permute.xlu1 %1918 }
 0x416   :  { %v1951_v23 = vsel %vm987_vm12, %v1949_v20, %v1919_v22 }
 0x417   :  { %v1956_v24 = vsel %vm1952_vm7, %v1950_v19, %v1954_v21  ;;  %vm1953_vm10 = vcmp.ge.f32.partialorder %v1951_v23, 0.0  ;;  %v1955_v34 = vmul.f32 0.1, %v1951_v23  ;;  %vm9000_vm7 = vcmask 457728  }
 0x418   :  { %1958 = vst [vmem:[#allocation3 + $0x1] sm:$0xff] %v1956_v24 }
 0x419   :  { %v1957_v25 = vsel %vm1953_vm10, %v1951_v23, %v1955_v34  ;;  %vm9001_vm10 = vmmov %vm9000_vm7 }
 0x41a   :  { %1959 = vst [vmem:[#allocation3 + $0x9] sm:$0xff] %v1957_v25  ;;  %v1965_v26 = vpack.c.bf16 %v1957_v25, %v1956_v24 }
 0x41c   :  { %1973 = vrot.lane.b32.xlu1 %v1965_v26, %s7262_s12  ;;  %6638 = vmatmul.mubr.msk.bf16.vlgmr.msra.gmra.mrb[64].mxu1 %vm953_vm9, %v1965_v26 }
 0x41d   :  { %6650 = vmatpush3.bf16.msra.mxu1 %v7838_v4  ;;  %6653 = vmatprep.mubr.msk.bf16.mxu1 %vm7257_vm4, %v7256_v0 }
 0x41e   :  { %6651 = vmatprep.subr.bf16.mxu1 %v7256_v0 }
 0x41f   :  { %v1960_v27 = vld [vmem:[#allocation3] sm:$0xff] }
 0x420   :  { %2132 = vrot.lane.b32.xlu1 %v1965_v26, %s7260_s22 }
 0x421   :  { %v1961_v28 = vld [vmem:[#allocation3 + $0x8] sm:$0xff]  ;;  %6652 = vmatpush3.bf16.msra.mxu1 %v7851_v11 }
 0x422   :  { %v1962_v29 = vpack.c.bf16 %v1961_v28, %v1960_v27  ;;  %6665 = vmatprep.subr.bf16.mxu1 %v7256_v0  ;;  %v1966_v30 = vld [vmem:[#allocation3 + $0x2] sm:$0xff]  ;;  %v1967_v31 = vld [vmem:[#allocation3 + $0xa] sm:$0xff] }
 0x423   :  { %v1968_v32 = vpack.c.bf16 %v1967_v31, %v1966_v30 }
 0x424   :  { %1970 = vrot.lane.b32.xlu0 %v1962_v29, %s7262_s12  ;;  %2226 = vrot.lane.b32.xlu1 %v1965_v26, %s7258_s20 }
 0x428   :  { %2085 = vrot.lane.b32.xlu0 %v1965_v26, %s7272_s28  ;;  %2320 = vrot.lane.b32.xlu1 %v1965_v26, %s7261_s23 }
 0x42c   :  { %2179 = vrot.lane.b32.xlu0 %v1965_v26, %s7271_s27  ;;  %2414 = vrot.lane.b32.xlu1 %v1965_v26, %s7268_s16 }
 0x430   :  { %2273 = vrot.lane.b32.xlu0 %v1965_v26, %s7270_s18  ;;  %2508 = vrot.lane.b32.xlu1 %v1965_v26, %s7266_s0 }
 0x434   :  { %2367 = vrot.lane.b32.xlu0 %v1965_v26, %s7269_s17  ;;  %2602 = vrot.lane.b32.xlu1 %v1965_v26, %s7264_s13 }
 0x438   :  { %2461 = vrot.lane.b32.xlu0 %v1965_v26, %s7267_s15  ;;  %2696 = vrot.lane.b32.xlu1 %v1965_v26, %s7259_s21 }
 0x43c   :  { %2555 = vrot.lane.b32.xlu0 %v1965_v26, %s7265_s14 }
 0x440   :  { %2649 = vrot.lane.b32.xlu0 %v1965_v26, %s7263_s2 }
 0x444   :  { %2699 = vrot.lane.b32.xlu0 %v1968_v32, %s7259_s21 }
 0x48e   :  { %v1974_v33 = vpop.permute.xlu1 %1973 }
 0x492   :  { %v2133_v35 = vpop.permute.xlu1 %2132 }
 0x493   :  { %6654 = vmatmul.mubr.msk.bf16.vlgmr.msra.gmra.mrb[68].mxu1 %vm953_vm9, %v2133_v35 }
 0x494   :  { %6666 = vmatpush3.bf16.msra.mxu1 %v7838_v4  ;;  %6669 = vmatprep.mubr.msk.bf16.mxu1 %vm7257_vm4, %v7256_v0 }
 0x495   :  { %6667 = vmatprep.subr.bf16.mxu1 %v7256_v0 }
 0x496   :  { %v1971_v36 = vpop.permute.xlu0 %1970  ;;  %v2227_v41 = vpop.permute.xlu1 %2226 }
 0x497   :  { %v1977_v38 = vsel %vm948_vm8, %v1971_v36, %v1974_v33 }
 0x498   :  { %v1978_v39 = vsel %vm85_vm5, %v1977_v38, %v1974_v33  ;;  %6668 = vmatpush3.bf16.msra.mxu1 %v7851_v11 }
 0x499   :  { %6630 = vmatmul.mubr.msk.bf16.vlgmr.msra.gmra.mrb[64].mxu0 %vm953_vm9, %v1978_v39  ;;  %6681 = vmatprep.subr.bf16.mxu1 %v7256_v0 }
 0x49a   :  { %6642 = vmatpush3.bf16.msra.mxu0 %v7838_v4  ;;  %v2086_v40 = vpop.permute.xlu0 %2085  ;;  %6645 = vmatprep.mubr.msk.bf16.mxu0 %vm7257_vm4, %v7256_v0  ;;  %v2321_v37 = vpop.permute.xlu1 %2320 }
 0x49b   :  { %6643 = vmatprep.subr.bf16.mxu0 %v7256_v0  ;;  %6670 = vmatmul.mubr.msk.bf16.vlgmr.msra.gmra.mrb[72].mxu1 %vm953_vm9, %v2227_v41 }
 0x49c   :  { %6682 = vmatpush3.bf16.msra.mxu1 %v7838_v4  ;;  %6685 = vmatprep.mubr.msk.bf16.mxu1 %vm7257_vm4, %v7256_v0 }
 0x49d   :  { %6683 = vmatprep.subr.bf16.mxu1 %v7256_v0 }
 0x49e   :  { %6644 = vmatpush3.bf16.msra.mxu0 %v7851_v11  ;;  %v2180_v54 = vpop.permute.xlu0 %2179  ;;  %v2415_v46 = vpop.permute.xlu1 %2414 }
 0x49f   :  { %6657 = vmatprep.subr.bf16.mxu0 %v7256_v0 }
 0x4a0   :  { %6684 = vmatpush3.bf16.msra.mxu1 %v7851_v11 }
 0x4a1   :  { %6646 = vmatmul.mubr.msk.bf16.vlgmr.msra.gmra.mrb[68].mxu0 %vm953_vm9, %v2086_v40  ;;  %6697 = vmatprep.subr.bf16.mxu1 %v7256_v0 }
 0x4a2   :  { %6658 = vmatpush3.bf16.msra.mxu0 %v7838_v4  ;;  %v2274_v44 = vpop.permute.xlu0 %2273  ;;  %6661 = vmatprep.mubr.msk.bf16.mxu0 %vm7257_vm4, %v7256_v0  ;;  %v2509_v43 = vpop.permute.xlu1 %2508 }
 0x4a3   :  { %6659 = vmatprep.subr.bf16.mxu0 %v7256_v0  ;;  %6686 = vmatmul.mubr.msk.bf16.vlgmr.msra.gmra.mrb[76].mxu1 %vm953_vm9, %v2321_v37 }
 0x4a4   :  { %6698 = vmatpush3.bf16.msra.mxu1 %v7838_v4  ;;  %6701 = vmatprep.mubr.msk.bf16.mxu1 %vm7257_vm4, %v7256_v0 }
 0x4a5   :  { %6699 = vmatprep.subr.bf16.mxu1 %v7256_v0 }
 0x4a6   :  { %6660 = vmatpush3.bf16.msra.mxu0 %v7851_v11  ;;  %v2368_v45 = vpop.permute.xlu0 %2367  ;;  %v2603_v48 = vpop.permute.xlu1 %2602 }
 0x4a7   :  { %6673 = vmatprep.subr.bf16.mxu0 %v7256_v0 }
 0x4a8   :  { %6700 = vmatpush3.bf16.msra.mxu1 %v7851_v11 }
 0x4a9   :  { %6662 = vmatmul.mubr.msk.bf16.vlgmr.msra.gmra.mrb[72].mxu0 %vm953_vm9, %v2180_v54  ;;  %6713 = vmatprep.subr.bf16.mxu1 %v7256_v0 }
 0x4aa   :  { %6674 = vmatpush3.bf16.msra.mxu0 %v7838_v4  ;;  %6677 = vmatprep.mubr.msk.bf16.mxu0 %vm7257_vm4, %v7256_v0  ;;  %v2462_v60 = vpop.permute.xlu0 %2461  ;;  %v2697_v55 = vpop.permute.xlu1 %2696 }
 0x4ab   :  { %6675 = vmatprep.subr.bf16.mxu0 %v7256_v0  ;;  %6702 = vmatmul.mubr.msk.bf16.vlgmr.msra.gmra.mrb[80].mxu1 %vm953_vm9, %v2415_v46 }
 0x4ac   :  { %6714 = vmatpush3.bf16.msra.mxu1 %v7838_v4  ;;  %6717 = vmatprep.mubr.msk.bf16.mxu1 %vm7257_vm4, %v7256_v0 }
 0x4ad   :  { %6715 = vmatprep.subr.bf16.mxu1 %v7256_v0 }
 0x4ae   :  { %6676 = vmatpush3.bf16.msra.mxu0 %v7851_v11  ;;  %v2556_v52 = vpop.permute.xlu0 %2555 }
 0x4af   :  { %6689 = vmatprep.subr.bf16.mxu0 %v7256_v0 }
 0x4b0   :  { %6716 = vmatpush3.bf16.msra.mxu1 %v7851_v11 }
 0x4b1   :  { %6678 = vmatmul.mubr.msk.bf16.vlgmr.msra.gmra.mrb[76].mxu0 %vm953_vm9, %v2274_v44  ;;  %6729 = vmatprep.subr.bf16.mxu1 %v7256_v0 }
 0x4b2   :  { %6690 = vmatpush3.bf16.msra.mxu0 %v7838_v4  ;;  %6693 = vmatprep.mubr.msk.bf16.mxu0 %vm7257_vm4, %v7256_v0  ;;  %v2650_v47 = vpop.permute.xlu0 %2649 }
 0x4b3   :  { %6691 = vmatprep.subr.bf16.mxu0 %v7256_v0  ;;  %6718 = vmatmul.mubr.msk.bf16.vlgmr.msra.gmra.mrb[84].mxu1 %vm953_vm9, %v2509_v43 }
 0x4b4   :  { %6730 = vmatpush3.bf16.msra.mxu1 %v7838_v4  ;;  %6733 = vmatprep.mubr.msk.bf16.mxu1 %vm7257_vm4, %v7256_v0 }
 0x4b5   :  { %6731 = vmatprep.subr.bf16.mxu1 %v7256_v0 }
 0x4b6   :  { %6692 = vmatpush3.bf16.msra.mxu0 %v7851_v11  ;;  %v2700_v42 = vpop.permute.xlu0 %2699 }
 0x4b7   :  { %6705 = vmatprep.subr.bf16.mxu0 %v7256_v0  ;;  %v2703_v49 = vsel %vm85_vm5, %v2697_v55, %v2700_v42 }
 0x4b8   :  { %6732 = vmatpush3.bf16.msra.mxu1 %v7851_v11 }
 0x4b9   :  { %6694 = vmatmul.mubr.msk.bf16.vlgmr.msra.gmra.mrb[80].mxu0 %vm953_vm9, %v2368_v45  ;;  %6745 = vmatprep.subr.bf16.mxu1 %v7256_v0 }
 0x4ba   :  { %6706 = vmatpush3.bf16.msra.mxu0 %v7838_v4  ;;  %6709 = vmatprep.mubr.msk.bf16.mxu0 %vm7257_vm4, %v7256_v0 }
 0x4bb   :  { %6707 = vmatprep.subr.bf16.mxu0 %v7256_v0  ;;  %6734 = vmatmul.mubr.msk.bf16.vlgmr.msra.gmra.mrb[88].mxu1 %vm953_vm9, %v2603_v48 }
 0x4bc   :  { %6746 = vmatpush3.bf16.msra.mxu1 %v7838_v4  ;;  %6749 = vmatprep.mubr.msk.bf16.mxu1 %vm7257_vm4, %v7256_v0 }
 0x4bd   :  { %6747 = vmatprep.subr.bf16.mxu1 %v7256_v0 }
 0x4be   :  { %6708 = vmatpush3.bf16.msra.mxu0 %v7851_v11 }
 0x4bf   :  { %6721 = vmatprep.subr.bf16.mxu0 %v7256_v0 }
 0x4c0   :  { %6748 = vmatpush3.bf16.msra.mxu1 %v7851_v11 }
 0x4c1   :  { %6710 = vmatmul.mubr.msk.bf16.vlgmr.msra.gmra.mrb[84].mxu0 %vm953_vm9, %v2462_v60  ;;  %6761 = vmatprep.subr.bf16.mxu1 %v7256_v0 }
 0x4c2   :  { %6722 = vmatpush3.bf16.msra.mxu0 %v7838_v4  ;;  %6725 = vmatprep.mubr.msk.bf16.mxu0 %vm7257_vm4, %v7256_v0 }
 0x4c3   :  { %6723 = vmatprep.subr.bf16.mxu0 %v7256_v0  ;;  %6750 = vmatmul.mubr.msk.bf16.vlgmr.msra.gmra.mrb[92].mxu1 %vm953_vm9, %v2703_v49 }
 0x4c4   :  { %6765 = vmatprep.mubr.msk.bf16.mxu1 %vm7257_vm4, %v7256_v0 }
 0x4c6   :  { %6724 = vmatpush3.bf16.msra.mxu0 %v7851_v11 }
 0x4c7   :  { %6737 = vmatprep.subr.bf16.mxu0 %v7256_v0 }
 0x4c9   :  { %6726 = vmatmul.mubr.msk.bf16.vlgmr.msra.gmra.mrb[88].mxu0 %vm953_vm9, %v2556_v52 }
 0x4ca   :  { %6738 = vmatpush3.bf16.msra.mxu0 %v7838_v4  ;;  %6741 = vmatprep.mubr.msk.bf16.mxu0 %vm7257_vm4, %v7256_v0 }
 0x4cb   :  { %6739 = vmatprep.subr.bf16.mxu0 %v7256_v0 }
 0x4ce   :  { %6740 = vmatpush3.bf16.msra.mxu0 %v7851_v11 }
 0x4cf   :  { %6753 = vmatprep.subr.bf16.mxu0 %v7256_v0 }
 0x4d1   :  { %6742 = vmatmul.mubr.msk.bf16.vlgmr.msra.gmra.mrb[92].mxu0 %vm953_vm9, %v2650_v47 }
 0x4d2   :  { %6757 = vmatprep.mubr.msk.bf16.mxu0 %vm7257_vm4, %v7256_v0 }
 0x4ef   :  { %v2078_v4 = vpop.f32.mrb[64].mxu1 }
 0x4f0   :  { %v2079_v51 = vadd.f32 %v8026_v50, %v2078_v4  ;;  %v6639_v53 = vpop.f32.mrb[65].mxu1 }
 0x4f1   :  { %v2081_v56 = vpop.f32.mrb[66].mxu1 }
 0x4f2   :  { %v2082_v57 = vadd.f32 %v8026_v50, %v2081_v56  ;;  %2749 = vrot.lane.b32.xlu1 %v2079_v51, %s7262_s12  ;;  %v6640_v11 = vpop.f32.mrb[67].mxu1 }
 0x4f4   :  { %2751 = vrot.lane.b32.xlu0 %v2082_v57, %s7262_s12 }
 0x566   :  { %v2172_v58 = vpop.f32.mrb[68].mxu1 }
 0x567   :  { %v2173_v59 = vadd.f32 %v8026_v50, %v2172_v58  ;;  %v6655_v61 = vpop.f32.mrb[69].mxu1 }
 0x568   :  { %v2175_v62 = vpop.f32.mrb[70].mxu1 }
 0x569   :  { %v2176_v63 = vadd.f32 %v8026_v50, %v2175_v62  ;;  %2765 = vrot.lane.b32.xlu1 %v2173_v59, %s7263_s2  ;;  %v6656_v1 = vpop.f32.mrb[71].mxu1 }
 0x56b   :  { %2767 = vrot.lane.b32.xlu0 %v2176_v63, %s7263_s2 }
 0x56c   :  { %v8036_v2 = vpop.f32.mrb[64].mxu0 }
 0x56d   :  { %v6631_v3 = vpop.f32.mrb[65].mxu0 }
 0x56e   :  { %v8038_v5 = vpop.f32.mrb[66].mxu0  ;;  %v2266_v7 = vpop.f32.mrb[72].mxu1 }
 0x56f   :  { %v6632_v8 = vpop.f32.mrb[67].mxu0  ;;  %v2267_v9 = vadd.f32 %v8026_v50, %v2266_v7  ;;  %v6671_v12 = vpop.f32.mrb[73].mxu1 }
 0x570   :  { %v2269_v13 = vpop.f32.mrb[74].mxu1 }
 0x571   :  { %v2270_v14 = vadd.f32 %v8026_v50, %v2269_v13  ;;  %2781 = vrot.lane.b32.xlu1 %v2267_v9, %s7265_s14  ;;  %v6672_v15 = vpop.f32.mrb[75].mxu1 }
 0x573   :  { %2783 = vrot.lane.b32.xlu0 %v2270_v14, %s7265_s14 }
 0x574   :  { %v2125_v16 = vpop.f32.mrb[68].mxu0 }
 0x575   :  { %v2126_v17 = vadd.f32 %v8026_v50, %v2125_v16  ;;  %v6647_v18 = vpop.f32.mrb[69].mxu0 }
 0x576   :  { %v2128_v19 = vpop.f32.mrb[70].mxu0  ;;  %v2360_v20 = vpop.f32.mrb[76].mxu1 }
 0x577   :  { %v2129_v21 = vadd.f32 %v8026_v50, %v2128_v19  ;;  %v6648_v22 = vpop.f32.mrb[71].mxu0  ;;  %2757 = vrot.lane.b32.xlu1 %v2126_v17, %s7259_s21  ;;  %v6687_v23 = vpop.f32.mrb[77].mxu1  ;;  %v2361_v34 = vadd.f32 %v8026_v50, %v2360_v20 }
 0x578   :  { %v2363_v24 = vpop.f32.mrb[78].mxu1 }
 0x579   :  { %2759 = vrot.lane.b32.xlu0 %v2129_v21, %s7259_s21  ;;  %v6688_v25 = vpop.f32.mrb[79].mxu1  ;;  %v2364_v26 = vadd.f32 %v8026_v50, %v2363_v24 }
 0x57b   :  { %2797 = vrot.lane.b32.xlu1 %v2361_v34, %s7267_s15 }
 0x57c   :  { %v2219_v27 = vpop.f32.mrb[72].mxu0 }
 0x57d   :  { %v2220_v28 = vadd.f32 %v8026_v50, %v2219_v27  ;;  %v6663_v29 = vpop.f32.mrb[73].mxu0  ;;  %2799 = vrot.lane.b32.xlu0 %v2364_v26, %s7267_s15 }
 0x57e   :  { %v2222_v30 = vpop.f32.mrb[74].mxu0  ;;  %v2454_v31 = vpop.f32.mrb[80].mxu1  ;;  %v8095_v29 = vld [vmem:[%s8980_s3 + $0xc] sm:$0xff]  }
 0x57f   :  { %v2223_v32 = vadd.f32 %v8026_v50, %v2222_v30  ;;  %v6664_v33 = vpop.f32.mrb[75].mxu0  ;;  %2773 = vrot.lane.b32.xlu1 %v2220_v28, %s7264_s13  ;;  %v6703_v35 = vpop.f32.mrb[81].mxu1  ;;  %v2455_v38 = vadd.f32 %v8026_v50, %v2454_v31  ;;  %6754 = vmatpush3.bf16.msra.mxu0 %v8095_v29 }
 0x580   :  { %v2457_v36 = vpop.f32.mrb[82].mxu1  ;;  %6762 = vmatpush3.bf16.msra.mxu1 %v8095_v29  ;;  %6755 = vmatprep.subr.bf16.mxu0 %v7256_v0  ;;  %v2750_v30 = vpop.permute.xlu1 %2749 }
 0x581   :  { %2775 = vrot.lane.b32.xlu0 %v2223_v32, %s7264_s13  ;;  %v6704_v39 = vpop.f32.mrb[83].mxu1  ;;  %v2458_v40 = vadd.f32 %v8026_v50, %v2457_v36  ;;  %6763 = vmatprep.subr.bf16.mxu1 %v7256_v0  ;;  %v2752_v31 = vpop.permute.xlu0 %2751 }
 0x583   :  { %2813 = vrot.lane.b32.xlu1 %v2455_v38, %s7269_s17 }
 0x584   :  { %v2313_v41 = vpop.f32.mrb[76].mxu0 }
 0x585   :  { %v2314_v54 = vadd.f32 %v8026_v50, %v2313_v41  ;;  %v6679_v37 = vpop.f32.mrb[77].mxu0  ;;  %2815 = vrot.lane.b32.xlu0 %v2458_v40, %s7269_s17 }
 0x586   :  { %v2316_v44 = vpop.f32.mrb[78].mxu0  ;;  %v2548_v45 = vpop.f32.mrb[84].mxu1 }
 0x587   :  { %v2317_v46 = vadd.f32 %v8026_v50, %v2316_v44  ;;  %v6680_v60 = vpop.f32.mrb[79].mxu0  ;;  %2789 = vrot.lane.b32.xlu1 %v2314_v54, %s7266_s0  ;;  %v6719_v43 = vpop.f32.mrb[85].mxu1  ;;  %v2549_v47 = vadd.f32 %v8026_v50, %v2548_v45 }
 0x588   :  { %v2551_v52 = vpop.f32.mrb[86].mxu1 }
 0x589   :  { %2791 = vrot.lane.b32.xlu0 %v2317_v46, %s7266_s0  ;;  %v6720_v48 = vpop.f32.mrb[87].mxu1  ;;  %v2552_v42 = vadd.f32 %v8026_v50, %v2551_v52  ;;  %v2034_v52 = vadd.f32 %v8026_v50, %v8036_v2 }
 0x58a   :  { %v2037_v48 = vadd.f32 %v8026_v50, %v8038_v5 }
 0x58b   :  { %2829 = vrot.lane.b32.xlu1 %v2549_v47, %s7270_s18 }
 0x58c   :  { %v2407_v55 = vpop.f32.mrb[80].mxu0 }
 0x58d   :  { %v2408_v49 = vadd.f32 %v8026_v50, %v2407_v55  ;;  %v6695_v4 = vpop.f32.mrb[81].mxu0  ;;  %2831 = vrot.lane.b32.xlu0 %v2552_v42, %s7270_s18  ;;  %v2867_v42 = vsel %vm948_vm8, %v2034_v52, %v2750_v30 }
 0x58e   :  { %v2410_v51 = vpop.f32.mrb[82].mxu0  ;;  %v2642_v53 = vpop.f32.mrb[88].mxu1  ;;  %v2868_v4 = vsel %vm948_vm8, %v2037_v48, %v2752_v31 }
 0x58f   :  { %v2411_v56 = vadd.f32 %v8026_v50, %v2410_v51  ;;  %v6696_v57 = vpop.f32.mrb[83].mxu0  ;;  %2805 = vrot.lane.b32.xlu1 %v2408_v49, %s7268_s16  ;;  %v6735_v11 = vpop.f32.mrb[89].mxu1  ;;  %v2643_v59 = vadd.f32 %v8026_v50, %v2642_v53 }
 0x590   :  { %v2645_v58 = vpop.f32.mrb[90].mxu1 }
 0x591   :  { %2807 = vrot.lane.b32.xlu0 %v2411_v56, %s7268_s16  ;;  %v6736_v61 = vpop.f32.mrb[91].mxu1  ;;  %v2646_v62 = vadd.f32 %v8026_v50, %v2645_v58 }
 0x593   :  { %2845 = vrot.lane.b32.xlu1 %v2643_v59, %s7271_s27 }
 0x594   :  { %v2501_v63 = vpop.f32.mrb[84].mxu0 }
 0x595   :  { %v2502_v1 = vadd.f32 %v8026_v50, %v2501_v63  ;;  %v6711_v3 = vpop.f32.mrb[85].mxu0  ;;  %2847 = vrot.lane.b32.xlu0 %v2646_v62, %s7271_s27 }
 0x596   :  { %v2504_v7 = vpop.f32.mrb[86].mxu0  ;;  %v2740_v8 = vpop.f32.mrb[92].mxu1 }
 0x597   :  { %v2505_v9 = vadd.f32 %v8026_v50, %v2504_v7  ;;  %v6712_v12 = vpop.f32.mrb[87].mxu0  ;;  %2821 = vrot.lane.b32.xlu1 %v2502_v1, %s7261_s23  ;;  %v6751_v13 = vpop.f32.mrb[93].mxu1  ;;  %v2741_v27 = vadd.f32 %v8026_v50, %v2740_v8 }
 0x598   :  { %v2743_v14 = vpop.f32.mrb[94].mxu1 }
 0x599   :  { %2823 = vrot.lane.b32.xlu0 %v2505_v9, %s7261_s23  ;;  %v6752_v15 = vpop.f32.mrb[95].mxu1  ;;  %v2744_v28 = vadd.f32 %v8026_v50, %v2743_v14 }
 0x59c   :  { %v2595_v16 = vpop.f32.mrb[88].mxu0 }
 0x59d   :  { %v2596_v17 = vadd.f32 %v8026_v50, %v2595_v16  ;;  %v6727_v18 = vpop.f32.mrb[89].mxu0 }
 0x59e   :  { %v2598_v19 = vpop.f32.mrb[90].mxu0 }
 0x59f   :  { %v2599_v20 = vadd.f32 %v8026_v50, %v2598_v19  ;;  %v6728_v21 = vpop.f32.mrb[91].mxu0  ;;  %2837 = vrot.lane.b32.xlu1 %v2596_v17, %s7258_s20 }
 0x5a1   :  { %2839 = vrot.lane.b32.xlu0 %v2599_v20, %s7258_s20 }
 0x5a4   :  { %v2689_v22 = vpop.f32.mrb[92].mxu0 }
 0x5a5   :  { %v2690_v23 = vadd.f32 %v8026_v50, %v2689_v22  ;;  %v6743_v24 = vpop.f32.mrb[93].mxu0 }
 0x5a6   :  { %v2692_v34 = vpop.f32.mrb[94].mxu0 }
 0x5a7   :  { %v2693_v25 = vadd.f32 %v8026_v50, %v2692_v34  ;;  %2853 = vrot.lane.b32.xlu1 %v2690_v23, %s7260_s22  ;;  %v6744_v26 = vpop.f32.mrb[95].mxu0 }
 0x5a9   :  { %2855 = vrot.lane.b32.xlu0 %v2693_v25, %s7260_s22 }
 0x5ab   :  { %2861 = vrot.lane.b32.xlu1 %v2741_v27, %s7272_s28 }
 0x5ad   :  { %2863 = vrot.lane.b32.xlu0 %v2744_v28, %s7272_s28 }
 0x5db   :  { %v2766_v32 = vpop.permute.xlu1 %2765 }
 0x5dd   :  { %v2768_v33 = vpop.permute.xlu0 %2767 }
 0x5e3   :  { %v2782_v35 = vpop.permute.xlu1 %2781 }
 0x5e5   :  { %v2784_v36 = vpop.permute.xlu0 %2783 }
 0x5e9   :  { %v2758_v38 = vpop.permute.xlu1 %2757 }
 0x5ea   :  { %v2869_v55 = vsel %vm85_vm5, %v2867_v42, %v2758_v38 }
 0x5eb   :  { %v2760_v39 = vpop.permute.xlu0 %2759  ;;  %v2871_v56 = vsel %vm953_vm9, %v2869_v55, %v2766_v32 }
 0x5ec   :  { %v2870_v51 = vsel %vm85_vm5, %v2868_v4, %v2760_v39 }
 0x5ed   :  { %v2798_v40 = vpop.permute.xlu1 %2797  ;;  %v2872_v2 = vsel %vm953_vm9, %v2870_v51, %v2768_v33 }
 0x5ef   :  { %v2800_v41 = vpop.permute.xlu0 %2799 }
 0x5f1   :  { %v2774_v54 = vpop.permute.xlu1 %2773 }
 0x5f2   :  { %v2873_v57 = vsel %vm107_vm6, %v2871_v56, %v2774_v54 }
 0x5f3   :  { %v2776_v37 = vpop.permute.xlu0 %2775  ;;  %v2875_v50 = vsel %vm8998_vm14, %v2873_v57, %v2782_v35  ;;  %vm9002_vm14 = vcmask 654336  }
 0x5f4   :  { %v2874_v11 = vsel %vm107_vm6, %v2872_v2, %v2776_v37 }
 0x5f5   :  { %v2814_v44 = vpop.permute.xlu1 %2813  ;;  %v2876_v61 = vsel %vm8999_vm1, %v2874_v11, %v2784_v36  ;;  %vm9003_vm1 = vmmov %vm9002_vm14  ;;  %v7245_v36 = vld [vmem:[%s8980_s3 + $0x14] ss:$0 sps:$4 sm:$0xff]  }
 0x5f7   :  { %v2816_v45 = vpop.permute.xlu0 %2815 }
 0x5f9   :  { %v2790_v46 = vpop.permute.xlu1 %2789 }
 0x5fa   :  { %v2877_v5 = vsel %vm961_vm11, %v2875_v50, %v2790_v46 }
 0x5fb   :  { %v2792_v60 = vpop.permute.xlu0 %2791  ;;  %v2879_v63 = vsel %vm9000_vm7, %v2877_v5, %v2798_v40  ;;  %vm9004_vm7 = vcmask 785408  }
 0x5fc   :  { %v2878_v62 = vsel %vm961_vm11, %v2876_v61, %v2792_v60 }
 0x5fd   :  { %v2830_v43 = vpop.permute.xlu1 %2829  ;;  %v2880_v7 = vsel %vm9001_vm10, %v2878_v62, %v2800_v41  ;;  %vm9005_vm10 = vmmov %vm9004_vm7 }
 0x5ff   :  { %v2832_v47 = vpop.permute.xlu0 %2831 }
 0x601   :  { %v2806_v49 = vpop.permute.xlu1 %2805 }
 0x602   :  { %v2881_v1 = vsel %vm35_vm0, %v2879_v63, %v2806_v49 }
 0x603   :  { %v2808_v53 = vpop.permute.xlu0 %2807  ;;  %v2883_v12 = vsel %vm969_vm13, %v2881_v1, %v2814_v44 }
 0x604   :  { %v2882_v8 = vsel %vm35_vm0, %v2880_v7, %v2808_v53 }
 0x605   :  { %v2846_v58 = vpop.permute.xlu1 %2845  ;;  %v2884_v15 = vsel %vm969_vm13, %v2882_v8, %v2816_v45 }
 0x607   :  { %v2848_v59 = vpop.permute.xlu0 %2847 }
 0x609   :  { %v2822_v3 = vpop.permute.xlu1 %2821 }
 0x60a   :  { %v2885_v13 = vsel %vm9002_vm14, %v2883_v12, %v2822_v3 }
 0x60b   :  { %v2824_v9 = vpop.permute.xlu0 %2823  ;;  %v2887_v18 = vsel %vm975_vm15, %v2885_v13, %v2830_v43 }
 0x60c   :  { %v2886_v16 = vsel %vm9003_vm1, %v2884_v15, %v2824_v9 }
 0x60d   :  { %v2888_v21 = vsel %vm975_vm15, %v2886_v16, %v2832_v47 }
 0x611   :  { %v2838_v14 = vpop.permute.xlu1 %2837 }
 0x612   :  { %v2889_v19 = vsel %vm9004_vm7, %v2887_v18, %v2838_v14  ;;  %vm9006_vm7 = vcmask 1043456  }
 0x613   :  { %v2840_v17 = vpop.permute.xlu0 %2839  ;;  %v2891_v24 = vsel %vm981_vm2, %v2889_v19, %v2846_v58  ;;  %v8150_v39 = vsel %vm9006_vm7, %v7245_v36, 0 }
 0x614   :  { %v2890_v22 = vsel %vm9005_vm10, %v2888_v21, %v2840_v17  ;;  %6756 = vmatpush3.bf16.msra.mxu0 %v8150_v39  ;;  %6764 = vmatpush3.bf16.msra.mxu1 %v8150_v39  ;;  %vm9007_vm10 = vmmov %vm9006_vm7  ;;  %vm9010_vm7 = vcmask 457728  }
 0x615   :  { %v2892_v26 = vsel %vm981_vm2, %v2890_v22, %v2848_v59  ;;  %6769 = vmatprep.subr.bf16.mxu0 %v7256_v0  ;;  %6777 = vmatprep.subr.bf16.mxu1 %v7256_v0 }
 0x619   :  { %v2854_v20 = vpop.permute.xlu1 %2853 }
 0x61a   :  { %v2893_v34 = vsel %vm984_vm3, %v2891_v24, %v2854_v20 }
 0x61b   :  { %v2856_v23 = vpop.permute.xlu0 %2855 }
 0x61c   :  { %v2894_v28 = vsel %vm984_vm3, %v2892_v26, %v2856_v23 }
 0x61d   :  { %v2862_v25 = vpop.permute.xlu1 %2861 }
 0x61e   :  { %v2895_v27 = vsel %vm987_vm12, %v2893_v34, %v2862_v25 }
 0x61f   :  { %v8135_v30 = vadd.f32 %v2895_v27, %v7641_v6  ;;  %v2864_v31 = vpop.permute.xlu0 %2863 }
 0x620   :  { %v2896_v32 = vsel %vm987_vm12, %v2894_v28, %v2864_v31 }
 0x621   :  { %vm2917_vm14 = vcmp.ge.f32.partialorder %v8135_v30, 0.0  ;;  %v2919_v33 = vmul.f32 0.1, %v8135_v30  ;;  %v8141_v35 = vadd.f32 %v2896_v32, %v7647_v10 }
 0x623   :  { %v2921_v38 = vsel %vm2917_vm14, %v8135_v30, %v2919_v33  ;;  %vm2918_vm1 = vcmp.ge.f32.partialorder %v8141_v35, 0.0  ;;  %v2920_v6 = vmul.f32 0.1, %v8141_v35  ;;  %vm9008_vm14 = vcmask 326656  }
 0x624   :  { %2923 = vst [vmem:[#allocation3 + $0x1] sm:$0xff] %v2921_v38 }
 0x625   :  { %v2922_v40 = vsel %vm2918_vm1, %v8141_v35, %v2920_v6  ;;  %vm9009_vm1 = vmmov %vm9008_vm14 }
 0x626   :  { %2924 = vst [vmem:[#allocation3 + $0x9] sm:$0xff] %v2922_v40  ;;  %v2930_v10 = vpack.c.bf16 %v2922_v40, %v2921_v38  ;;  %v8321_v40 = vld [vmem:[%s8981_s4 + $0x1] ss:$0 sm:$0xff] }
 0x628   :  { %2938 = vrot.lane.b32.xlu0 %v2930_v10, %s7262_s12 }
 0x62b   :  { %v2925_v41 = vld [vmem:[#allocation3] sm:$0xff] }
 0x62d   :  { %v2926_v54 = vld [vmem:[#allocation3 + $0x8] sm:$0xff] }
 0x62e   :  { %v2927_v37 = vpack.c.bf16 %v2926_v54, %v2925_v41  ;;  %v2931_v44 = vld [vmem:[#allocation3 + $0x2] sm:$0xff]  ;;  %v2932_v45 = vld [vmem:[#allocation3 + $0xa] sm:$0xff] }
 0x62f   :  { %v8172_v46 = vpack.c.bf16 %v2932_v45, %v2931_v44 }
 0x630   :  { %2935 = vrot.lane.b32.xlu1 %v2927_v37, %s7263_s2  ;;  %3008 = vrot.lane.b32.xlu0 %v2927_v37, %s7259_s21 }
 0x634   :  { %2940 = vrot.lane.b32.xlu1 %v2930_v10, %s7272_s28  ;;  %3060 = vrot.lane.b32.xlu0 %v2927_v37, %s7262_s12 }
 0x638   :  { %3010 = vrot.lane.b32.xlu1 %v2930_v10, %s7260_s22  ;;  %3111 = vrot.lane.b32.xlu0 %v2930_v10, %s7258_s20 }
 0x63c   :  { %3062 = vrot.lane.b32.xlu1 %v2930_v10, %s7271_s27  ;;  %3207 = vrot.lane.b32.xlu0 %v2930_v10, %s7261_s23 }
 0x640   :  { %3159 = vrot.lane.b32.xlu1 %v2930_v10, %s7270_s18  ;;  %3303 = vrot.lane.b32.xlu0 %v2930_v10, %s7268_s16 }
 0x644   :  { %3255 = vrot.lane.b32.xlu1 %v2930_v10, %s7269_s17  ;;  %3399 = vrot.lane.b32.xlu0 %v2930_v10, %s7266_s0 }
 0x648   :  { %3351 = vrot.lane.b32.xlu1 %v2930_v10, %s7267_s15  ;;  %3495 = vrot.lane.b32.xlu0 %v2930_v10, %s7264_s13 }
 0x64c   :  { %3447 = vrot.lane.b32.xlu1 %v2930_v10, %s7265_s14  ;;  %3592 = vrot.lane.b32.xlu0 %v8172_v46, %s7259_s21 }
 0x650   :  { %3543 = vrot.lane.b32.xlu1 %v2930_v10, %s7263_s2  ;;  %3688 = vrot.lane.b32.xlu0 %v2930_v10, %s7259_s21 }
 0x654   :  { %3640 = vrot.lane.b32.xlu1 %v8172_v46, %s7262_s12 }
 0x69a   :  { %v2939_v60 = vpop.permute.xlu0 %2938 }
 0x6a2   :  { %v2936_v43 = vpop.permute.xlu1 %2935  ;;  %v3009_v52 = vpop.permute.xlu0 %3008 }
 0x6a3   :  { %v2944_v47 = vsel %vm948_vm8, %v2936_v43, %v2939_v60  ;;  %v3014_v55 = vsel %vm948_vm8, %v3009_v52, %v2930_v10 }
 0x6a6   :  { %v2941_v48 = vpop.permute.xlu1 %2940  ;;  %v3061_v49 = vpop.permute.xlu0 %3060 }
 0x6a7   :  { %v2946_v42 = vsel %vm85_vm5, %v2944_v47, %v2941_v48  ;;  %v3065_v53 = vsel %vm948_vm8, %v3061_v49, %v2941_v48 }
 0x6a8   :  { %6758 = vmatmul.mubr.msk.bf16.vlgmr.msra.gmra.mrb[96].mxu0 %vm953_vm9, %v2946_v42 }
 0x6a9   :  { %6770 = vmatpush3.bf16.msra.mxu0 %v8095_v29  ;;  %6773 = vmatprep.mubr.msk.bf16.mxu0 %vm7257_vm4, %v7256_v0 }
 0x6aa   :  { %v3011_v4 = vpop.permute.xlu1 %3010  ;;  %6771 = vmatprep.subr.bf16.mxu0 %v7256_v0  ;;  %v3112_v11 = vpop.permute.xlu0 %3111 }
 0x6ab   :  { %v3016_v51 = vsel %vm85_vm5, %v3014_v55, %v3011_v4  ;;  %v3113_v2 = vsel %vm948_vm8, %v2930_v10, %v3011_v4  ;;  %v3209_v62 = vsel %vm948_vm8, %v3011_v4, %v3112_v11 }
 0x6ac   :  { %6766 = vmatmul.mubr.msk.bf16.vlgmr.msra.gmra.mrb[96].mxu1 %vm953_vm9, %v3016_v51  ;;  %v3115_v58 = vsel %vm85_vm5, %v3113_v2, %v3112_v11 }
 0x6ad   :  { %6772 = vmatpush3.bf16.msra.mxu0 %v8150_v39  ;;  %6778 = vmatpush3.bf16.msra.mxu1 %v8095_v29 }
 0x6ae   :  { %v3063_v56 = vpop.permute.xlu1 %3062  ;;  %6779 = vmatprep.subr.bf16.mxu1 %v7256_v0  ;;  %6785 = vmatprep.subr.bf16.mxu0 %v7256_v0  ;;  %v3208_v61 = vpop.permute.xlu0 %3207 }
 0x6af   :  { %v3067_v57 = vsel %vm85_vm5, %v3065_v53, %v3063_v56  ;;  %6781 = vmatprep.mubr.msk.bf16.mxu1 %vm7257_vm4, %v7256_v0  ;;  %v3161_v5 = vsel %vm948_vm8, %v2941_v48, %v3063_v56  ;;  %v3211_v63 = vsel %vm85_vm5, %v3209_v62, %v3208_v61  ;;  %v3305_v9 = vsel %vm948_vm8, %v3112_v11, %v3208_v61 }
 0x6b0   :  { %6774 = vmatmul.mubr.msk.bf16.vlgmr.msra.gmra.mrb[100].mxu0 %vm953_vm9, %v3067_v57 }
 0x6b1   :  { %6780 = vmatpush3.bf16.msra.mxu1 %v8150_v39  ;;  %6786 = vmatpush3.bf16.msra.mxu0 %v8095_v29 }
 0x6b2   :  { %6787 = vmatprep.subr.bf16.mxu0 %v7256_v0  ;;  %6793 = vmatprep.subr.bf16.mxu1 %v7256_v0  ;;  %v3160_v50 = vpop.permute.xlu1 %3159  ;;  %v3304_v8 = vpop.permute.xlu0 %3303 }
 0x6b3   :  { %6789 = vmatprep.mubr.msk.bf16.mxu0 %vm7257_vm4, %v7256_v0  ;;  %v3163_v59 = vsel %vm85_vm5, %v3161_v5, %v3160_v50  ;;  %v3257_v3 = vsel %vm948_vm8, %v3063_v56, %v3160_v50  ;;  %v3307_v12 = vsel %vm85_vm5, %v3305_v9, %v3304_v8  ;;  %v3401_v17 = vsel %vm948_vm8, %v3208_v61, %v3304_v8 }
 0x6b4   :  { %6782 = vmatmul.mubr.msk.bf16.vlgmr.msra.gmra.mrb[100].mxu1 %vm953_vm9, %v3115_v58 }
 0x6b5   :  { %6788 = vmatpush3.bf16.msra.mxu0 %v8150_v39  ;;  %6794 = vmatpush3.bf16.msra.mxu1 %v8095_v29 }
 0x6b6   :  { %6795 = vmatprep.subr.bf16.mxu1 %v7256_v0  ;;  %6801 = vmatprep.subr.bf16.mxu0 %v7256_v0  ;;  %v3256_v1 = vpop.permute.xlu1 %3255  ;;  %v3400_v16 = vpop.permute.xlu0 %3399 }
 0x6b7   :  { %6797 = vmatprep.mubr.msk.bf16.mxu1 %vm7257_vm4, %v7256_v0  ;;  %v3259_v7 = vsel %vm85_vm5, %v3257_v3, %v3256_v1  ;;  %v3353_v14 = vsel %vm948_vm8, %v3160_v50, %v3256_v1  ;;  %v3403_v18 = vsel %vm85_vm5, %v3401_v17, %v3400_v16  ;;  %v3497_v23 = vsel %vm948_vm8, %v3304_v8, %v3400_v16 }
 0x6b8   :  { %6790 = vmatmul.mubr.msk.bf16.vlgmr.msra.gmra.mrb[104].mxu0 %vm953_vm9, %v3163_v59 }
 0x6b9   :  { %6796 = vmatpush3.bf16.msra.mxu1 %v8150_v39  ;;  %6802 = vmatpush3.bf16.msra.mxu0 %v8095_v29 }
 0x6ba   :  { %6803 = vmatprep.subr.bf16.mxu0 %v7256_v0  ;;  %6809 = vmatprep.subr.bf16.mxu1 %v7256_v0  ;;  %v3352_v13 = vpop.permute.xlu1 %3351  ;;  %v3496_v22 = vpop.permute.xlu0 %3495 }
 0x6bb   :  { %6805 = vmatprep.mubr.msk.bf16.mxu0 %vm7257_vm4, %v7256_v0  ;;  %v3355_v15 = vsel %vm85_vm5, %v3353_v14, %v3352_v13  ;;  %v3449_v20 = vsel %vm948_vm8, %v3256_v1, %v3352_v13  ;;  %v3499_v24 = vsel %vm85_vm5, %v3497_v23, %v3496_v22  ;;  %v3594_v28 = vsel %vm948_vm8, %v3400_v16, %v3496_v22 }
 0x6bc   :  { %6798 = vmatmul.mubr.msk.bf16.vlgmr.msra.gmra.mrb[104].mxu1 %vm953_vm9, %v3211_v63 }
 0x6bd   :  { %6804 = vmatpush3.bf16.msra.mxu0 %v8150_v39  ;;  %6810 = vmatpush3.bf16.msra.mxu1 %v8095_v29 }
 0x6be   :  { %6811 = vmatprep.subr.bf16.mxu1 %v7256_v0  ;;  %6817 = vmatprep.subr.bf16.mxu0 %v7256_v0  ;;  %v3448_v19 = vpop.permute.xlu1 %3447  ;;  %v3593_v26 = vpop.permute.xlu0 %3592 }
 0x6bf   :  { %6813 = vmatprep.mubr.msk.bf16.mxu1 %vm7257_vm4, %v7256_v0  ;;  %v3451_v21 = vsel %vm85_vm5, %v3449_v20, %v3448_v19  ;;  %v3545_v25 = vsel %vm948_vm8, %v3352_v13, %v3448_v19  ;;  %v3596_v31 = vsel %vm85_vm5, %v3594_v28, %v3593_v26 }
 0x6c0   :  { %6806 = vmatmul.mubr.msk.bf16.vlgmr.msra.gmra.mrb[108].mxu0 %vm953_vm9, %v3259_v7 }
 0x6c1   :  { %6812 = vmatpush3.bf16.msra.mxu1 %v8150_v39  ;;  %6818 = vmatpush3.bf16.msra.mxu0 %v8095_v29 }
 0x6c2   :  { %6819 = vmatprep.subr.bf16.mxu0 %v7256_v0  ;;  %6825 = vmatprep.subr.bf16.mxu1 %v7256_v0  ;;  %v3544_v34 = vpop.permute.xlu1 %3543  ;;  %v3689_v33 = vpop.permute.xlu0 %3688 }
 0x6c3   :  { %6821 = vmatprep.mubr.msk.bf16.mxu0 %vm7257_vm4, %v7256_v0  ;;  %v3547_v27 = vsel %vm85_vm5, %v3545_v25, %v3544_v34  ;;  %v3642_v36 = vsel %vm948_vm8, %v3448_v19, %v3544_v34  ;;  %v3691_v6 = vsel %vm948_vm8, %v3496_v22, %v3689_v33 }
 0x6c4   :  { %6814 = vmatmul.mubr.msk.bf16.vlgmr.msra.gmra.mrb[108].mxu1 %vm953_vm9, %v3307_v12 }
 0x6c5   :  { %6820 = vmatpush3.bf16.msra.mxu0 %v8150_v39  ;;  %6826 = vmatpush3.bf16.msra.mxu1 %v8095_v29 }
 0x6c6   :  { %6827 = vmatprep.subr.bf16.mxu1 %v7256_v0  ;;  %6833 = vmatprep.subr.bf16.mxu0 %v7256_v0  ;;  %v3641_v32 = vpop.permute.xlu1 %3640 }
 0x6c7   :  { %6829 = vmatprep.mubr.msk.bf16.mxu1 %vm7257_vm4, %v7256_v0  ;;  %v3644_v38 = vsel %vm85_vm5, %v3642_v36, %v3641_v32 }
 0x6c8   :  { %6822 = vmatmul.mubr.msk.bf16.vlgmr.msra.gmra.mrb[112].mxu0 %vm953_vm9, %v3355_v15 }
 0x6c9   :  { %6828 = vmatpush3.bf16.msra.mxu1 %v8150_v39  ;;  %6834 = vmatpush3.bf16.msra.mxu0 %v8095_v29 }
 0x6ca   :  { %6835 = vmatprep.subr.bf16.mxu0 %v7256_v0  ;;  %6841 = vmatprep.subr.bf16.mxu1 %v7256_v0 }
 0x6cb   :  { %6837 = vmatprep.mubr.msk.bf16.mxu0 %vm7257_vm4, %v7256_v0 }
 0x6cc   :  { %6830 = vmatmul.mubr.msk.bf16.vlgmr.msra.gmra.mrb[112].mxu1 %vm953_vm9, %v3403_v18 }
 0x6cd   :  { %6836 = vmatpush3.bf16.msra.mxu0 %v8150_v39  ;;  %6842 = vmatpush3.bf16.msra.mxu1 %v8095_v29 }
 0x6ce   :  { %6843 = vmatprep.subr.bf16.mxu1 %v7256_v0  ;;  %6849 = vmatprep.subr.bf16.mxu0 %v7256_v0 }
 0x6cf   :  { %6845 = vmatprep.mubr.msk.bf16.mxu1 %vm7257_vm4, %v7256_v0 }
 0x6d0   :  { %6838 = vmatmul.mubr.msk.bf16.vlgmr.msra.gmra.mrb[116].mxu0 %vm953_vm9, %v3451_v21 }
 0x6d1   :  { %6844 = vmatpush3.bf16.msra.mxu1 %v8150_v39  ;;  %6850 = vmatpush3.bf16.msra.mxu0 %v8095_v29 }
 0x6d2   :  { %6851 = vmatprep.subr.bf16.mxu0 %v7256_v0  ;;  %6857 = vmatprep.subr.bf16.mxu1 %v7256_v0 }
 0x6d3   :  { %6853 = vmatprep.mubr.msk.bf16.mxu0 %vm7257_vm4, %v7256_v0 }
 0x6d4   :  { %6846 = vmatmul.mubr.msk.bf16.vlgmr.msra.gmra.mrb[116].mxu1 %vm953_vm9, %v3499_v24 }
 0x6d5   :  { %6852 = vmatpush3.bf16.msra.mxu0 %v8150_v39  ;;  %6858 = vmatpush3.bf16.msra.mxu1 %v8095_v29 }
 0x6d6   :  { %6859 = vmatprep.subr.bf16.mxu1 %v7256_v0  ;;  %6865 = vmatprep.subr.bf16.mxu0 %v7256_v0 }
 0x6d7   :  { %6861 = vmatprep.mubr.msk.bf16.mxu1 %vm7257_vm4, %v7256_v0 }
 0x6d8   :  { %6854 = vmatmul.mubr.msk.bf16.vlgmr.msra.gmra.mrb[120].mxu0 %vm953_vm9, %v3547_v27 }
 0x6d9   :  { %6860 = vmatpush3.bf16.msra.mxu1 %v8150_v39  ;;  %6866 = vmatpush3.bf16.msra.mxu0 %v8095_v29 }
 0x6da   :  { %6867 = vmatprep.subr.bf16.mxu0 %v7256_v0  ;;  %6873 = vmatprep.subr.bf16.mxu1 %v7256_v0 }
 0x6db   :  { %6869 = vmatprep.mubr.msk.bf16.mxu0 %vm7257_vm4, %v7256_v0 }
 0x6dc   :  { %6862 = vmatmul.mubr.msk.bf16.vlgmr.msra.gmra.mrb[120].mxu1 %vm953_vm9, %v3596_v31 }
 0x6dd   :  { %6868 = vmatpush3.bf16.msra.mxu0 %v8150_v39  ;;  %6874 = vmatpush3.bf16.msra.mxu1 %v8095_v29  ;;  %v3693_v29 = vsel %vm85_vm5, %v3691_v6, %v8172_v46 }
 0x6de   :  { %6875 = vmatprep.subr.bf16.mxu1 %v7256_v0  ;;  %6877 = vmatprep.mubr.msk.bf16.mxu1 %vm7257_vm4, %v7256_v0 }
 0x6df   :  { %6881 = vmatprep.subr.bf16.mxu0 %v7256_v0 }
 0x6e0   :  { %6870 = vmatmul.mubr.msk.bf16.vlgmr.msra.gmra.mrb[124].mxu0 %vm953_vm9, %v3644_v38 }
 0x6e1   :  { %6876 = vmatpush3.bf16.msra.mxu1 %v8150_v39  ;;  %6885 = vmatprep.mubr.msk.bf16.mxu0 %vm7257_vm4, %v7256_v0 }
 0x6e2   :  { %6889 = vmatprep.subr.bf16.mxu1 %v7256_v0 }
 0x6e4   :  { %6878 = vmatmul.mubr.msk.bf16.vlgmr.msra.gmra.mrb[124].mxu1 %vm953_vm9, %v3693_v29 }
 0x6e5   :  { %6893 = vmatprep.mubr.msk.bf16.mxu1 %vm7257_vm4, %v7256_v0 }
 0x77b   :  { %v3001_v10 = vpop.f32.mrb[96].mxu0 }
 0x77c   :  { %v8324_v39 = vadd.f32 %v8321_v40, %v3001_v10  ;;  %v6759_v41 = vpop.f32.mrb[97].mxu0 }
 0x77d   :  { %v3004_v54 = vpop.f32.mrb[98].mxu0 }
 0x77e   :  { %v8327_v37 = vadd.f32 %v8321_v40, %v3004_v54  ;;  %v6760_v44 = vpop.f32.mrb[99].mxu0 }
 0x77f   :  { %v3053_v45 = vpop.f32.mrb[96].mxu1 }
 0x780   :  { %v3054_v46 = vadd.f32 %v8321_v40, %v3053_v45  ;;  %v6767_v60 = vpop.f32.mrb[97].mxu1 }
 0x781   :  { %v3056_v43 = vpop.f32.mrb[98].mxu1 }
 0x782   :  { %v3057_v52 = vadd.f32 %v8321_v40, %v3056_v43  ;;  %3739 = vrot.lane.b32.xlu1 %v3054_v46, %s7262_s12  ;;  %v6768_v47 = vpop.f32.mrb[99].mxu1 }
 0x783   :  { %v3104_v48 = vpop.f32.mrb[100].mxu0 }
 0x784   :  { %v3105_v42 = vadd.f32 %v8321_v40, %v3104_v48  ;;  %3741 = vrot.lane.b32.xlu0 %v3057_v52, %s7262_s12  ;;  %v6775_v55 = vpop.f32.mrb[101].mxu0 }
 0x785   :  { %v3107_v49 = vpop.f32.mrb[102].mxu0 }
 0x786   :  { %v3108_v4 = vadd.f32 %v8321_v40, %v3107_v49  ;;  %3747 = vrot.lane.b32.xlu1 %v3105_v42, %s7259_s21  ;;  %v6776_v51 = vpop.f32.mrb[103].mxu0 }
 0x787   :  { %v3152_v53 = vpop.f32.mrb[100].mxu1  ;;  %v8377_v51 = vld [vmem:[%s8982_s5 + $0xc] sm:$0xff]  }
 0x788   :  { %v3153_v56 = vadd.f32 %v8321_v40, %v3152_v53  ;;  %v6783_v57 = vpop.f32.mrb[101].mxu1  ;;  %3749 = vrot.lane.b32.xlu0 %v3108_v4, %s7259_s21  ;;  %6890 = vmatpush3.bf16.msra.mxu1 %v8377_v51 }
 0x789   :  { %v3155_v2 = vpop.f32.mrb[102].mxu1  ;;  %6891 = vmatprep.subr.bf16.mxu1 %v7256_v0  ;;  %6882 = vmatpush3.bf16.msra.mxu0 %v8377_v51 }
 0x78a   :  { %v3156_v11 = vadd.f32 %v8321_v40, %v3155_v2  ;;  %v6784_v58 = vpop.f32.mrb[103].mxu1  ;;  %3755 = vrot.lane.b32.xlu1 %v3153_v56, %s7263_s2  ;;  %6883 = vmatprep.subr.bf16.mxu0 %v7256_v0 }
 0x78b   :  { %v3200_v50 = vpop.f32.mrb[104].mxu0 }
 0x78c   :  { %v3201_v5 = vadd.f32 %v8321_v40, %v3200_v50  ;;  %3757 = vrot.lane.b32.xlu0 %v3156_v11, %s7263_s2  ;;  %v6791_v59 = vpop.f32.mrb[105].mxu0  ;;  %v7247_v11 = vld [vmem:[%s8982_s5 + $0x14] ss:$0 sps:$4 sm:$0xff]  }
 0x78d   :  { %v3203_v61 = vpop.f32.mrb[106].mxu0  ;;  %v8391_v59 = vsel %vm9007_vm10, %v7247_v11, 0  ;;  %vm9011_vm10 = vmmov %vm9010_vm7 }
 0x78e   :  { %v3204_v62 = vadd.f32 %v8321_v40, %v3203_v61  ;;  %3763 = vrot.lane.b32.xlu1 %v3201_v5, %s7264_s13  ;;  %v6792_v63 = vpop.f32.mrb[107].mxu0  ;;  %6892 = vmatpush3.bf16.msra.mxu1 %v8391_v59 }
 0x78f   :  { %v3248_v1 = vpop.f32.mrb[104].mxu1  ;;  %6905 = vmatprep.subr.bf16.mxu1 %v7256_v0  ;;  %6884 = vmatpush3.bf16.msra.mxu0 %v8391_v59 }
 0x790   :  { %v3249_v3 = vadd.f32 %v8321_v40, %v3248_v1  ;;  %v6799_v7 = vpop.f32.mrb[105].mxu1  ;;  %3765 = vrot.lane.b32.xlu0 %v3204_v62, %s7264_s13  ;;  %6897 = vmatprep.subr.bf16.mxu0 %v7256_v0 }
 0x791   :  { %v3251_v8 = vpop.f32.mrb[106].mxu1 }
 0x792   :  { %v3252_v9 = vadd.f32 %v8321_v40, %v3251_v8  ;;  %v6800_v12 = vpop.f32.mrb[107].mxu1  ;;  %3771 = vrot.lane.b32.xlu1 %v3249_v3, %s7265_s14 }
 0x793   :  { %v3296_v13 = vpop.f32.mrb[108].mxu0 }
 0x794   :  { %v3297_v14 = vadd.f32 %v8321_v40, %v3296_v13  ;;  %3773 = vrot.lane.b32.xlu0 %v3252_v9, %s7265_s14  ;;  %v6807_v15 = vpop.f32.mrb[109].mxu0 }
 0x795   :  { %v3299_v16 = vpop.f32.mrb[110].mxu0 }
 0x796   :  { %v3300_v17 = vadd.f32 %v8321_v40, %v3299_v16  ;;  %3779 = vrot.lane.b32.xlu1 %v3297_v14, %s7266_s0  ;;  %v6808_v18 = vpop.f32.mrb[111].mxu0 }
 0x797   :  { %v3344_v19 = vpop.f32.mrb[108].mxu1 }
 0x798   :  { %v3345_v20 = vadd.f32 %v8321_v40, %v3344_v19  ;;  %v6815_v21 = vpop.f32.mrb[109].mxu1  ;;  %3781 = vrot.lane.b32.xlu0 %v3300_v17, %s7266_s0 }
 0x799   :  { %v3347_v22 = vpop.f32.mrb[110].mxu1 }
 0x79a   :  { %v3348_v23 = vadd.f32 %v8321_v40, %v3347_v22  ;;  %v6816_v24 = vpop.f32.mrb[111].mxu1  ;;  %3787 = vrot.lane.b32.xlu1 %v3345_v20, %s7267_s15 }
 0x79b   :  { %v3392_v34 = vpop.f32.mrb[112].mxu0 }
 0x79c   :  { %v3393_v25 = vadd.f32 %v8321_v40, %v3392_v34  ;;  %3789 = vrot.lane.b32.xlu0 %v3348_v23, %s7267_s15  ;;  %v6823_v26 = vpop.f32.mrb[113].mxu0 }
 0x79d   :  { %v3395_v27 = vpop.f32.mrb[114].mxu0 }
 0x79e   :  { %v3396_v28 = vadd.f32 %v8321_v40, %v3395_v27  ;;  %3795 = vrot.lane.b32.xlu1 %v3393_v25, %s7268_s16  ;;  %v6824_v31 = vpop.f32.mrb[115].mxu0 }
 0x79f   :  { %v3440_v32 = vpop.f32.mrb[112].mxu1 }
 0x7a0   :  { %v3441_v33 = vadd.f32 %v8321_v40, %v3440_v32  ;;  %v6831_v36 = vpop.f32.mrb[113].mxu1  ;;  %3797 = vrot.lane.b32.xlu0 %v3396_v28, %s7268_s16 }
 0x7a1   :  { %v3443_v38 = vpop.f32.mrb[114].mxu1 }
 0x7a2   :  { %v3444_v6 = vadd.f32 %v8321_v40, %v3443_v38  ;;  %v6832_v29 = vpop.f32.mrb[115].mxu1  ;;  %3803 = vrot.lane.b32.xlu1 %v3441_v33, %s7269_s17 }
 0x7a3   :  { %v3488_v10 = vpop.f32.mrb[116].mxu0 }
 0x7a4   :  { %v3489_v41 = vadd.f32 %v8321_v40, %v3488_v10  ;;  %3805 = vrot.lane.b32.xlu0 %v3444_v6, %s7269_s17  ;;  %v6839_v54 = vpop.f32.mrb[117].mxu0 }
 0x7a5   :  { %v3491_v44 = vpop.f32.mrb[118].mxu0 }
 0x7a6   :  { %v3492_v45 = vadd.f32 %v8321_v40, %v3491_v44  ;;  %3811 = vrot.lane.b32.xlu1 %v3489_v41, %s7261_s23  ;;  %v6840_v46 = vpop.f32.mrb[119].mxu0 }
 0x7a7   :  { %v3536_v60 = vpop.f32.mrb[116].mxu1 }
 0x7a8   :  { %v3537_v43 = vadd.f32 %v8321_v40, %v3536_v60  ;;  %v6847_v52 = vpop.f32.mrb[117].mxu1  ;;  %3813 = vrot.lane.b32.xlu0 %v3492_v45, %s7261_s23 }
 0x7a9   :  { %v3539_v47 = vpop.f32.mrb[118].mxu1 }
 0x7aa   :  { %v3540_v48 = vadd.f32 %v8321_v40, %v3539_v47  ;;  %v6848_v42 = vpop.f32.mrb[119].mxu1  ;;  %3819 = vrot.lane.b32.xlu1 %v3537_v43, %s7270_s18 }
 0x7ab   :  { %v3584_v55 = vpop.f32.mrb[120].mxu0 }
 0x7ac   :  { %v3585_v49 = vadd.f32 %v8321_v40, %v3584_v55  ;;  %3821 = vrot.lane.b32.xlu0 %v3540_v48, %s7270_s18  ;;  %v6855_v4 = vpop.f32.mrb[121].mxu0 }
 0x7ad   :  { %v3587_v53 = vpop.f32.mrb[122].mxu0 }
 0x7ae   :  { %v3588_v56 = vadd.f32 %v8321_v40, %v3587_v53  ;;  %3827 = vrot.lane.b32.xlu1 %v3585_v49, %s7258_s20  ;;  %v6856_v57 = vpop.f32.mrb[123].mxu0 }
 0x7af   :  { %v3633_v2 = vpop.f32.mrb[120].mxu1 }
 0x7b0   :  { %v3634_v58 = vadd.f32 %v8321_v40, %v3633_v2  ;;  %v6863_v50 = vpop.f32.mrb[121].mxu1  ;;  %3829 = vrot.lane.b32.xlu0 %v3588_v56, %s7258_s20 }
 0x7b1   :  { %v3636_v5 = vpop.f32.mrb[122].mxu1 }
 0x7b2   :  { %v3637_v61 = vadd.f32 %v8321_v40, %v3636_v5  ;;  %v6864_v62 = vpop.f32.mrb[123].mxu1  ;;  %3835 = vrot.lane.b32.xlu1 %v3634_v58, %s7271_s27 }
 0x7b3   :  { %v3681_v63 = vpop.f32.mrb[124].mxu0 }
 0x7b4   :  { %v3682_v1 = vadd.f32 %v8321_v40, %v3681_v63  ;;  %3837 = vrot.lane.b32.xlu0 %v3637_v61, %s7271_s27  ;;  %v6871_v3 = vpop.f32.mrb[125].mxu0 }
 0x7b5   :  { %v3684_v7 = vpop.f32.mrb[126].mxu0 }
 0x7b6   :  { %v3685_v8 = vadd.f32 %v8321_v40, %v3684_v7  ;;  %3843 = vrot.lane.b32.xlu1 %v3682_v1, %s7260_s22  ;;  %v6872_v9 = vpop.f32.mrb[127].mxu0 }
 0x7b7   :  { %v3730_v12 = vpop.f32.mrb[124].mxu1 }
 0x7b8   :  { %v3731_v13 = vadd.f32 %v8321_v40, %v3730_v12  ;;  %v6879_v14 = vpop.f32.mrb[125].mxu1  ;;  %3845 = vrot.lane.b32.xlu0 %v3685_v8, %s7260_s22 }
 0x7b9   :  { %v3733_v15 = vpop.f32.mrb[126].mxu1 }
 0x7ba   :  { %v3734_v16 = vadd.f32 %v8321_v40, %v3733_v15  ;;  %v6880_v17 = vpop.f32.mrb[127].mxu1  ;;  %3851 = vrot.lane.b32.xlu1 %v3731_v13, %s7272_s28 }
 0x7bc   :  { %3853 = vrot.lane.b32.xlu0 %v3734_v16, %s7272_s28 }
 0x7f4   :  { %v3740_v18 = vpop.permute.xlu1 %3739 }
 0x7f5   :  { %v3857_v54 = vsel %vm948_vm8, %v8324_v39, %v3740_v18 }
 0x7f6   :  { %v3742_v19 = vpop.permute.xlu0 %3741 }
 0x7f7   :  { %v3858_v46 = vsel %vm948_vm8, %v8327_v37, %v3742_v19 }
 0x7f8   :  { %v3748_v20 = vpop.permute.xlu1 %3747 }
 0x7f9   :  { %v3859_v44 = vsel %vm85_vm5, %v3857_v54, %v3748_v20 }
 0x7fa   :  { %v3750_v21 = vpop.permute.xlu0 %3749 }
 0x7fb   :  { %v3860_v43 = vsel %vm85_vm5, %v3858_v46, %v3750_v21 }
 0x7fc   :  { %v3756_v22 = vpop.permute.xlu1 %3755 }
 0x7fd   :  { %v3861_v60 = vsel %vm953_vm9, %v3859_v44, %v3756_v22 }
 0x7fe   :  { %v3758_v23 = vpop.permute.xlu0 %3757 }
 0x7ff   :  { %v3862_v48 = vsel %vm953_vm9, %v3860_v43, %v3758_v23 }
 0x800   :  { %v3764_v24 = vpop.permute.xlu1 %3763 }
 0x801   :  { %v3863_v52 = vsel %vm107_vm6, %v3861_v60, %v3764_v24 }
 0x802   :  { %v3766_v34 = vpop.permute.xlu0 %3765 }
 0x803   :  { %v3864_v55 = vsel %vm107_vm6, %v3862_v48, %v3766_v34 }
 0x804   :  { %v3772_v25 = vpop.permute.xlu1 %3771 }
 0x805   :  { %v3865_v42 = vsel %vm9008_vm14, %v3863_v52, %v3772_v25  ;;  %vm9012_vm14 = vcmask 654336  }
 0x806   :  { %v3774_v26 = vpop.permute.xlu0 %3773 }
 0x807   :  { %v3866_v4 = vsel %vm9009_vm1, %v3864_v55, %v3774_v26  ;;  %vm9013_vm1 = vmmov %vm9012_vm14  ;;  %v8567_v55 = vld [vmem:[%s8983_s6 + $0x1] ss:$0 sm:$0xff] }
 0x808   :  { %v3780_v27 = vpop.permute.xlu1 %3779 }
 0x809   :  { %v3867_v39 = vsel %vm961_vm11, %v3865_v42, %v3780_v27 }
 0x80a   :  { %v3782_v28 = vpop.permute.xlu0 %3781 }
 0x80b   :  { %v3868_v53 = vsel %vm961_vm11, %v3866_v4, %v3782_v28 }
 0x80c   :  { %v3788_v31 = vpop.permute.xlu1 %3787 }
 0x80d   :  { %v3869_v37 = vsel %vm9010_vm7, %v3867_v39, %v3788_v31  ;;  %vm9014_vm7 = vcmask 785408  }
 0x80e   :  { %v3790_v32 = vpop.permute.xlu0 %3789 }
 0x80f   :  { %v3870_v2 = vsel %vm9011_vm10, %v3868_v53, %v3790_v32  ;;  %vm9015_vm10 = vmmov %vm9014_vm7 }
 0x810   :  { %v3796_v40 = vpop.permute.xlu1 %3795 }
 0x811   :  { %v3871_v56 = vsel %vm35_vm0, %v3869_v37, %v3796_v40 }
 0x812   :  { %v3798_v33 = vpop.permute.xlu0 %3797 }
 0x813   :  { %v3872_v58 = vsel %vm35_vm0, %v3870_v2, %v3798_v33 }
 0x814   :  { %v3804_v36 = vpop.permute.xlu1 %3803 }
 0x815   :  { %v3873_v11 = vsel %vm969_vm13, %v3871_v56, %v3804_v36 }
 0x816   :  { %v3806_v38 = vpop.permute.xlu0 %3805 }
 0x817   :  { %v3874_v61 = vsel %vm969_vm13, %v3872_v58, %v3806_v38 }
 0x818   :  { %v3812_v6 = vpop.permute.xlu1 %3811 }
 0x819   :  { %v3875_v50 = vsel %vm9012_vm14, %v3873_v11, %v3812_v6 }
 0x81a   :  { %v3814_v29 = vpop.permute.xlu0 %3813 }
 0x81b   :  { %v3876_v63 = vsel %vm9013_vm1, %v3874_v61, %v3814_v29 }
 0x81c   :  { %v3820_v10 = vpop.permute.xlu1 %3819 }
 0x81d   :  { %v3877_v62 = vsel %vm975_vm15, %v3875_v50, %v3820_v10 }
 0x81e   :  { %v3822_v41 = vpop.permute.xlu0 %3821 }
 0x81f   :  { %v3878_v7 = vsel %vm975_vm15, %v3876_v63, %v3822_v41 }
 0x820   :  { %v3828_v45 = vpop.permute.xlu1 %3827 }
 0x821   :  { %v3879_v1 = vsel %vm9014_vm7, %v3877_v62, %v3828_v45  ;;  %vm9016_vm7 = vcmask 326656  }
 0x822   :  { %v3830_v47 = vpop.permute.xlu0 %3829 }
 0x823   :  { %v3880_v9 = vsel %vm9015_vm10, %v3878_v7, %v3830_v47  ;;  %vm9017_vm10 = vmmov %vm9016_vm7 }
 0x824   :  { %v3836_v49 = vpop.permute.xlu1 %3835 }
 0x825   :  { %v3881_v8 = vsel %vm981_vm2, %v3879_v1, %v3836_v49 }
 0x826   :  { %v3838_v57 = vpop.permute.xlu0 %3837 }
 0x827   :  { %v3882_v14 = vsel %vm981_vm2, %v3880_v9, %v3838_v57 }
 0x828   :  { %v3844_v5 = vpop.permute.xlu1 %3843 }
 0x829   :  { %v3883_v12 = vsel %vm984_vm3, %v3881_v8, %v3844_v5 }
 0x82a   :  { %v3846_v3 = vpop.permute.xlu0 %3845 }
 0x82b   :  { %v3884_v16 = vsel %vm984_vm3, %v3882_v14, %v3846_v3 }
 0x82c   :  { %v3852_v13 = vpop.permute.xlu1 %3851 }
 0x82d   :  { %v3885_v15 = vsel %vm987_vm12, %v3883_v12, %v3852_v13 }
 0x82e   :  { %vm3887_vm14 = vcmp.ge.f32.partialorder %v3885_v15, 0.0  ;;  %v3889_v17 = vmul.f32 0.1, %v3885_v15  ;;  %v3854_v18 = vpop.permute.xlu0 %3853 }
 0x82f   :  { %v3886_v19 = vsel %vm987_vm12, %v3884_v16, %v3854_v18 }
 0x830   :  { %v3891_v20 = vsel %vm3887_vm14, %v3885_v15, %v3889_v17  ;;  %vm3888_vm1 = vcmp.ge.f32.partialorder %v3886_v19, 0.0  ;;  %v3890_v21 = vmul.f32 0.1, %v3886_v19  ;;  %vm9018_vm14 = vcmask 457728  }
 0x831   :  { %3893 = vst [vmem:[#allocation3 + $0x1] sm:$0xff] %v3891_v20 }
 0x832   :  { %v3892_v22 = vsel %vm3888_vm1, %v3886_v19, %v3890_v21  ;;  %vm9019_vm1 = vmmov %vm9018_vm14 }
 0x833   :  { %3894 = vst [vmem:[#allocation3 + $0x9] sm:$0xff] %v3892_v22  ;;  %v3900_v23 = vpack.c.bf16 %v3892_v22, %v3891_v20 }
 0x835   :  { %3908 = vrot.lane.b32.xlu0 %v3900_v23, %s7262_s12  ;;  %6894 = vmatmul.mubr.msk.bf16.vlgmr.msra.gmra.mrb[128].mxu1 %vm953_vm9, %v3900_v23 }
 0x836   :  { %6906 = vmatpush3.bf16.msra.mxu1 %v8377_v51  ;;  %6909 = vmatprep.mubr.msk.bf16.mxu1 %vm7257_vm4, %v7256_v0 }
 0x837   :  { %6907 = vmatprep.subr.bf16.mxu1 %v7256_v0 }
 0x838   :  { %v3895_v24 = vld [vmem:[#allocation3] sm:$0xff] }
 0x839   :  { %4067 = vrot.lane.b32.xlu0 %v3900_v23, %s7260_s22 }
 0x83a   :  { %v3896_v34 = vld [vmem:[#allocation3 + $0x8] sm:$0xff]  ;;  %6908 = vmatpush3.bf16.msra.mxu1 %v8391_v59 }
 0x83b   :  { %v3897_v25 = vpack.c.bf16 %v3896_v34, %v3895_v24  ;;  %6921 = vmatprep.subr.bf16.mxu1 %v7256_v0  ;;  %v3901_v26 = vld [vmem:[#allocation3 + $0x2] sm:$0xff]  ;;  %v3902_v27 = vld [vmem:[#allocation3 + $0xa] sm:$0xff] }
 0x83c   :  { %v3903_v28 = vpack.c.bf16 %v3902_v27, %v3901_v26 }
 0x83d   :  { %3905 = vrot.lane.b32.xlu1 %v3897_v25, %s7262_s12  ;;  %4161 = vrot.lane.b32.xlu0 %v3900_v23, %s7258_s20 }
 0x841   :  { %4020 = vrot.lane.b32.xlu1 %v3900_v23, %s7272_s28  ;;  %4255 = vrot.lane.b32.xlu0 %v3900_v23, %s7261_s23 }
 0x845   :  { %4114 = vrot.lane.b32.xlu1 %v3900_v23, %s7271_s27  ;;  %4349 = vrot.lane.b32.xlu0 %v3900_v23, %s7268_s16 }
 0x849   :  { %4208 = vrot.lane.b32.xlu1 %v3900_v23, %s7270_s18  ;;  %4443 = vrot.lane.b32.xlu0 %v3900_v23, %s7266_s0 }
 0x84d   :  { %4302 = vrot.lane.b32.xlu1 %v3900_v23, %s7269_s17  ;;  %4537 = vrot.lane.b32.xlu0 %v3900_v23, %s7264_s13 }
 0x851   :  { %4396 = vrot.lane.b32.xlu1 %v3900_v23, %s7267_s15  ;;  %4631 = vrot.lane.b32.xlu0 %v3900_v23, %s7259_s21 }
 0x855   :  { %4490 = vrot.lane.b32.xlu1 %v3900_v23, %s7265_s14 }
 0x859   :  { %4584 = vrot.lane.b32.xlu1 %v3900_v23, %s7263_s2 }
 0x85d   :  { %4634 = vrot.lane.b32.xlu1 %v3903_v28, %s7259_s21 }
 0x8a7   :  { %v3909_v31 = vpop.permute.xlu0 %3908 }
 0x8ab   :  { %v4068_v32 = vpop.permute.xlu0 %4067 }
 0x8ac   :  { %6910 = vmatmul.mubr.msk.bf16.vlgmr.msra.gmra.mrb[132].mxu1 %vm953_vm9, %v4068_v32 }
 0x8ad   :  { %6922 = vmatpush3.bf16.msra.mxu1 %v8377_v51  ;;  %6925 = vmatprep.mubr.msk.bf16.mxu1 %vm7257_vm4, %v7256_v0 }
 0x8ae   :  { %6923 = vmatprep.subr.bf16.mxu1 %v7256_v0 }
 0x8af   :  { %v3906_v40 = vpop.permute.xlu1 %3905  ;;  %v4162_v6 = vpop.permute.xlu0 %4161 }
 0x8b0   :  { %v3912_v33 = vsel %vm948_vm8, %v3906_v40, %v3909_v31 }
 0x8b1   :  { %v3913_v36 = vsel %vm85_vm5, %v3912_v33, %v3909_v31  ;;  %6924 = vmatpush3.bf16.msra.mxu1 %v8391_v59 }
 0x8b2   :  { %6886 = vmatmul.mubr.msk.bf16.vlgmr.msra.gmra.mrb[128].mxu0 %vm953_vm9, %v3913_v36  ;;  %6937 = vmatprep.subr.bf16.mxu1 %v7256_v0 }
 0x8b3   :  { %6898 = vmatpush3.bf16.msra.mxu0 %v8377_v51  ;;  %v4021_v38 = vpop.permute.xlu1 %4020  ;;  %6901 = vmatprep.mubr.msk.bf16.mxu0 %vm7257_vm4, %v7256_v0  ;;  %v4256_v10 = vpop.permute.xlu0 %4255 }
 0x8b4   :  { %6899 = vmatprep.subr.bf16.mxu0 %v7256_v0  ;;  %6926 = vmatmul.mubr.msk.bf16.vlgmr.msra.gmra.mrb[136].mxu1 %vm953_vm9, %v4162_v6 }
 0x8b5   :  { %6938 = vmatpush3.bf16.msra.mxu1 %v8377_v51  ;;  %6941 = vmatprep.mubr.msk.bf16.mxu1 %vm7257_vm4, %v7256_v0 }
 0x8b6   :  { %6939 = vmatprep.subr.bf16.mxu1 %v7256_v0 }
 0x8b7   :  { %6900 = vmatpush3.bf16.msra.mxu0 %v8391_v59  ;;  %v4115_v29 = vpop.permute.xlu1 %4114  ;;  %v4350_v44 = vpop.permute.xlu0 %4349 }
 0x8b8   :  { %6913 = vmatprep.subr.bf16.mxu0 %v7256_v0 }
 0x8b9   :  { %6940 = vmatpush3.bf16.msra.mxu1 %v8391_v59 }
 0x8ba   :  { %6902 = vmatmul.mubr.msk.bf16.vlgmr.msra.gmra.mrb[132].mxu0 %vm953_vm9, %v4021_v38  ;;  %6953 = vmatprep.subr.bf16.mxu1 %v7256_v0 }
 0x8bb   :  { %6914 = vmatpush3.bf16.msra.mxu0 %v8377_v51  ;;  %v4209_v41 = vpop.permute.xlu1 %4208  ;;  %6917 = vmatprep.mubr.msk.bf16.mxu0 %vm7257_vm4, %v7256_v0  ;;  %v4444_v46 = vpop.permute.xlu0 %4443 }
 0x8bc   :  { %6915 = vmatprep.subr.bf16.mxu0 %v7256_v0  ;;  %6942 = vmatmul.mubr.msk.bf16.vlgmr.msra.gmra.mrb[140].mxu1 %vm953_vm9, %v4256_v10 }
 0x8bd   :  { %6954 = vmatpush3.bf16.msra.mxu1 %v8377_v51  ;;  %6957 = vmatprep.mubr.msk.bf16.mxu1 %vm7257_vm4, %v7256_v0 }
 0x8be   :  { %6955 = vmatprep.subr.bf16.mxu1 %v7256_v0 }
 0x8bf   :  { %6916 = vmatpush3.bf16.msra.mxu0 %v8391_v59  ;;  %v4303_v54 = vpop.permute.xlu1 %4302  ;;  %v4538_v52 = vpop.permute.xlu0 %4537 }
 0x8c0   :  { %6929 = vmatprep.subr.bf16.mxu0 %v7256_v0 }
 0x8c1   :  { %6956 = vmatpush3.bf16.msra.mxu1 %v8391_v59 }
 0x8c2   :  { %6918 = vmatmul.mubr.msk.bf16.vlgmr.msra.gmra.mrb[136].mxu0 %vm953_vm9, %v4115_v29  ;;  %6969 = vmatprep.subr.bf16.mxu1 %v7256_v0 }
 0x8c3   :  { %6930 = vmatpush3.bf16.msra.mxu0 %v8377_v51  ;;  %6933 = vmatprep.mubr.msk.bf16.mxu0 %vm7257_vm4, %v7256_v0  ;;  %v4397_v45 = vpop.permute.xlu1 %4396  ;;  %v4632_v48 = vpop.permute.xlu0 %4631 }
 0x8c4   :  { %6931 = vmatprep.subr.bf16.mxu0 %v7256_v0  ;;  %6958 = vmatmul.mubr.msk.bf16.vlgmr.msra.gmra.mrb[144].mxu1 %vm953_vm9, %v4350_v44 }
 0x8c5   :  { %6970 = vmatpush3.bf16.msra.mxu1 %v8377_v51  ;;  %6973 = vmatprep.mubr.msk.bf16.mxu1 %vm7257_vm4, %v7256_v0 }
 0x8c6   :  { %6971 = vmatprep.subr.bf16.mxu1 %v7256_v0 }
 0x8c7   :  { %6932 = vmatpush3.bf16.msra.mxu0 %v8391_v59  ;;  %v4491_v60 = vpop.permute.xlu1 %4490 }
 0x8c8   :  { %6945 = vmatprep.subr.bf16.mxu0 %v7256_v0 }
 0x8c9   :  { %6972 = vmatpush3.bf16.msra.mxu1 %v8391_v59 }
 0x8ca   :  { %6934 = vmatmul.mubr.msk.bf16.vlgmr.msra.gmra.mrb[140].mxu0 %vm953_vm9, %v4209_v41  ;;  %6985 = vmatprep.subr.bf16.mxu1 %v7256_v0 }
 0x8cb   :  { %6946 = vmatpush3.bf16.msra.mxu0 %v8377_v51  ;;  %6949 = vmatprep.mubr.msk.bf16.mxu0 %vm7257_vm4, %v7256_v0  ;;  %v4585_v43 = vpop.permute.xlu1 %4584 }
 0x8cc   :  { %6947 = vmatprep.subr.bf16.mxu0 %v7256_v0  ;;  %6974 = vmatmul.mubr.msk.bf16.vlgmr.msra.gmra.mrb[148].mxu1 %vm953_vm9, %v4444_v46 }
 0x8cd   :  { %6986 = vmatpush3.bf16.msra.mxu1 %v8377_v51  ;;  %6989 = vmatprep.mubr.msk.bf16.mxu1 %vm7257_vm4, %v7256_v0 }
 0x8ce   :  { %6987 = vmatprep.subr.bf16.mxu1 %v7256_v0 }
 0x8cf   :  { %6948 = vmatpush3.bf16.msra.mxu0 %v8391_v59  ;;  %v4635_v47 = vpop.permute.xlu1 %4634 }
 0x8d0   :  { %6961 = vmatprep.subr.bf16.mxu0 %v7256_v0  ;;  %v4638_v42 = vsel %vm85_vm5, %v4632_v48, %v4635_v47 }
 0x8d1   :  { %6988 = vmatpush3.bf16.msra.mxu1 %v8391_v59 }
 0x8d2   :  { %6950 = vmatmul.mubr.msk.bf16.vlgmr.msra.gmra.mrb[144].mxu0 %vm953_vm9, %v4303_v54  ;;  %7001 = vmatprep.subr.bf16.mxu1 %v7256_v0 }
 0x8d3   :  { %6962 = vmatpush3.bf16.msra.mxu0 %v8377_v51  ;;  %6965 = vmatprep.mubr.msk.bf16.mxu0 %vm7257_vm4, %v7256_v0 }
 0x8d4   :  { %6963 = vmatprep.subr.bf16.mxu0 %v7256_v0  ;;  %6990 = vmatmul.mubr.msk.bf16.vlgmr.msra.gmra.mrb[152].mxu1 %vm953_vm9, %v4538_v52 }
 0x8d5   :  { %7002 = vmatpush3.bf16.msra.mxu1 %v8377_v51  ;;  %7005 = vmatprep.mubr.msk.bf16.mxu1 %vm7257_vm4, %v7256_v0 }
 0x8d6   :  { %7003 = vmatprep.subr.bf16.mxu1 %v7256_v0 }
 0x8d7   :  { %6964 = vmatpush3.bf16.msra.mxu0 %v8391_v59 }
 0x8d8   :  { %6977 = vmatprep.subr.bf16.mxu0 %v7256_v0 }
 0x8d9   :  { %7004 = vmatpush3.bf16.msra.mxu1 %v8391_v59 }
 0x8da   :  { %6966 = vmatmul.mubr.msk.bf16.vlgmr.msra.gmra.mrb[148].mxu0 %vm953_vm9, %v4397_v45  ;;  %7021 = vmatprep.subr.bf16.mxu1 %v7256_v0 }
 0x8db   :  { %6978 = vmatpush3.bf16.msra.mxu0 %v8377_v51  ;;  %6981 = vmatprep.mubr.msk.bf16.mxu0 %vm7257_vm4, %v7256_v0 }
 0x8dc   :  { %6979 = vmatprep.subr.bf16.mxu0 %v7256_v0  ;;  %7006 = vmatmul.mubr.msk.bf16.vlgmr.msra.gmra.mrb[156].mxu1 %vm953_vm9, %v4638_v42 }
 0x8dd   :  { %7029 = vmatprep.mubr.msk.bf16.mxu1 %vm7257_vm4, %v7256_v0 }
 0x8df   :  { %6980 = vmatpush3.bf16.msra.mxu0 %v8391_v59 }
 0x8e0   :  { %6993 = vmatprep.subr.bf16.mxu0 %v7256_v0 }
 0x8e2   :  { %6982 = vmatmul.mubr.msk.bf16.vlgmr.msra.gmra.mrb[152].mxu0 %vm953_vm9, %v4491_v60 }
 0x8e3   :  { %6994 = vmatpush3.bf16.msra.mxu0 %v8377_v51  ;;  %6997 = vmatprep.mubr.msk.bf16.mxu0 %vm7257_vm4, %v7256_v0 }
 0x8e4   :  { %6995 = vmatprep.subr.bf16.mxu0 %v7256_v0 }
 0x8e7   :  { %6996 = vmatpush3.bf16.msra.mxu0 %v8391_v59 }
 0x8e8   :  { %7009 = vmatprep.subr.bf16.mxu0 %v7256_v0 }
 0x8ea   :  { %6998 = vmatmul.mubr.msk.bf16.vlgmr.msra.gmra.mrb[156].mxu0 %vm953_vm9, %v4585_v43 }
 0x8eb   :  { %7017 = vmatprep.mubr.msk.bf16.mxu0 %vm7257_vm4, %v7256_v0 }
 0x908   :  { %v4013_v51 = vpop.f32.mrb[128].mxu1 }
 0x909   :  { %v4014_v39 = vadd.f32 %v8567_v55, %v4013_v51  ;;  %v6895_v49 = vpop.f32.mrb[129].mxu1 }
 0x90a   :  { %v4016_v4 = vpop.f32.mrb[130].mxu1 }
 0x90b   :  { %v4017_v37 = vadd.f32 %v8567_v55, %v4016_v4  ;;  %4684 = vrot.lane.b32.xlu0 %v4014_v39, %s7262_s12  ;;  %v6896_v59 = vpop.f32.mrb[131].mxu1 }
 0x90d   :  { %4686 = vrot.lane.b32.xlu1 %v4017_v37, %s7262_s12 }
 0x97f   :  { %v4107_v53 = vpop.f32.mrb[132].mxu1 }
 0x980   :  { %v4108_v56 = vadd.f32 %v8567_v55, %v4107_v53  ;;  %v6911_v57 = vpop.f32.mrb[133].mxu1 }
 0x981   :  { %v4110_v2 = vpop.f32.mrb[134].mxu1 }
 0x982   :  { %v4111_v11 = vadd.f32 %v8567_v55, %v4110_v2  ;;  %4700 = vrot.lane.b32.xlu0 %v4108_v56, %s7263_s2  ;;  %v6912_v58 = vpop.f32.mrb[135].mxu1 }
 0x984   :  { %4702 = vrot.lane.b32.xlu1 %v4111_v11, %s7263_s2 }
 0x985   :  { %v8577_v50 = vpop.f32.mrb[128].mxu0 }
 0x986   :  { %v6887_v5 = vpop.f32.mrb[129].mxu0 }
 0x987   :  { %v8579_v61 = vpop.f32.mrb[130].mxu0  ;;  %v4201_v62 = vpop.f32.mrb[136].mxu1 }
 0x988   :  { %v6888_v63 = vpop.f32.mrb[131].mxu0  ;;  %v4202_v1 = vadd.f32 %v8567_v55, %v4201_v62  ;;  %v6927_v3 = vpop.f32.mrb[137].mxu1 }
 0x989   :  { %v4204_v7 = vpop.f32.mrb[138].mxu1 }
 0x98a   :  { %v4205_v8 = vadd.f32 %v8567_v55, %v4204_v7  ;;  %4716 = vrot.lane.b32.xlu0 %v4202_v1, %s7265_s14  ;;  %v6928_v9 = vpop.f32.mrb[139].mxu1 }
 0x98c   :  { %4718 = vrot.lane.b32.xlu1 %v4205_v8, %s7265_s14 }
 0x98d   :  { %v4060_v12 = vpop.f32.mrb[132].mxu0 }
 0x98e   :  { %v4061_v13 = vadd.f32 %v8567_v55, %v4060_v12  ;;  %v6903_v14 = vpop.f32.mrb[133].mxu0 }
 0x98f   :  { %v4063_v15 = vpop.f32.mrb[134].mxu0  ;;  %v4295_v16 = vpop.f32.mrb[140].mxu1 }
 0x990   :  { %v4064_v17 = vadd.f32 %v8567_v55, %v4063_v15  ;;  %v6904_v18 = vpop.f32.mrb[135].mxu0  ;;  %4692 = vrot.lane.b32.xlu0 %v4061_v13, %s7259_s21  ;;  %v6943_v19 = vpop.f32.mrb[141].mxu1  ;;  %v4296_v21 = vadd.f32 %v8567_v55, %v4295_v16 }
 0x991   :  { %v4298_v20 = vpop.f32.mrb[142].mxu1 }
 0x992   :  { %4694 = vrot.lane.b32.xlu1 %v4064_v17, %s7259_s21  ;;  %v6944_v22 = vpop.f32.mrb[143].mxu1  ;;  %v4299_v23 = vadd.f32 %v8567_v55, %v4298_v20 }
 0x994   :  { %4732 = vrot.lane.b32.xlu0 %v4296_v21, %s7267_s15 }
 0x995   :  { %v4154_v24 = vpop.f32.mrb[136].mxu0 }
 0x996   :  { %v4155_v34 = vadd.f32 %v8567_v55, %v4154_v24  ;;  %v6919_v25 = vpop.f32.mrb[137].mxu0  ;;  %4734 = vrot.lane.b32.xlu1 %v4299_v23, %s7267_s15 }
 0x997   :  { %v4157_v26 = vpop.f32.mrb[138].mxu0  ;;  %v4389_v27 = vpop.f32.mrb[144].mxu1  ;;  %v8636_v25 = vld [vmem:[%s8984_s7] sm:$0xff]  }
 0x998   :  { %v4158_v28 = vadd.f32 %v8567_v55, %v4157_v26  ;;  %v6920_v31 = vpop.f32.mrb[139].mxu0  ;;  %4708 = vrot.lane.b32.xlu0 %v4155_v34, %s7264_s13  ;;  %v6959_v32 = vpop.f32.mrb[145].mxu1  ;;  %v4390_v33 = vadd.f32 %v8567_v55, %v4389_v27  ;;  %7010 = vmatpush3.bf16.msra.mxu0 %v8636_v25  ;;  %v8642_v26 = vld [vmem:[%s8984_s7 + $0x8] sm:$0xff]  }
 0x999   :  { %v4392_v40 = vpop.f32.mrb[146].mxu1  ;;  %7022 = vmatpush3.bf16.msra.mxu1 %v8636_v25  ;;  %7011 = vmatprep.subr.bf16.mxu0 %v7256_v0  ;;  %v4685_v27 = vpop.permute.xlu0 %4684  ;;  %v8651_v31 = vld [vmem:[%s8984_s7 + $0x10] sm:$0xff]  }
 0x99a   :  { %4710 = vrot.lane.b32.xlu1 %v4158_v28, %s7264_s13  ;;  %v6960_v36 = vpop.f32.mrb[147].mxu1  ;;  %v4393_v38 = vadd.f32 %v8567_v55, %v4392_v40  ;;  %7023 = vmatprep.subr.bf16.mxu1 %v7256_v0  ;;  %v4687_v28 = vpop.permute.xlu1 %4686 }
 0x99c   :  { %4748 = vrot.lane.b32.xlu0 %v4390_v33, %s7269_s17  ;;  %7012 = vmatpush3.bf16.msra.mxu0 %v8642_v26 }
 0x99d   :  { %v4248_v6 = vpop.f32.mrb[140].mxu0  ;;  %7024 = vmatpush3.bf16.msra.mxu1 %v8642_v26  ;;  %7013 = vmatprep.subr.bf16.mxu0 %v7256_v0 }
 0x99e   :  { %v4249_v29 = vadd.f32 %v8567_v55, %v4248_v6  ;;  %v6935_v10 = vpop.f32.mrb[141].mxu0  ;;  %4750 = vrot.lane.b32.xlu1 %v4393_v38, %s7269_s17  ;;  %7025 = vmatprep.subr.bf16.mxu1 %v7256_v0 }
 0x99f   :  { %v4251_v41 = vpop.f32.mrb[142].mxu0  ;;  %v4483_v54 = vpop.f32.mrb[148].mxu1 }
 0x9a0   :  { %v4252_v44 = vadd.f32 %v8567_v55, %v4251_v41  ;;  %v6936_v45 = vpop.f32.mrb[143].mxu0  ;;  %4724 = vrot.lane.b32.xlu0 %v4249_v29, %s7266_s0  ;;  %v6975_v46 = vpop.f32.mrb[149].mxu1  ;;  %v4484_v43 = vadd.f32 %v8567_v55, %v4483_v54  ;;  %7014 = vmatpush3.bf16.msra.mxu0 %v8651_v31 }
 0x9a1   :  { %v4486_v60 = vpop.f32.mrb[150].mxu1  ;;  %7026 = vmatpush3.bf16.msra.mxu1 %v8651_v31  ;;  %7015 = vmatprep.subr.bf16.mxu0 %v7256_v0 }
 0x9a2   :  { %4726 = vrot.lane.b32.xlu1 %v4252_v44, %s7266_s0  ;;  %v6976_v52 = vpop.f32.mrb[151].mxu1  ;;  %v4487_v47 = vadd.f32 %v8567_v55, %v4486_v60  ;;  %7027 = vmatprep.subr.bf16.mxu1 %v7256_v0 }
 0x9a3   :  { %v3969_v52 = vadd.f32 %v8567_v55, %v8577_v50 }
 0x9a4   :  { %4764 = vrot.lane.b32.xlu0 %v4484_v43, %s7270_s18 }
 0x9a5   :  { %v4342_v48 = vpop.f32.mrb[144].mxu0 }
 0x9a6   :  { %v4343_v42 = vadd.f32 %v8567_v55, %v4342_v48  ;;  %v6951_v51 = vpop.f32.mrb[145].mxu0  ;;  %4766 = vrot.lane.b32.xlu1 %v4487_v47, %s7270_s18  ;;  %v3972_v48 = vadd.f32 %v8567_v55, %v8579_v61 }
 0x9a7   :  { %v4345_v39 = vpop.f32.mrb[146].mxu0  ;;  %v4577_v49 = vpop.f32.mrb[152].mxu1 }
 0x9a8   :  { %v4346_v4 = vadd.f32 %v8567_v55, %v4345_v39  ;;  %v6952_v37 = vpop.f32.mrb[147].mxu0  ;;  %4740 = vrot.lane.b32.xlu0 %v4343_v42, %s7268_s16  ;;  %v6991_v59 = vpop.f32.mrb[153].mxu1  ;;  %v4578_v56 = vadd.f32 %v8567_v55, %v4577_v49  ;;  %v4802_v42 = vsel %vm948_vm8, %v3969_v52, %v4685_v27  ;;  %v4803_v49 = vsel %vm948_vm8, %v3972_v48, %v4687_v28 }
 0x9a9   :  { %v4580_v53 = vpop.f32.mrb[154].mxu1  ;;  %v14_v52 = vstv %s8985_s8  ;;  %s7273_s8 = smov 1  }
 0x9aa   :  { %4742 = vrot.lane.b32.xlu1 %v4346_v4, %s7268_s16  ;;  %v6992_v57 = vpop.f32.mrb[155].mxu1  ;;  %v4581_v2 = vadd.f32 %v8567_v55, %v4580_v53  ;;  %15 = vst [vmem:[#allocation7] sm:$0x1] %v14_v52 }
 0x9ac   :  { %4780 = vrot.lane.b32.xlu0 %v4578_v56, %s7271_s27 }
 0x9ad   :  { %v4436_v11 = vpop.f32.mrb[148].mxu0 }
 0x9ae   :  { %v4437_v58 = vadd.f32 %v8567_v55, %v4436_v11  ;;  %v6967_v5 = vpop.f32.mrb[149].mxu0  ;;  %4782 = vrot.lane.b32.xlu1 %v4581_v2, %s7271_s27 }
 0x9af   :  { %v4439_v62 = vpop.f32.mrb[150].mxu0  ;;  %v4675_v63 = vpop.f32.mrb[156].mxu1 }
 0x9b0   :  { %v4440_v1 = vadd.f32 %v8567_v55, %v4439_v62  ;;  %v6968_v3 = vpop.f32.mrb[151].mxu0  ;;  %4756 = vrot.lane.b32.xlu0 %v4437_v58, %s7261_s23  ;;  %v7007_v7 = vpop.f32.mrb[157].mxu1  ;;  %v4676_v24 = vadd.f32 %v8567_v55, %v4675_v63 }
 0x9b1   :  { %v4678_v8 = vpop.f32.mrb[158].mxu1 }
 0x9b2   :  { %4758 = vrot.lane.b32.xlu1 %v4440_v1, %s7261_s23  ;;  %v7008_v9 = vpop.f32.mrb[159].mxu1  ;;  %v4679_v34 = vadd.f32 %v8567_v55, %v4678_v8 }
 0x9b5   :  { %v4530_v12 = vpop.f32.mrb[152].mxu0 }
 0x9b6   :  { %v4531_v13 = vadd.f32 %v8567_v55, %v4530_v12  ;;  %v6983_v14 = vpop.f32.mrb[153].mxu0 }
 0x9b7   :  { %v4533_v15 = vpop.f32.mrb[154].mxu0 }
 0x9b8   :  { %v4534_v16 = vadd.f32 %v8567_v55, %v4533_v15  ;;  %v6984_v17 = vpop.f32.mrb[155].mxu0  ;;  %4772 = vrot.lane.b32.xlu0 %v4531_v13, %s7258_s20 }
 0x9ba   :  { %4774 = vrot.lane.b32.xlu1 %v4534_v16, %s7258_s20 }
 0x9bd   :  { %v4624_v18 = vpop.f32.mrb[156].mxu0 }
 0x9be   :  { %v4625_v19 = vadd.f32 %v8567_v55, %v4624_v18  ;;  %v6999_v20 = vpop.f32.mrb[157].mxu0 }
 0x9bf   :  { %v4627_v21 = vpop.f32.mrb[158].mxu0 }
 0x9c0   :  { %v4628_v22 = vadd.f32 %v8567_v55, %v4627_v21  ;;  %4788 = vrot.lane.b32.xlu0 %v4625_v19, %s7260_s22  ;;  %v7000_v23 = vpop.f32.mrb[159].mxu0 }
 0x9c2   :  { %4790 = vrot.lane.b32.xlu1 %v4628_v22, %s7260_s22 }
 0x9c4   :  { %4796 = vrot.lane.b32.xlu0 %v4676_v24, %s7272_s28 }
 0x9c6   :  { %4798 = vrot.lane.b32.xlu1 %v4679_v34, %s7272_s28 }
 0x9f4   :  { %v4701_v32 = vpop.permute.xlu0 %4700 }
 0x9f6   :  { %v4703_v40 = vpop.permute.xlu1 %4702 }
 0x9fc   :  { %v4717_v33 = vpop.permute.xlu0 %4716 }
 0x9fe   :  { %v4719_v36 = vpop.permute.xlu1 %4718 }
 0xa02   :  { %v4693_v38 = vpop.permute.xlu0 %4692 }
 0xa03   :  { %v4804_v51 = vsel %vm85_vm5, %v4802_v42, %v4693_v38 }
 0xa04   :  { %v4695_v6 = vpop.permute.xlu1 %4694  ;;  %v4806_v59 = vsel %vm953_vm9, %v4804_v51, %v4701_v32 }
 0xa05   :  { %v4805_v4 = vsel %vm85_vm5, %v4803_v49, %v4695_v6 }
 0xa06   :  { %v4733_v29 = vpop.permute.xlu0 %4732  ;;  %v4807_v50 = vsel %vm953_vm9, %v4805_v4, %v4703_v40 }
 0xa08   :  { %v4735_v10 = vpop.permute.xlu1 %4734 }
 0xa0a   :  { %v4709_v41 = vpop.permute.xlu0 %4708 }
 0xa0b   :  { %v4808_v53 = vsel %vm107_vm6, %v4806_v59, %v4709_v41 }
 0xa0c   :  { %v4711_v54 = vpop.permute.xlu1 %4710  ;;  %v4810_v55 = vsel %vm9016_vm7, %v4808_v53, %v4717_v33  ;;  %vm9020_vm7 = vcmask 654336  }
 0xa0d   :  { %v4809_v56 = vsel %vm107_vm6, %v4807_v50, %v4711_v54 }
 0xa0e   :  { %v4749_v44 = vpop.permute.xlu0 %4748  ;;  %v4811_v11 = vsel %vm9017_vm10, %v4809_v56, %v4719_v36  ;;  %vm9021_vm10 = vmmov %vm9020_vm7  ;;  %v7251_v36 = vld [vmem:[%s8984_s7 + $0x18] ss:$0 sps:$4 sm:$0xff]  }
 0xa10   :  { %v4751_v45 = vpop.permute.xlu1 %4750 }
 0xa12   :  { %v4725_v46 = vpop.permute.xlu0 %4724 }
 0xa13   :  { %v4812_v61 = vsel %vm961_vm11, %v4810_v55, %v4725_v46 }
 0xa14   :  { %v4727_v60 = vpop.permute.xlu1 %4726  ;;  %v4814_v5 = vsel %vm9018_vm14, %v4812_v61, %v4733_v29  ;;  %vm9022_vm14 = vcmask 785408  }
 0xa15   :  { %v4813_v58 = vsel %vm961_vm11, %v4811_v11, %v4727_v60 }
 0xa16   :  { %v4765_v43 = vpop.permute.xlu0 %4764  ;;  %v4815_v1 = vsel %vm9019_vm1, %v4813_v58, %v4735_v10  ;;  %vm9023_vm1 = vmmov %vm9022_vm14 }
 0xa18   :  { %v4767_v47 = vpop.permute.xlu1 %4766 }
 0xa1a   :  { %v4741_v39 = vpop.permute.xlu0 %4740 }
 0xa1b   :  { %v4816_v62 = vsel %vm35_vm0, %v4814_v5, %v4741_v39 }
 0xa1c   :  { %v4743_v37 = vpop.permute.xlu1 %4742  ;;  %v4818_v8 = vsel %vm969_vm13, %v4816_v62, %v4749_v44 }
 0xa1d   :  { %v4817_v3 = vsel %vm35_vm0, %v4815_v1, %v4743_v37 }
 0xa1e   :  { %v4781_v57 = vpop.permute.xlu0 %4780  ;;  %v4819_v13 = vsel %vm969_vm13, %v4817_v3, %v4751_v45  ;;  %vm9024_vm13 = vcmask 1043456  }
 0xa1f   :  { %v8700_v29 = vsel %vm9024_vm13, %v7251_v36, 0 }
 0xa20   :  { %v4783_v2 = vpop.permute.xlu1 %4782  ;;  %7016 = vmatpush3.bf16.msra.mxu0 %v8700_v29  ;;  %7028 = vmatpush3.bf16.msra.mxu1 %v8700_v29 }
 0xa21   :  { %7033 = vmatprep.subr.bf16.mxu0 %v7256_v0  ;;  %7045 = vmatprep.subr.bf16.mxu1 %v7256_v0 }
 0xa22   :  { %v4757_v63 = vpop.permute.xlu0 %4756 }
 0xa23   :  { %v4820_v9 = vsel %vm9020_vm7, %v4818_v8, %v4757_v63 }
 0xa24   :  { %v4759_v7 = vpop.permute.xlu1 %4758  ;;  %v4822_v16 = vsel %vm975_vm15, %v4820_v9, %v4765_v43 }
 0xa25   :  { %v4821_v14 = vsel %vm9021_vm10, %v4819_v13, %v4759_v7 }
 0xa26   :  { %v4823_v19 = vsel %vm975_vm15, %v4821_v14, %v4767_v47 }
 0xa2a   :  { %v4773_v12 = vpop.permute.xlu0 %4772 }
 0xa2b   :  { %v4824_v17 = vsel %vm9022_vm14, %v4822_v16, %v4773_v12 }
 0xa2c   :  { %v4775_v15 = vpop.permute.xlu1 %4774  ;;  %v4826_v22 = vsel %vm981_vm2, %v4824_v17, %v4781_v57 }
 0xa2d   :  { %v4825_v20 = vsel %vm9023_vm1, %v4823_v19, %v4775_v15 }
 0xa2e   :  { %v4827_v34 = vsel %vm981_vm2, %v4825_v20, %v4783_v2  ;;  %vm9026_vm2 = vcmask 457728  }
 0xa2f   :  { %vm9028_vm7 = vmmov %vm9026_vm2 }
 0xa30   :  { %vm9030_vm10 = vmmov %vm9026_vm2 }
 0xa31   :  { %vm9031_vm14 = vmmov %vm9026_vm2 }
 0xa32   :  { %v4789_v18 = vpop.permute.xlu0 %4788  ;;  %vm9032_vm1 = vmmov %vm9026_vm2 }
 0xa33   :  { %v4828_v23 = vsel %vm984_vm3, %v4826_v22, %v4789_v18 }
 0xa34   :  { %v4791_v21 = vpop.permute.xlu1 %4790 }
 0xa35   :  { %v4829_v28 = vsel %vm984_vm3, %v4827_v34, %v4791_v21 }
 0xa36   :  { %v4797_v24 = vpop.permute.xlu0 %4796 }
 0xa37   :  { %v4830_v27 = vsel %vm987_vm12, %v4828_v23, %v4797_v24 }
 0xa38   :  { %v4834_v32 = vadd.f32 %v4830_v27, %v8135_v30  ;;  %v4799_v40 = vpop.permute.xlu1 %4798 }
 0xa39   :  { %v4831_v33 = vsel %vm987_vm12, %v4829_v28, %v4799_v40  ;;  %vm9025_vm12 = vcmask 326656   ;;  %v8927_v40 = vld [vmem:[#allocation7] ss:$0 sm:$0xff] }
 0xa3a   :  { %vm4844_vm0 = vcmp.ge.f32.partialorder %v4834_v32, 0.0  ;;  %v4846_v38 = vmul.f32 0.01, %v4834_v32  ;;  %v4835_v6 = vadd.f32 %v4831_v33, %v8141_v35  ;;  %vm9027_vm3 = vmmov %vm9025_vm12 }
 0xa3c   :  { %v4848_v10 = vsel %vm4844_vm0, %v4834_v32, %v4846_v38  ;;  %vm4845_vm15 = vcmp.ge.f32.partialorder %v4835_v6, 0.0  ;;  %v4847_v41 = vmul.f32 0.01, %v4835_v6  ;;  %vm9033_vm0 = vmmov %vm9032_vm1 }
 0xa3d   :  { %4850 = vst [vmem:[#allocation3 + $0x1] sm:$0xff] %v4848_v10  ;;  %vm9034_vm13 = vmmov %vm9033_vm0 }
 0xa3e   :  { %v4849_v30 = vsel %vm4845_vm15, %v4835_v6, %v4847_v41  ;;  %vm9035_vm15 = vmmov %vm9033_vm0 }
 0xa3f   :  { %4851 = vst [vmem:[#allocation3 + $0x9] sm:$0xff] %v4849_v30  ;;  %v8706_v54 = vpack.c.bf16 %v4849_v30, %v4848_v10 }
 0xa41   :  { %4873 = vrot.lane.b32.xlu1 %v8706_v54, %s7263_s2 }
 0xa44   :  { %v4860_v35 = vld [vmem:[#allocation3] sm:$0xff] }
 0xa45   :  { %4957 = vrot.lane.b32.xlu1 %v8706_v54, %s7259_s21 }
 0xa46   :  { %v4861_v44 = vld [vmem:[#allocation3 + $0x8] sm:$0xff] }
 0xa47   :  { %v4862_v45 = vpack.c.bf16 %v4861_v44, %v4860_v35  ;;  %v4866_v46 = vld [vmem:[#allocation3 + $0x2] sm:$0xff]  ;;  %v4867_v60 = vld [vmem:[#allocation3 + $0xa] sm:$0xff] }
 0xa48   :  { %v4868_v43 = vpack.c.bf16 %v4867_v60, %v4866_v46 }
 0xa49   :  { %4870 = vrot.lane.b32.xlu0 %v4862_v45, %s7263_s2  ;;  %5011 = vrot.lane.b32.xlu1 %v8706_v54, %s7262_s12  ;;  %s7277_s2 = smov 5  }
 0xa4d   :  { %4955 = vrot.lane.b32.xlu0 %v4862_v45, %s7259_s21  ;;  %5164 = vrot.lane.b32.xlu1 %v8706_v54, %s7260_s22  ;;  %s7274_s21 = smov 2   ;;  %s7275_s22 = smov 3  }
 0xa51   :  { %5009 = vrot.lane.b32.xlu0 %v4862_v45, %s7262_s12  ;;  %5266 = vrot.lane.b32.xlu1 %v8706_v54, %s7258_s20 }
 0xa55   :  { %5113 = vrot.lane.b32.xlu0 %v8706_v54, %s7272_s28  ;;  %5368 = vrot.lane.b32.xlu1 %v8706_v54, %s7261_s23  ;;  %s7276_s23 = smov 4  }
 0xa59   :  { %5215 = vrot.lane.b32.xlu0 %v8706_v54, %s7271_s27  ;;  %5470 = vrot.lane.b32.xlu1 %v8706_v54, %s7268_s16  ;;  %s7283_s16 = smov 12   ;;  %s7286_s27 = smov 15  }
 0xa5d   :  { %5317 = vrot.lane.b32.xlu0 %v8706_v54, %s7270_s18  ;;  %5572 = vrot.lane.b32.xlu1 %v8706_v54, %s7266_s0  ;;  %s7285_s18 = smov 14  }
 0xa61   :  { %5419 = vrot.lane.b32.xlu0 %v8706_v54, %s7269_s17  ;;  %5627 = vrot.lane.b32.xlu1 %v8706_v54, %s7265_s14  ;;  %s7284_s17 = smov 13  }
 0xa65   :  { %5521 = vrot.lane.b32.xlu0 %v8706_v54, %s7267_s15  ;;  %5681 = vrot.lane.b32.xlu1 %v8706_v54, %s7264_s13  ;;  %s7281_s15 = smov 10  }
 0xa69   :  { %5575 = vrot.lane.b32.xlu0 %v4868_v43, %s7266_s0  ;;  %s7280_s0 = smov 9  }
 0xa6d   :  { %5629 = vrot.lane.b32.xlu0 %v4868_v43, %s7265_s14  ;;  %s7279_s14 = smov 7  }
 0xa71   :  { %5683 = vrot.lane.b32.xlu0 %v4868_v43, %s7264_s13  ;;  %s7278_s13 = smov 6  }
 0xab3   :  { %v4874_v47 = vpop.permute.xlu1 %4873 }
 0xab7   :  { %v4958_v39 = vpop.permute.xlu1 %4957 }
 0xabb   :  { %v4871_v48 = vpop.permute.xlu0 %4870  ;;  %v5012_v56 = vpop.permute.xlu1 %5011 }
 0xabc   :  { %v4878_v42 = vsel %vm953_vm9, %v4871_v48, %v4874_v47 }
 0xabd   :  { %v4879_v51 = vsel %vm107_vm6, %v4878_v42, %v4874_v47 }
 0xabe   :  { %v4880_v49 = vsel %vm9025_vm12, %v4879_v51, %v4874_v47  ;;  %vm9036_vm12 = vmmov %vm9033_vm0 }
 0xabf   :  { %v4956_v4 = vpop.permute.xlu0 %4955  ;;  %v4881_v37 = vsel %vm961_vm11, %v4880_v49, %v4874_v47  ;;  %v5165_v3 = vpop.permute.xlu1 %5164 }
 0xac0   :  { %v4961_v59 = vsel %vm85_vm5, %v4956_v4, %v4958_v39  ;;  %7018 = vmatmul.mubr.msk.bf16.vlgmr.msra.gmra.mrb[160].mxu0 %vm9026_vm2, %v4881_v37  ;;  %vm9037_vm2 = vmmov %vm9033_vm0 }
 0xac1   :  { %v4962_v53 = vsel %vm953_vm9, %v4961_v59, %v4958_v39  ;;  %7034 = vmatpush3.bf16.msra.mxu0 %v8636_v25  ;;  %7041 = vmatprep.mubr.msk.bf16.mxu0 %vm7257_vm4, %v7256_v0 }
 0xac2   :  { %v4963_v50 = vsel %vm107_vm6, %v4962_v53, %v4958_v39  ;;  %7035 = vmatprep.subr.bf16.mxu0 %v7256_v0 }
 0xac3   :  { %v5010_v57 = vpop.permute.xlu0 %5009  ;;  %v4964_v55 = vsel %vm9027_vm3, %v4963_v50, %v4958_v39  ;;  %v5267_v8 = vpop.permute.xlu1 %5266 }
 0xac4   :  { %v5015_v61 = vsel %vm948_vm8, %v5010_v57, %v5012_v56  ;;  %v4965_v2 = vsel %vm961_vm11, %v4964_v55, %v4958_v39 }
 0xac5   :  { %v5016_v11 = vsel %vm85_vm5, %v5015_v61, %v5012_v56  ;;  %7036 = vmatpush3.bf16.msra.mxu0 %v8642_v26  ;;  %7030 = vmatmul.mubr.msk.bf16.vlgmr.msra.gmra.mrb[160].mxu1 %vm9028_vm7, %v4965_v2  ;;  %vm9039_vm7 = vmmov %vm9033_vm0 }
 0xac6   :  { %v5017_v58 = vsel %vm953_vm9, %v5016_v11, %v5012_v56  ;;  %7046 = vmatpush3.bf16.msra.mxu1 %v8636_v25  ;;  %7037 = vmatprep.subr.bf16.mxu0 %v7256_v0  ;;  %vm9029_vm9 = vmmov %vm9027_vm3 }
 0xac7   :  { %7047 = vmatprep.subr.bf16.mxu1 %v7256_v0  ;;  %7053 = vmatprep.mubr.msk.bf16.mxu1 %vm7257_vm4, %v7256_v0  ;;  %v5018_v5 = vsel %vm107_vm6, %v5017_v58, %v5012_v56  ;;  %v5114_v1 = vpop.permute.xlu0 %5113  ;;  %v5369_v12 = vpop.permute.xlu1 %5368  ;;  %vm9038_vm3 = vmmov %vm9033_vm0 }
 0xac8   :  { %v5019_v62 = vsel %vm9029_vm9, %v5018_v5, %v5012_v56  ;;  %vm9040_vm9 = vmmov %vm9033_vm0 }
 0xac9   :  { %7038 = vmatpush3.bf16.msra.mxu0 %v8651_v31  ;;  %v5020_v63 = vsel %vm961_vm11, %v5019_v62, %v5012_v56 }
 0xaca   :  { %7048 = vmatpush3.bf16.msra.mxu1 %v8642_v26  ;;  %7039 = vmatprep.subr.bf16.mxu0 %v7256_v0 }
 0xacb   :  { %7049 = vmatprep.subr.bf16.mxu1 %v7256_v0  ;;  %v5216_v7 = vpop.permute.xlu0 %5215  ;;  %v5471_v14 = vpop.permute.xlu1 %5470 }
 0xacd   :  { %7040 = vmatpush3.bf16.msra.mxu0 %v8700_v29 }
 0xace   :  { %7050 = vmatpush3.bf16.msra.mxu1 %v8651_v31  ;;  %7057 = vmatprep.subr.bf16.mxu0 %v7256_v0 }
 0xacf   :  { %7051 = vmatprep.subr.bf16.mxu1 %v7256_v0  ;;  %v5318_v9 = vpop.permute.xlu0 %5317  ;;  %v5573_v17 = vpop.permute.xlu1 %5572 }
 0xad0   :  { %7042 = vmatmul.mubr.msk.bf16.vlgmr.msra.gmra.mrb[164].mxu0 %vm9030_vm10, %v5020_v63  ;;  %vm9041_vm10 = vmmov %vm9033_vm0 }
 0xad1   :  { %7058 = vmatpush3.bf16.msra.mxu0 %v8636_v25  ;;  %7065 = vmatprep.mubr.msk.bf16.mxu0 %vm7257_vm4, %v7256_v0 }
 0xad2   :  { %7052 = vmatpush3.bf16.msra.mxu1 %v8700_v29  ;;  %7059 = vmatprep.subr.bf16.mxu0 %v7256_v0 }
 0xad3   :  { %7069 = vmatprep.subr.bf16.mxu1 %v7256_v0  ;;  %v5420_v13 = vpop.permute.xlu0 %5419  ;;  %v5628_v20 = vpop.permute.xlu1 %5627 }
 0xad5   :  { %7054 = vmatmul.mubr.msk.bf16.vlgmr.msra.gmra.mrb[164].mxu1 %vm9031_vm14, %v8706_v54  ;;  %7060 = vmatpush3.bf16.msra.mxu0 %v8642_v26  ;;  %vm9042_vm14 = vcmask 326656  }
 0xad6   :  { %7070 = vmatpush3.bf16.msra.mxu1 %v8636_v25  ;;  %7061 = vmatprep.subr.bf16.mxu0 %v7256_v0 }
 0xad7   :  { %7071 = vmatprep.subr.bf16.mxu1 %v7256_v0  ;;  %7077 = vmatprep.mubr.msk.bf16.mxu1 %vm7257_vm4, %v7256_v0  ;;  %v5522_v15 = vpop.permute.xlu0 %5521 }
 0xad9   :  { %7062 = vmatpush3.bf16.msra.mxu0 %v8651_v31 }
 0xada   :  { %7072 = vmatpush3.bf16.msra.mxu1 %v8642_v26  ;;  %7063 = vmatprep.subr.bf16.mxu0 %v7256_v0 }
 0xadb   :  { %7073 = vmatprep.subr.bf16.mxu1 %v7256_v0  ;;  %v5576_v16 = vpop.permute.xlu0 %5575 }
 0xadc   :  { %v5583_v18 = vsel %vm961_vm11, %v5573_v17, %v5576_v16 }
 0xadd   :  { %7064 = vmatpush3.bf16.msra.mxu0 %v8700_v29 }
 0xade   :  { %7074 = vmatpush3.bf16.msra.mxu1 %v8651_v31  ;;  %7081 = vmatprep.subr.bf16.mxu0 %v7256_v0 }
 0xadf   :  { %7075 = vmatprep.subr.bf16.mxu1 %v7256_v0  ;;  %v5630_v19 = vpop.permute.xlu0 %5629 }
 0xae0   :  { %7066 = vmatmul.mubr.msk.bf16.vlgmr.msra.gmra.mrb[168].mxu0 %vm9032_vm1, %v5114_v1  ;;  %v5636_v22 = vsel %vm9042_vm14, %v5628_v20, %v5630_v19  ;;  %vm9044_vm1 = vmmov %vm9042_vm14  ;;  %vm5887_vm14 = vcmask 97280  }
 0xae1   :  { %7082 = vmatpush3.bf16.msra.mxu0 %v8636_v25  ;;  %7089 = vmatprep.mubr.msk.bf16.mxu0 %vm7257_vm4, %v7256_v0  ;;  %v5637_v24 = vsel %vm961_vm11, %v5636_v22, %v5630_v19 }
 0xae2   :  { %7076 = vmatpush3.bf16.msra.mxu1 %v8700_v29  ;;  %7083 = vmatprep.subr.bf16.mxu0 %v7256_v0 }
 0xae3   :  { %7093 = vmatprep.subr.bf16.mxu1 %v7256_v0  ;;  %v5684_v21 = vpop.permute.xlu0 %5683 }
 0xae5   :  { %7078 = vmatmul.mubr.msk.bf16.vlgmr.msra.gmra.mrb[168].mxu1 %vm9033_vm0, %v5165_v3  ;;  %7084 = vmatpush3.bf16.msra.mxu0 %v8642_v26 }
 0xae6   :  { %7094 = vmatpush3.bf16.msra.mxu1 %v8636_v25  ;;  %7085 = vmatprep.subr.bf16.mxu0 %v7256_v0 }
 0xae7   :  { %7095 = vmatprep.subr.bf16.mxu1 %v7256_v0  ;;  %7101 = vmatprep.mubr.msk.bf16.mxu1 %vm7257_vm4, %v7256_v0 }
 0xae9   :  { %7086 = vmatpush3.bf16.msra.mxu0 %v8651_v31 }
 0xaea   :  { %7096 = vmatpush3.bf16.msra.mxu1 %v8642_v26  ;;  %7087 = vmatprep.subr.bf16.mxu0 %v7256_v0 }
 0xaeb   :  { %7097 = vmatprep.subr.bf16.mxu1 %v7256_v0 }
 0xaed   :  { %7088 = vmatpush3.bf16.msra.mxu0 %v8700_v29 }
 0xaee   :  { %7098 = vmatpush3.bf16.msra.mxu1 %v8651_v31  ;;  %7105 = vmatprep.subr.bf16.mxu0 %v7256_v0 }
 0xaef   :  { %7099 = vmatprep.subr.bf16.mxu1 %v7256_v0 }
 0xaf0   :  { %7090 = vmatmul.mubr.msk.bf16.vlgmr.msra.gmra.mrb[172].mxu0 %vm9034_vm13, %v5216_v7  ;;  %vm5861_vm13 = vcmask 23552  }
 0xaf1   :  { %7106 = vmatpush3.bf16.msra.mxu0 %v8636_v25  ;;  %7113 = vmatprep.mubr.msk.bf16.mxu0 %vm7257_vm4, %v7256_v0 }
 0xaf2   :  { %7100 = vmatpush3.bf16.msra.mxu1 %v8700_v29  ;;  %7107 = vmatprep.subr.bf16.mxu0 %v7256_v0 }
 0xaf3   :  { %7117 = vmatprep.subr.bf16.mxu1 %v7256_v0 }
 0xaf5   :  { %7102 = vmatmul.mubr.msk.bf16.vlgmr.msra.gmra.mrb[172].mxu1 %vm9035_vm15, %v5267_v8  ;;  %7108 = vmatpush3.bf16.msra.mxu0 %v8642_v26  ;;  %vm5864_vm15 = vcmask 31744  }
 0xaf6   :  { %7118 = vmatpush3.bf16.msra.mxu1 %v8636_v25  ;;  %7109 = vmatprep.subr.bf16.mxu0 %v7256_v0 }
 0xaf7   :  { %7119 = vmatprep.subr.bf16.mxu1 %v7256_v0  ;;  %7125 = vmatprep.mubr.msk.bf16.mxu1 %vm7257_vm4, %v7256_v0 }
 0xaf9   :  { %7110 = vmatpush3.bf16.msra.mxu0 %v8651_v31 }
 0xafa   :  { %7120 = vmatpush3.bf16.msra.mxu1 %v8642_v26  ;;  %7111 = vmatprep.subr.bf16.mxu0 %v7256_v0 }
 0xafb   :  { %7121 = vmatprep.subr.bf16.mxu1 %v7256_v0 }
 0xafd   :  { %7112 = vmatpush3.bf16.msra.mxu0 %v8700_v29 }
 0xafe   :  { %7122 = vmatpush3.bf16.msra.mxu1 %v8651_v31  ;;  %7129 = vmatprep.subr.bf16.mxu0 %v7256_v0 }
 0xaff   :  { %7123 = vmatprep.subr.bf16.mxu1 %v7256_v0 }
 0xb00   :  { %7114 = vmatmul.mubr.msk.bf16.vlgmr.msra.gmra.mrb[176].mxu0 %vm9036_vm12, %v5318_v9  ;;  %vm5867_vm12 = vcmask 39936  }
 0xb01   :  { %7130 = vmatpush3.bf16.msra.mxu0 %v8636_v25  ;;  %7137 = vmatprep.mubr.msk.bf16.mxu0 %vm7257_vm4, %v7256_v0 }
 0xb02   :  { %7124 = vmatpush3.bf16.msra.mxu1 %v8700_v29  ;;  %7131 = vmatprep.subr.bf16.mxu0 %v7256_v0 }
 0xb03   :  { %7141 = vmatprep.subr.bf16.mxu1 %v7256_v0 }
 0xb05   :  { %7126 = vmatmul.mubr.msk.bf16.vlgmr.msra.gmra.mrb[176].mxu1 %vm9037_vm2, %v5369_v12  ;;  %7132 = vmatpush3.bf16.msra.mxu0 %v8642_v26  ;;  %vm5870_vm2 = vcmask 48128  }
 0xb06   :  { %7142 = vmatpush3.bf16.msra.mxu1 %v8636_v25  ;;  %7133 = vmatprep.subr.bf16.mxu0 %v7256_v0 }
 0xb07   :  { %7143 = vmatprep.subr.bf16.mxu1 %v7256_v0  ;;  %7149 = vmatprep.mubr.msk.bf16.mxu1 %vm7257_vm4, %v7256_v0 }
 0xb09   :  { %7134 = vmatpush3.bf16.msra.mxu0 %v8651_v31 }
 0xb0a   :  { %7144 = vmatpush3.bf16.msra.mxu1 %v8642_v26  ;;  %7135 = vmatprep.subr.bf16.mxu0 %v7256_v0 }
 0xb0b   :  { %7145 = vmatprep.subr.bf16.mxu1 %v7256_v0 }
 0xb0d   :  { %7136 = vmatpush3.bf16.msra.mxu0 %v8700_v29 }
 0xb0e   :  { %7146 = vmatpush3.bf16.msra.mxu1 %v8651_v31  ;;  %7153 = vmatprep.subr.bf16.mxu0 %v7256_v0 }
 0xb0f   :  { %7147 = vmatprep.subr.bf16.mxu1 %v7256_v0 }
 0xb10   :  { %7138 = vmatmul.mubr.msk.bf16.vlgmr.msra.gmra.mrb[180].mxu0 %vm9038_vm3, %v5420_v13  ;;  %vm5873_vm3 = vcmask 56320  }
 0xb11   :  { %7154 = vmatpush3.bf16.msra.mxu0 %v8636_v25  ;;  %7161 = vmatprep.mubr.msk.bf16.mxu0 %vm7257_vm4, %v7256_v0 }
 0xb12   :  { %7148 = vmatpush3.bf16.msra.mxu1 %v8700_v29  ;;  %7155 = vmatprep.subr.bf16.mxu0 %v7256_v0 }
 0xb13   :  { %7165 = vmatprep.subr.bf16.mxu1 %v7256_v0 }
 0xb15   :  { %7150 = vmatmul.mubr.msk.bf16.vlgmr.msra.gmra.mrb[180].mxu1 %vm9039_vm7, %v5471_v14  ;;  %7156 = vmatpush3.bf16.msra.mxu0 %v8642_v26  ;;  %vm5878_vm7 = vcmask 72704  }
 0xb16   :  { %7166 = vmatpush3.bf16.msra.mxu1 %v8636_v25  ;;  %7157 = vmatprep.subr.bf16.mxu0 %v7256_v0 }
 0xb17   :  { %7167 = vmatprep.subr.bf16.mxu1 %v7256_v0  ;;  %7173 = vmatprep.mubr.msk.bf16.mxu1 %vm7257_vm4, %v7256_v0 }
 0xb19   :  { %7158 = vmatpush3.bf16.msra.mxu0 %v8651_v31 }
 0xb1a   :  { %7168 = vmatpush3.bf16.msra.mxu1 %v8642_v26  ;;  %7159 = vmatprep.subr.bf16.mxu0 %v7256_v0 }
 0xb1b   :  { %7169 = vmatprep.subr.bf16.mxu1 %v7256_v0 }
 0xb1d   :  { %7160 = vmatpush3.bf16.msra.mxu0 %v8700_v29 }
 0xb1e   :  { %7170 = vmatpush3.bf16.msra.mxu1 %v8651_v31  ;;  %7177 = vmatprep.subr.bf16.mxu0 %v7256_v0 }
 0xb1f   :  { %7171 = vmatprep.subr.bf16.mxu1 %v7256_v0 }
 0xb20   :  { %7162 = vmatmul.mubr.msk.bf16.vlgmr.msra.gmra.mrb[184].mxu0 %vm9040_vm9, %v5522_v15  ;;  %vm5881_vm9 = vcmask 80896  }
 0xb21   :  { %7178 = vmatpush3.bf16.msra.mxu0 %v8636_v25  ;;  %7185 = vmatprep.mubr.msk.bf16.mxu0 %vm7257_vm4, %v7256_v0 }
 0xb22   :  { %7172 = vmatpush3.bf16.msra.mxu1 %v8700_v29  ;;  %7179 = vmatprep.subr.bf16.mxu0 %v7256_v0 }
 0xb23   :  { %7189 = vmatprep.subr.bf16.mxu1 %v7256_v0 }
 0xb25   :  { %7174 = vmatmul.mubr.msk.bf16.vlgmr.msra.gmra.mrb[184].mxu1 %vm9041_vm10, %v5583_v18  ;;  %7180 = vmatpush3.bf16.msra.mxu0 %v8642_v26  ;;  %vm5884_vm10 = vcmask 89088  }
 0xb26   :  { %7190 = vmatpush3.bf16.msra.mxu1 %v8636_v25  ;;  %7181 = vmatprep.subr.bf16.mxu0 %v7256_v0  ;;  %v5682_v25 = vpop.permute.xlu1 %5681 }
 0xb27   :  { %7191 = vmatprep.subr.bf16.mxu1 %v7256_v0  ;;  %7197 = vmatprep.mubr.msk.bf16.mxu1 %vm7257_vm4, %v7256_v0  ;;  %v5689_v23 = vsel %vm107_vm6, %v5682_v25, %v5684_v21  ;;  %vm9043_vm4 = vmmov %vm9033_vm0  ;;  %vm5855_vm6 = vcmask 7168  }
 0xb29   :  { %7182 = vmatpush3.bf16.msra.mxu0 %v8651_v31 }
 0xb2a   :  { %7192 = vmatpush3.bf16.msra.mxu1 %v8642_v26  ;;  %7183 = vmatprep.subr.bf16.mxu0 %v7256_v0  ;;  %v5690_v26 = vsel %vm9044_vm1, %v5689_v23, %v5684_v21  ;;  %vm5893_vm1 = vcmask 113664  }
 0xb2b   :  { %7193 = vmatprep.subr.bf16.mxu1 %v7256_v0  ;;  %v5691_v34 = vsel %vm961_vm11, %v5690_v26, %v5684_v21  ;;  %vm5858_vm11 = vcmask 15360  }
 0xb2d   :  { %7184 = vmatpush3.bf16.msra.mxu0 %v8700_v29 }
 0xb2e   :  { %7194 = vmatpush3.bf16.msra.mxu1 %v8651_v31 }
 0xb2f   :  { %7195 = vmatprep.subr.bf16.mxu1 %v7256_v0 }
 0xb30   :  { %7186 = vmatmul.mubr.msk.bf16.vlgmr.msra.gmra.mrb[188].mxu0 %vm9043_vm4, %v5637_v24  ;;  %vm5890_vm4 = vcmask 105472  }
 0xb32   :  { %7196 = vmatpush3.bf16.msra.mxu1 %v8700_v29 }
 0xb35   :  { %7198 = vmatmul.mubr.msk.bf16.vlgmr.msra.gmra.mrb[188].mxu1 %vm9033_vm0, %v5691_v34  ;;  %vm5896_vm0 = vcmask 121856  }
 0xb93   :  { %v8923_v27 = vpop.f32.mrb[160].mxu0 }
 0xb94   :  { %v7019_v28 = vpop.f32.mrb[161].mxu0 }
 0xb95   :  { %v8925_v32 = vpop.f32.mrb[162].mxu0 }
 0xb96   :  { %v7020_v31 = vpop.f32.mrb[163].mxu0 }
 0xb98   :  { %v5002_v33 = vpop.f32.mrb[160].mxu1 }
 0xb99   :  { %v5003_v0 = vadd.f32 %v8927_v40, %v5002_v33  ;;  %v7031_v36 = vpop.f32.mrb[161].mxu1 }
 0xb9a   :  { %v5005_v38 = vpop.f32.mrb[162].mxu1 }
 0xb9b   :  { %v5006_v6 = vadd.f32 %v8927_v40, %v5005_v38  ;;  %5737 = vrot.lane.b32.xlu1 %v5003_v0, %s7273_s8  ;;  %v7032_v29 = vpop.f32.mrb[163].mxu1 }
 0xb9d   :  { %5739 = vrot.lane.b32.xlu0 %v5006_v6, %s7273_s8 }
 0xba3   :  { %v5057_v10 = vpop.f32.mrb[164].mxu0 }
 0xba4   :  { %v5058_v41 = vadd.f32 %v8927_v40, %v5057_v10  ;;  %v7043_v30 = vpop.f32.mrb[165].mxu0 }
 0xba5   :  { %v5060_v54 = vpop.f32.mrb[166].mxu0 }
 0xba6   :  { %v5061_v35 = vadd.f32 %v8927_v40, %v5060_v54  ;;  %5745 = vrot.lane.b32.xlu1 %v5058_v41, %s7274_s21  ;;  %v7044_v44 = vpop.f32.mrb[167].mxu0 }
 0xba8   :  { %v5106_v45 = vpop.f32.mrb[164].mxu1  ;;  %5747 = vrot.lane.b32.xlu0 %v5061_v35, %s7274_s21 }
 0xba9   :  { %v5107_v46 = vadd.f32 %v8927_v40, %v5106_v45  ;;  %v7055_v60 = vpop.f32.mrb[165].mxu1 }
 0xbaa   :  { %v5109_v43 = vpop.f32.mrb[166].mxu1 }
 0xbab   :  { %v5110_v52 = vadd.f32 %v8927_v40, %v5109_v43  ;;  %v7056_v47 = vpop.f32.mrb[167].mxu1  ;;  %5753 = vrot.lane.b32.xlu1 %v5107_v46, %s7275_s22 }
 0xbad   :  { %5755 = vrot.lane.b32.xlu0 %v5110_v52, %s7275_s22 }
 0xbb3   :  { %v5157_v48 = vpop.f32.mrb[168].mxu0 }
 0xbb4   :  { %v5158_v42 = vadd.f32 %v8927_v40, %v5157_v48  ;;  %v7067_v51 = vpop.f32.mrb[169].mxu0 }
 0xbb5   :  { %v5160_v39 = vpop.f32.mrb[170].mxu0 }
 0xbb6   :  { %v5161_v49 = vadd.f32 %v8927_v40, %v5160_v39  ;;  %5761 = vrot.lane.b32.xlu1 %v5158_v42, %s7276_s23  ;;  %v7068_v4 = vpop.f32.mrb[171].mxu0 }
 0xbb8   :  { %v5208_v37 = vpop.f32.mrb[168].mxu1  ;;  %5763 = vrot.lane.b32.xlu0 %v5161_v49, %s7276_s23 }
 0xbb9   :  { %v5209_v59 = vadd.f32 %v8927_v40, %v5208_v37  ;;  %v7079_v53 = vpop.f32.mrb[169].mxu1 }
 0xbba   :  { %v5211_v50 = vpop.f32.mrb[170].mxu1 }
 0xbbb   :  { %v5212_v56 = vadd.f32 %v8927_v40, %v5211_v50  ;;  %v7080_v57 = vpop.f32.mrb[171].mxu1  ;;  %5769 = vrot.lane.b32.xlu1 %v5209_v59, %s7277_s2 }
 0xbbd   :  { %5771 = vrot.lane.b32.xlu0 %v5212_v56, %s7277_s2 }
 0xbc3   :  { %v5259_v55 = vpop.f32.mrb[172].mxu0 }
 0xbc4   :  { %v5260_v61 = vadd.f32 %v8927_v40, %v5259_v55  ;;  %v7091_v2 = vpop.f32.mrb[173].mxu0 }
 0xbc5   :  { %v5262_v11 = vpop.f32.mrb[174].mxu0 }
 0xbc6   :  { %v5263_v58 = vadd.f32 %v8927_v40, %v5262_v11  ;;  %5777 = vrot.lane.b32.xlu1 %v5260_v61, %s7278_s13  ;;  %v7092_v5 = vpop.f32.mrb[175].mxu0 }
 0xbc8   :  { %v5310_v62 = vpop.f32.mrb[172].mxu1  ;;  %5779 = vrot.lane.b32.xlu0 %v5263_v58, %s7278_s13 }
 0xbc9   :  { %v5311_v63 = vadd.f32 %v8927_v40, %v5310_v62  ;;  %v7103_v1 = vpop.f32.mrb[173].mxu1 }
 0xbca   :  { %v5313_v3 = vpop.f32.mrb[174].mxu1 }
 0xbcb   :  { %v5314_v7 = vadd.f32 %v8927_v40, %v5313_v3  ;;  %v7104_v8 = vpop.f32.mrb[175].mxu1  ;;  %5785 = vrot.lane.b32.xlu1 %v5311_v63, %s7279_s14 }
 0xbcd   :  { %5787 = vrot.lane.b32.xlu0 %v5314_v7, %s7279_s14 }
 0xbd3   :  { %v5361_v9 = vpop.f32.mrb[176].mxu0 }
 0xbd4   :  { %v5362_v12 = vadd.f32 %v8927_v40, %v5361_v9  ;;  %v7115_v13 = vpop.f32.mrb[177].mxu0 }
 0xbd5   :  { %v5364_v14 = vpop.f32.mrb[178].mxu0 }
 0xbd6   :  { %v5365_v15 = vadd.f32 %v8927_v40, %v5364_v14  ;;  %5793 = vrot.lane.b32.xlu1 %v5362_v12, %s7262_s12  ;;  %v7116_v16 = vpop.f32.mrb[179].mxu0 }
 0xbd8   :  { %v5412_v17 = vpop.f32.mrb[176].mxu1  ;;  %5795 = vrot.lane.b32.xlu0 %v5365_v15, %s7262_s12  ;;  %s7282_s12 = smov 11  }
 0xbd9   :  { %v5413_v18 = vadd.f32 %v8927_v40, %v5412_v17  ;;  %v7127_v19 = vpop.f32.mrb[177].mxu1 }
 0xbda   :  { %v5415_v20 = vpop.f32.mrb[178].mxu1 }
 0xbdb   :  { %v5416_v21 = vadd.f32 %v8927_v40, %v5415_v20  ;;  %v7128_v22 = vpop.f32.mrb[179].mxu1  ;;  %5801 = vrot.lane.b32.xlu1 %v5413_v18, %s7280_s0  ;;  %v4949_v20 = vadd.f32 %v8927_v40, %v8923_v27 }
 0xbdc   :  { %v4952_v22 = vadd.f32 %v8927_v40, %v8925_v32 }
 0xbdd   :  { %5803 = vrot.lane.b32.xlu0 %v5416_v21, %s7280_s0 }
 0xbe3   :  { %v5463_v25 = vpop.f32.mrb[180].mxu0 }
 0xbe4   :  { %v5464_v23 = vadd.f32 %v8927_v40, %v5463_v25  ;;  %v7139_v24 = vpop.f32.mrb[181].mxu0 }
 0xbe5   :  { %v5466_v26 = vpop.f32.mrb[182].mxu0 }
 0xbe6   :  { %v5467_v34 = vadd.f32 %v8927_v40, %v5466_v26  ;;  %5809 = vrot.lane.b32.xlu1 %v5464_v23, %s7281_s15  ;;  %v7140_v28 = vpop.f32.mrb[183].mxu0 }
 0xbe8   :  { %v5514_v31 = vpop.f32.mrb[180].mxu1  ;;  %5811 = vrot.lane.b32.xlu0 %v5467_v34, %s7281_s15 }
 0xbe9   :  { %v5515_v33 = vadd.f32 %v8927_v40, %v5514_v31  ;;  %v7151_v0 = vpop.f32.mrb[181].mxu1 }
 0xbea   :  { %v5517_v36 = vpop.f32.mrb[182].mxu1 }
 0xbeb   :  { %v5518_v38 = vadd.f32 %v8927_v40, %v5517_v36  ;;  %v7152_v6 = vpop.f32.mrb[183].mxu1  ;;  %5817 = vrot.lane.b32.xlu1 %v5515_v33, %s7282_s12 }
 0xbed   :  { %5819 = vrot.lane.b32.xlu0 %v5518_v38, %s7282_s12 }
 0xbf3   :  { %v5565_v29 = vpop.f32.mrb[184].mxu0 }
 0xbf4   :  { %v5566_v10 = vadd.f32 %v8927_v40, %v5565_v29  ;;  %v7163_v41 = vpop.f32.mrb[185].mxu0 }
 0xbf5   :  { %v5568_v30 = vpop.f32.mrb[186].mxu0 }
 0xbf6   :  { %v5569_v54 = vadd.f32 %v8927_v40, %v5568_v30  ;;  %5825 = vrot.lane.b32.xlu1 %v5566_v10, %s7283_s16  ;;  %v7164_v35 = vpop.f32.mrb[187].mxu0 }
 0xbf8   :  { %5827 = vrot.lane.b32.xlu0 %v5569_v54, %s7283_s16  ;;  %v5620_v44 = vpop.f32.mrb[184].mxu1 }
 0xbf9   :  { %v5621_v45 = vadd.f32 %v8927_v40, %v5620_v44  ;;  %v7175_v46 = vpop.f32.mrb[185].mxu1 }
 0xbfa   :  { %v5623_v60 = vpop.f32.mrb[186].mxu1 }
 0xbfb   :  { %v5624_v43 = vadd.f32 %v8927_v40, %v5623_v60  ;;  %5833 = vrot.lane.b32.xlu1 %v5621_v45, %s7284_s17  ;;  %v7176_v52 = vpop.f32.mrb[187].mxu1 }
 0xbfd   :  { %5835 = vrot.lane.b32.xlu0 %v5624_v43, %s7284_s17 }
 0xc03   :  { %v5674_v47 = vpop.f32.mrb[188].mxu0 }
 0xc04   :  { %v5675_v48 = vadd.f32 %v8927_v40, %v5674_v47  ;;  %v7187_v42 = vpop.f32.mrb[189].mxu0 }
 0xc05   :  { %v5677_v51 = vpop.f32.mrb[190].mxu0 }
 0xc06   :  { %v5678_v39 = vadd.f32 %v8927_v40, %v5677_v51  ;;  %5841 = vrot.lane.b32.xlu1 %v5675_v48, %s7285_s18  ;;  %v7188_v49 = vpop.f32.mrb[191].mxu0 }
 0xc08   :  { %5843 = vrot.lane.b32.xlu0 %v5678_v39, %s7285_s18  ;;  %v5728_v4 = vpop.f32.mrb[188].mxu1 }
 0xc09   :  { %v5729_v37 = vadd.f32 %v8927_v40, %v5728_v4  ;;  %v7199_v59 = vpop.f32.mrb[189].mxu1 }
 0xc0a   :  { %v5731_v53 = vpop.f32.mrb[190].mxu1 }
 0xc0b   :  { %v5732_v50 = vadd.f32 %v8927_v40, %v5731_v53  ;;  %5849 = vrot.lane.b32.xlu1 %v5729_v37, %s7286_s27  ;;  %v7200_v56 = vpop.f32.mrb[191].mxu1 }
 0xc0d   :  { %5851 = vrot.lane.b32.xlu0 %v5732_v50, %s7286_s27  ;;  %v5738_v57 = vpop.permute.xlu1 %5737 }
 0xc0e   :  { %v5856_v25 = vsel %vm5855_vm6, %v4949_v20, %v5738_v57 }
 0xc0f   :  { %v5740_v55 = vpop.permute.xlu0 %5739 }
 0xc10   :  { %v5857_v26 = vsel %vm5855_vm6, %v4952_v22, %v5740_v55 }
 0xc18   :  { %v5746_v61 = vpop.permute.xlu1 %5745 }
 0xc19   :  { %v5859_v24 = vsel %vm5858_vm11, %v5856_v25, %v5746_v61 }
 0xc1a   :  { %v5748_v2 = vpop.permute.xlu0 %5747 }
 0xc1b   :  { %v5860_v28 = vsel %vm5858_vm11, %v5857_v26, %v5748_v2 }
 0xc1d   :  { %v5754_v11 = vpop.permute.xlu1 %5753 }
 0xc1e   :  { %v5862_v34 = vsel %vm5861_vm13, %v5859_v24, %v5754_v11 }
 0xc1f   :  { %v5756_v58 = vpop.permute.xlu0 %5755 }
 0xc20   :  { %v5863_v33 = vsel %vm5861_vm13, %v5860_v28, %v5756_v58 }
 0xc28   :  { %v5762_v5 = vpop.permute.xlu1 %5761 }
 0xc29   :  { %v5865_v31 = vsel %vm5864_vm15, %v5862_v34, %v5762_v5 }
 0xc2a   :  { %v5764_v62 = vpop.permute.xlu0 %5763 }
 0xc2b   :  { %v5866_v36 = vsel %vm5864_vm15, %v5863_v33, %v5764_v62 }
 0xc2d   :  { %v5770_v63 = vpop.permute.xlu1 %5769 }
 0xc2e   :  { %v5868_v0 = vsel %vm5867_vm12, %v5865_v31, %v5770_v63 }
 0xc2f   :  { %v5772_v1 = vpop.permute.xlu0 %5771 }
 0xc30   :  { %v5869_v6 = vsel %vm5867_vm12, %v5866_v36, %v5772_v1 }
 0xc38   :  { %v5778_v3 = vpop.permute.xlu1 %5777 }
 0xc39   :  { %v5871_v38 = vsel %vm5870_vm2, %v5868_v0, %v5778_v3 }
 0xc3a   :  { %v5780_v7 = vpop.permute.xlu0 %5779 }
 0xc3b   :  { %v5872_v40 = vsel %vm5870_vm2, %v5869_v6, %v5780_v7 }
 0xc3d   :  { %v5786_v8 = vpop.permute.xlu1 %5785 }
 0xc3e   :  { %v5874_v29 = vsel %vm5873_vm3, %v5871_v38, %v5786_v8 }
 0xc3f   :  { %v5788_v9 = vpop.permute.xlu0 %5787 }
 0xc40   :  { %v5875_v41 = vsel %vm5873_vm3, %v5872_v40, %v5788_v9 }
 0xc48   :  { %v5794_v12 = vpop.permute.xlu1 %5793 }
 0xc49   :  { %v5876_v10 = vsel %vm948_vm8, %v5874_v29, %v5794_v12 }
 0xc4a   :  { %v5796_v13 = vpop.permute.xlu0 %5795 }
 0xc4b   :  { %v5877_v35 = vsel %vm948_vm8, %v5875_v41, %v5796_v13 }
 0xc4d   :  { %v5802_v14 = vpop.permute.xlu1 %5801 }
 0xc4e   :  { %v5879_v30 = vsel %vm5878_vm7, %v5876_v10, %v5802_v14 }
 0xc4f   :  { %v5804_v15 = vpop.permute.xlu0 %5803 }
 0xc50   :  { %v5880_v45 = vsel %vm5878_vm7, %v5877_v35, %v5804_v15 }
 0xc58   :  { %v5810_v16 = vpop.permute.xlu1 %5809 }
 0xc59   :  { %v5882_v44 = vsel %vm5881_vm9, %v5879_v30, %v5810_v16 }
 0xc5a   :  { %v5812_v17 = vpop.permute.xlu0 %5811 }
 0xc5b   :  { %v5883_v43 = vsel %vm5881_vm9, %v5880_v45, %v5812_v17 }
 0xc5d   :  { %v5818_v18 = vpop.permute.xlu1 %5817 }
 0xc5e   :  { %v5885_v46 = vsel %vm5884_vm10, %v5882_v44, %v5818_v18 }
 0xc5f   :  { %v5820_v19 = vpop.permute.xlu0 %5819 }
 0xc60   :  { %v5886_v47 = vsel %vm5884_vm10, %v5883_v43, %v5820_v19 }
 0xc68   :  { %v5826_v21 = vpop.permute.xlu1 %5825 }
 0xc69   :  { %v5888_v52 = vsel %vm5887_vm14, %v5885_v46, %v5826_v21 }
 0xc6a   :  { %v5828_v23 = vpop.permute.xlu0 %5827 }
 0xc6b   :  { %v5889_v42 = vsel %vm5887_vm14, %v5886_v47, %v5828_v23 }
 0xc6d   :  { %v5834_v27 = vpop.permute.xlu1 %5833 }
 0xc6e   :  { %v5891_v48 = vsel %vm5890_vm4, %v5888_v52, %v5834_v27 }
 0xc6f   :  { %v5836_v32 = vpop.permute.xlu0 %5835 }
 0xc70   :  { %v5892_v49 = vsel %vm5890_vm4, %v5889_v42, %v5836_v32 }
 0xc78   :  { %v5842_v54 = vpop.permute.xlu1 %5841 }
 0xc79   :  { %v5894_v51 = vsel %vm5893_vm1, %v5891_v48, %v5842_v54 }
 0xc7a   :  { %v5844_v60 = vpop.permute.xlu0 %5843 }
 0xc7b   :  { %v5895_v37 = vsel %vm5893_vm1, %v5892_v49, %v5844_v60 }
 0xc7d   :  { %v5850_v39 = vpop.permute.xlu1 %5849 }
 0xc7e   :  { %v5897_v4 = vsel %vm5896_vm0, %v5894_v51, %v5850_v39 }
 0xc7f   :  { %7252 = vtanh.f32 %v5897_v4  ;;  %v5852_v59 = vpop.permute.xlu0 %5851 }
 0xc80   :  { %v5898_v53 = vsel %vm5896_vm0, %v5895_v37, %v5852_v59 }
 0xc81   :  { %7254 = vtanh.f32 %v5898_v53 }
 0xc89   :  { %v7253_v50 = vpop.eup %7252 }
 0xc8a   :  { %5901 = vst.msk [vmem:[%s8986_s9] sm:$0xff] %vm85_vm5, %v7253_v50 }
 0xc8b   :  { %v7255_v56 = vpop.eup %7254 }
 0xc8c   :  { %5902 = vst.msk [vmem:[%s8986_s9 + $0x8] sm:$0xff] %vm85_vm5, %v7255_v56 }

</bundles_post_ra>
